<compile_context>
chip_gen: v6e
topology: v6e:2x2x1
jax: 0.10.0
libtpu: 0.0.40
codegen_flags: <defaults>
</compile_context>

<pallas_src>
import functools
import math

import jax
import jax.numpy as jnp
import numpy as np
from jax.experimental import pallas as pl
from jax.experimental.pallas import tpu as pltpu

_VMEM_SPEC = pl.BlockSpec(memory_space=pltpu.MemorySpace.VMEM)
_MM_DTYPE = jnp.float32   # jnp.bfloat16 on v6e/v7x for single-pass MXU (modest win)


def _mm(a, b):
    return jnp.dot(a.astype(_MM_DTYPE), b.astype(_MM_DTYPE),
                   preferred_element_type=jnp.float32)


# ----------------------------------------------------------------------------
# The single fused kernel
# ----------------------------------------------------------------------------
def _vae_kernel(*refs, meta):
    o_ref, dc_ref = refs[-2], refs[-1]          # output slab, decoder-canvas scratch
    it = iter(refs[:-2])

    map_canvas = next(it)[...]                  # (BP, inMapDim*inMapDim)
    sa = next(it)[...]                          # (BP, S+A)
    eps = next(it)[...]                         # (BP, L)

    bp = meta["bp"]

    # ---- encoder convolutions on the flattened canvas ----
    x = map_canvas
    for (k, wg, out_w) in meta["enc_convs"]:
        a_ref = next(it)
        b_ref = next(it)
        acc = None
        t = 0
        for dy in range(k):
            for dx in range(k):
                s = dy * wg + dx
                term = _mm(a_ref[t], x[:, s:s + out_w])
                acc = term if acc is None else acc + term
                t += 1
        x = jnp.maximum(acc + b_ref[...], 0.0)

    # ---- conv->FC junction + first encoder FC (split map / [state|action] weights) ----
    venc_ref = next(it)
    w1sa_ref = next(it)
    b1_ref = next(it)
    h = _mm(sa, w1sa_ref[...]) + b1_ref[...]
    for c in range(meta["enc_c_last"]):
        h = h + _mm(x[c * bp:(c + 1) * bp, :], venc_ref[c])
    h = jnp.maximum(h, 0.0)

    # ---- remaining encoder FCs ----
    for _ in range(meta["n_enc_fc_rest"]):
        w_ref = next(it)
        b_ref = next(it)
        h = jnp.maximum(_mm(h, w_ref[...]) + b_ref[...], 0.0)

    # ---- fused mean|logvar + reparameterization ----
    wml_ref = next(it)
    bml_ref = next(it)
    ml = _mm(h, wml_ref[...]) + bml_ref[...]
    lat = meta["latent"]
    mu = ml[:, :lat]
    logvar = ml[:, lat:]
    z = mu + eps * jnp.exp(0.5 * logvar)

    # ---- decoder FCs ----
    d = z
    for _ in range(meta["n_dec_fc"]):
        w_ref = next(it)
        b_ref = next(it)
        d = jnp.maximum(_mm(d, w_ref[...]) + b_ref[...], 0.0)

    # ---- fused state|action heads ----
    wsa_ref = next(it)
    bsa_ref = next(it)
    sa_head = _mm(d, wsa_ref[...]) + bsa_ref[...]

    # ---- map head -> offset-placed, zero-padded decoder canvas (VMEM scratch) ----
    vdec_ref = next(it)
    bdec_ref = next(it)
    for c in range(meta["dec_c_first"]):
        dc_ref[c * bp:(c + 1) * bp, :] = _mm(d, vdec_ref[c]) + bdec_ref[c]

    # ---- transposed convolutions as canvas convs with pre-flipped kernels ----
    y = None
    for li, (k, dg, out_w, masked) in enumerate(meta["dec_convs"]):
        a_ref = next(it)
        b_ref = next(it)
        mask_ref = next(it) if masked else None
        acc = None
        t = 0
        for dy in range(k):
            for dx in range(k):
                s = dy * dg + dx
                src = dc_ref[:, s:s + out_w] if li == 0 else y[:, s:s + out_w]
                term = _mm(a_ref[t], src)
                acc = term if acc is None else acc + term
                t += 1
        acc = acc + b_ref[...]
        if masked:                       # ReLU + exact-zero border for next deconv's padding
            acc = jnp.maximum(acc, 0.0) * mask_ref[...]
        y = acc

    # ---- one fused lane-dense output slab: [mean | logvar | z | state|action | map] ----
    sa_dim = meta["sa_dim"]
    o_ref[:, 0:2 * lat] = ml
    o_ref[:, 2 * lat:3 * lat] = z
    o_ref[:, 3 * lat:3 * lat + sa_dim] = sa_head
    o_ref[:, 3 * lat + sa_dim:3 * lat + sa_dim + meta["map_w"]] = y


# ----------------------------------------------------------------------------
# Parameter init (PyTorch layout + PyTorch-default uniform fan-in init)
# ----------------------------------------------------------------------------
def _uniform(key, shape, bound):
    return jax.random.uniform(key, shape, jnp.float32, -bound, bound)


def init_raw_params(key, dimension_args, nn_size):
    in_state, in_map, in_action, latent = dimension_args
    conv_cfg, fc_cfg = nn_size
    keys = iter(jax.random.split(key, 128))

    raw = {"dims": dict(state=in_state, map=in_map, action=in_action, latent=latent)}

    enc_convs, dec_convs = [], []
    last_ch, last_sz = 1, in_map
    for (out_ch, k) in conv_cfg:
        bound = 1.0 / math.sqrt(last_ch * k * k)
        w = _uniform(next(keys), (out_ch, last_ch, k, k), bound)
        b = _uniform(next(keys), (out_ch,), bound)
        enc_convs.append((w, b, k))
        # ConvTranspose2d(out_ch, last_ch, k): weight (in=out_ch, out=last_ch, k, k)
        bound_t = 1.0 / math.sqrt(last_ch * k * k)
        wt = _uniform(next(keys), (out_ch, last_ch, k, k), bound_t)
        bt = _uniform(next(keys), (last_ch,), bound_t)
        dec_convs.insert(0, (wt, bt, k))
        last_ch, last_sz = out_ch, last_sz - k + 1
    raw["enc_convs"] = enc_convs
    raw["dec_convs"] = dec_convs
    raw["conv_out_ch"] = last_ch
    raw["conv_out_sz"] = last_sz
    conv_out_dim = last_ch * last_sz * last_sz
    raw["conv_out_dim"] = conv_out_dim

    def linear(kk, n_in, n_out):
        bound = 1.0 / math.sqrt(n_in)
        return (_uniform(kk, (n_out, n_in), bound),
                _uniform(jax.random.fold_in(kk, 1), (n_out,), bound))

    enc_fcs = []
    d = conv_out_dim + in_state + in_action
    for hdim in fc_cfg:
        enc_fcs.append(linear(next(keys), d, hdim))
        d = hdim
    raw["enc_fcs"] = enc_fcs
    raw["mean_fc"] = linear(next(keys), d, latent)
    raw["logvar_fc"] = linear(next(keys), d, latent)

    dec_fcs = []
    d = latent
    for hdim in reversed(fc_cfg):
        dec_fcs.append(linear(next(keys), d, hdim))
        d = hdim
    raw["dec_fcs"] = dec_fcs
    raw["state_fc"] = linear(next(keys), d, in_state)
    raw["action_fc"] = linear(next(keys), d, in_action)
    raw["map_fc"] = linear(next(keys), d, conv_out_dim)
    return raw


# ----------------------------------------------------------------------------
# Build kernel-ready matrices (kron shift matrices, junction/head canvas weights)
# ----------------------------------------------------------------------------
def build_kernel_params(raw, bp):
    dims = raw["dims"]
    in_map, in_state, in_action, latent = dims["map"], dims["state"], dims["action"], dims["latent"]
    eye = jnp.eye(bp, dtype=jnp.float32)

    inputs = []
    meta = {"bp": bp, "latent": latent, "sa_dim": in_state + in_action, "in_map": in_map}

    # -------- encoder conv geometry (all layers on the in_map-wide canvas grid) --------
    wg = in_map
    sizes = [in_map]
    for (_, _, k) in raw["enc_convs"]:
        sizes.append(sizes[-1] - k + 1)
    n_enc = len(raw["enc_convs"])
    s_last = sizes[-1]
    enc_out_w = [0] * n_enc
    need = (s_last - 1) * (wg + 1) + 1
    for l in reversed(range(n_enc)):
        enc_out_w[l] = need
        need += (raw["enc_convs"][l][2] - 1) * (wg + 1)
    assert need == wg * wg

    enc_meta = []
    for l, (w, b, k) in enumerate(raw["enc_convs"]):
        mats = jnp.stack([jnp.kron(w[:, :, dy, dx], eye)
                          for dy in range(k) for dx in range(k)], axis=0)
        brow = jnp.repeat(b, bp)[:, None]
        inputs += [mats, brow]
        enc_meta.append((k, wg, enc_out_w[l]))
    meta["enc_convs"] = enc_meta
    c_last = raw["conv_out_ch"]
    meta["enc_c_last"] = c_last

    # -------- junction: first encoder FC split into per-channel map blocks + [state|action] --------
    w1, b1 = raw["enc_fcs"][0]                      # (out, conv_out + S + A), (out,)
    n_h1 = w1.shape[0]
    conv_out_dim = raw["conv_out_dim"]
    w1_map = w1[:, :conv_out_dim].T.reshape(c_last, s_last * s_last, n_h1)
    cols = (np.arange(s_last)[:, None] * wg + np.arange(s_last)[None, :]).reshape(-1)
    junc_w = enc_out_w[-1]
    venc = jnp.zeros((c_last, junc_w, n_h1), jnp.float32).at[:, cols, :].set(w1_map)
    inputs += [venc, w1[:, conv_out_dim:].T, b1[None, :]]

    meta["n_enc_fc_rest"] = len(raw["enc_fcs"]) - 1
    for (w, b) in raw["enc_fcs"][1:]:
        inputs += [w.T, b[None, :]]

    # -------- fused mean|logvar --------
    wm, bm = raw["mean_fc"]
    wl, bl = raw["logvar_fc"]
    inputs += [jnp.concatenate([wm.T, wl.T], axis=1), jnp.concatenate([bm, bl])[None, :]]

    # -------- decoder FCs --------
    meta["n_dec_fc"] = len(raw["dec_fcs"])
    for (w, b) in raw["dec_fcs"]:
        inputs += [w.T, b[None, :]]

    # -------- fused state|action heads --------
    ws, bs = raw["state_fc"]
    wa, ba = raw["action_fc"]
    inputs += [jnp.concatenate([ws.T, wa.T], axis=1), jnp.concatenate([bs, ba])[None, :]]

    # -------- decoder (transposed conv) geometry on a larger canvas grid --------
    dec_ks = [k for (_, _, k) in raw["dec_convs"]]
    n_dec = len(dec_ks)
    dg = in_map + max(dec_ks) - 1
    r = [s_last]
    for k in dec_ks:
        r.append(r[-1] + k - 1)
    assert r[-1] == in_map
    suffix = [0] * (n_dec + 1)
    for l in reversed(range(n_dec)):
        suffix[l] = suffix[l + 1] + dec_ks[l] - 1
    dec_out_w = [0] * n_dec
    need = (in_map - 1) * (dg + 1) + 1
    for l in reversed(range(n_dec)):
        dec_out_w[l] = need
        need += (dec_ks[l] - 1) * (dg + 1)
    dec_in_w = need                                   # map-head canvas width
    meta["map_w"] = dec_out_w[-1]
    meta["dg"] = dg

    # -------- map head -> offset-placed decoder canvas (implicit zero padding) --------
    wmap, bmap = raw["map_fc"]                        # (conv_out_dim, n_d), (conv_out_dim,)
    n_d = wmap.shape[1]
    off0 = suffix[0]
    cols_d = ((np.arange(s_last) + off0)[:, None] * dg
              + (np.arange(s_last) + off0)[None, :]).reshape(-1)
    wmap_t = wmap.T.reshape(n_d, c_last, s_last * s_last)
    vdec = jnp.zeros((c_last, n_d, dec_in_w), jnp.float32).at[:, :, cols_d].set(
        jnp.transpose(wmap_t, (1, 0, 2)))
    bdec = jnp.zeros((c_last, 1, dec_in_w), jnp.float32).at[:, 0, cols_d].set(
        bmap.reshape(c_last, s_last * s_last))
    inputs += [vdec, bdec]
    meta["dec_c_first"] = c_last
    meta["dec_canvas"] = (c_last * bp, dec_in_w)

    # -------- transposed convs as canvas convs with flipped, channel-swapped kernels --------
    dec_meta = []
    for l, (wt, bt, k) in enumerate(raw["dec_convs"]):
        w_eff = jnp.transpose(jnp.flip(wt, axis=(2, 3)), (1, 0, 2, 3))   # (Cout, Cin, k, k)
        mats = jnp.stack([jnp.kron(w_eff[:, :, dy, dx], eye)
                          for dy in range(k) for dx in range(k)], axis=0)
        brow = jnp.repeat(bt, bp)[:, None]
        masked = l < n_dec - 1
        inputs += [mats, brow]
        if masked:
            lo, hi = suffix[l + 1], suffix[l + 1] + r[l + 1]
            m = np.zeros((1, dec_out_w[l]), np.float32)
            for u in range(lo, hi):
                m[0, u * dg + lo:u * dg + hi] = 1.0
            inputs.append(jnp.asarray(m))
        dec_meta.append((k, dg, dec_out_w[l], masked))
    meta["dec_convs"] = dec_meta

    meta["out_w"] = 3 * latent + in_state + in_action + meta["map_w"]
    return {"inputs": inputs, "meta": meta}


# ----------------------------------------------------------------------------
# Forward wrapper (mirrors inputVAE.forward)
# ----------------------------------------------------------------------------
def make_forward(params):
    meta = params["meta"]
    bp, lat = meta["bp"], meta["latent"]

    call = pl.pallas_call(
        functools.partial(_vae_kernel, meta=meta),
        out_shape=jax.ShapeDtypeStruct((bp, meta["out_w"]), jnp.float32),
        in_specs=[_VMEM_SPEC] * (3 + len(params["inputs"])),
        out_specs=_VMEM_SPEC,
        scratch_shapes=[pltpu.VMEM(meta["dec_canvas"], jnp.float32)],
    )

    def forward(r_state, r_map, r_action, eps):
        b = r_state.shape[0]
        assert b <= bp
        pad = bp - b
        map0 = jnp.pad(r_map.reshape(b, -1), ((0, pad), (0, 0)))
        sa = jnp.pad(jnp.concatenate([r_state, r_action], axis=1), ((0, pad), (0, 0)))
        eps_p = jnp.pad(eps, ((0, pad), (0, 0)))
        slab = call(map0, sa, eps_p, *params["inputs"])

        s_dim, a_dim = r_state.shape[1], r_action.shape[1]
        mu = slab[:b, 0:lat]
        logvar = slab[:b, lat:2 * lat]
        z = slab[:b, 2 * lat:3 * lat]
        st = slab[:b, 3 * lat:3 * lat + s_dim]
        ac = slab[:b, 3 * lat + s_dim:3 * lat + s_dim + a_dim]
        m_flat = slab[:b, 3 * lat + s_dim + a_dim:]
        dg, im = meta["dg"], meta["in_map"]
        m = jnp.pad(m_flat, ((0, 0), (0, im * dg - m_flat.shape[1])))
        m = m.reshape(b, im, dg)[:, :, :im][:, None, :, :]
        return z, mu, logvar, (st, m, ac)

    return forward


# ----------------------------------------------------------------------------
# Pure-JAX reference of the PyTorch module (for a numeric sanity check)
# ----------------------------------------------------------------------------
_HI = jax.lax.Precision.HIGHEST


def _lin_ref(x, w, b):
    return jax.lax.dot_general(x, w, (((1,), (1,)), ((), ())), precision=_HI) + b


def _conv2d_ref(x, w, b):
    k = w.shape[-1]
    ho, wo = x.shape[2] - k + 1, x.shape[3] - k + 1
    out = None
    for dy in range(k):
        for dx in range(k):
            t = jnp.einsum("bchw,oc->bohw", x[:, :, dy:dy + ho, dx:dx + wo],
                           w[:, :, dy, dx], precision=_HI)
            out = t if out is None else out + t
    return out + b[None, :, None, None]


def _deconv2d_ref(x, w, b):
    k = w.shape[-1]
    bsz, _, h, wd = x.shape
    out = jnp.zeros((bsz, w.shape[1], h + k - 1, wd + k - 1), x.dtype)
    for dy in range(k):
        for dx in range(k):
            t = jnp.einsum("bchw,co->bohw", x, w[:, :, dy, dx], precision=_HI)
            out = out.at[:, :, dy:dy + h, dx:dx + wd].add(t)
    return out + b[None, :, None, None]


def reference_forward(raw, r_state, r_map, r_action, eps):
    x = r_map
    for (w, b, _) in raw["enc_convs"]:
        x = jax.nn.relu(_conv2d_ref(x, w, b))
    b_sz = r_state.shape[0]
    h = jnp.concatenate([x.reshape(b_sz, -1), r_state, r_action], axis=1)
    for (w, b) in raw["enc_fcs"]:
        h = jax.nn.relu(_lin_ref(h, w, b))
    mu = _lin_ref(h, *raw["mean_fc"])
    logvar = _lin_ref(h, *raw["logvar_fc"])
    z = mu + eps * jnp.exp(0.5 * logvar)
    d = z
    for (w, b) in raw["dec_fcs"]:
        d = jax.nn.relu(_lin_ref(d, w, b))
    st = _lin_ref(d, *raw["state_fc"])
    ac = _lin_ref(d, *raw["action_fc"])
    m = _lin_ref(d, *raw["map_fc"]).reshape(b_sz, raw["conv_out_ch"],
                                            raw["conv_out_sz"], raw["conv_out_sz"])
    n = len(raw["dec_convs"])
    for i, (w, b, _) in enumerate(raw["dec_convs"]):
        m = _deconv2d_ref(m, w, b)
        if i < n - 1:
            m = jax.nn.relu(m)
    return z, mu, logvar, (st, m, ac)


# ----------------------------------------------------------------------------
# Driver
# ----------------------------------------------------------------------------
if __name__ == "__main__":
    in_state_dim, in_map_dim, in_action_dim, latent_dim = 8, 16, 4, 16
    dimension_args = [in_state_dim, in_map_dim, in_action_dim, latent_dim]
    encoder_conv_size = [[4, 3], [8, 3]]   # [out_channels, kernel_size]
    encoder_fc_size = [64, 32]
    nn_size = [encoder_conv_size, encoder_fc_size]
    batch = 2
    bp = 8                                  # batch rows padded to one sublane tile

    key = jax.random.PRNGKey(0)
    kp, ks, km, ka, ke = jax.random.split(key, 5)
    raw = init_raw_params(kp, dimension_args, nn_size)
    params = build_kernel_params(raw, bp)

    r_state = jax.random.normal(ks, (batch, in_state_dim), jnp.float32)
    r_map = jax.random.normal(km, (batch, 1, in_map_dim, in_map_dim), jnp.float32)
    r_action = jax.random.normal(ka, (batch, in_action_dim), jnp.float32)
    # TODO(synk): torch.randn_like(std) has no in-graph equivalent; eps is an explicit input.
    eps = jax.random.normal(ke, (batch, latent_dim), jnp.float32)

    fwd = jax.jit(make_forward(params))
    z, mu, logvar, (rec_state, rec_map, rec_action) = fwd(r_state, r_map, r_action, eps)
    jax.block_until_ready((z, mu, logvar, rec_state, rec_map, rec_action))

    # shape checks
    assert z.shape == (batch, latent_dim) and mu.shape == (batch, latent_dim)
    assert logvar.shape == (batch, latent_dim)
    assert rec_state.shape == (batch, in_state_dim)
    assert rec_action.shape == (batch, in_action_dim)
    assert rec_map.shape == (batch, 1, in_map_dim, in_map_dim)

    # numeric sanity check against the pure-JAX reference of the PyTorch module
    rz, rmu, rlv, (rst, rm, rac) = reference_forward(raw, r_state, r_map, r_action, eps)
    pairs = [(z, rz), (mu, rmu), (logvar, rlv), (rec_state, rst),
             (rec_action, rac), (rec_map, rm)]
    max_err = max(float(jnp.max(jnp.abs(a - b))) for a, b in pairs)
    assert max_err < 1e-1, f"kernel/reference mismatch: max abs err {max_err}"
    for t in (z, mu, logvar, rec_state, rec_map, rec_action):
        assert bool(jnp.all(jnp.isfinite(t)))

    print("KERNEL_OK")
</pallas_src>

<mosaic_0001>
module attributes {stable_mosaic.version = 11 : i64} {
  func.func @_vae_kernel(%arg0: memref<8x256xf32, #tpu.memory_space<vmem>>, %arg1: memref<8x12xf32, #tpu.memory_space<vmem>>, %arg2: memref<8x16xf32, #tpu.memory_space<vmem>>, %arg3: memref<9x32x8xf32, #tpu.memory_space<vmem>>, %arg4: memref<32x1xf32, #tpu.memory_space<vmem>>, %arg5: memref<9x64x32xf32, #tpu.memory_space<vmem>>, %arg6: memref<64x1xf32, #tpu.memory_space<vmem>>, %arg7: memref<8x188x64xf32, #tpu.memory_space<vmem>>, %arg8: memref<12x64xf32, #tpu.memory_space<vmem>>, %arg9: memref<1x64xf32, #tpu.memory_space<vmem>>, %arg10: memref<64x32xf32, #tpu.memory_space<vmem>>, %arg11: memref<1x32xf32, #tpu.memory_space<vmem>>, %arg12: memref<32x32xf32, #tpu.memory_space<vmem>>, %arg13: memref<1x32xf32, #tpu.memory_space<vmem>>, %arg14: memref<16x32xf32, #tpu.memory_space<vmem>>, %arg15: memref<1x32xf32, #tpu.memory_space<vmem>>, %arg16: memref<32x64xf32, #tpu.memory_space<vmem>>, %arg17: memref<1x64xf32, #tpu.memory_space<vmem>>, %arg18: memref<64x12xf32, #tpu.memory_space<vmem>>, %arg19: memref<1x12xf32, #tpu.memory_space<vmem>>, %arg20: memref<8x64x362xf32, #tpu.memory_space<vmem>>, %arg21: memref<8x1x362xf32, #tpu.memory_space<vmem>>, %arg22: memref<9x32x64xf32, #tpu.memory_space<vmem>>, %arg23: memref<32x1xf32, #tpu.memory_space<vmem>>, %arg24: memref<1x324xf32, #tpu.memory_space<vmem>>, %arg25: memref<9x8x32xf32, #tpu.memory_space<vmem>>, %arg26: memref<8x1xf32, #tpu.memory_space<vmem>>, %arg27: memref<8x346xf32, #tpu.memory_space<vmem>>, %arg28: memref<64x362xf32, #tpu.memory_space<vmem>>) attributes {dimension_semantics = [], scalar_prefetch = 0 : i64, scratch_operands = 1 : i64, tpu.core_type = #tpu.core_type<tc>} {
    %c0 = arith.constant 0 : index
    %c0_0 = arith.constant 0 : index
    %0 = vector.load %arg0[%c0, %c0_0] : memref<8x256xf32, #tpu.memory_space<vmem>>, vector<8x256xf32>
    %c0_1 = arith.constant 0 : index
    %c0_2 = arith.constant 0 : index
    %1 = vector.load %arg1[%c0_1, %c0_2] : memref<8x12xf32, #tpu.memory_space<vmem>>, vector<8x12xf32>
    %c0_3 = arith.constant 0 : index
    %c0_4 = arith.constant 0 : index
    %2 = vector.load %arg2[%c0_3, %c0_4] : memref<8x16xf32, #tpu.memory_space<vmem>>, vector<8x16xf32>
    %c0_5 = arith.constant 0 : index
    %c0_6 = arith.constant 0 : index
    %c0_7 = arith.constant 0 : index
    %3 = vector.load %arg3[%c0_5, %c0_6, %c0_7] : memref<9x32x8xf32, #tpu.memory_space<vmem>>, vector<1x32x8xf32>
    %4 = vector.shape_cast %3 : vector<1x32x8xf32> to vector<32x8xf32>
    %5 = vector.extract_strided_slice %0 {offsets = [0, 0], sizes = [8, 222], strides = [1, 1]} : vector<8x256xf32> to vector<8x222xf32>
    %cst = arith.constant dense<0.000000e+00> : vector<32x222xf32>
    %6 = tpu.matmul %4, %5, %cst {dimension_numbers = #tpu.dot_dimension_numbers<[1], [0], [0], [1], [0, 0, 1, 1], [], []>} : vector<32x8xf32>, vector<8x222xf32>, vector<32x222xf32> -> vector<32x222xf32>
    %c1 = arith.constant 1 : index
    %c0_8 = arith.constant 0 : index
    %c0_9 = arith.constant 0 : index
    %7 = vector.load %arg3[%c1, %c0_8, %c0_9] : memref<9x32x8xf32, #tpu.memory_space<vmem>>, vector<1x32x8xf32>
    %8 = vector.shape_cast %7 : vector<1x32x8xf32> to vector<32x8xf32>
    %9 = vector.extract_strided_slice %0 {offsets = [0, 1], sizes = [8, 222], strides = [1, 1]} : vector<8x256xf32> to vector<8x222xf32>
    %cst_10 = arith.constant dense<0.000000e+00> : vector<32x222xf32>
    %10 = tpu.matmul %8, %9, %cst_10 {dimension_numbers = #tpu.dot_dimension_numbers<[1], [0], [0], [1], [0, 0, 1, 1], [], []>} : vector<32x8xf32>, vector<8x222xf32>, vector<32x222xf32> -> vector<32x222xf32>
    %11 = arith.addf %6, %10 : vector<32x222xf32>
    %c2 = arith.constant 2 : index
    %c0_11 = arith.constant 0 : index
    %c0_12 = arith.constant 0 : index
    %12 = vector.load %arg3[%c2, %c0_11, %c0_12] : memref<9x32x8xf32, #tpu.memory_space<vmem>>, vector<1x32x8xf32>
    %13 = vector.shape_cast %12 : vector<1x32x8xf32> to vector<32x8xf32>
    %14 = vector.extract_strided_slice %0 {offsets = [0, 2], sizes = [8, 222], strides = [1, 1]} : vector<8x256xf32> to vector<8x222xf32>
    %cst_13 = arith.constant dense<0.000000e+00> : vector<32x222xf32>
    %15 = tpu.matmul %13, %14, %cst_13 {dimension_numbers = #tpu.dot_dimension_numbers<[1], [0], [0], [1], [0, 0, 1, 1], [], []>} : vector<32x8xf32>, vector<8x222xf32>, vector<32x222xf32> -> vector<32x222xf32>
    %16 = arith.addf %11, %15 : vector<32x222xf32>
    %c3 = arith.constant 3 : index
    %c0_14 = arith.constant 0 : index
    %c0_15 = arith.constant 0 : index
    %17 = vector.load %arg3[%c3, %c0_14, %c0_15] : memref<9x32x8xf32, #tpu.memory_space<vmem>>, vector<1x32x8xf32>
    %18 = vector.shape_cast %17 : vector<1x32x8xf32> to vector<32x8xf32>
    %19 = vector.extract_strided_slice %0 {offsets = [0, 16], sizes = [8, 222], strides = [1, 1]} : vector<8x256xf32> to vector<8x222xf32>
    %cst_16 = arith.constant dense<0.000000e+00> : vector<32x222xf32>
    %20 = tpu.matmul %18, %19, %cst_16 {dimension_numbers = #tpu.dot_dimension_numbers<[1], [0], [0], [1], [0, 0, 1, 1], [], []>} : vector<32x8xf32>, vector<8x222xf32>, vector<32x222xf32> -> vector<32x222xf32>
    %21 = arith.addf %16, %20 : vector<32x222xf32>
    %c4 = arith.constant 4 : index
    %c0_17 = arith.constant 0 : index
    %c0_18 = arith.constant 0 : index
    %22 = vector.load %arg3[%c4, %c0_17, %c0_18] : memref<9x32x8xf32, #tpu.memory_space<vmem>>, vector<1x32x8xf32>
    %23 = vector.shape_cast %22 : vector<1x32x8xf32> to vector<32x8xf32>
    %24 = vector.extract_strided_slice %0 {offsets = [0, 17], sizes = [8, 222], strides = [1, 1]} : vector<8x256xf32> to vector<8x222xf32>
    %cst_19 = arith.constant dense<0.000000e+00> : vector<32x222xf32>
    %25 = tpu.matmul %23, %24, %cst_19 {dimension_numbers = #tpu.dot_dimension_numbers<[1], [0], [0], [1], [0, 0, 1, 1], [], []>} : vector<32x8xf32>, vector<8x222xf32>, vector<32x222xf32> -> vector<32x222xf32>
    %26 = arith.addf %21, %25 : vector<32x222xf32>
    %c5 = arith.constant 5 : index
    %c0_20 = arith.constant 0 : index
    %c0_21 = arith.constant 0 : index
    %27 = vector.load %arg3[%c5, %c0_20, %c0_21] : memref<9x32x8xf32, #tpu.memory_space<vmem>>, vector<1x32x8xf32>
    %28 = vector.shape_cast %27 : vector<1x32x8xf32> to vector<32x8xf32>
    %29 = vector.extract_strided_slice %0 {offsets = [0, 18], sizes = [8, 222], strides = [1, 1]} : vector<8x256xf32> to vector<8x222xf32>
    %cst_22 = arith.constant dense<0.000000e+00> : vector<32x222xf32>
    %30 = tpu.matmul %28, %29, %cst_22 {dimension_numbers = #tpu.dot_dimension_numbers<[1], [0], [0], [1], [0, 0, 1, 1], [], []>} : vector<32x8xf32>, vector<8x222xf32>, vector<32x222xf32> -> vector<32x222xf32>
    %31 = arith.addf %26, %30 : vector<32x222xf32>
    %c6 = arith.constant 6 : index
    %c0_23 = arith.constant 0 : index
    %c0_24 = arith.constant 0 : index
    %32 = vector.load %arg3[%c6, %c0_23, %c0_24] : memref<9x32x8xf32, #tpu.memory_space<vmem>>, vector<1x32x8xf32>
    %33 = vector.shape_cast %32 : vector<1x32x8xf32> to vector<32x8xf32>
    %34 = vector.extract_strided_slice %0 {offsets = [0, 32], sizes = [8, 222], strides = [1, 1]} : vector<8x256xf32> to vector<8x222xf32>
    %cst_25 = arith.constant dense<0.000000e+00> : vector<32x222xf32>
    %35 = tpu.matmul %33, %34, %cst_25 {dimension_numbers = #tpu.dot_dimension_numbers<[1], [0], [0], [1], [0, 0, 1, 1], [], []>} : vector<32x8xf32>, vector<8x222xf32>, vector<32x222xf32> -> vector<32x222xf32>
    %36 = arith.addf %31, %35 : vector<32x222xf32>
    %c7 = arith.constant 7 : index
    %c0_26 = arith.constant 0 : index
    %c0_27 = arith.constant 0 : index
    %37 = vector.load %arg3[%c7, %c0_26, %c0_27] : memref<9x32x8xf32, #tpu.memory_space<vmem>>, vector<1x32x8xf32>
    %38 = vector.shape_cast %37 : vector<1x32x8xf32> to vector<32x8xf32>
    %39 = vector.extract_strided_slice %0 {offsets = [0, 33], sizes = [8, 222], strides = [1, 1]} : vector<8x256xf32> to vector<8x222xf32>
    %cst_28 = arith.constant dense<0.000000e+00> : vector<32x222xf32>
    %40 = tpu.matmul %38, %39, %cst_28 {dimension_numbers = #tpu.dot_dimension_numbers<[1], [0], [0], [1], [0, 0, 1, 1], [], []>} : vector<32x8xf32>, vector<8x222xf32>, vector<32x222xf32> -> vector<32x222xf32>
    %41 = arith.addf %36, %40 : vector<32x222xf32>
    %c8 = arith.constant 8 : index
    %c0_29 = arith.constant 0 : index
    %c0_30 = arith.constant 0 : index
    %42 = vector.load %arg3[%c8, %c0_29, %c0_30] : memref<9x32x8xf32, #tpu.memory_space<vmem>>, vector<1x32x8xf32>
    %43 = vector.shape_cast %42 : vector<1x32x8xf32> to vector<32x8xf32>
    %44 = vector.extract_strided_slice %0 {offsets = [0, 34], sizes = [8, 222], strides = [1, 1]} : vector<8x256xf32> to vector<8x222xf32>
    %cst_31 = arith.constant dense<0.000000e+00> : vector<32x222xf32>
    %45 = tpu.matmul %43, %44, %cst_31 {dimension_numbers = #tpu.dot_dimension_numbers<[1], [0], [0], [1], [0, 0, 1, 1], [], []>} : vector<32x8xf32>, vector<8x222xf32>, vector<32x222xf32> -> vector<32x222xf32>
    %46 = arith.addf %41, %45 : vector<32x222xf32>
    %c0_32 = arith.constant 0 : index
    %c0_33 = arith.constant 0 : index
    %47 = vector.load %arg4[%c0_32, %c0_33] : memref<32x1xf32, #tpu.memory_space<vmem>>, vector<32x1xf32>
    %48 = vector.broadcast %47 : vector<32x1xf32> to vector<32x222xf32>
    %49 = arith.addf %46, %48 : vector<32x222xf32>
    %cst_34 = arith.constant 0.000000e+00 : f32
    %50 = vector.broadcast %cst_34 : f32 to vector<32x222xf32>
    %51 = arith.maximumf %49, %50 : vector<32x222xf32>
    %c0_35 = arith.constant 0 : index
    %c0_36 = arith.constant 0 : index
    %c0_37 = arith.constant 0 : index
    %52 = vector.load %arg5[%c0_35, %c0_36, %c0_37] : memref<9x64x32xf32, #tpu.memory_space<vmem>>, vector<1x64x32xf32>
    %53 = vector.shape_cast %52 : vector<1x64x32xf32> to vector<64x32xf32>
    %54 = vector.extract_strided_slice %51 {offsets = [0, 0], sizes = [32, 188], strides = [1, 1]} : vector<32x222xf32> to vector<32x188xf32>
    %cst_38 = arith.constant dense<0.000000e+00> : vector<64x188xf32>
    %55 = tpu.matmul %53, %54, %cst_38 {dimension_numbers = #tpu.dot_dimension_numbers<[1], [0], [0], [1], [0, 0, 1, 1], [], []>} : vector<64x32xf32>, vector<32x188xf32>, vector<64x188xf32> -> vector<64x188xf32>
    %c1_39 = arith.constant 1 : index
    %c0_40 = arith.constant 0 : index
    %c0_41 = arith.constant 0 : index
    %56 = vector.load %arg5[%c1_39, %c0_40, %c0_41] : memref<9x64x32xf32, #tpu.memory_space<vmem>>, vector<1x64x32xf32>
    %57 = vector.shape_cast %56 : vector<1x64x32xf32> to vector<64x32xf32>
    %58 = vector.extract_strided_slice %51 {offsets = [0, 1], sizes = [32, 188], strides = [1, 1]} : vector<32x222xf32> to vector<32x188xf32>
    %cst_42 = arith.constant dense<0.000000e+00> : vector<64x188xf32>
    %59 = tpu.matmul %57, %58, %cst_42 {dimension_numbers = #tpu.dot_dimension_numbers<[1], [0], [0], [1], [0, 0, 1, 1], [], []>} : vector<64x32xf32>, vector<32x188xf32>, vector<64x188xf32> -> vector<64x188xf32>
    %60 = arith.addf %55, %59 : vector<64x188xf32>
    %c2_43 = arith.constant 2 : index
    %c0_44 = arith.constant 0 : index
    %c0_45 = arith.constant 0 : index
    %61 = vector.load %arg5[%c2_43, %c0_44, %c0_45] : memref<9x64x32xf32, #tpu.memory_space<vmem>>, vector<1x64x32xf32>
    %62 = vector.shape_cast %61 : vector<1x64x32xf32> to vector<64x32xf32>
    %63 = vector.extract_strided_slice %51 {offsets = [0, 2], sizes = [32, 188], strides = [1, 1]} : vector<32x222xf32> to vector<32x188xf32>
    %cst_46 = arith.constant dense<0.000000e+00> : vector<64x188xf32>
    %64 = tpu.matmul %62, %63, %cst_46 {dimension_numbers = #tpu.dot_dimension_numbers<[1], [0], [0], [1], [0, 0, 1, 1], [], []>} : vector<64x32xf32>, vector<32x188xf32>, vector<64x188xf32> -> vector<64x188xf32>
    %65 = arith.addf %60, %64 : vector<64x188xf32>
    %c3_47 = arith.constant 3 : index
    %c0_48 = arith.constant 0 : index
    %c0_49 = arith.constant 0 : index
    %66 = vector.load %arg5[%c3_47, %c0_48, %c0_49] : memref<9x64x32xf32, #tpu.memory_space<vmem>>, vector<1x64x32xf32>
    %67 = vector.shape_cast %66 : vector<1x64x32xf32> to vector<64x32xf32>
    %68 = vector.extract_strided_slice %51 {offsets = [0, 16], sizes = [32, 188], strides = [1, 1]} : vector<32x222xf32> to vector<32x188xf32>
    %cst_50 = arith.constant dense<0.000000e+00> : vector<64x188xf32>
    %69 = tpu.matmul %67, %68, %cst_50 {dimension_numbers = #tpu.dot_dimension_numbers<[1], [0], [0], [1], [0, 0, 1, 1], [], []>} : vector<64x32xf32>, vector<32x188xf32>, vector<64x188xf32> -> vector<64x188xf32>
    %70 = arith.addf %65, %69 : vector<64x188xf32>
    %c4_51 = arith.constant 4 : index
    %c0_52 = arith.constant 0 : index
    %c0_53 = arith.constant 0 : index
    %71 = vector.load %arg5[%c4_51, %c0_52, %c0_53] : memref<9x64x32xf32, #tpu.memory_space<vmem>>, vector<1x64x32xf32>
    %72 = vector.shape_cast %71 : vector<1x64x32xf32> to vector<64x32xf32>
    %73 = vector.extract_strided_slice %51 {offsets = [0, 17], sizes = [32, 188], strides = [1, 1]} : vector<32x222xf32> to vector<32x188xf32>
    %cst_54 = arith.constant dense<0.000000e+00> : vector<64x188xf32>
    %74 = tpu.matmul %72, %73, %cst_54 {dimension_numbers = #tpu.dot_dimension_numbers<[1], [0], [0], [1], [0, 0, 1, 1], [], []>} : vector<64x32xf32>, vector<32x188xf32>, vector<64x188xf32> -> vector<64x188xf32>
    %75 = arith.addf %70, %74 : vector<64x188xf32>
    %c5_55 = arith.constant 5 : index
    %c0_56 = arith.constant 0 : index
    %c0_57 = arith.constant 0 : index
    %76 = vector.load %arg5[%c5_55, %c0_56, %c0_57] : memref<9x64x32xf32, #tpu.memory_space<vmem>>, vector<1x64x32xf32>
    %77 = vector.shape_cast %76 : vector<1x64x32xf32> to vector<64x32xf32>
    %78 = vector.extract_strided_slice %51 {offsets = [0, 18], sizes = [32, 188], strides = [1, 1]} : vector<32x222xf32> to vector<32x188xf32>
    %cst_58 = arith.constant dense<0.000000e+00> : vector<64x188xf32>
    %79 = tpu.matmul %77, %78, %cst_58 {dimension_numbers = #tpu.dot_dimension_numbers<[1], [0], [0], [1], [0, 0, 1, 1], [], []>} : vector<64x32xf32>, vector<32x188xf32>, vector<64x188xf32> -> vector<64x188xf32>
    %80 = arith.addf %75, %79 : vector<64x188xf32>
    %c6_59 = arith.constant 6 : index
    %c0_60 = arith.constant 0 : index
    %c0_61 = arith.constant 0 : index
    %81 = vector.load %arg5[%c6_59, %c0_60, %c0_61] : memref<9x64x32xf32, #tpu.memory_space<vmem>>, vector<1x64x32xf32>
    %82 = vector.shape_cast %81 : vector<1x64x32xf32> to vector<64x32xf32>
    %83 = vector.extract_strided_slice %51 {offsets = [0, 32], sizes = [32, 188], strides = [1, 1]} : vector<32x222xf32> to vector<32x188xf32>
    %cst_62 = arith.constant dense<0.000000e+00> : vector<64x188xf32>
    %84 = tpu.matmul %82, %83, %cst_62 {dimension_numbers = #tpu.dot_dimension_numbers<[1], [0], [0], [1], [0, 0, 1, 1], [], []>} : vector<64x32xf32>, vector<32x188xf32>, vector<64x188xf32> -> vector<64x188xf32>
    %85 = arith.addf %80, %84 : vector<64x188xf32>
    %c7_63 = arith.constant 7 : index
    %c0_64 = arith.constant 0 : index
    %c0_65 = arith.constant 0 : index
    %86 = vector.load %arg5[%c7_63, %c0_64, %c0_65] : memref<9x64x32xf32, #tpu.memory_space<vmem>>, vector<1x64x32xf32>
    %87 = vector.shape_cast %86 : vector<1x64x32xf32> to vector<64x32xf32>
    %88 = vector.extract_strided_slice %51 {offsets = [0, 33], sizes = [32, 188], strides = [1, 1]} : vector<32x222xf32> to vector<32x188xf32>
    %cst_66 = arith.constant dense<0.000000e+00> : vector<64x188xf32>
    %89 = tpu.matmul %87, %88, %cst_66 {dimension_numbers = #tpu.dot_dimension_numbers<[1], [0], [0], [1], [0, 0, 1, 1], [], []>} : vector<64x32xf32>, vector<32x188xf32>, vector<64x188xf32> -> vector<64x188xf32>
    %90 = arith.addf %85, %89 : vector<64x188xf32>
    %c8_67 = arith.constant 8 : index
    %c0_68 = arith.constant 0 : index
    %c0_69 = arith.constant 0 : index
    %91 = vector.load %arg5[%c8_67, %c0_68, %c0_69] : memref<9x64x32xf32, #tpu.memory_space<vmem>>, vector<1x64x32xf32>
    %92 = vector.shape_cast %91 : vector<1x64x32xf32> to vector<64x32xf32>
    %93 = vector.extract_strided_slice %51 {offsets = [0, 34], sizes = [32, 188], strides = [1, 1]} : vector<32x222xf32> to vector<32x188xf32>
    %cst_70 = arith.constant dense<0.000000e+00> : vector<64x188xf32>
    %94 = tpu.matmul %92, %93, %cst_70 {dimension_numbers = #tpu.dot_dimension_numbers<[1], [0], [0], [1], [0, 0, 1, 1], [], []>} : vector<64x32xf32>, vector<32x188xf32>, vector<64x188xf32> -> vector<64x188xf32>
    %95 = arith.addf %90, %94 : vector<64x188xf32>
    %c0_71 = arith.constant 0 : index
    %c0_72 = arith.constant 0 : index
    %96 = vector.load %arg6[%c0_71, %c0_72] : memref<64x1xf32, #tpu.memory_space<vmem>>, vector<64x1xf32>
    %97 = vector.broadcast %96 : vector<64x1xf32> to vector<64x188xf32>
    %98 = arith.addf %95, %97 : vector<64x188xf32>
    %cst_73 = arith.constant 0.000000e+00 : f32
    %99 = vector.broadcast %cst_73 : f32 to vector<64x188xf32>
    %100 = arith.maximumf %98, %99 : vector<64x188xf32>
    %c0_74 = arith.constant 0 : index
    %c0_75 = arith.constant 0 : index
    %101 = vector.load %arg8[%c0_74, %c0_75] : memref<12x64xf32, #tpu.memory_space<vmem>>, vector<12x64xf32>
    %cst_76 = arith.constant dense<0.000000e+00> : vector<8x64xf32>
    %102 = tpu.matmul %1, %101, %cst_76 {dimension_numbers = #tpu.dot_dimension_numbers<[1], [0], [0], [1], [0, 0, 1, 1], [], []>} : vector<8x12xf32>, vector<12x64xf32>, vector<8x64xf32> -> vector<8x64xf32>
    %c0_77 = arith.constant 0 : index
    %c0_78 = arith.constant 0 : index
    %103 = vector.load %arg9[%c0_77, %c0_78] : memref<1x64xf32, #tpu.memory_space<vmem>>, vector<1x64xf32>
    %104 = vector.broadcast %103 : vector<1x64xf32> to vector<8x64xf32>
    %105 = arith.addf %102, %104 : vector<8x64xf32>
    %106 = vector.extract_strided_slice %100 {offsets = [0, 0], sizes = [8, 188], strides = [1, 1]} : vector<64x188xf32> to vector<8x188xf32>
    %c0_79 = arith.constant 0 : index
    %c0_80 = arith.constant 0 : index
    %c0_81 = arith.constant 0 : index
    %107 = vector.load %arg7[%c0_79, %c0_80, %c0_81] : memref<8x188x64xf32, #tpu.memory_space<vmem>>, vector<1x188x64xf32>
    %108 = vector.shape_cast %107 : vector<1x188x64xf32> to vector<188x64xf32>
    %cst_82 = arith.constant dense<0.000000e+00> : vector<8x64xf32>
    %109 = tpu.matmul %106, %108, %cst_82 {dimension_numbers = #tpu.dot_dimension_numbers<[1], [0], [0], [1], [0, 0, 1, 1], [], []>} : vector<8x188xf32>, vector<188x64xf32>, vector<8x64xf32> -> vector<8x64xf32>
    %110 = arith.addf %105, %109 : vector<8x64xf32>
    %111 = vector.extract_strided_slice %100 {offsets = [8, 0], sizes = [8, 188], strides = [1, 1]} : vector<64x188xf32> to vector<8x188xf32>
    %c1_83 = arith.constant 1 : index
    %c0_84 = arith.constant 0 : index
    %c0_85 = arith.constant 0 : index
    %112 = vector.load %arg7[%c1_83, %c0_84, %c0_85] : memref<8x188x64xf32, #tpu.memory_space<vmem>>, vector<1x188x64xf32>
    %113 = vector.shape_cast %112 : vector<1x188x64xf32> to vector<188x64xf32>
    %cst_86 = arith.constant dense<0.000000e+00> : vector<8x64xf32>
    %114 = tpu.matmul %111, %113, %cst_86 {dimension_numbers = #tpu.dot_dimension_numbers<[1], [0], [0], [1], [0, 0, 1, 1], [], []>} : vector<8x188xf32>, vector<188x64xf32>, vector<8x64xf32> -> vector<8x64xf32>
    %115 = arith.addf %110, %114 : vector<8x64xf32>
    %116 = vector.extract_strided_slice %100 {offsets = [16, 0], sizes = [8, 188], strides = [1, 1]} : vector<64x188xf32> to vector<8x188xf32>
    %c2_87 = arith.constant 2 : index
    %c0_88 = arith.constant 0 : index
    %c0_89 = arith.constant 0 : index
    %117 = vector.load %arg7[%c2_87, %c0_88, %c0_89] : memref<8x188x64xf32, #tpu.memory_space<vmem>>, vector<1x188x64xf32>
    %118 = vector.shape_cast %117 : vector<1x188x64xf32> to vector<188x64xf32>
    %cst_90 = arith.constant dense<0.000000e+00> : vector<8x64xf32>
    %119 = tpu.matmul %116, %118, %cst_90 {dimension_numbers = #tpu.dot_dimension_numbers<[1], [0], [0], [1], [0, 0, 1, 1], [], []>} : vector<8x188xf32>, vector<188x64xf32>, vector<8x64xf32> -> vector<8x64xf32>
    %120 = arith.addf %115, %119 : vector<8x64xf32>
    %121 = vector.extract_strided_slice %100 {offsets = [24, 0], sizes = [8, 188], strides = [1, 1]} : vector<64x188xf32> to vector<8x188xf32>
    %c3_91 = arith.constant 3 : index
    %c0_92 = arith.constant 0 : index
    %c0_93 = arith.constant 0 : index
    %122 = vector.load %arg7[%c3_91, %c0_92, %c0_93] : memref<8x188x64xf32, #tpu.memory_space<vmem>>, vector<1x188x64xf32>
    %123 = vector.shape_cast %122 : vector<1x188x64xf32> to vector<188x64xf32>
    %cst_94 = arith.constant dense<0.000000e+00> : vector<8x64xf32>
    %124 = tpu.matmul %121, %123, %cst_94 {dimension_numbers = #tpu.dot_dimension_numbers<[1], [0], [0], [1], [0, 0, 1, 1], [], []>} : vector<8x188xf32>, vector<188x64xf32>, vector<8x64xf32> -> vector<8x64xf32>
    %125 = arith.addf %120, %124 : vector<8x64xf32>
    %126 = vector.extract_strided_slice %100 {offsets = [32, 0], sizes = [8, 188], strides = [1, 1]} : vector<64x188xf32> to vector<8x188xf32>
    %c4_95 = arith.constant 4 : index
    %c0_96 = arith.constant 0 : index
    %c0_97 = arith.constant 0 : index
    %127 = vector.load %arg7[%c4_95, %c0_96, %c0_97] : memref<8x188x64xf32, #tpu.memory_space<vmem>>, vector<1x188x64xf32>
    %128 = vector.shape_cast %127 : vector<1x188x64xf32> to vector<188x64xf32>
    %cst_98 = arith.constant dense<0.000000e+00> : vector<8x64xf32>
    %129 = tpu.matmul %126, %128, %cst_98 {dimension_numbers = #tpu.dot_dimension_numbers<[1], [0], [0], [1], [0, 0, 1, 1], [], []>} : vector<8x188xf32>, vector<188x64xf32>, vector<8x64xf32> -> vector<8x64xf32>
    %130 = arith.addf %125, %129 : vector<8x64xf32>
    %131 = vector.extract_strided_slice %100 {offsets = [40, 0], sizes = [8, 188], strides = [1, 1]} : vector<64x188xf32> to vector<8x188xf32>
    %c5_99 = arith.constant 5 : index
    %c0_100 = arith.constant 0 : index
    %c0_101 = arith.constant 0 : index
    %132 = vector.load %arg7[%c5_99, %c0_100, %c0_101] : memref<8x188x64xf32, #tpu.memory_space<vmem>>, vector<1x188x64xf32>
    %133 = vector.shape_cast %132 : vector<1x188x64xf32> to vector<188x64xf32>
    %cst_102 = arith.constant dense<0.000000e+00> : vector<8x64xf32>
    %134 = tpu.matmul %131, %133, %cst_102 {dimension_numbers = #tpu.dot_dimension_numbers<[1], [0], [0], [1], [0, 0, 1, 1], [], []>} : vector<8x188xf32>, vector<188x64xf32>, vector<8x64xf32> -> vector<8x64xf32>
    %135 = arith.addf %130, %134 : vector<8x64xf32>
    %136 = vector.extract_strided_slice %100 {offsets = [48, 0], sizes = [8, 188], strides = [1, 1]} : vector<64x188xf32> to vector<8x188xf32>
    %c6_103 = arith.constant 6 : index
    %c0_104 = arith.constant 0 : index
    %c0_105 = arith.constant 0 : index
    %137 = vector.load %arg7[%c6_103, %c0_104, %c0_105] : memref<8x188x64xf32, #tpu.memory_space<vmem>>, vector<1x188x64xf32>
    %138 = vector.shape_cast %137 : vector<1x188x64xf32> to vector<188x64xf32>
    %cst_106 = arith.constant dense<0.000000e+00> : vector<8x64xf32>
    %139 = tpu.matmul %136, %138, %cst_106 {dimension_numbers = #tpu.dot_dimension_numbers<[1], [0], [0], [1], [0, 0, 1, 1], [], []>} : vector<8x188xf32>, vector<188x64xf32>, vector<8x64xf32> -> vector<8x64xf32>
    %140 = arith.addf %135, %139 : vector<8x64xf32>
    %141 = vector.extract_strided_slice %100 {offsets = [56, 0], sizes = [8, 188], strides = [1, 1]} : vector<64x188xf32> to vector<8x188xf32>
    %c7_107 = arith.constant 7 : index
    %c0_108 = arith.constant 0 : index
    %c0_109 = arith.constant 0 : index
    %142 = vector.load %arg7[%c7_107, %c0_108, %c0_109] : memref<8x188x64xf32, #tpu.memory_space<vmem>>, vector<1x188x64xf32>
    %143 = vector.shape_cast %142 : vector<1x188x64xf32> to vector<188x64xf32>
    %cst_110 = arith.constant dense<0.000000e+00> : vector<8x64xf32>
    %144 = tpu.matmul %141, %143, %cst_110 {dimension_numbers = #tpu.dot_dimension_numbers<[1], [0], [0], [1], [0, 0, 1, 1], [], []>} : vector<8x188xf32>, vector<188x64xf32>, vector<8x64xf32> -> vector<8x64xf32>
    %145 = arith.addf %140, %144 : vector<8x64xf32>
    %cst_111 = arith.constant 0.000000e+00 : f32
    %146 = vector.broadcast %cst_111 : f32 to vector<8x64xf32>
    %147 = arith.maximumf %145, %146 : vector<8x64xf32>
    %c0_112 = arith.constant 0 : index
    %c0_113 = arith.constant 0 : index
    %148 = vector.load %arg10[%c0_112, %c0_113] : memref<64x32xf32, #tpu.memory_space<vmem>>, vector<64x32xf32>
    %cst_114 = arith.constant dense<0.000000e+00> : vector<8x32xf32>
    %149 = tpu.matmul %147, %148, %cst_114 {dimension_numbers = #tpu.dot_dimension_numbers<[1], [0], [0], [1], [0, 0, 1, 1], [], []>} : vector<8x64xf32>, vector<64x32xf32>, vector<8x32xf32> -> vector<8x32xf32>
    %c0_115 = arith.constant 0 : index
    %c0_116 = arith.constant 0 : index
    %150 = vector.load %arg11[%c0_115, %c0_116] : memref<1x32xf32, #tpu.memory_space<vmem>>, vector<1x32xf32>
    %151 = vector.broadcast %150 : vector<1x32xf32> to vector<8x32xf32>
    %152 = arith.addf %149, %151 : vector<8x32xf32>
    %cst_117 = arith.constant 0.000000e+00 : f32
    %153 = vector.broadcast %cst_117 : f32 to vector<8x32xf32>
    %154 = arith.maximumf %152, %153 : vector<8x32xf32>
    %c0_118 = arith.constant 0 : index
    %c0_119 = arith.constant 0 : index
    %155 = vector.load %arg12[%c0_118, %c0_119] : memref<32x32xf32, #tpu.memory_space<vmem>>, vector<32x32xf32>
    %cst_120 = arith.constant dense<0.000000e+00> : vector<8x32xf32>
    %156 = tpu.matmul %154, %155, %cst_120 {dimension_numbers = #tpu.dot_dimension_numbers<[1], [0], [0], [1], [0, 0, 1, 1], [], []>} : vector<8x32xf32>, vector<32x32xf32>, vector<8x32xf32> -> vector<8x32xf32>
    %c0_121 = arith.constant 0 : index
    %c0_122 = arith.constant 0 : index
    %157 = vector.load %arg13[%c0_121, %c0_122] : memref<1x32xf32, #tpu.memory_space<vmem>>, vector<1x32xf32>
    %158 = vector.broadcast %157 : vector<1x32xf32> to vector<8x32xf32>
    %159 = arith.addf %156, %158 : vector<8x32xf32>
    %160 = vector.extract_strided_slice %159 {offsets = [0, 0], sizes = [8, 16], strides = [1, 1]} : vector<8x32xf32> to vector<8x16xf32>
    %161 = vector.extract_strided_slice %159 {offsets = [0, 16], sizes = [8, 16], strides = [1, 1]} : vector<8x32xf32> to vector<8x16xf32>
    %cst_123 = arith.constant 5.000000e-01 : f32
    %162 = vector.broadcast %cst_123 : f32 to vector<8x16xf32>
    %163 = arith.mulf %162, %161 : vector<8x16xf32>
    %164 = math.exp %163 : vector<8x16xf32>
    %165 = arith.mulf %2, %164 : vector<8x16xf32>
    %166 = arith.addf %160, %165 : vector<8x16xf32>
    %c0_124 = arith.constant 0 : index
    %c0_125 = arith.constant 0 : index
    %167 = vector.load %arg14[%c0_124, %c0_125] : memref<16x32xf32, #tpu.memory_space<vmem>>, vector<16x32xf32>
    %cst_126 = arith.constant dense<0.000000e+00> : vector<8x32xf32>
    %168 = tpu.matmul %166, %167, %cst_126 {dimension_numbers = #tpu.dot_dimension_numbers<[1], [0], [0], [1], [0, 0, 1, 1], [], []>} : vector<8x16xf32>, vector<16x32xf32>, vector<8x32xf32> -> vector<8x32xf32>
    %c0_127 = arith.constant 0 : index
    %c0_128 = arith.constant 0 : index
    %169 = vector.load %arg15[%c0_127, %c0_128] : memref<1x32xf32, #tpu.memory_space<vmem>>, vector<1x32xf32>
    %170 = vector.broadcast %169 : vector<1x32xf32> to vector<8x32xf32>
    %171 = arith.addf %168, %170 : vector<8x32xf32>
    %cst_129 = arith.constant 0.000000e+00 : f32
    %172 = vector.broadcast %cst_129 : f32 to vector<8x32xf32>
    %173 = arith.maximumf %171, %172 : vector<8x32xf32>
    %c0_130 = arith.constant 0 : index
    %c0_131 = arith.constant 0 : index
    %174 = vector.load %arg16[%c0_130, %c0_131] : memref<32x64xf32, #tpu.memory_space<vmem>>, vector<32x64xf32>
    %cst_132 = arith.constant dense<0.000000e+00> : vector<8x64xf32>
    %175 = tpu.matmul %173, %174, %cst_132 {dimension_numbers = #tpu.dot_dimension_numbers<[1], [0], [0], [1], [0, 0, 1, 1], [], []>} : vector<8x32xf32>, vector<32x64xf32>, vector<8x64xf32> -> vector<8x64xf32>
    %c0_133 = arith.constant 0 : index
    %c0_134 = arith.constant 0 : index
    %176 = vector.load %arg17[%c0_133, %c0_134] : memref<1x64xf32, #tpu.memory_space<vmem>>, vector<1x64xf32>
    %177 = vector.broadcast %176 : vector<1x64xf32> to vector<8x64xf32>
    %178 = arith.addf %175, %177 : vector<8x64xf32>
    %cst_135 = arith.constant 0.000000e+00 : f32
    %179 = vector.broadcast %cst_135 : f32 to vector<8x64xf32>
    %180 = arith.maximumf %178, %179 : vector<8x64xf32>
    %c0_136 = arith.constant 0 : index
    %c0_137 = arith.constant 0 : index
    %181 = vector.load %arg18[%c0_136, %c0_137] : memref<64x12xf32, #tpu.memory_space<vmem>>, vector<64x12xf32>
    %cst_138 = arith.constant dense<0.000000e+00> : vector<8x12xf32>
    %182 = tpu.matmul %180, %181, %cst_138 {dimension_numbers = #tpu.dot_dimension_numbers<[1], [0], [0], [1], [0, 0, 1, 1], [], []>} : vector<8x64xf32>, vector<64x12xf32>, vector<8x12xf32> -> vector<8x12xf32>
    %c0_139 = arith.constant 0 : index
    %c0_140 = arith.constant 0 : index
    %183 = vector.load %arg19[%c0_139, %c0_140] : memref<1x12xf32, #tpu.memory_space<vmem>>, vector<1x12xf32>
    %184 = vector.broadcast %183 : vector<1x12xf32> to vector<8x12xf32>
    %185 = arith.addf %182, %184 : vector<8x12xf32>
    %c0_141 = arith.constant 0 : index
    %c0_142 = arith.constant 0 : index
    %c0_143 = arith.constant 0 : index
    %186 = vector.load %arg20[%c0_141, %c0_142, %c0_143] : memref<8x64x362xf32, #tpu.memory_space<vmem>>, vector<1x64x362xf32>
    %187 = vector.shape_cast %186 : vector<1x64x362xf32> to vector<64x362xf32>
    %cst_144 = arith.constant dense<0.000000e+00> : vector<8x362xf32>
    %188 = tpu.matmul %180, %187, %cst_144 {dimension_numbers = #tpu.dot_dimension_numbers<[1], [0], [0], [1], [0, 0, 1, 1], [], []>} : vector<8x64xf32>, vector<64x362xf32>, vector<8x362xf32> -> vector<8x362xf32>
    %c0_145 = arith.constant 0 : index
    %c0_146 = arith.constant 0 : index
    %c0_147 = arith.constant 0 : index
    %189 = vector.load %arg21[%c0_145, %c0_146, %c0_147] : memref<8x1x362xf32, #tpu.memory_space<vmem>>, vector<1x1x362xf32>
    %190 = vector.shape_cast %189 : vector<1x1x362xf32> to vector<1x362xf32>
    %191 = vector.broadcast %190 : vector<1x362xf32> to vector<8x362xf32>
    %192 = arith.addf %188, %191 : vector<8x362xf32>
    %c0_148 = arith.constant 0 : index
    %c0_149 = arith.constant 0 : index
    %193 = vector.load %arg28[%c0_148, %c0_149] : memref<64x362xf32, #tpu.memory_space<vmem>>, vector<8x362xf32>
    tpu.vector_store %arg28[%c0_148, %c0_149], %192 {strides = array<i32>} : memref<64x362xf32, #tpu.memory_space<vmem>>, vector<8x362xf32>,
    %c1_150 = arith.constant 1 : index
    %c0_151 = arith.constant 0 : index
    %c0_152 = arith.constant 0 : index
    %194 = vector.load %arg20[%c1_150, %c0_151, %c0_152] : memref<8x64x362xf32, #tpu.memory_space<vmem>>, vector<1x64x362xf32>
    %195 = vector.shape_cast %194 : vector<1x64x362xf32> to vector<64x362xf32>
    %cst_153 = arith.constant dense<0.000000e+00> : vector<8x362xf32>
    %196 = tpu.matmul %180, %195, %cst_153 {dimension_numbers = #tpu.dot_dimension_numbers<[1], [0], [0], [1], [0, 0, 1, 1], [], []>} : vector<8x64xf32>, vector<64x362xf32>, vector<8x362xf32> -> vector<8x362xf32>
    %c1_154 = arith.constant 1 : index
    %c0_155 = arith.constant 0 : index
    %c0_156 = arith.constant 0 : index
    %197 = vector.load %arg21[%c1_154, %c0_155, %c0_156] : memref<8x1x362xf32, #tpu.memory_space<vmem>>, vector<1x1x362xf32>
    %198 = vector.shape_cast %197 : vector<1x1x362xf32> to vector<1x362xf32>
    %199 = vector.broadcast %198 : vector<1x362xf32> to vector<8x362xf32>
    %200 = arith.addf %196, %199 : vector<8x362xf32>
    %c8_157 = arith.constant 8 : index
    %c0_158 = arith.constant 0 : index
    %201 = vector.load %arg28[%c8_157, %c0_158] : memref<64x362xf32, #tpu.memory_space<vmem>>, vector<8x362xf32>
    tpu.vector_store %arg28[%c8_157, %c0_158], %200 {strides = array<i32>} : memref<64x362xf32, #tpu.memory_space<vmem>>, vector<8x362xf32>,
    %c2_159 = arith.constant 2 : index
    %c0_160 = arith.constant 0 : index
    %c0_161 = arith.constant 0 : index
    %202 = vector.load %arg20[%c2_159, %c0_160, %c0_161] : memref<8x64x362xf32, #tpu.memory_space<vmem>>, vector<1x64x362xf32>
    %203 = vector.shape_cast %202 : vector<1x64x362xf32> to vector<64x362xf32>
    %cst_162 = arith.constant dense<0.000000e+00> : vector<8x362xf32>
    %204 = tpu.matmul %180, %203, %cst_162 {dimension_numbers = #tpu.dot_dimension_numbers<[1], [0], [0], [1], [0, 0, 1, 1], [], []>} : vector<8x64xf32>, vector<64x362xf32>, vector<8x362xf32> -> vector<8x362xf32>
    %c2_163 = arith.constant 2 : index
    %c0_164 = arith.constant 0 : index
    %c0_165 = arith.constant 0 : index
    %205 = vector.load %arg21[%c2_163, %c0_164, %c0_165] : memref<8x1x362xf32, #tpu.memory_space<vmem>>, vector<1x1x362xf32>
    %206 = vector.shape_cast %205 : vector<1x1x362xf32> to vector<1x362xf32>
    %207 = vector.broadcast %206 : vector<1x362xf32> to vector<8x362xf32>
    %208 = arith.addf %204, %207 : vector<8x362xf32>
    %c16 = arith.constant 16 : index
    %c0_166 = arith.constant 0 : index
    %209 = vector.load %arg28[%c16, %c0_166] : memref<64x362xf32, #tpu.memory_space<vmem>>, vector<8x362xf32>
    tpu.vector_store %arg28[%c16, %c0_166], %208 {strides = array<i32>} : memref<64x362xf32, #tpu.memory_space<vmem>>, vector<8x362xf32>,
    %c3_167 = arith.constant 3 : index
    %c0_168 = arith.constant 0 : index
    %c0_169 = arith.constant 0 : index
    %210 = vector.load %arg20[%c3_167, %c0_168, %c0_169] : memref<8x64x362xf32, #tpu.memory_space<vmem>>, vector<1x64x362xf32>
    %211 = vector.shape_cast %210 : vector<1x64x362xf32> to vector<64x362xf32>
    %cst_170 = arith.constant dense<0.000000e+00> : vector<8x362xf32>
    %212 = tpu.matmul %180, %211, %cst_170 {dimension_numbers = #tpu.dot_dimension_numbers<[1], [0], [0], [1], [0, 0, 1, 1], [], []>} : vector<8x64xf32>, vector<64x362xf32>, vector<8x362xf32> -> vector<8x362xf32>
    %c3_171 = arith.constant 3 : index
    %c0_172 = arith.constant 0 : index
    %c0_173 = arith.constant 0 : index
    %213 = vector.load %arg21[%c3_171, %c0_172, %c0_173] : memref<8x1x362xf32, #tpu.memory_space<vmem>>, vector<1x1x362xf32>
    %214 = vector.shape_cast %213 : vector<1x1x362xf32> to vector<1x362xf32>
    %215 = vector.broadcast %214 : vector<1x362xf32> to vector<8x362xf32>
    %216 = arith.addf %212, %215 : vector<8x362xf32>
    %c24 = arith.constant 24 : index
    %c0_174 = arith.constant 0 : index
    %217 = vector.load %arg28[%c24, %c0_174] : memref<64x362xf32, #tpu.memory_space<vmem>>, vector<8x362xf32>
    tpu.vector_store %arg28[%c24, %c0_174], %216 {strides = array<i32>} : memref<64x362xf32, #tpu.memory_space<vmem>>, vector<8x362xf32>,
    %c4_175 = arith.constant 4 : index
    %c0_176 = arith.constant 0 : index
    %c0_177 = arith.constant 0 : index
    %218 = vector.load %arg20[%c4_175, %c0_176, %c0_177] : memref<8x64x362xf32, #tpu.memory_space<vmem>>, vector<1x64x362xf32>
    %219 = vector.shape_cast %218 : vector<1x64x362xf32> to vector<64x362xf32>
    %cst_178 = arith.constant dense<0.000000e+00> : vector<8x362xf32>
    %220 = tpu.matmul %180, %219, %cst_178 {dimension_numbers = #tpu.dot_dimension_numbers<[1], [0], [0], [1], [0, 0, 1, 1], [], []>} : vector<8x64xf32>, vector<64x362xf32>, vector<8x362xf32> -> vector<8x362xf32>
    %c4_179 = arith.constant 4 : index
    %c0_180 = arith.constant 0 : index
    %c0_181 = arith.constant 0 : index
    %221 = vector.load %arg21[%c4_179, %c0_180, %c0_181] : memref<8x1x362xf32, #tpu.memory_space<vmem>>, vector<1x1x362xf32>
    %222 = vector.shape_cast %221 : vector<1x1x362xf32> to vector<1x362xf32>
    %223 = vector.broadcast %222 : vector<1x362xf32> to vector<8x362xf32>
    %224 = arith.addf %220, %223 : vector<8x362xf32>
    %c32 = arith.constant 32 : index
    %c0_182 = arith.constant 0 : index
    %225 = vector.load %arg28[%c32, %c0_182] : memref<64x362xf32, #tpu.memory_space<vmem>>, vector<8x362xf32>
    tpu.vector_store %arg28[%c32, %c0_182], %224 {strides = array<i32>} : memref<64x362xf32, #tpu.memory_space<vmem>>, vector<8x362xf32>,
    %c5_183 = arith.constant 5 : index
    %c0_184 = arith.constant 0 : index
    %c0_185 = arith.constant 0 : index
    %226 = vector.load %arg20[%c5_183, %c0_184, %c0_185] : memref<8x64x362xf32, #tpu.memory_space<vmem>>, vector<1x64x362xf32>
    %227 = vector.shape_cast %226 : vector<1x64x362xf32> to vector<64x362xf32>
    %cst_186 = arith.constant dense<0.000000e+00> : vector<8x362xf32>
    %228 = tpu.matmul %180, %227, %cst_186 {dimension_numbers = #tpu.dot_dimension_numbers<[1], [0], [0], [1], [0, 0, 1, 1], [], []>} : vector<8x64xf32>, vector<64x362xf32>, vector<8x362xf32> -> vector<8x362xf32>
    %c5_187 = arith.constant 5 : index
    %c0_188 = arith.constant 0 : index
    %c0_189 = arith.constant 0 : index
    %229 = vector.load %arg21[%c5_187, %c0_188, %c0_189] : memref<8x1x362xf32, #tpu.memory_space<vmem>>, vector<1x1x362xf32>
    %230 = vector.shape_cast %229 : vector<1x1x362xf32> to vector<1x362xf32>
    %231 = vector.broadcast %230 : vector<1x362xf32> to vector<8x362xf32>
    %232 = arith.addf %228, %231 : vector<8x362xf32>
    %c40 = arith.constant 40 : index
    %c0_190 = arith.constant 0 : index
    %233 = vector.load %arg28[%c40, %c0_190] : memref<64x362xf32, #tpu.memory_space<vmem>>, vector<8x362xf32>
    tpu.vector_store %arg28[%c40, %c0_190], %232 {strides = array<i32>} : memref<64x362xf32, #tpu.memory_space<vmem>>, vector<8x362xf32>,
    %c6_191 = arith.constant 6 : index
    %c0_192 = arith.constant 0 : index
    %c0_193 = arith.constant 0 : index
    %234 = vector.load %arg20[%c6_191, %c0_192, %c0_193] : memref<8x64x362xf32, #tpu.memory_space<vmem>>, vector<1x64x362xf32>
    %235 = vector.shape_cast %234 : vector<1x64x362xf32> to vector<64x362xf32>
    %cst_194 = arith.constant dense<0.000000e+00> : vector<8x362xf32>
    %236 = tpu.matmul %180, %235, %cst_194 {dimension_numbers = #tpu.dot_dimension_numbers<[1], [0], [0], [1], [0, 0, 1, 1], [], []>} : vector<8x64xf32>, vector<64x362xf32>, vector<8x362xf32> -> vector<8x362xf32>
    %c6_195 = arith.constant 6 : index
    %c0_196 = arith.constant 0 : index
    %c0_197 = arith.constant 0 : index
    %237 = vector.load %arg21[%c6_195, %c0_196, %c0_197] : memref<8x1x362xf32, #tpu.memory_space<vmem>>, vector<1x1x362xf32>
    %238 = vector.shape_cast %237 : vector<1x1x362xf32> to vector<1x362xf32>
    %239 = vector.broadcast %238 : vector<1x362xf32> to vector<8x362xf32>
    %240 = arith.addf %236, %239 : vector<8x362xf32>
    %c48 = arith.constant 48 : index
    %c0_198 = arith.constant 0 : index
    %241 = vector.load %arg28[%c48, %c0_198] : memref<64x362xf32, #tpu.memory_space<vmem>>, vector<8x362xf32>
    tpu.vector_store %arg28[%c48, %c0_198], %240 {strides = array<i32>} : memref<64x362xf32, #tpu.memory_space<vmem>>, vector<8x362xf32>,
    %c7_199 = arith.constant 7 : index
    %c0_200 = arith.constant 0 : index
    %c0_201 = arith.constant 0 : index
    %242 = vector.load %arg20[%c7_199, %c0_200, %c0_201] : memref<8x64x362xf32, #tpu.memory_space<vmem>>, vector<1x64x362xf32>
    %243 = vector.shape_cast %242 : vector<1x64x362xf32> to vector<64x362xf32>
    %cst_202 = arith.constant dense<0.000000e+00> : vector<8x362xf32>
    %244 = tpu.matmul %180, %243, %cst_202 {dimension_numbers = #tpu.dot_dimension_numbers<[1], [0], [0], [1], [0, 0, 1, 1], [], []>} : vector<8x64xf32>, vector<64x362xf32>, vector<8x362xf32> -> vector<8x362xf32>
    %c7_203 = arith.constant 7 : index
    %c0_204 = arith.constant 0 : index
    %c0_205 = arith.constant 0 : index
    %245 = vector.load %arg21[%c7_203, %c0_204, %c0_205] : memref<8x1x362xf32, #tpu.memory_space<vmem>>, vector<1x1x362xf32>
    %246 = vector.shape_cast %245 : vector<1x1x362xf32> to vector<1x362xf32>
    %247 = vector.broadcast %246 : vector<1x362xf32> to vector<8x362xf32>
    %248 = arith.addf %244, %247 : vector<8x362xf32>
    %c56 = arith.constant 56 : index
    %c0_206 = arith.constant 0 : index
    %249 = vector.load %arg28[%c56, %c0_206] : memref<64x362xf32, #tpu.memory_space<vmem>>, vector<8x362xf32>
    tpu.vector_store %arg28[%c56, %c0_206], %248 {strides = array<i32>} : memref<64x362xf32, #tpu.memory_space<vmem>>, vector<8x362xf32>,
    %c0_207 = arith.constant 0 : index
    %c0_208 = arith.constant 0 : index
    %250 = vector.load %arg28[%c0_207, %c0_208] : memref<64x362xf32, #tpu.memory_space<vmem>>, vector<64x324xf32>
    %c0_209 = arith.constant 0 : index
    %c0_210 = arith.constant 0 : index
    %c0_211 = arith.constant 0 : index
    %251 = vector.load %arg22[%c0_209, %c0_210, %c0_211] : memref<9x32x64xf32, #tpu.memory_space<vmem>>, vector<1x32x64xf32>
    %252 = vector.shape_cast %251 : vector<1x32x64xf32> to vector<32x64xf32>
    %cst_212 = arith.constant dense<0.000000e+00> : vector<32x324xf32>
    %253 = tpu.matmul %252, %250, %cst_212 {dimension_numbers = #tpu.dot_dimension_numbers<[1], [0], [0], [1], [0, 0, 1, 1], [], []>} : vector<32x64xf32>, vector<64x324xf32>, vector<32x324xf32> -> vector<32x324xf32>
    %c0_213 = arith.constant 0 : index
    %c1_214 = arith.constant 1 : index
    %254 = vector.load %arg28[%c0_213, %c1_214] : memref<64x362xf32, #tpu.memory_space<vmem>>, vector<64x324xf32>
    %c1_215 = arith.constant 1 : index
    %c0_216 = arith.constant 0 : index
    %c0_217 = arith.constant 0 : index
    %255 = vector.load %arg22[%c1_215, %c0_216, %c0_217] : memref<9x32x64xf32, #tpu.memory_space<vmem>>, vector<1x32x64xf32>
    %256 = vector.shape_cast %255 : vector<1x32x64xf32> to vector<32x64xf32>
    %cst_218 = arith.constant dense<0.000000e+00> : vector<32x324xf32>
    %257 = tpu.matmul %256, %254, %cst_218 {dimension_numbers = #tpu.dot_dimension_numbers<[1], [0], [0], [1], [0, 0, 1, 1], [], []>} : vector<32x64xf32>, vector<64x324xf32>, vector<32x324xf32> -> vector<32x324xf32>
    %258 = arith.addf %253, %257 : vector<32x324xf32>
    %c0_219 = arith.constant 0 : index
    %c2_220 = arith.constant 2 : index
    %259 = vector.load %arg28[%c0_219, %c2_220] : memref<64x362xf32, #tpu.memory_space<vmem>>, vector<64x324xf32>
    %c2_221 = arith.constant 2 : index
    %c0_222 = arith.constant 0 : index
    %c0_223 = arith.constant 0 : index
    %260 = vector.load %arg22[%c2_221, %c0_222, %c0_223] : memref<9x32x64xf32, #tpu.memory_space<vmem>>, vector<1x32x64xf32>
    %261 = vector.shape_cast %260 : vector<1x32x64xf32> to vector<32x64xf32>
    %cst_224 = arith.constant dense<0.000000e+00> : vector<32x324xf32>
    %262 = tpu.matmul %261, %259, %cst_224 {dimension_numbers = #tpu.dot_dimension_numbers<[1], [0], [0], [1], [0, 0, 1, 1], [], []>} : vector<32x64xf32>, vector<64x324xf32>, vector<32x324xf32> -> vector<32x324xf32>
    %263 = arith.addf %258, %262 : vector<32x324xf32>
    %c0_225 = arith.constant 0 : index
    %c18 = arith.constant 18 : index
    %264 = vector.load %arg28[%c0_225, %c18] : memref<64x362xf32, #tpu.memory_space<vmem>>, vector<64x324xf32>
    %c3_226 = arith.constant 3 : index
    %c0_227 = arith.constant 0 : index
    %c0_228 = arith.constant 0 : index
    %265 = vector.load %arg22[%c3_226, %c0_227, %c0_228] : memref<9x32x64xf32, #tpu.memory_space<vmem>>, vector<1x32x64xf32>
    %266 = vector.shape_cast %265 : vector<1x32x64xf32> to vector<32x64xf32>
    %cst_229 = arith.constant dense<0.000000e+00> : vector<32x324xf32>
    %267 = tpu.matmul %266, %264, %cst_229 {dimension_numbers = #tpu.dot_dimension_numbers<[1], [0], [0], [1], [0, 0, 1, 1], [], []>} : vector<32x64xf32>, vector<64x324xf32>, vector<32x324xf32> -> vector<32x324xf32>
    %268 = arith.addf %263, %267 : vector<32x324xf32>
    %c0_230 = arith.constant 0 : index
    %c19 = arith.constant 19 : index
    %269 = vector.load %arg28[%c0_230, %c19] : memref<64x362xf32, #tpu.memory_space<vmem>>, vector<64x324xf32>
    %c4_231 = arith.constant 4 : index
    %c0_232 = arith.constant 0 : index
    %c0_233 = arith.constant 0 : index
    %270 = vector.load %arg22[%c4_231, %c0_232, %c0_233] : memref<9x32x64xf32, #tpu.memory_space<vmem>>, vector<1x32x64xf32>
    %271 = vector.shape_cast %270 : vector<1x32x64xf32> to vector<32x64xf32>
    %cst_234 = arith.constant dense<0.000000e+00> : vector<32x324xf32>
    %272 = tpu.matmul %271, %269, %cst_234 {dimension_numbers = #tpu.dot_dimension_numbers<[1], [0], [0], [1], [0, 0, 1, 1], [], []>} : vector<32x64xf32>, vector<64x324xf32>, vector<32x324xf32> -> vector<32x324xf32>
    %273 = arith.addf %268, %272 : vector<32x324xf32>
    %c0_235 = arith.constant 0 : index
    %c20 = arith.constant 20 : index
    %274 = vector.load %arg28[%c0_235, %c20] : memref<64x362xf32, #tpu.memory_space<vmem>>, vector<64x324xf32>
    %c5_236 = arith.constant 5 : index
    %c0_237 = arith.constant 0 : index
    %c0_238 = arith.constant 0 : index
    %275 = vector.load %arg22[%c5_236, %c0_237, %c0_238] : memref<9x32x64xf32, #tpu.memory_space<vmem>>, vector<1x32x64xf32>
    %276 = vector.shape_cast %275 : vector<1x32x64xf32> to vector<32x64xf32>
    %cst_239 = arith.constant dense<0.000000e+00> : vector<32x324xf32>
    %277 = tpu.matmul %276, %274, %cst_239 {dimension_numbers = #tpu.dot_dimension_numbers<[1], [0], [0], [1], [0, 0, 1, 1], [], []>} : vector<32x64xf32>, vector<64x324xf32>, vector<32x324xf32> -> vector<32x324xf32>
    %278 = arith.addf %273, %277 : vector<32x324xf32>
    %c0_240 = arith.constant 0 : index
    %c36 = arith.constant 36 : index
    %279 = vector.load %arg28[%c0_240, %c36] : memref<64x362xf32, #tpu.memory_space<vmem>>, vector<64x324xf32>
    %c6_241 = arith.constant 6 : index
    %c0_242 = arith.constant 0 : index
    %c0_243 = arith.constant 0 : index
    %280 = vector.load %arg22[%c6_241, %c0_242, %c0_243] : memref<9x32x64xf32, #tpu.memory_space<vmem>>, vector<1x32x64xf32>
    %281 = vector.shape_cast %280 : vector<1x32x64xf32> to vector<32x64xf32>
    %cst_244 = arith.constant dense<0.000000e+00> : vector<32x324xf32>
    %282 = tpu.matmul %281, %279, %cst_244 {dimension_numbers = #tpu.dot_dimension_numbers<[1], [0], [0], [1], [0, 0, 1, 1], [], []>} : vector<32x64xf32>, vector<64x324xf32>, vector<32x324xf32> -> vector<32x324xf32>
    %283 = arith.addf %278, %282 : vector<32x324xf32>
    %c0_245 = arith.constant 0 : index
    %c37 = arith.constant 37 : index
    %284 = vector.load %arg28[%c0_245, %c37] : memref<64x362xf32, #tpu.memory_space<vmem>>, vector<64x324xf32>
    %c7_246 = arith.constant 7 : index
    %c0_247 = arith.constant 0 : index
    %c0_248 = arith.constant 0 : index
    %285 = vector.load %arg22[%c7_246, %c0_247, %c0_248] : memref<9x32x64xf32, #tpu.memory_space<vmem>>, vector<1x32x64xf32>
    %286 = vector.shape_cast %285 : vector<1x32x64xf32> to vector<32x64xf32>
    %cst_249 = arith.constant dense<0.000000e+00> : vector<32x324xf32>
    %287 = tpu.matmul %286, %284, %cst_249 {dimension_numbers = #tpu.dot_dimension_numbers<[1], [0], [0], [1], [0, 0, 1, 1], [], []>} : vector<32x64xf32>, vector<64x324xf32>, vector<32x324xf32> -> vector<32x324xf32>
    %288 = arith.addf %283, %287 : vector<32x324xf32>
    %c0_250 = arith.constant 0 : index
    %c38 = arith.constant 38 : index
    %289 = vector.load %arg28[%c0_250, %c38] : memref<64x362xf32, #tpu.memory_space<vmem>>, vector<64x324xf32>
    %c8_251 = arith.constant 8 : index
    %c0_252 = arith.constant 0 : index
    %c0_253 = arith.constant 0 : index
    %290 = vector.load %arg22[%c8_251, %c0_252, %c0_253] : memref<9x32x64xf32, #tpu.memory_space<vmem>>, vector<1x32x64xf32>
    %291 = vector.shape_cast %290 : vector<1x32x64xf32> to vector<32x64xf32>
    %cst_254 = arith.constant dense<0.000000e+00> : vector<32x324xf32>
    %292 = tpu.matmul %291, %289, %cst_254 {dimension_numbers = #tpu.dot_dimension_numbers<[1], [0], [0], [1], [0, 0, 1, 1], [], []>} : vector<32x64xf32>, vector<64x324xf32>, vector<32x324xf32> -> vector<32x324xf32>
    %293 = arith.addf %288, %292 : vector<32x324xf32>
    %c0_255 = arith.constant 0 : index
    %c0_256 = arith.constant 0 : index
    %294 = vector.load %arg23[%c0_255, %c0_256] : memref<32x1xf32, #tpu.memory_space<vmem>>, vector<32x1xf32>
    %295 = vector.broadcast %294 : vector<32x1xf32> to vector<32x324xf32>
    %296 = arith.addf %293, %295 : vector<32x324xf32>
    %cst_257 = arith.constant 0.000000e+00 : f32
    %297 = vector.broadcast %cst_257 : f32 to vector<32x324xf32>
    %298 = arith.maximumf %296, %297 : vector<32x324xf32>
    %c0_258 = arith.constant 0 : index
    %c0_259 = arith.constant 0 : index
    %299 = vector.load %arg24[%c0_258, %c0_259] : memref<1x324xf32, #tpu.memory_space<vmem>>, vector<1x324xf32>
    %300 = vector.broadcast %299 : vector<1x324xf32> to vector<32x324xf32>
    %301 = arith.mulf %298, %300 : vector<32x324xf32>
    %302 = vector.extract_strided_slice %301 {offsets = [0, 0], sizes = [32, 286], strides = [1, 1]} : vector<32x324xf32> to vector<32x286xf32>
    %c0_260 = arith.constant 0 : index
    %c0_261 = arith.constant 0 : index
    %c0_262 = arith.constant 0 : index
    %303 = vector.load %arg25[%c0_260, %c0_261, %c0_262] : memref<9x8x32xf32, #tpu.memory_space<vmem>>, vector<1x8x32xf32>
    %304 = vector.shape_cast %303 : vector<1x8x32xf32> to vector<8x32xf32>
    %cst_263 = arith.constant dense<0.000000e+00> : vector<8x286xf32>
    %305 = tpu.matmul %304, %302, %cst_263 {dimension_numbers = #tpu.dot_dimension_numbers<[1], [0], [0], [1], [0, 0, 1, 1], [], []>} : vector<8x32xf32>, vector<32x286xf32>, vector<8x286xf32> -> vector<8x286xf32>
    %306 = vector.extract_strided_slice %301 {offsets = [0, 1], sizes = [32, 286], strides = [1, 1]} : vector<32x324xf32> to vector<32x286xf32>
    %c1_264 = arith.constant 1 : index
    %c0_265 = arith.constant 0 : index
    %c0_266 = arith.constant 0 : index
    %307 = vector.load %arg25[%c1_264, %c0_265, %c0_266] : memref<9x8x32xf32, #tpu.memory_space<vmem>>, vector<1x8x32xf32>
    %308 = vector.shape_cast %307 : vector<1x8x32xf32> to vector<8x32xf32>
    %cst_267 = arith.constant dense<0.000000e+00> : vector<8x286xf32>
    %309 = tpu.matmul %308, %306, %cst_267 {dimension_numbers = #tpu.dot_dimension_numbers<[1], [0], [0], [1], [0, 0, 1, 1], [], []>} : vector<8x32xf32>, vector<32x286xf32>, vector<8x286xf32> -> vector<8x286xf32>
    %310 = arith.addf %305, %309 : vector<8x286xf32>
    %311 = vector.extract_strided_slice %301 {offsets = [0, 2], sizes = [32, 286], strides = [1, 1]} : vector<32x324xf32> to vector<32x286xf32>
    %c2_268 = arith.constant 2 : index
    %c0_269 = arith.constant 0 : index
    %c0_270 = arith.constant 0 : index
    %312 = vector.load %arg25[%c2_268, %c0_269, %c0_270] : memref<9x8x32xf32, #tpu.memory_space<vmem>>, vector<1x8x32xf32>
    %313 = vector.shape_cast %312 : vector<1x8x32xf32> to vector<8x32xf32>
    %cst_271 = arith.constant dense<0.000000e+00> : vector<8x286xf32>
    %314 = tpu.matmul %313, %311, %cst_271 {dimension_numbers = #tpu.dot_dimension_numbers<[1], [0], [0], [1], [0, 0, 1, 1], [], []>} : vector<8x32xf32>, vector<32x286xf32>, vector<8x286xf32> -> vector<8x286xf32>
    %315 = arith.addf %310, %314 : vector<8x286xf32>
    %316 = vector.extract_strided_slice %301 {offsets = [0, 18], sizes = [32, 286], strides = [1, 1]} : vector<32x324xf32> to vector<32x286xf32>
    %c3_272 = arith.constant 3 : index
    %c0_273 = arith.constant 0 : index
    %c0_274 = arith.constant 0 : index
    %317 = vector.load %arg25[%c3_272, %c0_273, %c0_274] : memref<9x8x32xf32, #tpu.memory_space<vmem>>, vector<1x8x32xf32>
    %318 = vector.shape_cast %317 : vector<1x8x32xf32> to vector<8x32xf32>
    %cst_275 = arith.constant dense<0.000000e+00> : vector<8x286xf32>
    %319 = tpu.matmul %318, %316, %cst_275 {dimension_numbers = #tpu.dot_dimension_numbers<[1], [0], [0], [1], [0, 0, 1, 1], [], []>} : vector<8x32xf32>, vector<32x286xf32>, vector<8x286xf32> -> vector<8x286xf32>
    %320 = arith.addf %315, %319 : vector<8x286xf32>
    %321 = vector.extract_strided_slice %301 {offsets = [0, 19], sizes = [32, 286], strides = [1, 1]} : vector<32x324xf32> to vector<32x286xf32>
    %c4_276 = arith.constant 4 : index
    %c0_277 = arith.constant 0 : index
    %c0_278 = arith.constant 0 : index
    %322 = vector.load %arg25[%c4_276, %c0_277, %c0_278] : memref<9x8x32xf32, #tpu.memory_space<vmem>>, vector<1x8x32xf32>
    %323 = vector.shape_cast %322 : vector<1x8x32xf32> to vector<8x32xf32>
    %cst_279 = arith.constant dense<0.000000e+00> : vector<8x286xf32>
    %324 = tpu.matmul %323, %321, %cst_279 {dimension_numbers = #tpu.dot_dimension_numbers<[1], [0], [0], [1], [0, 0, 1, 1], [], []>} : vector<8x32xf32>, vector<32x286xf32>, vector<8x286xf32> -> vector<8x286xf32>
    %325 = arith.addf %320, %324 : vector<8x286xf32>
    %326 = vector.extract_strided_slice %301 {offsets = [0, 20], sizes = [32, 286], strides = [1, 1]} : vector<32x324xf32> to vector<32x286xf32>
    %c5_280 = arith.constant 5 : index
    %c0_281 = arith.constant 0 : index
    %c0_282 = arith.constant 0 : index
    %327 = vector.load %arg25[%c5_280, %c0_281, %c0_282] : memref<9x8x32xf32, #tpu.memory_space<vmem>>, vector<1x8x32xf32>
    %328 = vector.shape_cast %327 : vector<1x8x32xf32> to vector<8x32xf32>
    %cst_283 = arith.constant dense<0.000000e+00> : vector<8x286xf32>
    %329 = tpu.matmul %328, %326, %cst_283 {dimension_numbers = #tpu.dot_dimension_numbers<[1], [0], [0], [1], [0, 0, 1, 1], [], []>} : vector<8x32xf32>, vector<32x286xf32>, vector<8x286xf32> -> vector<8x286xf32>
    %330 = arith.addf %325, %329 : vector<8x286xf32>
    %331 = vector.extract_strided_slice %301 {offsets = [0, 36], sizes = [32, 286], strides = [1, 1]} : vector<32x324xf32> to vector<32x286xf32>
    %c6_284 = arith.constant 6 : index
    %c0_285 = arith.constant 0 : index
    %c0_286 = arith.constant 0 : index
    %332 = vector.load %arg25[%c6_284, %c0_285, %c0_286] : memref<9x8x32xf32, #tpu.memory_space<vmem>>, vector<1x8x32xf32>
    %333 = vector.shape_cast %332 : vector<1x8x32xf32> to vector<8x32xf32>
    %cst_287 = arith.constant dense<0.000000e+00> : vector<8x286xf32>
    %334 = tpu.matmul %333, %331, %cst_287 {dimension_numbers = #tpu.dot_dimension_numbers<[1], [0], [0], [1], [0, 0, 1, 1], [], []>} : vector<8x32xf32>, vector<32x286xf32>, vector<8x286xf32> -> vector<8x286xf32>
    %335 = arith.addf %330, %334 : vector<8x286xf32>
    %336 = vector.extract_strided_slice %301 {offsets = [0, 37], sizes = [32, 286], strides = [1, 1]} : vector<32x324xf32> to vector<32x286xf32>
    %c7_288 = arith.constant 7 : index
    %c0_289 = arith.constant 0 : index
    %c0_290 = arith.constant 0 : index
    %337 = vector.load %arg25[%c7_288, %c0_289, %c0_290] : memref<9x8x32xf32, #tpu.memory_space<vmem>>, vector<1x8x32xf32>
    %338 = vector.shape_cast %337 : vector<1x8x32xf32> to vector<8x32xf32>
    %cst_291 = arith.constant dense<0.000000e+00> : vector<8x286xf32>
    %339 = tpu.matmul %338, %336, %cst_291 {dimension_numbers = #tpu.dot_dimension_numbers<[1], [0], [0], [1], [0, 0, 1, 1], [], []>} : vector<8x32xf32>, vector<32x286xf32>, vector<8x286xf32> -> vector<8x286xf32>
    %340 = arith.addf %335, %339 : vector<8x286xf32>
    %341 = vector.extract_strided_slice %301 {offsets = [0, 38], sizes = [32, 286], strides = [1, 1]} : vector<32x324xf32> to vector<32x286xf32>
    %c8_292 = arith.constant 8 : index
    %c0_293 = arith.constant 0 : index
    %c0_294 = arith.constant 0 : index
    %342 = vector.load %arg25[%c8_292, %c0_293, %c0_294] : memref<9x8x32xf32, #tpu.memory_space<vmem>>, vector<1x8x32xf32>
    %343 = vector.shape_cast %342 : vector<1x8x32xf32> to vector<8x32xf32>
    %cst_295 = arith.constant dense<0.000000e+00> : vector<8x286xf32>
    %344 = tpu.matmul %343, %341, %cst_295 {dimension_numbers = #tpu.dot_dimension_numbers<[1], [0], [0], [1], [0, 0, 1, 1], [], []>} : vector<8x32xf32>, vector<32x286xf32>, vector<8x286xf32> -> vector<8x286xf32>
    %345 = arith.addf %340, %344 : vector<8x286xf32>
    %c0_296 = arith.constant 0 : index
    %c0_297 = arith.constant 0 : index
    %346 = vector.load %arg26[%c0_296, %c0_297] : memref<8x1xf32, #tpu.memory_space<vmem>>, vector<8x1xf32>
    %347 = vector.broadcast %346 : vector<8x1xf32> to vector<8x286xf32>
    %348 = arith.addf %345, %347 : vector<8x286xf32>
    %c0_298 = arith.constant 0 : index
    %c0_299 = arith.constant 0 : index
    %349 = vector.load %arg27[%c0_298, %c0_299] : memref<8x346xf32, #tpu.memory_space<vmem>>, vector<8x32xf32>
    tpu.vector_store %arg27[%c0_298, %c0_299], %159 {strides = array<i32>} : memref<8x346xf32, #tpu.memory_space<vmem>>, vector<8x32xf32>,
    %c0_300 = arith.constant 0 : index
    %c32_301 = arith.constant 32 : index
    %350 = vector.load %arg27[%c0_300, %c32_301] : memref<8x346xf32, #tpu.memory_space<vmem>>, vector<8x16xf32>
    tpu.vector_store %arg27[%c0_300, %c32_301], %166 {strides = array<i32>} : memref<8x346xf32, #tpu.memory_space<vmem>>, vector<8x16xf32>,
    %c0_302 = arith.constant 0 : index
    %c48_303 = arith.constant 48 : index
    %351 = vector.load %arg27[%c0_302, %c48_303] : memref<8x346xf32, #tpu.memory_space<vmem>>, vector<8x12xf32>
    tpu.vector_store %arg27[%c0_302, %c48_303], %185 {strides = array<i32>} : memref<8x346xf32, #tpu.memory_space<vmem>>, vector<8x12xf32>,
    %c0_304 = arith.constant 0 : index
    %c60 = arith.constant 60 : index
    %352 = vector.load %arg27[%c0_304, %c60] : memref<8x346xf32, #tpu.memory_space<vmem>>, vector<8x286xf32>
    tpu.vector_store %arg27[%c0_304, %c60], %348 {strides = array<i32>} : memref<8x346xf32, #tpu.memory_space<vmem>>, vector<8x286xf32>,
    return
  }
}

</mosaic_0001>

<bundles_post_ra>
// kernel: forward.1
= control target key start
LH: loop header
LB: loop body
LE: loop exit
PB: predicated region body
PF: predicated region fallthrough
CT: control target
= control target key end

     0   :  { %s15847_s0 = inlined_call_operand.vmem [shape: f32[8,256], index: 0, kind: input, shape index: {}]   ;;  %s15848_s1 = inlined_call_operand.vmem [shape: f32[8,12], index: 1, kind: input, shape index: {}]   ;;  %s15849_s2 = inlined_call_operand.vmem [shape: f32[8,16], index: 2, kind: input, shape index: {}]   ;;  %s15850_s3 = inlined_call_operand.hbm [shape: f32[9,32,8], index: 3, kind: input, shape index: {}]   ;;  %s15851_s4 = inlined_call_operand.hbm [shape: f32[32,1], index: 4, kind: input, shape index: {}]   ;;  %s15852_s5 = inlined_call_operand.hbm [shape: f32[9,64,32], index: 5, kind: input, shape index: {}]   ;;  %s15853_s6 = inlined_call_operand.hbm [shape: f32[64,1], index: 6, kind: input, shape index: {}]   ;;  %s15854_s7 = inlined_call_operand.hbm [shape: f32[8,188,64], index: 7, kind: input, shape index: {}]   ;;  %s15855_s8 = inlined_call_operand.hbm [shape: f32[12,64], index: 8, kind: input, shape index: {}]   ;;  %s15856_s9 = inlined_call_operand.hbm [shape: f32[1,64], index: 9, kind: input, shape index: {}]   ;;  %s15857_s10 = inlined_call_operand.hbm [shape: f32[64,32], index: 10, kind: input, shape index: {}]   ;;  %s15858_s11 = inlined_call_operand.hbm [shape: f32[1,32], index: 11, kind: input, shape index: {}]   ;;  %s15859_s12 = inlined_call_operand.hbm [shape: f32[32,32], index: 12, kind: input, shape index: {}]   ;;  %s15860_s13 = inlined_call_operand.hbm [shape: f32[1,32], index: 13, kind: input, shape index: {}]   ;;  %s15861_s14 = inlined_call_operand.hbm [shape: f32[16,32], index: 14, kind: input, shape index: {}]   ;;  %s15862_s15 = inlined_call_operand.hbm [shape: f32[1,32], index: 15, kind: input, shape index: {}]   ;;  %s15863_s16 = inlined_call_operand.hbm [shape: f32[32,64], index: 16, kind: input, shape index: {}]   ;;  %s15864_s17 = inlined_call_operand.vmem [shape: f32[1,64], index: 17, kind: input, shape index: {}]   ;;  %s15865_s18 = inlined_call_operand.vmem [shape: f32[64,12], index: 18, kind: input, shape index: {}]   ;;  %s15866_s19 = inlined_call_operand.vmem [shape: f32[1,12], index: 19, kind: input, shape index: {}]   ;;  %s15867_s20 = inlined_call_operand.hbm [shape: f32[8,64,362], index: 20, kind: input, shape index: {}]   ;;  %s15868_s21 = inlined_call_operand.hbm [shape: f32[8,1,362], index: 21, kind: input, shape index: {}]   ;;  %s15869_s22 = inlined_call_operand.hbm [shape: f32[9,32,64], index: 22, kind: input, shape index: {}]   ;;  %s15870_s23 = inlined_call_operand.hbm [shape: f32[32,1], index: 23, kind: input, shape index: {}]   ;;  %s15871_s24 = inlined_call_operand.hbm [shape: f32[1,324], index: 24, kind: input, shape index: {}]   ;;  %s15872_s25 = inlined_call_operand.vmem [shape: f32[9,8,32], index: 25, kind: input, shape index: {}]   ;;  %s15873_s26 = inlined_call_operand.vmem [shape: f32[8,1], index: 26, kind: input, shape index: {}]   ;;  %s15874_s27 = inlined_call_operand.vmem [shape: f32[8,346], index: 27, kind: output, shape index: {}]  }
   0x1   :  { %15947 = sst [smem:[#allocation136_spill]] %s15847_s0 }
   0x2   :  { %15948 = sst [smem:[#allocation137_spill]] %s15848_s1 }
   0x3   :  { %15949 = sst [smem:[#allocation138_spill]] %s15849_s2 }
   0x4   :  { %15950 = sst [smem:[#allocation139_spill]] %s15850_s3 }
   0x5   :  { %15951 = sst [smem:[#allocation140_spill]] %s15851_s4 }
   0x6   :  { %15952 = sst [smem:[#allocation141_spill]] %s15852_s5 }
   0x7   :  { %15953 = sst [smem:[#allocation142_spill]] %s15853_s6 }
   0x8   :  { %15954 = sst [smem:[#allocation143_spill]] %s15854_s7 }
   0x9   :  { %15955 = sst [smem:[#allocation144_spill]] %s15855_s8 }
   0xa   :  { %15956 = sst [smem:[#allocation145_spill]] %s15856_s9 }
   0xb   :  { %15957 = sst [smem:[#allocation146_spill]] %s15857_s10 }
   0xc   :  { %15958 = sst [smem:[#allocation147_spill]] %s15858_s11 }
   0xd   :  { %32 = vsyncpa [#allocation4], 0 }
   0xe   :  { %33 = vsyncpa [#allocation6], 0 }
   0xf   :  { %34 = vsyncpa [#allocation9], 0 }
  0x10   :  { %35 = vsyncpa [#allocation12], 0 }
  0x11   :  { %36 = vsyncpa [#allocation15], 0 }
  0x12   :  { %37 = vsyncpa [#allocation18], 0 }
  0x13   :  { %38 = vsyncpa [#allocation21], 0 }
  0x14   :  { %39 = vsyncpa [#allocation24], 0 }
  0x15   :  { %40 = vsyncpa [#allocation27], 0 }
  0x16   :  { %41 = vsyncpa [#allocation30], 0  ;;  %s11903_s7 = smov [#allocation5]   ;;  %s11904_s8 = smov [#allocation8]  }
  0x17   :  { %s65_s4 = sshll.u32 %s11903_s7, 4  ;;  %s89_s30 = sshll.u32 %s11904_s8, 4  ;;  %s66_s4 = int_to_ptr.vmem [resolvable:$true] %s65_s4  ;;  %s90_s30 = int_to_ptr.vmem [resolvable:$true] %s89_s30 }
  0x18   :  { %s11511_s9 = scalar_lea.vmem %s66_s4, 512  ;;  %p11516_p1 = scmp.lt.s32.totalorder %s66_s4, %s66_s4 }
  0x19   :  { %p11512_p0 = scmp.ne.s32.totalorder %s66_s4, %s11511_s9  ;;  %p11517_p2 = scmp.lt.s32.totalorder %s11511_s9, %s11511_s9 }
  0x1b   :  { %p11518_p3 = por %p11517_p2, %p11516_p1 }
  0x1d   :  { %p11519_p4 = pnand %p11518_p3, %p11512_p0 }
  0x1f   :  { %11522 = shalt.err (!%p11519_p4)
}
  0x20   :  { %s11905_s5 = smov 128   ;;  %s11906_s28 = smov 8  }
  0x21   :  { %s15959_s29 = sld [smem:[#allocation140_spill]]  ;;  %s11531_s1 = scalar_lea.vmem %s90_s30, 1024 }
  0x22   :  { %p11532_p5 = scmp.ne.s32.totalorder %s90_s30, %s11531_s1  ;;  %p11536_p6 = scmp.lt.s32.totalorder %s90_s30, %s90_s30 }
  0x23   :  { %p11537_p7 = scmp.lt.s32.totalorder %s11531_s1, %s11531_s1 }
  0x25   :  { %p11538_p8 = por %p11537_p7, %p11536_p6 }
  0x27   :  { %71 = dma.hbm_to_vmem [thread:$0]  %s15959_s29, 512, %s66_s4, [#allocation6], %s11905_s5, %s11905_s5, %s11906_s28  }
  0x28   :  { %p11539_p9 = pnand %p11538_p8, %p11532_p5 }
  0x2a   :  { %11542 = shalt.err (!%p11539_p9)
}
  0x2b   :  { %s15960_s2 = sld [smem:[#allocation142_spill]]  ;;  %s11907_s3 = smov [#allocation11]  }
  0x2c   :  { %s113_s7 = sshll.u32 %s11907_s3, 4  ;;  %s11908_s8 = smov [#allocation14]   ;;  %s114_s7 = int_to_ptr.vmem [resolvable:$true] %s113_s7 }
  0x2d   :  { %s135_s9 = sshll.u32 %s11908_s8, 4  ;;  %s11551_s4 = scalar_lea.vmem %s114_s7, 256  ;;  %s136_s9 = int_to_ptr.vmem [resolvable:$true] %s135_s9 }
  0x2e   :  { %p11552_p10 = scmp.ne.s32.totalorder %s114_s7, %s11551_s4  ;;  %p11556_p11 = scmp.lt.s32.totalorder %s114_s7, %s114_s7 }
  0x2f   :  { %p11557_p12 = scmp.lt.s32.totalorder %s11551_s4, %s11551_s4 }
  0x31   :  { %95 = dma.hbm_to_vmem [thread:$0]  %s15960_s2, 1024, %s90_s30, [#allocation9], %s11905_s5, %s11905_s5, %s11906_s28  }
  0x32   :  { %p11558_p13 = por %p11557_p12, %p11556_p11 }
  0x34   :  { %p11559_p0 = pnand %p11558_p13, %p11552_p10 }
  0x36   :  { %11562 = shalt.err (!%p11559_p0)
}
  0x37   :  { %s15961_s29 = sld [smem:[#allocation144_spill]]  ;;  %s11571_s30 = scalar_lea.vmem %s136_s9, 1024 }
  0x38   :  { %p11572_p1 = scmp.ne.s32.totalorder %s136_s9, %s11571_s30  ;;  %p11576_p2 = scmp.lt.s32.totalorder %s136_s9, %s136_s9 }
  0x39   :  { %p11577_p3 = scmp.lt.s32.totalorder %s11571_s30, %s11571_s30 }
  0x3b   :  { %p11578_p4 = por %p11577_p3, %p11576_p2 }
  0x3d   :  { %119 = dma.hbm_to_vmem [thread:$0]  %s15961_s29, 256, %s114_s7, [#allocation12], %s11905_s5, %s11905_s5, %s11906_s28  }
  0x3e   :  { %p11579_p5 = pnand %p11578_p4, %p11572_p1 }
  0x40   :  { %11582 = shalt.err (!%p11579_p5)
}
  0x41   :  { %s15962_s11 = sld [smem:[#allocation146_spill]]  ;;  %s11909_s2 = smov [#allocation17]  }
  0x42   :  { %s157_s3 = sshll.u32 %s11909_s2, 4  ;;  %s11910_s8 = smov [#allocation20]   ;;  %s158_s3 = int_to_ptr.vmem [resolvable:$true] %s157_s3 }
  0x43   :  { %s179_s4 = sshll.u32 %s11910_s8, 4  ;;  %s11591_s7 = scalar_lea.vmem %s158_s3, 512  ;;  %s180_s4 = int_to_ptr.vmem [resolvable:$true] %s179_s4 }
  0x44   :  { %p11592_p6 = scmp.ne.s32.totalorder %s158_s3, %s11591_s7  ;;  %p11596_p7 = scmp.lt.s32.totalorder %s158_s3, %s158_s3 }
  0x45   :  { %p11597_p8 = scmp.lt.s32.totalorder %s11591_s7, %s11591_s7 }
  0x47   :  { %141 = dma.hbm_to_vmem [thread:$0]  %s15962_s11, 1024, %s136_s9, [#allocation15], %s11905_s5, %s11905_s5, %s11906_s28  }
  0x48   :  { %p11598_p9 = por %p11597_p8, %p11596_p7 }
  0x4a   :  { %p11599_p10 = pnand %p11598_p9, %p11592_p6 }
  0x4c   :  { %11602 = shalt.err (!%p11599_p10)
}
  0x4d   :  { %163 = dma.hbm_to_vmem [thread:$0]  %s15859_s12, 512, %s158_s3, [#allocation18], %s11905_s5, %s11905_s5, %s11906_s28  }
  0x4e   :  { %s11611_s9 = scalar_lea.vmem %s180_s4, 256  ;;  %p11616_p12 = scmp.lt.s32.totalorder %s180_s4, %s180_s4 }
  0x4f   :  { %p11612_p11 = scmp.ne.s32.totalorder %s180_s4, %s11611_s9  ;;  %p11617_p13 = scmp.lt.s32.totalorder %s11611_s9, %s11611_s9 }
  0x51   :  { %p11618_p0 = por %p11617_p13, %p11616_p12 }
  0x53   :  { %p11619_p1 = pnand %p11618_p0, %p11612_p11 }
  0x55   :  { %11622 = shalt.err (!%p11619_p1)
}
  0x56   :  { %185 = dma.hbm_to_vmem [thread:$0]  %s15861_s14, 256, %s180_s4, [#allocation21], %s11905_s5, %s11905_s5, %s11906_s28  }
  0x57   :  { %s11911_s1 = smov [#allocation23]   ;;  %s11912_s11 = smov [#allocation26]  }
  0x58   :  { %s201_s6 = sshll.u32 %s11911_s1, 4  ;;  %s231_s2 = sshll.u32 %s11912_s11, 4  ;;  %s202_s6 = int_to_ptr.vmem [resolvable:$true] %s201_s6  ;;  %s232_s2 = int_to_ptr.vmem [resolvable:$true] %s231_s2 }
  0x59   :  { %s11631_s12 = scalar_lea.vmem %s202_s6, 512  ;;  %p11636_p3 = scmp.lt.s32.totalorder %s202_s6, %s202_s6 }
  0x5a   :  { %p11632_p2 = scmp.ne.s32.totalorder %s202_s6, %s11631_s12  ;;  %p11637_p4 = scmp.lt.s32.totalorder %s11631_s12, %s11631_s12 }
  0x5c   :  { %p11638_p5 = por %p11637_p4, %p11636_p3 }
  0x5e   :  { %p11639_p6 = pnand %p11638_p5, %p11632_p2 }
  0x60   :  { %11642 = shalt.err (!%p11639_p6)
}
  0x61   :  { %207 = dma.hbm_to_vmem [thread:$0]  %s15863_s16, 512, %s202_s6, [#allocation24], %s11905_s5, %s11905_s5, %s11906_s28  }
  0x62   :  { %s11651_s14 = scalar_lea.vmem %s232_s2, 384  ;;  %p11656_p8 = scmp.lt.s32.totalorder %s232_s2, %s232_s2 }
  0x63   :  { %p11652_p7 = scmp.ne.s32.totalorder %s232_s2, %s11651_s14  ;;  %p11657_p9 = scmp.lt.s32.totalorder %s11651_s14, %s11651_s14 }
  0x65   :  { %p11658_p10 = por %p11657_p9, %p11656_p8 }
  0x67   :  { %p11659_p11 = pnand %p11658_p10, %p11652_p7 }
  0x69   :  { %11662 = shalt.err (!%p11659_p11)
}
  0x6a   :  { %s11913_s4 = smov 48   ;;  %s11914_s7 = smov 3  }
  0x6b   :  { %237 = dma.hbm_to_vmem [thread:$0]  %s15868_s21, 384, %s232_s2, [#allocation27], %s11913_s4, %s11913_s4, %s11914_s7  }
  0x6c   :  { %s11915_s9 = smov [#allocation29]   ;;  %s11916_s30 = smov [#allocation3]  }
  0x6d   :  { %s255_s29 = sshll.u32 %s11915_s9, 4  ;;  %s53_s1 = sshll.u32 %s11916_s30, 4  ;;  %s256_s29 = int_to_ptr.vmem [resolvable:$true] %s255_s29  ;;  %s54_s1 = int_to_ptr.vmem [resolvable:$true] %s53_s1 }
  0x6e   :  { %s11671_s16 = scalar_lea.vmem %s256_s29, 512  ;;  %p11676_p13 = scmp.lt.s32.totalorder %s256_s29, %s256_s29 }
  0x6f   :  { %p11672_p12 = scmp.ne.s32.totalorder %s256_s29, %s11671_s16  ;;  %p11677_p0 = scmp.lt.s32.totalorder %s11671_s16, %s11671_s16 }
  0x71   :  { %p11678_p1 = por %p11677_p0, %p11676_p13 }
  0x73   :  { %p11679_p2 = pnand %p11678_p1, %p11672_p12 }
  0x75   :  { %11682 = shalt.err (!%p11679_p2)
}
  0x76   :  { %261 = dma.hbm_to_vmem [thread:$0]  %s15870_s23, 512, %s256_s29, [#allocation30], %s11905_s5, %s11905_s5, %s11906_s28  }
  0x77   :  { %s11691_s21 = scalar_lea.vmem %s54_s1, 4608  ;;  %p11696_p4 = scmp.lt.s32.totalorder %s54_s1, %s54_s1 }
  0x78   :  { %p11692_p3 = scmp.ne.s32.totalorder %s54_s1, %s11691_s21  ;;  %p11697_p5 = scmp.lt.s32.totalorder %s11691_s21, %s11691_s21 }
  0x7a   :  { %p11698_p6 = por %p11697_p5, %p11696_p4 }
  0x7c   :  { %p11699_p7 = pnand %p11698_p6, %p11692_p3 }
  0x7e   :  { %11702 = shalt.err (!%p11699_p7)
}
  0x7f   :  { %s15963_s3 = sld [smem:[#allocation139_spill]]  ;;  %s11917_s8 = smov [#allocation7]  }
  0x80   :  { %s77_s14 = sshll.u32 %s11917_s8, 4  ;;  %s11918_s7 = smov [#allocation10]   ;;  %s78_s14 = int_to_ptr.vmem [resolvable:$true] %s77_s14 }
  0x81   :  { %s101_s0 = sshll.u32 %s11918_s7, 4  ;;  %s11711_s23 = scalar_lea.vmem %s78_s14, 9216  ;;  %s102_s0 = int_to_ptr.vmem [resolvable:$true] %s101_s0 }
  0x82   :  { %p11712_p8 = scmp.ne.s32.totalorder %s78_s14, %s11711_s23  ;;  %p11716_p9 = scmp.lt.s32.totalorder %s78_s14, %s78_s14 }
  0x83   :  { %p11717_p10 = scmp.lt.s32.totalorder %s11711_s23, %s11711_s23 }
  0x85   :  { %59 = dma.hbm_to_vmem [thread:$0]  %s15963_s3, 4608, %s54_s1, [#allocation4], %s11905_s5, %s11905_s5, %s11906_s28  }
  0x86   :  { %p11718_p11 = por %p11717_p10, %p11716_p9 }
  0x88   :  { %p11719_p12 = pnand %p11718_p11, %p11712_p8 }
  0x8a   :  { %11722 = shalt.err (!%p11719_p12)
}
  0x8b   :  { %s15964_s29 = sld [smem:[#allocation141_spill]]  ;;  %s11731_s30 = scalar_lea.vmem %s102_s0, 24576 }
  0x8c   :  { %p11732_p13 = scmp.ne.s32.totalorder %s102_s0, %s11731_s30  ;;  %p11736_p0 = scmp.lt.s32.totalorder %s102_s0, %s102_s0 }
  0x8d   :  { %p11737_p1 = scmp.lt.s32.totalorder %s11731_s30, %s11731_s30 }
  0x8f   :  { %p11738_p2 = por %p11737_p1, %p11736_p0 }
  0x91   :  { %83 = dma.hbm_to_vmem [thread:$0]  %s15964_s29, 9216, %s78_s14, [#allocation6], %s11905_s5, %s11905_s5, %s11906_s28  }
  0x92   :  { %p11739_p3 = pnand %p11738_p2, %p11732_p13 }
  0x94   :  { %11742 = shalt.err (!%p11739_p3)
}
  0x95   :  { %s15965_s6 = sld [smem:[#allocation143_spill]]  ;;  %s11919_s11 = smov [#allocation13]  }
  0x96   :  { %s126_s21 = sshll.u32 %s11919_s11, 4  ;;  %s11920_s2 = smov [#allocation16]   ;;  %s127_s21 = int_to_ptr.vmem [resolvable:$true] %s126_s21 }
  0x97   :  { %s148_s12 = sshll.u32 %s11920_s2, 4  ;;  %s11751_s3 = scalar_lea.vmem %s127_s21, 16  ;;  %s149_s12 = int_to_ptr.vmem [resolvable:$true] %s148_s12 }
  0x98   :  { %p11752_p4 = scmp.ne.s32.totalorder %s127_s21, %s11751_s3  ;;  %s11755_s8 = scalar_lea.vmem %s127_s21, 32 }
  0x99   :  { %p11756_p5 = scmp.lt.s32.totalorder %s127_s21, %s127_s21  ;;  %p11757_p6 = scmp.lt.s32.totalorder %s11755_s8, %s11751_s3 }
  0x9b   :  { %107 = dma.hbm_to_vmem [thread:$0]  %s15965_s6, 24576, %s102_s0, [#allocation9], %s11905_s5, %s11905_s5, %s11906_s28  }
  0x9c   :  { %p11758_p7 = por %p11757_p6, %p11756_p5 }
  0x9e   :  { %p11759_p8 = pnand %p11758_p7, %p11752_p4 }
  0xa0   :  { %11762 = shalt.err (!%p11759_p8)
}
  0xa1   :  { %s15966_s23 = sld [smem:[#allocation145_spill]]  ;;  %s11771_s10 = scalar_lea.vmem %s149_s12, 16 }
  0xa2   :  { %p11772_p9 = scmp.ne.s32.totalorder %s149_s12, %s11771_s10  ;;  %s11775_s0 = scalar_lea.vmem %s149_s12, 32 }
  0xa3   :  { %p11776_p10 = scmp.lt.s32.totalorder %s149_s12, %s149_s12  ;;  %p11777_p11 = scmp.lt.s32.totalorder %s11775_s0, %s11771_s10 }
  0xa5   :  { %p11778_p12 = por %p11777_p11, %p11776_p10 }
  0xa7   :  { %129 = dma.hbm_to_vmem [thread:$0]  %s15966_s23, 16, %s127_s21, [#allocation12]  }
  0xa8   :  { %p11779_p13 = pnand %p11778_p12, %p11772_p9 }
  0xaa   :  { %11782 = shalt.err (!%p11779_p13)
}
  0xab   :  { %s15967_s30 = sld [smem:[#allocation147_spill]]  ;;  %s11921_s1 = smov [#allocation19]  }
  0xac   :  { %s170_s16 = sshll.u32 %s11921_s1, 4  ;;  %s11922_s6 = smov [#allocation22]   ;;  %s171_s16 = int_to_ptr.vmem [resolvable:$true] %s170_s16 }
  0xad   :  { %s192_s11 = sshll.u32 %s11922_s6, 4  ;;  %s11791_s2 = scalar_lea.vmem %s171_s16, 16  ;;  %s193_s11 = int_to_ptr.vmem [resolvable:$true] %s192_s11 }
  0xae   :  { %p11792_p0 = scmp.ne.s32.totalorder %s171_s16, %s11791_s2  ;;  %s11795_s21 = scalar_lea.vmem %s171_s16, 32 }
  0xaf   :  { %p11796_p1 = scmp.lt.s32.totalorder %s171_s16, %s171_s16  ;;  %p11797_p2 = scmp.lt.s32.totalorder %s11795_s21, %s11791_s2 }
  0xb1   :  { %151 = dma.hbm_to_vmem [thread:$0]  %s15967_s30, 16, %s149_s12, [#allocation15]  }
  0xb2   :  { %p11798_p3 = por %p11797_p2, %p11796_p1 }
  0xb4   :  { %p11799_p4 = pnand %p11798_p3, %p11792_p0 }
  0xb6   :  { %11802 = shalt.err (!%p11799_p4)
}
  0xb7   :  { %173 = dma.hbm_to_vmem [thread:$0]  %s15860_s13, 16, %s171_s16, [#allocation18]  }
  0xb8   :  { %s11811_s14 = scalar_lea.vmem %s193_s11, 16  ;;  %s11815_s12 = scalar_lea.vmem %s193_s11, 32 }
  0xb9   :  { %p11812_p5 = scmp.ne.s32.totalorder %s193_s11, %s11811_s14  ;;  %p11816_p6 = scmp.lt.s32.totalorder %s193_s11, %s193_s11 }
  0xba   :  { %p11817_p7 = scmp.lt.s32.totalorder %s11815_s12, %s11811_s14 }
  0xbc   :  { %p11818_p8 = por %p11817_p7, %p11816_p6 }
  0xbe   :  { %p11819_p9 = pnand %p11818_p8, %p11812_p5 }
  0xc0   :  { %11822 = shalt.err (!%p11819_p9)
}
  0xc1   :  { %195 = dma.hbm_to_vmem [thread:$0]  %s15862_s15, 16, %s193_s11, [#allocation21]  }
  0xc2   :  { %s11923_s10 = smov [#allocation25]  }
  0xc3   :  { %s219_s0 = sshll.u32 %s11923_s10, 4  ;;  %s220_s0 = int_to_ptr.vmem [resolvable:$true] %s219_s0 }
  0xc4   :  { %s11831_s9 = scalar_lea.vmem %s220_s0, 24576  ;;  %p11836_p11 = scmp.lt.s32.totalorder %s220_s0, %s220_s0 }
  0xc5   :  { %p11832_p10 = scmp.ne.s32.totalorder %s220_s0, %s11831_s9  ;;  %p11837_p12 = scmp.lt.s32.totalorder %s11831_s9, %s11831_s9 }
  0xc7   :  { %p11838_p13 = por %p11837_p12, %p11836_p11 }
  0xc9   :  { %p11839_p0 = pnand %p11838_p13, %p11832_p10 }
  0xcb   :  { %11842 = shalt.err (!%p11839_p0)
}
  0xcc   :  { %s11924_s13 = smov 384   ;;  %s11925_s29 = smov 24  }
  0xcd   :  { %225 = dma.hbm_to_vmem [thread:$0]  %s15867_s20, 24576, %s220_s0, [#allocation24], %s11924_s13, %s11924_s13, %s11925_s29  }
  0xce   :  { %s11926_s16 = smov [#allocation28]   ;;  %s11927_s15 = smov [#allocation31]  }
  0xcf   :  { %s243_s6 = sshll.u32 %s11926_s16, 4  ;;  %s268_s11 = sshll.u32 %s11927_s15, 4  ;;  %s244_s6 = int_to_ptr.vmem [resolvable:$true] %s243_s6  ;;  %s269_s11 = int_to_ptr.vmem [resolvable:$true] %s268_s11 }
  0xd0   :  { %s11851_s2 = scalar_lea.vmem %s244_s6, 4608  ;;  %p11856_p2 = scmp.lt.s32.totalorder %s244_s6, %s244_s6 }
  0xd1   :  { %p11852_p1 = scmp.ne.s32.totalorder %s244_s6, %s11851_s2  ;;  %p11857_p3 = scmp.lt.s32.totalorder %s11851_s2, %s11851_s2 }
  0xd3   :  { %p11858_p4 = por %p11857_p3, %p11856_p2 }
  0xd5   :  { %p11859_p5 = pnand %p11858_p4, %p11852_p1 }
  0xd7   :  { %11862 = shalt.err (!%p11859_p5)
}
  0xd8   :  { %249 = dma.hbm_to_vmem [thread:$0]  %s15869_s22, 4608, %s244_s6, [#allocation27], %s11905_s5, %s11905_s5, %s11906_s28  }
  0xd9   :  { %s11871_s20 = scalar_lea.vmem %s269_s11, 48  ;;  %s11875_s8 = scalar_lea.vmem %s269_s11, 64 }
  0xda   :  { %p11872_p6 = scmp.ne.s32.totalorder %s269_s11, %s11871_s20  ;;  %p11876_p7 = scmp.lt.s32.totalorder %s269_s11, %s269_s11 }
  0xdb   :  { %p11877_p8 = scmp.lt.s32.totalorder %s11875_s8, %s11871_s20 }
  0xdd   :  { %p11878_p9 = por %p11877_p8, %p11876_p7 }
  0xdf   :  { %p11879_p10 = pnand %p11878_p9, %p11872_p6 }
  0xe1   :  { %11882 = shalt.err (!%p11879_p10)
}
  0xe2   :  { %271 = dma.hbm_to_vmem [thread:$0]  %s15871_s24, 48, %s269_s11, [#allocation30]  }
  0xe3   :  { %11883 = dma.done.wait [#allocation4], 4608  }
  0xe4   :  { %11884 = vsyncadd [#allocation4], 4294962688 }
  0xe5   :  { %11885 = dma.done.wait [#allocation6], 9728  }
  0xe6   :  { %11886 = vsyncadd [#allocation6], 4294957568 }
  0xe7   :  { %11887 = dma.done.wait [#allocation9], 25600  }
  0xe8   :  { %11888 = vsyncadd [#allocation9], 4294941696 }
  0xe9   :  { %11889 = dma.done.wait [#allocation12], 272  }
  0xea   :  { %11890 = vsyncadd [#allocation12], 4294967024 }
  0xeb   :  { %11891 = dma.done.wait [#allocation15], 1040  }
  0xec   :  { %11892 = vsyncadd [#allocation15], 4294966256 }
  0xed   :  { %11893 = dma.done.wait [#allocation18], 528  }
  0xee   :  { %11894 = vsyncadd [#allocation18], 4294966768 }
  0xef   :  { %11895 = dma.done.wait [#allocation21], 272  }
  0xf0   :  { %11896 = vsyncadd [#allocation21], 4294967024 }
  0xf1   :  { %11897 = dma.done.wait [#allocation24], 25088  }
  0xf2   :  { %11898 = vsyncadd [#allocation24], 4294942208 }
  0xf3   :  { %11899 = dma.done.wait [#allocation27], 4992  }
  0xf4   :  { %11900 = vsyncadd [#allocation27], 4294962304 }
  0xf5   :  { %11901 = dma.done.wait [#allocation30], 560  }
  0xf6   :  { %11902 = vsyncadd [#allocation30], 4294966736  ;;  %v15876_v0 = vmov 0.0   ;;  %s15968_s5 = sld [smem:[#allocation136_spill]]  ;;  %s11929_s28 = smov 127   ;;  %vm356_vm0 = vcmask 64512  }
  0xf7   :  { %433 = vmatprep.mubr.f32.mxu0 %v15876_v0  ;;  %534 = vmatprep.mubr.f32.mxu1 %v15876_v0  ;;  %s11930_s7 = smov 126   ;;  %v337_v3 = vld [vmem:[#allocation3] sm:$0xff]  ;;  %v338_v4 = vld [vmem:[#allocation3 + $0x8] sm:$0xff]  ;;  %s11931_s0 = smov 112   ;;  %v339_v5 = vld [vmem:[#allocation3 + $0x10] sm:$0xff]  ;;  %v11937_v9 = vmov 0  }
  0xf8   :  { %s11932_s9 = smov 111   ;;  %v340_v6 = vld [vmem:[#allocation3 + $0x18] sm:$0xff]  ;;  %s11933_s13 = smov 110   ;;  %v1415_v8 = vld [vmem:[#allocation5 + $0x10] sm:$0xff]  ;;  %11493 = vset.pattern.permute.xlu0 %v11937_v9  ;;  %11494 = vset.pattern.permute.xlu1 %v11937_v9  ;;  %v1413_v10 = vld [vmem:[#allocation5] sm:$0xff]  ;;  %vm352_vm1 = vcmask 1039360  }
  0xf9   :  { %s11934_s29 = smov 96   ;;  %s11935_s30 = smov 95   ;;  %v1416_v7 = vld [vmem:[#allocation5 + $0x18] sm:$0xff]  ;;  %v1414_v11 = vld [vmem:[#allocation5 + $0x8] sm:$0xff]  ;;  %vm568_vm2 = vcmask 1031168   ;;  %v342_v15 = vld [vmem:[#allocation3 + $0x20] sm:$0xff] }
  0xfa   :  { %s11936_s1 = smov 94   ;;  %vm690_vm3 = vcmask 916480   ;;  %v343_v19 = vld [vmem:[#allocation3 + $0x28] sm:$0xff]  ;;  %v682_v22 = vld [vmem:[#allocation3 + $0x60] sm:$0xff]  ;;  %v344_v24 = vld [vmem:[#allocation3 + $0x30] sm:$0xff]  ;;  %vm934_vm4 = vcmask 900096  }
  0xfb   :  { %v683_v27 = vld [vmem:[#allocation3 + $0x68] sm:$0xff]  ;;  %v345_v28 = vld [vmem:[#allocation3 + $0x38] sm:$0xff]  ;;  %v684_v29 = vld [vmem:[#allocation3 + $0x70] sm:$0xff]  ;;  %vm812_vm5 = vcmask 908288   ;;  %vm1178_vm6 = vcmask 777216   ;;  %vm1056_vm7 = vcmask 785408  }
  0xfc   :  { %v333_v1 = vld [vmem:[%s15968_s5] sm:$0xff]  ;;  %v334_v2 = vld [vmem:[%s15968_s5 + $0x8] sm:$0xff]  ;;  %v685_v34 = vld [vmem:[#allocation3 + $0x78] sm:$0xff]  ;;  %vm1300_vm8 = vcmask 769024   ;;  %vm1506_vm9 = vcmask 261120   ;;  %vm3204_vm10 = vcmask 1043456  }
  0xfd   :  { %348 = vrot.lane.b32.xlu0 %v333_v1, %s11929_s28  ;;  %564 = vrot.lane.b32.xlu1 %v333_v1, %s11930_s7  ;;  %v560_v33 = vld [vmem:[#allocation3 + $0x40] sm:$0xff]  ;;  %v561_v38 = vld [vmem:[#allocation3 + $0x48] sm:$0xff]  ;;  %v562_v43 = vld [vmem:[#allocation3 + $0x50] sm:$0xff]  ;;  %vm11938_vm11 = vmmov 0   ;;  %s15984_s15 = sld [smem:[#allocation137_spill]]  ;;  %vm3200_vm12 = vcmask 97280  }
  0xfe   :  { %500 = vmatprep.subr.mxu1 %v334_v2  ;;  %v926_v39 = vld [vmem:[#allocation3 + $0xa0] sm:$0xff]  ;;  %v927_v44 = vld [vmem:[#allocation3 + $0xa8] sm:$0xff]  ;;  %v563_v45 = vld [vmem:[#allocation3 + $0x58] sm:$0xff]  ;;  %vm3302_vm13 = vcmask 490496   ;;  %vm4110_vm14 = vcmask 523264   ;;  %s16030_s20 = sld [smem:[#allocation138_spill]] }
  0xff   :  { %501 = vmatpush1.msra.mxu1 %v333_v1  ;;  %v928_v46 = vld [vmem:[#allocation3 + $0xb0] sm:$0xff]  ;;  %v804_v47 = vld [vmem:[#allocation3 + $0x80] sm:$0xff]  ;;  %v929_v48 = vld [vmem:[#allocation3 + $0xb8] sm:$0xff]  ;;  %vm4287_vm15 = vcmask 130048   ;;  %s11941_s21 = smov 92   ;;  %s11942_s3 = smov 91  }
 0x100   :  { %10421 = vmatmul.mubr.msk.f32.vlgmr.msra.gmra.mxu1 %vm356_vm0, %v337_v3  ;;  %v805_v51 = vld [vmem:[#allocation3 + $0x88] sm:$0xff]  ;;  %v1170_v52 = vld [vmem:[#allocation3 + $0xe0] sm:$0xff]  ;;  %v806_v53 = vld [vmem:[#allocation3 + $0x90] sm:$0xff]  ;;  %s11944_s14 = smov 32  }
 0x101   :  { %350 = vrot.lane.b32.xlu0 %v334_v2, %s11929_s28  ;;  %566 = vrot.lane.b32.xlu1 %v334_v2, %s11930_s7  ;;  %v1171_v54 = vld [vmem:[#allocation3 + $0xe8] sm:$0xff]  ;;  %v807_v55 = vld [vmem:[#allocation3 + $0x98] sm:$0xff]  ;;  %v1172_v56 = vld [vmem:[#allocation3 + $0xf0] sm:$0xff] }
 0x102   :  { %540 = vmatprep.mubr.f32.mxu1 %v15876_v0  ;;  %v1048_v58 = vld [vmem:[#allocation3 + $0xc0] sm:$0xff]  ;;  %v1173_v59 = vld [vmem:[#allocation3 + $0xf8] sm:$0xff]  ;;  %v1049_v61 = vld [vmem:[#allocation3 + $0xc8] sm:$0xff] }
 0x103   :  { %v1050_v62 = vld [vmem:[#allocation3 + $0xd0] sm:$0xff]  ;;  %v1051_v63 = vld [vmem:[#allocation3 + $0xd8] sm:$0xff] }
 0x104   :  { %10422 = vmatmul.mubr.msk.f32.gmra.mxu1 %vm356_vm0, %v338_v4  ;;  %v1294_v3 = vld [vmem:[#allocation3 + $0x110] sm:$0xff]  ;;  %v1295_v4 = vld [vmem:[#allocation3 + $0x118] sm:$0xff] }
 0x105   :  { %688 = vrot.lane.b32.xlu1 %v334_v2, %s11931_s0  ;;  %686 = vrot.lane.b32.xlu0 %v333_v1, %s11931_s0 }
 0x106   :  { %546 = vmatprep.mubr.f32.mxu1 %v15876_v0 }
 0x108   :  { %10423 = vmatmul.mubr.msk.f32.gmra.mxu1 %vm356_vm0, %v339_v5 }
 0x109   :  { %810 = vrot.lane.b32.xlu1 %v334_v2, %s11932_s9  ;;  %808 = vrot.lane.b32.xlu0 %v333_v1, %s11932_s9 }
 0x10a   :  { %552 = vmatprep.mubr.f32.mxu1 %v15876_v0 }
 0x10c   :  { %10424 = vmatmul.mubr.msk.f32.gmra.mxu1 %vm356_vm0, %v340_v6 }
 0x10d   :  { %932 = vrot.lane.b32.xlu1 %v334_v2, %s11933_s13  ;;  %930 = vrot.lane.b32.xlu0 %v333_v1, %s11933_s13 }
 0x10e   :  { %770 = vmatprep.mubr.f32.mxu1 %v15876_v0 }
 0x111   :  { %1054 = vrot.lane.b32.xlu1 %v334_v2, %s11934_s29  ;;  %1052 = vrot.lane.b32.xlu0 %v333_v1, %s11934_s29 }
 0x115   :  { %1176 = vrot.lane.b32.xlu1 %v334_v2, %s11935_s30  ;;  %1174 = vrot.lane.b32.xlu0 %v333_v1, %s11935_s30 }
 0x119   :  { %1298 = vrot.lane.b32.xlu1 %v334_v2, %s11936_s1  ;;  %1296 = vrot.lane.b32.xlu0 %v333_v1, %s11936_s1  ;;  %v1292_v1 = vld [vmem:[#allocation3 + $0x100] sm:$0xff]  ;;  %v1293_v2 = vld [vmem:[#allocation3 + $0x108] sm:$0xff] }
 0x11d   :  { %1434 = vperm.xlu0 %11493, %v1416_v7   ;;  %1429 = vperm.xlu1 %11494, %v1415_v8  }
 0x121   :  { %1419 = vperm.xlu0 %11493, %v1413_v10   ;;  %1424 = vperm.xlu1 %11494, %v1414_v11  }
 0x16f   :  { %v349_v12 = vpop.permute.xlu0 %348  ;;  %v565_v13 = vpop.permute.xlu1 %564 }
 0x173   :  { %v351_v14 = vpop.permute.xlu0 %350  ;;  %v567_v16 = vpop.permute.xlu1 %566 }
 0x174   :  { %399 = vmatprep.subr.mxu0 %v351_v14  ;;  %v353_v17 = vsel %vm352_vm1, %v349_v12, %v351_v14  ;;  %v569_v18 = vsel %vm568_vm2, %v565_v13, %v567_v16 }
 0x175   :  { %400 = vmatpush1.msra.mxu0 %v353_v17 }
 0x176   :  { %10417 = vmatmul.mubr.msk.f32.vlgmr.msra.gmra.mxu0 %vm356_vm0, %v342_v15  ;;  %614 = vmatprep.subr.mxu0 %v567_v16 }
 0x177   :  { %439 = vmatprep.mubr.f32.mxu0 %v15876_v0  ;;  %615 = vmatpush1.msra.mxu0 %v569_v18  ;;  %v689_v20 = vpop.permute.xlu1 %688  ;;  %v687_v21 = vpop.permute.xlu0 %686 }
 0x178   :  { %v691_v23 = vsel %vm690_vm3, %v687_v21, %v689_v20  ;;  %736 = vmatprep.subr.mxu1 %v689_v20 }
 0x179   :  { %737 = vmatpush1.msra.mxu1 %v691_v23 }
 0x17a   :  { %10418 = vmatmul.mubr.msk.f32.gmra.mxu0 %vm356_vm0, %v343_v19  ;;  %10429 = vmatmul.mubr.msk.f32.vlgmr.msra.gmra.mxu1 %vm356_vm0, %v682_v22 }
 0x17b   :  { %445 = vmatprep.mubr.f32.mxu0 %v15876_v0  ;;  %v811_v25 = vpop.permute.xlu1 %810  ;;  %v809_v26 = vpop.permute.xlu0 %808  ;;  %776 = vmatprep.mubr.f32.mxu1 %v15876_v0 }
 0x17c   :  { %858 = vmatprep.subr.mxu0 %v811_v25  ;;  %v813_v37 = vsel %vm812_vm5, %v809_v26, %v811_v25 }
 0x17e   :  { %10419 = vmatmul.mubr.msk.f32.gmra.mxu0 %vm356_vm0, %v344_v24  ;;  %10430 = vmatmul.mubr.msk.f32.gmra.mxu1 %vm356_vm0, %v683_v27 }
 0x17f   :  { %451 = vmatprep.mubr.f32.mxu0 %v15876_v0  ;;  %782 = vmatprep.mubr.f32.mxu1 %v15876_v0  ;;  %v933_v30 = vpop.permute.xlu1 %932  ;;  %v931_v31 = vpop.permute.xlu0 %930 }
 0x180   :  { %v935_v32 = vsel %vm934_vm4, %v931_v31, %v933_v30  ;;  %980 = vmatprep.subr.mxu1 %v933_v30 }
 0x181   :  { %981 = vmatpush1.msra.mxu1 %v935_v32 }
 0x182   :  { %10420 = vmatmul.mubr.msk.f32.gmra.mxu0 %vm356_vm0, %v345_v28  ;;  %10431 = vmatmul.mubr.msk.f32.gmra.mxu1 %vm356_vm0, %v684_v29 }
 0x183   :  { %648 = vmatprep.mubr.f32.mxu0 %v15876_v0  ;;  %788 = vmatprep.mubr.f32.mxu1 %v15876_v0  ;;  %v1055_v35 = vpop.permute.xlu1 %1054  ;;  %v1053_v36 = vpop.permute.xlu0 %1052 }
 0x184   :  { %v1057_v49 = vsel %vm1056_vm7, %v1053_v36, %v1055_v35 }
 0x186   :  { %10425 = vmatmul.mubr.msk.f32.vlgmr.msra.gmra.mxu0 %vm356_vm0, %v560_v33  ;;  %10432 = vmatmul.mubr.msk.f32.gmra.mxu1 %vm356_vm0, %v685_v34 }
 0x187   :  { %654 = vmatprep.mubr.f32.mxu0 %v15876_v0  ;;  %859 = vmatpush1.msra.mxu0 %v813_v37  ;;  %v1177_v40 = vpop.permute.xlu1 %1176  ;;  %v1175_v41 = vpop.permute.xlu0 %1174 }
 0x188   :  { %1014 = vmatprep.mubr.f32.mxu1 %v15876_v0  ;;  %1102 = vmatprep.subr.mxu0 %v1055_v35  ;;  %v1179_v42 = vsel %vm1178_vm6, %v1175_v41, %v1177_v40 }
 0x189   :  { %1224 = vmatprep.subr.mxu1 %v1177_v40 }
 0x18a   :  { %10426 = vmatmul.mubr.msk.f32.gmra.mxu0 %vm356_vm0, %v561_v38  ;;  %10437 = vmatmul.mubr.msk.f32.vlgmr.msra.gmra.mxu1 %vm356_vm0, %v926_v39 }
 0x18b   :  { %660 = vmatprep.mubr.f32.mxu0 %v15876_v0  ;;  %1020 = vmatprep.mubr.f32.mxu1 %v15876_v0  ;;  %v1299_v50 = vpop.permute.xlu1 %1298  ;;  %v1297_v57 = vpop.permute.xlu0 %1296 }
 0x18c   :  { %1225 = vmatpush1.msra.mxu1 %v1179_v42  ;;  %v1301_v60 = vsel %vm1300_vm8, %v1297_v57, %v1299_v50 }
 0x18e   :  { %10427 = vmatmul.mubr.msk.f32.gmra.mxu0 %vm356_vm0, %v562_v43  ;;  %10438 = vmatmul.mubr.msk.f32.gmra.mxu1 %vm356_vm0, %v927_v44 }
 0x18f   :  { %666 = vmatprep.mubr.f32.mxu0 %v15876_v0  ;;  %1026 = vmatprep.mubr.f32.mxu1 %v15876_v0 }
 0x192   :  { %10428 = vmatmul.mubr.msk.f32.gmra.mxu0 %vm356_vm0, %v563_v45  ;;  %10439 = vmatmul.mubr.msk.f32.gmra.mxu1 %vm356_vm0, %v928_v46 }
 0x193   :  { %892 = vmatprep.mubr.f32.mxu0 %v15876_v0  ;;  %1032 = vmatprep.mubr.f32.mxu1 %v15876_v0 }
 0x196   :  { %10433 = vmatmul.mubr.msk.f32.vlgmr.msra.gmra.mxu0 %vm356_vm0, %v804_v47  ;;  %10440 = vmatmul.mubr.msk.f32.gmra.mxu1 %vm356_vm0, %v929_v48 }
 0x197   :  { %898 = vmatprep.mubr.f32.mxu0 %v15876_v0  ;;  %1103 = vmatpush1.msra.mxu0 %v1057_v49 }
 0x198   :  { %1258 = vmatprep.mubr.f32.mxu1 %v15876_v0  ;;  %1346 = vmatprep.subr.mxu0 %v1299_v50 }
 0x19a   :  { %10434 = vmatmul.mubr.msk.f32.gmra.mxu0 %vm356_vm0, %v805_v51  ;;  %10445 = vmatmul.mubr.msk.f32.vlgmr.msra.gmra.mxu1 %vm356_vm0, %v1170_v52 }
 0x19b   :  { %904 = vmatprep.mubr.f32.mxu0 %v15876_v0  ;;  %1264 = vmatprep.mubr.f32.mxu1 %v15876_v0 }
 0x19e   :  { %10435 = vmatmul.mubr.msk.f32.gmra.mxu0 %vm356_vm0, %v806_v53  ;;  %10446 = vmatmul.mubr.msk.f32.gmra.mxu1 %vm356_vm0, %v1171_v54 }
 0x19f   :  { %910 = vmatprep.mubr.f32.mxu0 %v15876_v0  ;;  %1270 = vmatprep.mubr.f32.mxu1 %v15876_v0 }
 0x1a2   :  { %10436 = vmatmul.mubr.msk.f32.gmra.mxu0 %vm356_vm0, %v807_v55  ;;  %10447 = vmatmul.mubr.msk.f32.gmra.mxu1 %vm356_vm0, %v1172_v56 }
 0x1a3   :  { %1136 = vmatprep.mubr.f32.mxu0 %v15876_v0  ;;  %1276 = vmatprep.mubr.f32.mxu1 %v15876_v0 }
 0x1a6   :  { %10441 = vmatmul.mubr.msk.f32.vlgmr.msra.gmra.mxu0 %vm356_vm0, %v1048_v58  ;;  %10448 = vmatmul.mubr.msk.f32.gmra.mxu1 %vm356_vm0, %v1173_v59 }
 0x1a7   :  { %1142 = vmatprep.mubr.f32.mxu0 %v15876_v0  ;;  %1347 = vmatpush1.msra.mxu0 %v1301_v60 }
 0x1a8   :  { %1595 = vmatprep.mubr.f32.mxu1 %v15876_v0 }
 0x1aa   :  { %10442 = vmatmul.mubr.msk.f32.gmra.mxu0 %vm356_vm0, %v1049_v61 }
 0x1ab   :  { %1148 = vmatprep.mubr.f32.mxu0 %v15876_v0 }
 0x1ae   :  { %10443 = vmatmul.mubr.msk.f32.gmra.mxu0 %vm356_vm0, %v1050_v62 }
 0x1af   :  { %1154 = vmatprep.mubr.f32.mxu0 %v15876_v0 }
 0x1b2   :  { %10444 = vmatmul.mubr.msk.f32.gmra.mxu0 %vm356_vm0, %v1051_v63 }
 0x1b3   :  { %1380 = vmatprep.mubr.f32.mxu0 %v15876_v0 }
 0x1b6   :  { %10449 = vmatmul.mubr.msk.f32.vlgmr.msra.gmra.mxu0 %vm356_vm0, %v1292_v1 }
 0x1b7   :  { %1386 = vmatprep.mubr.f32.mxu0 %v15876_v0 }
 0x1ba   :  { %10450 = vmatmul.mubr.msk.f32.gmra.mxu0 %vm356_vm0, %v1293_v2 }
 0x1bb   :  { %1392 = vmatprep.mubr.f32.mxu0 %v15876_v0 }
 0x1be   :  { %10451 = vmatmul.mubr.msk.f32.gmra.mxu0 %vm356_vm0, %v1294_v3 }
 0x1bf   :  { %1398 = vmatprep.mubr.f32.mxu0 %v15876_v0 }
 0x1c0   :  { %v12285_v5 = vpop.f32.mrf.mxu1 }
 0x1c2   :  { %10452 = vmatmul.mubr.msk.f32.gmra.mxu0 %vm356_vm0, %v1295_v4  ;;  %v12287_v6 = vpop.f32.mrf.mxu1  ;;  %vm4719_vm0 = vcmask 867328  }
 0x1c3   :  { %1732 = vmatprep.mubr.f32.mxu0 %v15876_v0 }
 0x1c4   :  { %v542_v7 = vpop.f32.mrf.mxu1 }
 0x1c6   :  { %v544_v8 = vpop.f32.mrf.mxu1 }
 0x1c8   :  { %v548_v9 = vpop.f32.mrf.mxu1 }
 0x1ca   :  { %v550_v10 = vpop.f32.mrf.mxu1 }
 0x1cc   :  { %v554_v11 = vpop.f32.mrf.mxu1 }
 0x1ce   :  { %v556_v14 = vpop.f32.mrf.mxu1 }
 0x236   :  { %v435_v12 = vpop.f32.mrf.mxu0 }
 0x238   :  { %v437_v13 = vpop.f32.mrf.mxu0 }
 0x23a   :  { %v441_v15 = vpop.f32.mrf.mxu0  ;;  %v12289_v16 = vpop.f32.mrf.mxu1 }
 0x23b   :  { %v543_v1 = vadd.f32 %v542_v7, %v441_v15 }
 0x23c   :  { %v443_v17 = vpop.f32.mrf.mxu0  ;;  %v12291_v18 = vpop.f32.mrf.mxu1 }
 0x23d   :  { %v545_v0 = vadd.f32 %v544_v8, %v443_v17 }
 0x23e   :  { %v447_v19 = vpop.f32.mrf.mxu0  ;;  %v12293_v20 = vpop.f32.mrf.mxu1 }
 0x23f   :  { %v549_v58 = vadd.f32 %v548_v9, %v447_v19  ;;  %v539_v9 = vadd.f32 %v12287_v6, %v437_v13 }
 0x240   :  { %v449_v21 = vpop.f32.mrf.mxu0  ;;  %v12295_v22 = vpop.f32.mrf.mxu1 }
 0x241   :  { %v551_v61 = vadd.f32 %v550_v10, %v449_v21 }
 0x242   :  { %v453_v23 = vpop.f32.mrf.mxu0  ;;  %v784_v24 = vpop.f32.mrf.mxu1 }
 0x243   :  { %v555_v2 = vadd.f32 %v554_v11, %v453_v23 }
 0x244   :  { %v455_v25 = vpop.f32.mrf.mxu0  ;;  %v786_v26 = vpop.f32.mrf.mxu1 }
 0x246   :  { %v650_v27 = vpop.f32.mrf.mxu0  ;;  %v790_v28 = vpop.f32.mrf.mxu1 }
 0x248   :  { %v652_v29 = vpop.f32.mrf.mxu0  ;;  %v792_v30 = vpop.f32.mrf.mxu1 }
 0x249   :  { %v674_v15 = vadd.f32 %v652_v29, %v539_v9 }
 0x24a   :  { %v656_v31 = vpop.f32.mrf.mxu0  ;;  %v12297_v32 = vpop.f32.mrf.mxu1 }
 0x24b   :  { %15969 = vst [vmem:[#allocation42_spill] sm:$0xff] %v12297_v32 }
 0x24c   :  { %v658_v33 = vpop.f32.mrf.mxu0  ;;  %v12299_v34 = vpop.f32.mrf.mxu1 }
 0x24d   :  { %15970 = vst [vmem:[#allocation43_spill] sm:$0xff] %v12299_v34  ;;  %v675_v34 = vadd.f32 %v656_v31, %v543_v1  ;;  %v676_v19 = vadd.f32 %v658_v33, %v545_v0 }
 0x24e   :  { %v662_v35 = vpop.f32.mrf.mxu0  ;;  %v12301_v36 = vpop.f32.mrf.mxu1 }
 0x24f   :  { %v677_v62 = vadd.f32 %v662_v35, %v549_v58  ;;  %v797_v8 = vadd.f32 %v12293_v20, %v675_v34 }
 0x250   :  { %v664_v37 = vpop.f32.mrf.mxu0  ;;  %v12303_v38 = vpop.f32.mrf.mxu1 }
 0x251   :  { %v678_v3 = vadd.f32 %v664_v37, %v551_v61 }
 0x252   :  { %v668_v39 = vpop.f32.mrf.mxu0  ;;  %v1028_v40 = vpop.f32.mrf.mxu1 }
 0x253   :  { %v679_v32 = vadd.f32 %v668_v39, %v555_v2  ;;  %v800_v21 = vadd.f32 %v786_v26, %v678_v3  ;;  %v796_v26 = vadd.f32 %v12291_v18, %v674_v15  ;;  %v1435_v3 = vpop.permute.xlu0 %1434 }
 0x254   :  { %v670_v41 = vpop.f32.mrf.mxu0  ;;  %v1030_v43 = vpop.f32.mrf.mxu1 }
 0x256   :  { %v894_v42 = vpop.f32.mrf.mxu0  ;;  %v1034_v46 = vpop.f32.mrf.mxu1 }
 0x258   :  { %v896_v44 = vpop.f32.mrf.mxu0  ;;  %v1036_v49 = vpop.f32.mrf.mxu1 }
 0x25a   :  { %v900_v45 = vpop.f32.mrf.mxu0  ;;  %v12305_v52 = vpop.f32.mrf.mxu1 }
 0x25b   :  { %15971 = vst [vmem:[#allocation44_spill] sm:$0xff] %v12305_v52  ;;  %v557_v52 = vadd.f32 %v556_v14, %v455_v25  ;;  %v801_v14 = vadd.f32 %v790_v28, %v679_v32  ;;  %v918_v28 = vadd.f32 %v896_v44, %v796_v26  ;;  %v1430_v44 = vpop.permute.xlu1 %1429  ;;  %v1420_v26 = vpop.permute.xlu0 %1419 }
 0x25c   :  { %v902_v47 = vpop.f32.mrf.mxu0  ;;  %v12309_v55 = vpop.f32.mrf.mxu1 }
 0x25d   :  { %15973 = vst [vmem:[#allocation46_spill] sm:$0xff] %v12309_v55  ;;  %v799_v55 = vadd.f32 %v784_v24, %v677_v62  ;;  %v798_v24 = vadd.f32 %v12295_v22, %v676_v19 }
 0x25e   :  { %v906_v48 = vpop.f32.mrf.mxu0  ;;  %v12313_v59 = vpop.f32.mrf.mxu1 }
 0x25f   :  { %15975 = vst [vmem:[#allocation48_spill] sm:$0xff] %v12313_v59  ;;  %v680_v59 = vadd.f32 %v670_v41, %v557_v52  ;;  %v921_v35 = vadd.f32 %v906_v48, %v799_v55  ;;  %v920_v33 = vadd.f32 %v902_v47, %v798_v24  ;;  %v15976_v47 = vld [vmem:[#allocation42_spill] sm:$0xff]  ;;  %v15977_v52 = vld [vmem:[#allocation43_spill] sm:$0xff] }
 0x260   :  { %v908_v50 = vpop.f32.mrf.mxu0  ;;  %v12315_v4 = vpop.f32.mrf.mxu1 }
 0x261   :  { %v922_v17 = vadd.f32 %v908_v50, %v800_v21  ;;  %v802_v25 = vadd.f32 %v792_v30, %v680_v59 }
 0x262   :  { %v912_v51 = vpop.f32.mrf.mxu0  ;;  %v1272_v7 = vpop.f32.mrf.mxu1 }
 0x263   :  { %v923_v6 = vadd.f32 %v912_v51, %v801_v14  ;;  %v1044_v37 = vadd.f32 %v1030_v43, %v922_v17  ;;  %v1040_v43 = vadd.f32 %v15977_v52, %v918_v28 }
 0x264   :  { %v914_v53 = vpop.f32.mrf.mxu0  ;;  %v1274_v0 = vpop.f32.mrf.mxu1  ;;  %v15982_v15 = vld [vmem:[#allocation46_spill] sm:$0xff] }
 0x265   :  { %v1045_v30 = vadd.f32 %v1034_v46, %v923_v6 }
 0x266   :  { %v12307_v54 = vpop.f32.mrf.mxu0  ;;  %v1278_v41 = vpop.f32.mrf.mxu1  ;;  %v15980_v61 = vld [vmem:[#allocation48_spill] sm:$0xff] }
 0x267   :  { %15972 = vst [vmem:[#allocation45_spill] sm:$0xff] %v12307_v54 }
 0x268   :  { %v12311_v56 = vpop.f32.mrf.mxu0 }
 0x269   :  { %15974 = vst [vmem:[#allocation47_spill] sm:$0xff] %v12311_v56  ;;  %v537_v56 = vadd.f32 %v12285_v5, %v435_v12  ;;  %v919_v5 = vadd.f32 %v900_v45, %v797_v8  ;;  %v1043_v12 = vadd.f32 %v1028_v40, %v921_v35  ;;  %v1042_v40 = vadd.f32 %v12303_v38, %v920_v33  ;;  %v1425_v8 = vpop.permute.xlu1 %1424 }
 0x26a   :  { %v1144_v57 = vpop.f32.mrf.mxu0 }
 0x26b   :  { %v673_v11 = vadd.f32 %v650_v27, %v537_v56  ;;  %v924_v27 = vadd.f32 %v914_v53, %v802_v25  ;;  %v1041_v22 = vadd.f32 %v12301_v36, %v919_v5  ;;  %v1280_v36 = vpop.f32.mrf.mxu1 }
 0x26c   :  { %v1146_v60 = vpop.f32.mrf.mxu0 }
 0x26d   :  { %v795_v13 = vadd.f32 %v12289_v16, %v673_v11  ;;  %v1046_v45 = vadd.f32 %v1036_v49, %v924_v27  ;;  %v1163_v16 = vadd.f32 %v1144_v57, %v1041_v22  ;;  %v1164_v53 = vadd.f32 %v1146_v60, %v1042_v40  ;;  %v1457_v40 = vld [vmem:[#allocation7 + $0x20] sm:$0xff] }
 0x26e   :  { %v1150_v63 = vpop.f32.mrf.mxu0  ;;  %v15983_v22 = vmov 0.0  }
 0x26f   :  { %v1165_v39 = vadd.f32 %v1150_v63, %v1043_v12  ;;  %v917_v20 = vadd.f32 %v894_v42, %v795_v13  ;;  %v1285_v57 = vadd.f32 %v15980_v61, %v1163_v16  ;;  %v1286_v2 = vadd.f32 %v12315_v4, %v1164_v53  ;;  %v1460_v16 = vld [vmem:[#allocation7 + $0x38] sm:$0xff] }
 0x270   :  { %v1152_v54 = vpop.f32.mrf.mxu0  ;;  %v15979_v59 = vld [vmem:[#allocation47_spill] sm:$0xff] }
 0x271   :  { %v1166_v34 = vadd.f32 %v1152_v54, %v1044_v37  ;;  %v1287_v50 = vadd.f32 %v1272_v7, %v1165_v39  ;;  %v1039_v51 = vadd.f32 %v15976_v47, %v917_v20  ;;  %v15978_v54 = vld [vmem:[#allocation45_spill] sm:$0xff]  ;;  %v1162_v38 = vadd.f32 %v15979_v59, %v1040_v43  ;;  %v15981_v7 = vld [vmem:[#allocation44_spill] sm:$0xff] }
 0x272   :  { %v1156_v10 = vpop.f32.mrf.mxu0  ;;  %v3113_v59 = vld [vmem:[#allocation8 + $0x10] sm:$0xff] }
 0x273   :  { %v1167_v18 = vadd.f32 %v1156_v10, %v1045_v30  ;;  %v1288_v56 = vadd.f32 %v1274_v0, %v1166_v34  ;;  %v1161_v58 = vadd.f32 %v15978_v54, %v1039_v51  ;;  %v1454_v30 = vld [vmem:[#allocation7 + $0x8] sm:$0xff]  ;;  %v1455_v34 = vld [vmem:[#allocation7 + $0x10] sm:$0xff]  ;;  %v1462_v54 = vld [vmem:[#allocation7 + $0x40] sm:$0xff] }
 0x274   :  { %v1158_v23 = vpop.f32.mrf.mxu0 }
 0x275   :  { %v1168_v42 = vadd.f32 %v1158_v23, %v1046_v45  ;;  %v1289_v62 = vadd.f32 %v1278_v41, %v1167_v18  ;;  %v1283_v11 = vadd.f32 %v15981_v7, %v1161_v58  ;;  %v1284_v23 = vadd.f32 %v15982_v15, %v1162_v38  ;;  %v1456_v41 = vld [vmem:[#allocation7 + $0x18] sm:$0xff]  ;;  %v1458_v45 = vld [vmem:[#allocation7 + $0x28] sm:$0xff] }
 0x276   :  { %v1382_v31 = vpop.f32.mrf.mxu0  ;;  %v1465_v7 = vld [vmem:[#allocation7 + $0x58] sm:$0xff] }
 0x277   :  { %v1290_v60 = vadd.f32 %v1280_v36, %v1168_v42  ;;  %v1405_v4 = vadd.f32 %v1382_v31, %v1283_v11  ;;  %v3112_v36 = vld [vmem:[#allocation8 + $0x8] sm:$0xff] }
 0x278   :  { %v1384_v29 = vpop.f32.mrf.mxu0 }
 0x279   :  { %v1406_v12 = vadd.f32 %v1384_v29, %v1284_v23  ;;  %v1437_v37 = vadd.f32 %v1420_v26, %v1405_v4 }
 0x27a   :  { %v1388_v32 = vpop.f32.mrf.mxu0 }
 0x27b   :  { %v1407_v19 = vadd.f32 %v1388_v32, %v1285_v57  ;;  %v1438_v39 = vadd.f32 %v1420_v26, %v1406_v12  ;;  %v12359_v29 = vmax.f32 %v1437_v37, 0.0  ;;  %v1453_v32 = vld [vmem:[#allocation7] sm:$0xff]  ;;  %v1463_v57 = vld [vmem:[#allocation7 + $0x48] sm:$0xff]  ;;  %v1468_v12 = vld [vmem:[#allocation7 + $0x70] sm:$0xff] }
 0x27c   :  { %v1390_v48 = vpop.f32.mrf.mxu0 }
 0x27d   :  { %v1408_v17 = vadd.f32 %v1390_v48, %v1286_v2  ;;  %v1439_v6 = vadd.f32 %v1425_v8, %v1407_v19  ;;  %v12361_v28 = vmax.f32 %v1438_v39, 0.0  ;;  %v1459_v48 = vld [vmem:[#allocation7 + $0x30] sm:$0xff] }
 0x27e   :  { %v1394_v55 = vpop.f32.mrf.mxu0 }
 0x27f   :  { %v1409_v46 = vadd.f32 %v1394_v55, %v1287_v50  ;;  %v1440_v33 = vadd.f32 %v1425_v8, %v1408_v17  ;;  %v12347_v20 = vmax.f32 %v1439_v6, 0.0  ;;  %v3111_v55 = vld [vmem:[#allocation8] sm:$0xff] }
 0x280   :  { %v1396_v49 = vpop.f32.mrf.mxu0  ;;  %v1466_v8 = vld [vmem:[#allocation7 + $0x60] sm:$0xff] }
 0x281   :  { %v1441_v63 = vadd.f32 %v1430_v44, %v1409_v46  ;;  %v1410_v1 = vadd.f32 %v1396_v49, %v1288_v56  ;;  %v12353_v31 = vmax.f32 %v1440_v33, 0.0  ;;  %v3114_v49 = vld [vmem:[#allocation8 + $0x18] sm:$0xff] }
 0x282   :  { %v1400_v9 = vpop.f32.mrf.mxu0 }
 0x283   :  { %v12331_v10 = vmax.f32 %v1441_v63, 0.0  ;;  %v1442_v21 = vadd.f32 %v1430_v44, %v1410_v1  ;;  %v1411_v35 = vadd.f32 %v1400_v9, %v1289_v62  ;;  %v3115_v62 = vld [vmem:[#allocation8 + $0x20] sm:$0xff]  ;;  %v3116_v1 = vld [vmem:[#allocation8 + $0x28] sm:$0xff]  ;;  %v3117_v9 = vld [vmem:[#allocation8 + $0x30] sm:$0xff] }
 0x284   :  { %v1402_v14 = vpop.f32.mrf.mxu0 }
 0x285   :  { %v12335_v24 = vmax.f32 %v1442_v21, 0.0  ;;  %v1443_v25 = vadd.f32 %v1435_v3, %v1411_v35  ;;  %v1412_v5 = vadd.f32 %v1402_v14, %v1290_v60  ;;  %1486 = vrot.lane.b32.xlu1 %v12331_v10, %s11929_s28  ;;  %v3118_v21 = vld [vmem:[#allocation8 + $0x38] sm:$0xff] }
 0x287   :  { %v12339_v0 = vmax.f32 %v1443_v25, 0.0  ;;  %v1444_v13 = vadd.f32 %v1435_v3, %v1412_v5  ;;  %1488 = vrot.lane.b32.xlu0 %v12335_v24, %s11929_s28  ;;  %v1464_v3 = vld [vmem:[#allocation7 + $0x50] sm:$0xff]  ;;  %v1467_v25 = vld [vmem:[#allocation7 + $0x68] sm:$0xff] }
 0x289   :  { %v12343_v27 = vmax.f32 %v1444_v13, 0.0  ;;  %1490 = vrot.lane.b32.xlu1 %v12339_v0, %s11929_s28  ;;  %v1469_v13 = vld [vmem:[#allocation7 + $0x78] sm:$0xff] }
 0x28b   :  { %1692 = vmatprep.subr.mxu0 %v12343_v27  ;;  %1492 = vrot.lane.b32.xlu0 %v12343_v27, %s11929_s28 }
 0x28c   :  { %1693 = vmatpush1.msra.mxu0 %v12339_v0 }
 0x28d   :  { %1694 = vmatprep.subr.mxu0 %v12335_v24  ;;  %1482 = vrot.lane.b32.xlu1 %v12347_v20, %s11929_s28 }
 0x28e   :  { %1695 = vmatpush1.msra.mxu0 %v12331_v10 }
 0x28f   :  { %1484 = vrot.lane.b32.xlu0 %v12353_v31, %s11929_s28  ;;  %1696 = vmatprep.subr.mxu0 %v12353_v31 }
 0x290   :  { %1697 = vmatpush1.msra.mxu0 %v12347_v20 }
 0x291   :  { %1698 = vmatprep.subr.mxu0 %v12361_v28  ;;  %1478 = vrot.lane.b32.xlu1 %v12359_v29, %s11929_s28 }
 0x292   :  { %1699 = vmatpush1.msra.mxu0 %v12359_v29 }
 0x293   :  { %1480 = vrot.lane.b32.xlu0 %v12361_v28, %s11929_s28  ;;  %10461 = vmatmul.mubr.msk.f32.vlgmr.msra.gmra.mxu0 %vm1506_vm9, %v1453_v32 }
 0x294   :  { %1738 = vmatprep.mubr.f32.mxu0 %v15983_v22 }
 0x295   :  { %1802 = vrot.lane.b32.xlu1 %v12339_v0, %s11930_s7 }
 0x297   :  { %1800 = vrot.lane.b32.xlu0 %v12335_v24, %s11930_s7  ;;  %10462 = vmatmul.mubr.msk.f32.gmra.mxu0 %vm1506_vm9, %v1454_v30  ;;  %v1784_v30 = vld [vmem:[#allocation7 + $0x90] sm:$0xff] }
 0x298   :  { %1744 = vmatprep.mubr.f32.mxu0 %v15983_v22 }
 0x299   :  { %1798 = vrot.lane.b32.xlu1 %v12331_v10, %s11930_s7 }
 0x29b   :  { %1804 = vrot.lane.b32.xlu0 %v12343_v27, %s11930_s7  ;;  %10463 = vmatmul.mubr.msk.f32.gmra.mxu0 %vm1506_vm9, %v1455_v34 }
 0x29c   :  { %1750 = vmatprep.mubr.f32.mxu0 %v15983_v22 }
 0x29d   :  { %1794 = vrot.lane.b32.xlu1 %v12347_v20, %s11930_s7 }
 0x29f   :  { %1796 = vrot.lane.b32.xlu0 %v12353_v31, %s11930_s7  ;;  %10464 = vmatmul.mubr.msk.f32.gmra.mxu0 %vm1506_vm9, %v1456_v41 }
 0x2a0   :  { %1756 = vmatprep.mubr.f32.mxu0 %v15983_v22 }
 0x2a1   :  { %1790 = vrot.lane.b32.xlu1 %v12359_v29, %s11930_s7 }
 0x2a3   :  { %1792 = vrot.lane.b32.xlu0 %v12361_v28, %s11930_s7  ;;  %10465 = vmatmul.mubr.msk.f32.gmra.mxu0 %vm1506_vm9, %v1457_v40 }
 0x2a4   :  { %1762 = vmatprep.mubr.f32.mxu0 %v15983_v22 }
 0x2a5   :  { %1992 = vrot.lane.b32.xlu1 %v12339_v0, %s11931_s0 }
 0x2a7   :  { %1990 = vrot.lane.b32.xlu0 %v12335_v24, %s11931_s0  ;;  %10466 = vmatmul.mubr.msk.f32.gmra.mxu0 %vm1506_vm9, %v1458_v45  ;;  %v1972_v45 = vld [vmem:[#allocation7 + $0xc0] sm:$0xff] }
 0x2a8   :  { %1768 = vmatprep.mubr.f32.mxu0 %v15983_v22 }
 0x2a9   :  { %1988 = vrot.lane.b32.xlu1 %v12331_v10, %s11931_s0 }
 0x2ab   :  { %1986 = vrot.lane.b32.xlu0 %v12353_v31, %s11931_s0  ;;  %10467 = vmatmul.mubr.msk.f32.gmra.mxu0 %vm1506_vm9, %v1459_v48 }
 0x2ac   :  { %1774 = vmatprep.mubr.f32.mxu0 %v15983_v22 }
 0x2ad   :  { %2182 = vrot.lane.b32.xlu1 %v12339_v0, %s11932_s9 }
 0x2af   :  { %2180 = vrot.lane.b32.xlu0 %v12335_v24, %s11932_s9  ;;  %10468 = vmatmul.mubr.msk.f32.gmra.mxu0 %vm1506_vm9, %v1460_v16 }
 0x2b0   :  { %2096 = vmatprep.mubr.f32.mxu0 %v15983_v22 }
 0x2b1   :  { %1984 = vrot.lane.b32.xlu1 %v12347_v20, %s11931_s0 }
 0x2b3   :  { %1982 = vrot.lane.b32.xlu0 %v12361_v28, %s11931_s0 }
 0x2b5   :  { %2178 = vrot.lane.b32.xlu1 %v12331_v10, %s11932_s9 }
 0x2b7   :  { %1994 = vrot.lane.b32.xlu0 %v12343_v27, %s11931_s0 }
 0x2b9   :  { %1980 = vrot.lane.b32.xlu1 %v12359_v29, %s11931_s0 }
 0x2bb   :  { %2184 = vrot.lane.b32.xlu0 %v12343_v27, %s11932_s9 }
 0x2bd   :  { %2174 = vrot.lane.b32.xlu1 %v12347_v20, %s11932_s9 }
 0x2bf   :  { %2176 = vrot.lane.b32.xlu0 %v12353_v31, %s11932_s9 }
 0x2c1   :  { %2170 = vrot.lane.b32.xlu1 %v12359_v29, %s11932_s9 }
 0x2c3   :  { %2172 = vrot.lane.b32.xlu0 %v12361_v28, %s11932_s9 }
 0x2c5   :  { %2372 = vrot.lane.b32.xlu1 %v12339_v0, %s11933_s13 }
 0x2c7   :  { %2370 = vrot.lane.b32.xlu0 %v12335_v24, %s11933_s13 }
 0x2c9   :  { %2368 = vrot.lane.b32.xlu1 %v12331_v10, %s11933_s13 }
 0x2cb   :  { %2366 = vrot.lane.b32.xlu0 %v12353_v31, %s11933_s13 }
 0x2cd   :  { %2562 = vrot.lane.b32.xlu1 %v12339_v0, %s11934_s29 }
 0x2cf   :  { %2560 = vrot.lane.b32.xlu0 %v12335_v24, %s11934_s29 }
 0x2d1   :  { %2364 = vrot.lane.b32.xlu1 %v12347_v20, %s11933_s13 }
 0x2d3   :  { %2362 = vrot.lane.b32.xlu0 %v12361_v28, %s11933_s13 }
 0x2d5   :  { %2558 = vrot.lane.b32.xlu1 %v12331_v10, %s11934_s29 }
 0x2d7   :  { %2374 = vrot.lane.b32.xlu0 %v12343_v27, %s11933_s13 }
 0x2d9   :  { %2360 = vrot.lane.b32.xlu1 %v12359_v29, %s11933_s13 }
 0x2db   :  { %2564 = vrot.lane.b32.xlu0 %v12343_v27, %s11934_s29 }
 0x2dd   :  { %2554 = vrot.lane.b32.xlu1 %v12347_v20, %s11934_s29 }
 0x2df   :  { %2556 = vrot.lane.b32.xlu0 %v12353_v31, %s11934_s29 }
 0x2e1   :  { %2550 = vrot.lane.b32.xlu1 %v12359_v29, %s11934_s29 }
 0x2e3   :  { %2552 = vrot.lane.b32.xlu0 %v12361_v28, %s11934_s29 }
 0x2e5   :  { %2752 = vrot.lane.b32.xlu1 %v12339_v0, %s11935_s30 }
 0x2e7   :  { %2750 = vrot.lane.b32.xlu0 %v12335_v24, %s11935_s30 }
 0x2e9   :  { %2748 = vrot.lane.b32.xlu1 %v12331_v10, %s11935_s30 }
 0x2eb   :  { %2746 = vrot.lane.b32.xlu0 %v12353_v31, %s11935_s30 }
 0x2ed   :  { %2942 = vrot.lane.b32.xlu1 %v12339_v0, %s11936_s1 }
 0x2ef   :  { %2940 = vrot.lane.b32.xlu0 %v12335_v24, %s11936_s1 }
 0x2f1   :  { %2744 = vrot.lane.b32.xlu1 %v12347_v20, %s11935_s30 }
 0x2f3   :  { %2742 = vrot.lane.b32.xlu0 %v12361_v28, %s11935_s30 }
 0x2f5   :  { %2938 = vrot.lane.b32.xlu1 %v12331_v10, %s11936_s1 }
 0x2f7   :  { %v1487_v50 = vpop.permute.xlu1 %1486  ;;  %2754 = vrot.lane.b32.xlu0 %v12343_v27, %s11935_s30 }
 0x2f9   :  { %v1489_v18 = vpop.permute.xlu0 %1488  ;;  %2740 = vrot.lane.b32.xlu1 %v12359_v29, %s11935_s30 }
 0x2fa   :  { %v1496_v53 = vsel %vm352_vm1, %v1487_v50, %v1489_v18 }
 0x2fb   :  { %v1491_v47 = vpop.permute.xlu1 %1490  ;;  %2944 = vrot.lane.b32.xlu0 %v12343_v27, %s11936_s1  ;;  %v1782_v27 = vld [vmem:[#allocation7 + $0x80] sm:$0xff] }
 0x2fd   :  { %v1493_v51 = vpop.permute.xlu0 %1492  ;;  %2934 = vrot.lane.b32.xlu1 %v12347_v20, %s11936_s1  ;;  %v1783_v20 = vld [vmem:[#allocation7 + $0x88] sm:$0xff] }
 0x2fe   :  { %1555 = vmatprep.subr.mxu1 %v1493_v51  ;;  %v1497_v52 = vsel %vm352_vm1, %v1491_v47, %v1493_v51  ;;  %v1785_v47 = vld [vmem:[#allocation7 + $0x98] sm:$0xff] }
 0x2ff   :  { %1556 = vmatpush1.msra.mxu1 %v1497_v52  ;;  %v1483_v43 = vpop.permute.xlu1 %1482  ;;  %2936 = vrot.lane.b32.xlu0 %v12353_v31, %s11936_s1  ;;  %v1973_v52 = vld [vmem:[#allocation7 + $0xc8] sm:$0xff] }
 0x300   :  { %1557 = vmatprep.subr.mxu1 %v1489_v18 }
 0x301   :  { %1558 = vmatpush1.msra.mxu1 %v1496_v53  ;;  %v1485_v42 = vpop.permute.xlu0 %1484  ;;  %2930 = vrot.lane.b32.xlu1 %v12359_v29, %s11936_s1 }
 0x302   :  { %1559 = vmatprep.subr.mxu1 %v1485_v42  ;;  %v1495_v44 = vsel %vm352_vm1, %v1483_v43, %v1485_v42  ;;  %v1786_v42 = vld [vmem:[#allocation7 + $0xa0] sm:$0xff] }
 0x303   :  { %1560 = vmatpush1.msra.mxu1 %v1495_v44  ;;  %2932 = vrot.lane.b32.xlu0 %v12361_v28, %s11936_s1  ;;  %v1479_v56 = vpop.permute.xlu1 %1478 }
 0x305   :  { %v1481_v46 = vpop.permute.xlu0 %1480  ;;  %3121 = vperm.xlu1 %11494, %v3111_v55   ;;  %v1974_v55 = vld [vmem:[#allocation7 + $0xd0] sm:$0xff] }
 0x306   :  { %1561 = vmatprep.subr.mxu1 %v1481_v46  ;;  %v1494_v58 = vsel %vm352_vm1, %v1479_v56, %v1481_v46 }
 0x307   :  { %3126 = vperm.xlu0 %11493, %v3112_v36   ;;  %1562 = vmatpush1.msra.mxu1 %v1494_v58  ;;  %v1803_v38 = vpop.permute.xlu1 %1802  ;;  %v1787_v36 = vld [vmem:[#allocation7 + $0xa8] sm:$0xff] }
 0x308   :  { %10453 = vmatmul.mubr.msk.f32.vlgmr.msra.gmra.mxu1 %vm1506_vm9, %v1462_v54  ;;  %v1975_v54 = vld [vmem:[#allocation7 + $0xd8] sm:$0xff] }
 0x309   :  { %v1801_v61 = vpop.permute.xlu0 %1800  ;;  %3131 = vperm.xlu1 %11494, %v3113_v59   ;;  %1601 = vmatprep.mubr.f32.mxu1 %v15983_v22  ;;  %v1788_v59 = vld [vmem:[#allocation7 + $0xb0] sm:$0xff] }
 0x30b   :  { %3136 = vperm.xlu0 %11493, %v3114_v49   ;;  %v1799_v63 = vpop.permute.xlu1 %1798  ;;  %v1976_v49 = vld [vmem:[#allocation7 + $0xe0] sm:$0xff] }
 0x30c   :  { %10454 = vmatmul.mubr.msk.f32.gmra.mxu1 %vm1506_vm9, %v1463_v57  ;;  %v1808_v10 = vsel %vm568_vm2, %v1799_v63, %v1801_v61  ;;  %v1789_v57 = vld [vmem:[#allocation7 + $0xb8] sm:$0xff]  ;;  %v1977_v63 = vld [vmem:[#allocation7 + $0xe8] sm:$0xff] }
 0x30d   :  { %v1805_v2 = vpop.permute.xlu0 %1804  ;;  %3141 = vperm.xlu1 %11494, %v3115_v62   ;;  %1607 = vmatprep.mubr.f32.mxu1 %v15983_v22 }
 0x30e   :  { %1866 = vmatprep.subr.mxu1 %v1805_v2  ;;  %v1809_v60 = vsel %vm568_vm2, %v1803_v38, %v1805_v2  ;;  %v2162_v2 = vld [vmem:[#allocation7 + $0x100] sm:$0xff] }
 0x30f   :  { %3146 = vperm.xlu0 %11493, %v3116_v1   ;;  %1867 = vmatpush1.msra.mxu1 %v1809_v60  ;;  %v1795_v19 = vpop.permute.xlu1 %1794  ;;  %v1978_v60 = vld [vmem:[#allocation7 + $0xf0] sm:$0xff] }
 0x310   :  { %10455 = vmatmul.mubr.msk.f32.gmra.mxu1 %vm1506_vm9, %v1464_v3  ;;  %1868 = vmatprep.subr.mxu1 %v1801_v61 }
 0x311   :  { %v1797_v35 = vpop.permute.xlu0 %1796  ;;  %3151 = vperm.xlu1 %11494, %v3117_v9   ;;  %1869 = vmatpush1.msra.mxu1 %v1808_v10  ;;  %v2163_v10 = vld [vmem:[#allocation7 + $0x108] sm:$0xff] }
 0x312   :  { %1870 = vmatprep.subr.mxu1 %v1797_v35  ;;  %1613 = vmatprep.mubr.f32.mxu1 %v15983_v22  ;;  %v1807_v11 = vsel %vm568_vm2, %v1795_v19, %v1797_v35  ;;  %v1979_v35 = vld [vmem:[#allocation7 + $0xf8] sm:$0xff] }
 0x313   :  { %3156 = vperm.xlu0 %11493, %v3118_v21   ;;  %1871 = vmatpush1.msra.mxu1 %v1807_v11  ;;  %v1791_v15 = vpop.permute.xlu1 %1790 }
 0x314   :  { %10456 = vmatmul.mubr.msk.f32.gmra.mxu1 %vm1506_vm9, %v1465_v7 }
 0x315   :  { %v1793_v23 = vpop.permute.xlu0 %1792  ;;  %1619 = vmatprep.mubr.f32.mxu1 %v15983_v22 }
 0x316   :  { %1872 = vmatprep.subr.mxu1 %v1793_v23  ;;  %v1806_v14 = vsel %vm568_vm2, %v1791_v15, %v1793_v23  ;;  %v2164_v23 = vld [vmem:[#allocation7 + $0x110] sm:$0xff] }
 0x317   :  { %1873 = vmatpush1.msra.mxu1 %v1806_v14  ;;  %v1993_v17 = vpop.permute.xlu1 %1992 }
 0x318   :  { %10457 = vmatmul.mubr.msk.f32.gmra.mxu1 %vm1506_vm9, %v1466_v8 }
 0x319   :  { %v1991_v24 = vpop.permute.xlu0 %1990  ;;  %1625 = vmatprep.mubr.f32.mxu1 %v15983_v22 }
 0x31b   :  { %v1989_v5 = vpop.permute.xlu1 %1988 }
 0x31c   :  { %10458 = vmatmul.mubr.msk.f32.gmra.mxu1 %vm1506_vm9, %v1467_v25  ;;  %v1998_v28 = vsel %vm690_vm3, %v1989_v5, %v1991_v24  ;;  %v2352_v25 = vld [vmem:[#allocation7 + $0x140] sm:$0xff] }
 0x31d   :  { %v1987_v4 = vpop.permute.xlu0 %1986  ;;  %1631 = vmatprep.mubr.f32.mxu1 %v15983_v22 }
 0x31f   :  { %v2183_v6 = vpop.permute.xlu1 %2182 }
 0x320   :  { %10459 = vmatmul.mubr.msk.f32.gmra.mxu1 %vm1506_vm9, %v1468_v12 }
 0x321   :  { %v2181_v0 = vpop.permute.xlu0 %2180  ;;  %1637 = vmatprep.mubr.f32.mxu1 %v15983_v22 }
 0x323   :  { %v1985_v26 = vpop.permute.xlu1 %1984 }
 0x324   :  { %10460 = vmatmul.mubr.msk.f32.gmra.mxu1 %vm1506_vm9, %v1469_v13  ;;  %v1997_v34 = vsel %vm690_vm3, %v1985_v26, %v1987_v4  ;;  %v2353_v13 = vld [vmem:[#allocation7 + $0x148] sm:$0xff] }
 0x325   :  { %v1983_v33 = vpop.permute.xlu0 %1982  ;;  %1906 = vmatprep.mubr.f32.mxu1 %v15983_v22 }
 0x327   :  { %v2179_v37 = vpop.permute.xlu1 %2178 }
 0x328   :  { %10469 = vmatmul.mubr.msk.f32.vlgmr.msra.gmra.mxu1 %vm1506_vm9, %v1782_v27  ;;  %v2188_v16 = vsel %vm812_vm5, %v2179_v37, %v2181_v0  ;;  %v2166_v27 = vld [vmem:[#allocation7 + $0x120] sm:$0xff] }
 0x329   :  { %v1995_v39 = vpop.permute.xlu0 %1994  ;;  %1912 = vmatprep.mubr.f32.mxu1 %v15983_v22 }
 0x32a   :  { %2056 = vmatprep.subr.mxu0 %v1995_v39  ;;  %v1999_v31 = vsel %vm690_vm3, %v1993_v17, %v1995_v39  ;;  %v2354_v39 = vld [vmem:[#allocation7 + $0x150] sm:$0xff] }
 0x32b   :  { %v1981_v29 = vpop.permute.xlu1 %1980  ;;  %2057 = vmatpush1.msra.mxu0 %v1999_v31  ;;  %v2167_v31 = vld [vmem:[#allocation7 + $0x128] sm:$0xff] }
 0x32c   :  { %10470 = vmatmul.mubr.msk.f32.gmra.mxu1 %vm1506_vm9, %v1783_v20  ;;  %2058 = vmatprep.subr.mxu0 %v1991_v24  ;;  %v1996_v48 = vsel %vm690_vm3, %v1981_v29, %v1983_v33  ;;  %vm7182_vm3 = vcmask 891904  }
 0x32d   :  { %v2185_v32 = vpop.permute.xlu0 %2184  ;;  %2059 = vmatpush1.msra.mxu0 %v1998_v28  ;;  %1918 = vmatprep.mubr.f32.mxu1 %v15983_v22  ;;  %v2355_v28 = vld [vmem:[#allocation7 + $0x158] sm:$0xff] }
 0x32e   :  { %2060 = vmatprep.subr.mxu0 %v1987_v4  ;;  %2246 = vmatprep.subr.mxu1 %v2185_v32  ;;  %v2189_v41 = vsel %vm812_vm5, %v2183_v6, %v2185_v32  ;;  %v2165_v6 = vld [vmem:[#allocation7 + $0x118] sm:$0xff] }
 0x32f   :  { %2247 = vmatpush1.msra.mxu1 %v2189_v41  ;;  %v2175_v40 = vpop.permute.xlu1 %2174  ;;  %2061 = vmatpush1.msra.mxu0 %v1997_v34  ;;  %v2356_v41 = vld [vmem:[#allocation7 + $0x160] sm:$0xff] }
 0x330   :  { %10471 = vmatmul.mubr.msk.f32.gmra.mxu1 %vm1506_vm9, %v1784_v30  ;;  %2062 = vmatprep.subr.mxu0 %v1983_v33  ;;  %v2168_v30 = vld [vmem:[#allocation7 + $0x130] sm:$0xff] }
 0x331   :  { %2248 = vmatprep.subr.mxu1 %v2181_v0  ;;  %v2177_v50 = vpop.permute.xlu0 %2176  ;;  %2063 = vmatpush1.msra.mxu0 %v1996_v48 }
 0x332   :  { %2249 = vmatpush1.msra.mxu1 %v2188_v16  ;;  %10477 = vmatmul.mubr.msk.f32.vlgmr.msra.gmra.mxu0 %vm1506_vm9, %v1972_v45  ;;  %v2187_v18 = vsel %vm812_vm5, %v2175_v40, %v2177_v50  ;;  %v2169_v45 = vld [vmem:[#allocation7 + $0x138] sm:$0xff]  ;;  %v2357_v16 = vld [vmem:[#allocation7 + $0x168] sm:$0xff] }
 0x333   :  { %2250 = vmatprep.subr.mxu1 %v2177_v50  ;;  %1924 = vmatprep.mubr.f32.mxu1 %v15983_v22  ;;  %v2171_v51 = vpop.permute.xlu1 %2170 }
 0x334   :  { %2251 = vmatpush1.msra.mxu1 %v2187_v18  ;;  %2102 = vmatprep.mubr.f32.mxu0 %v15983_v22  ;;  %v2542_v18 = vld [vmem:[#allocation7 + $0x180] sm:$0xff] }
 0x335   :  { %10472 = vmatmul.mubr.msk.f32.gmra.mxu1 %vm1506_vm9, %v1785_v47  ;;  %v2173_v43 = vpop.permute.xlu0 %2172 }
 0x336   :  { %10478 = vmatmul.mubr.msk.f32.gmra.mxu0 %vm1506_vm9, %v1973_v52  ;;  %2252 = vmatprep.subr.mxu1 %v2173_v43  ;;  %v2186_v53 = vsel %vm812_vm5, %v2171_v51, %v2173_v43  ;;  %v2358_v51 = vld [vmem:[#allocation7 + $0x170] sm:$0xff]  ;;  %vm7474_vm5 = vcmask 883712  }
 0x337   :  { %1930 = vmatprep.mubr.f32.mxu1 %v15983_v22  ;;  %2253 = vmatpush1.msra.mxu1 %v2186_v53  ;;  %v2373_v44 = vpop.permute.xlu1 %2372  ;;  %v2543_v53 = vld [vmem:[#allocation7 + $0x188] sm:$0xff] }
 0x338   :  { %2108 = vmatprep.mubr.f32.mxu0 %v15983_v22 }
 0x339   :  { %10473 = vmatmul.mubr.msk.f32.gmra.mxu1 %vm1506_vm9, %v1786_v42  ;;  %v2371_v56 = vpop.permute.xlu0 %2370 }
 0x33a   :  { %10479 = vmatmul.mubr.msk.f32.gmra.mxu0 %vm1506_vm9, %v1974_v55  ;;  %1936 = vmatprep.mubr.f32.mxu1 %v15983_v22  ;;  %v2359_v55 = vld [vmem:[#allocation7 + $0x178] sm:$0xff] }
 0x33b   :  { %v2369_v46 = vpop.permute.xlu1 %2368  ;;  %2114 = vmatprep.mubr.f32.mxu0 %v15983_v22 }
 0x33c   :  { %v2378_v7 = vsel %vm934_vm4, %v2369_v46, %v2371_v56  ;;  %v2544_v46 = vld [vmem:[#allocation7 + $0x190] sm:$0xff] }
 0x33d   :  { %10474 = vmatmul.mubr.msk.f32.gmra.mxu1 %vm1506_vm9, %v1787_v36  ;;  %v2367_v58 = vpop.permute.xlu0 %2366 }
 0x33e   :  { %10480 = vmatmul.mubr.msk.f32.gmra.mxu0 %vm1506_vm9, %v1975_v54  ;;  %1942 = vmatprep.mubr.f32.mxu1 %v15983_v22 }
 0x33f   :  { %v2563_v38 = vpop.permute.xlu1 %2562  ;;  %2120 = vmatprep.mubr.f32.mxu0 %v15983_v22 }
 0x341   :  { %10475 = vmatmul.mubr.msk.f32.gmra.mxu1 %vm1506_vm9, %v1788_v59  ;;  %v2561_v61 = vpop.permute.xlu0 %2560  ;;  %v2732_v59 = vld [vmem:[#allocation7 + $0x1c0] sm:$0xff] }
 0x342   :  { %10481 = vmatmul.mubr.msk.f32.gmra.mxu0 %vm1506_vm9, %v1976_v49  ;;  %1948 = vmatprep.mubr.f32.mxu1 %v15983_v22 }
 0x343   :  { %v2365_v62 = vpop.permute.xlu1 %2364  ;;  %2126 = vmatprep.mubr.f32.mxu0 %v15983_v22 }
 0x344   :  { %v2377_v8 = vsel %vm934_vm4, %v2365_v62, %v2367_v58 }
 0x345   :  { %10476 = vmatmul.mubr.msk.f32.gmra.mxu1 %vm1506_vm9, %v1789_v57  ;;  %v2363_v1 = vpop.permute.xlu0 %2362  ;;  %v2545_v57 = vld [vmem:[#allocation7 + $0x198] sm:$0xff] }
 0x346   :  { %10482 = vmatmul.mubr.msk.f32.gmra.mxu0 %vm1506_vm9, %v1977_v63  ;;  %2286 = vmatprep.mubr.f32.mxu1 %v15983_v22 }
 0x347   :  { %v2559_v3 = vpop.permute.xlu1 %2558  ;;  %2132 = vmatprep.mubr.f32.mxu0 %v15983_v22 }
 0x348   :  { %v2568_v5 = vsel %vm1056_vm7, %v2559_v3, %v2561_v61  ;;  %v2546_v3 = vld [vmem:[#allocation7 + $0x1a0] sm:$0xff] }
 0x349   :  { %10485 = vmatmul.mubr.msk.f32.vlgmr.msra.gmra.mxu1 %vm1506_vm9, %v2162_v2  ;;  %v2375_v9 = vpop.permute.xlu0 %2374 }
 0x34a   :  { %10483 = vmatmul.mubr.msk.f32.gmra.mxu0 %vm1506_vm9, %v1978_v60  ;;  %2436 = vmatprep.subr.mxu0 %v2375_v9  ;;  %v2379_v19 = vsel %vm934_vm4, %v2373_v44, %v2375_v9  ;;  %v2734_v60 = vld [vmem:[#allocation7 + $0x1d0] sm:$0xff]  ;;  %v2547_v9 = vld [vmem:[#allocation7 + $0x1a8] sm:$0xff] }
 0x34b   :  { %2292 = vmatprep.mubr.f32.mxu1 %v15983_v22  ;;  %v2361_v21 = vpop.permute.xlu1 %2360  ;;  %2437 = vmatpush1.msra.mxu0 %v2379_v19  ;;  %v2735_v19 = vld [vmem:[#allocation7 + $0x1d8] sm:$0xff] }
 0x34c   :  { %2438 = vmatprep.subr.mxu0 %v2371_v56  ;;  %2138 = vmatprep.mubr.f32.mxu0 %v15983_v22  ;;  %v2376_v17 = vsel %vm934_vm4, %v2361_v21, %v2363_v1  ;;  %v2736_v21 = vld [vmem:[#allocation7 + $0x1e0] sm:$0xff] }
 0x34d   :  { %10486 = vmatmul.mubr.msk.f32.gmra.mxu1 %vm1506_vm9, %v2163_v10  ;;  %v2565_v11 = vpop.permute.xlu0 %2564  ;;  %2439 = vmatpush1.msra.mxu0 %v2378_v7  ;;  %v2548_v10 = vld [vmem:[#allocation7 + $0x1b0] sm:$0xff]  ;;  %v2737_v7 = vld [vmem:[#allocation7 + $0x1e8] sm:$0xff] }
 0x34e   :  { %10484 = vmatmul.mubr.msk.f32.gmra.mxu0 %vm1506_vm9, %v1979_v35  ;;  %2440 = vmatprep.subr.mxu0 %v2367_v58  ;;  %v2569_v15 = vsel %vm1056_vm7, %v2563_v38, %v2565_v11  ;;  %v2549_v35 = vld [vmem:[#allocation7 + $0x1b8] sm:$0xff] }
 0x34f   :  { %2626 = vmatprep.subr.mxu1 %v2565_v11  ;;  %2298 = vmatprep.mubr.f32.mxu1 %v15983_v22  ;;  %v2555_v14 = vpop.permute.xlu1 %2554  ;;  %v2922_v11 = vld [vmem:[#allocation7 + $0x200] sm:$0xff] }
 0x350   :  { %2627 = vmatpush1.msra.mxu1 %v2569_v15  ;;  %2441 = vmatpush1.msra.mxu0 %v2377_v8  ;;  %v2738_v15 = vld [vmem:[#allocation7 + $0x1f0] sm:$0xff]  ;;  %v2739_v8 = vld [vmem:[#allocation7 + $0x1f8] sm:$0xff] }
 0x351   :  { %10487 = vmatmul.mubr.msk.f32.gmra.mxu1 %vm1506_vm9, %v2164_v23  ;;  %2442 = vmatprep.subr.mxu0 %v2363_v1  ;;  %v2557_v24 = vpop.permute.xlu0 %2556  ;;  %v2733_v1 = vld [vmem:[#allocation7 + $0x1c8] sm:$0xff] }
 0x352   :  { %2628 = vmatprep.subr.mxu1 %v2561_v61  ;;  %2443 = vmatpush1.msra.mxu0 %v2376_v17  ;;  %v2567_v4 = vsel %vm1056_vm7, %v2555_v14, %v2557_v24  ;;  %v2923_v23 = vld [vmem:[#allocation7 + $0x208] sm:$0xff]  ;;  %v2924_v17 = vld [vmem:[#allocation7 + $0x210] sm:$0xff] }
 0x353   :  { %2476 = vmatprep.mubr.f32.mxu0 %v15983_v22  ;;  %2629 = vmatpush1.msra.mxu1 %v2568_v5  ;;  %v2551_v12 = vpop.permute.xlu1 %2550  ;;  %v3192_v14 = vld [vmem:[#allocation11 + $0x8] sm:$0xf] }
 0x354   :  { %10493 = vmatmul.mubr.msk.f32.vlgmr.msra.gmra.mxu0 %vm1506_vm9, %v2352_v25  ;;  %2630 = vmatprep.subr.mxu1 %v2557_v24  ;;  %v2925_v24 = vld [vmem:[#allocation7 + $0x218] sm:$0xff]  ;;  %v2926_v25 = vld [vmem:[#allocation7 + $0x220] sm:$0xff]  ;;  %v2927_v5 = vld [vmem:[#allocation7 + $0x228] sm:$0xff] }
 0x355   :  { %2304 = vmatprep.mubr.f32.mxu1 %v15983_v22  ;;  %2631 = vmatpush1.msra.mxu1 %v2567_v4  ;;  %v2553_v0 = vpop.permute.xlu0 %2552  ;;  %v3191_v4 = vld [vmem:[#allocation11] sm:$0xff] }
 0x356   :  { %10488 = vmatmul.mubr.msk.f32.gmra.mxu1 %vm1506_vm9, %v2165_v6  ;;  %2482 = vmatprep.mubr.f32.mxu0 %v15983_v22  ;;  %v2566_v26 = vsel %vm1056_vm7, %v2551_v12, %v2553_v0  ;;  %v2928_v12 = vld [vmem:[#allocation7 + $0x230] sm:$0xff]  ;;  %v2929_v6 = vld [vmem:[#allocation7 + $0x238] sm:$0xff]  ;;  %vm8058_vm7 = vcmask 744448  }
 0x357   :  { %2632 = vmatprep.subr.mxu1 %v2553_v0  ;;  %2310 = vmatprep.mubr.f32.mxu1 %v15983_v22  ;;  %v2753_v33 = vpop.permute.xlu1 %2752  ;;  %v3293_v0 = vld [vmem:[#allocation10 + $0x78] sm:$0xff] }
 0x358   :  { %10494 = vmatmul.mubr.msk.f32.gmra.mxu0 %vm1506_vm9, %v2353_v13  ;;  %2633 = vmatpush1.msra.mxu1 %v2566_v26  ;;  %v3292_v13 = vld [vmem:[#allocation10 + $0x70] sm:$0xff]  ;;  %v335_v26 = vld [vmem:[%s15984_s15] sm:$0xff] }
 0x359   :  { %v2751_v37 = vpop.permute.xlu0 %2750  ;;  %2488 = vmatprep.mubr.f32.mxu0 %v15983_v22 }
 0x35a   :  { %10489 = vmatmul.mubr.msk.f32.gmra.mxu1 %vm1506_vm9, %v2166_v27  ;;  %v3396_v27 = vld [vmem:[#allocation10 + $0x138] sm:$0xff] }
 0x35b   :  { %2316 = vmatprep.mubr.f32.mxu1 %v15983_v22  ;;  %v2749_v20 = vpop.permute.xlu1 %2748 }
 0x35c   :  { %10495 = vmatmul.mubr.msk.f32.gmra.mxu0 %vm1506_vm9, %v2354_v39  ;;  %v2758_v42 = vsel %vm1178_vm6, %v2749_v20, %v2751_v37  ;;  %v3395_v39 = vld [vmem:[#allocation10 + $0x130] sm:$0xff]  ;;  %v3289_v20 = vld [vmem:[#allocation10 + $0x58] sm:$0xff] }
 0x35d   :  { %v2747_v29 = vpop.permute.xlu0 %2746  ;;  %2494 = vmatprep.mubr.f32.mxu0 %v15983_v22 }
 0x35e   :  { %10490 = vmatmul.mubr.msk.f32.gmra.mxu1 %vm1506_vm9, %v2167_v31  ;;  %v3394_v31 = vld [vmem:[#allocation10 + $0x128] sm:$0xff] }
 0x35f   :  { %2322 = vmatprep.mubr.f32.mxu1 %v15983_v22  ;;  %v2943_v32 = vpop.permute.xlu1 %2942 }
 0x360   :  { %10496 = vmatmul.mubr.msk.f32.gmra.mxu0 %vm1506_vm9, %v2355_v28  ;;  %v3393_v28 = vld [vmem:[#allocation10 + $0x120] sm:$0xff] }
 0x361   :  { %v2941_v34 = vpop.permute.xlu0 %2940  ;;  %2500 = vmatprep.mubr.f32.mxu0 %v15983_v22 }
 0x362   :  { %10491 = vmatmul.mubr.msk.f32.gmra.mxu1 %vm1506_vm9, %v2168_v30  ;;  %v3392_v30 = vld [vmem:[#allocation10 + $0x118] sm:$0xff] }
 0x363   :  { %2328 = vmatprep.mubr.f32.mxu1 %v15983_v22  ;;  %v2745_v40 = vpop.permute.xlu1 %2744 }
 0x364   :  { %10497 = vmatmul.mubr.msk.f32.gmra.mxu0 %vm1506_vm9, %v2356_v41  ;;  %v2757_v54 = vsel %vm1178_vm6, %v2745_v40, %v2747_v29  ;;  %v3391_v41 = vld [vmem:[#allocation10 + $0x110] sm:$0xff]  ;;  %v12681_v40 = vpop.f32.mrf.mxu0 }
 0x365   :  { %v2743_v48 = vpop.permute.xlu0 %2742  ;;  %2506 = vmatprep.mubr.f32.mxu0 %v15983_v22 }
 0x366   :  { %10492 = vmatmul.mubr.msk.f32.gmra.mxu1 %vm1506_vm9, %v2169_v45  ;;  %v3285_v45 = vld [vmem:[#allocation10 + $0x38] sm:$0xff] }
 0x367   :  { %2666 = vmatprep.mubr.f32.mxu1 %v15983_v22  ;;  %v2939_v50 = vpop.permute.xlu1 %2938 }
 0x368   :  { %10498 = vmatmul.mubr.msk.f32.gmra.mxu0 %vm1506_vm9, %v2357_v16  ;;  %v2948_v49 = vsel %vm1300_vm8, %v2939_v50, %v2941_v34  ;;  %v3284_v16 = vld [vmem:[#allocation10 + $0x30] sm:$0xff]  ;;  %v3389_v50 = vld [vmem:[#allocation10 + $0x100] sm:$0xff] }
 0x369   :  { %v2755_v47 = vpop.permute.xlu0 %2754  ;;  %2512 = vmatprep.mubr.f32.mxu0 %v15983_v22 }
 0x36a   :  { %10501 = vmatmul.mubr.msk.f32.vlgmr.msra.gmra.mxu1 %vm1506_vm9, %v2542_v18  ;;  %2816 = vmatprep.subr.mxu0 %v2755_v47  ;;  %v2759_v52 = vsel %vm1178_vm6, %v2753_v33, %v2755_v47  ;;  %v3291_v33 = vld [vmem:[#allocation10 + $0x68] sm:$0xff]  ;;  %v12687_v18 = vpop.f32.mrf.mxu0 }
 0x36b   :  { %2672 = vmatprep.mubr.f32.mxu1 %v15983_v22  ;;  %v2741_v43 = vpop.permute.xlu1 %2740  ;;  %2817 = vmatpush1.msra.mxu0 %v2759_v52  ;;  %v3283_v47 = vld [vmem:[#allocation10 + $0x28] sm:$0xff]  ;;  %v3282_v52 = vld [vmem:[#allocation10 + $0x20] sm:$0xff] }
 0x36c   :  { %10499 = vmatmul.mubr.msk.f32.gmra.mxu0 %vm1506_vm9, %v2358_v51  ;;  %2818 = vmatprep.subr.mxu0 %v2751_v37  ;;  %v2756_v38 = vsel %vm1178_vm6, %v2741_v43, %v2743_v48  ;;  %v3290_v37 = vld [vmem:[#allocation10 + $0x60] sm:$0xff]  ;;  %v3388_v51 = vld [vmem:[#allocation10 + $0xf8] sm:$0xff]  ;;  %v3387_v43 = vld [vmem:[#allocation10 + $0xf0] sm:$0xff]  ;;  %vm7766_vm6 = vcmask 752640  }
 0x36d   :  { %v2945_v44 = vpop.permute.xlu0 %2944  ;;  %2518 = vmatprep.mubr.f32.mxu0 %v15983_v22  ;;  %2819 = vmatpush1.msra.mxu0 %v2758_v42  ;;  %v3281_v42 = vld [vmem:[#allocation10 + $0x18] sm:$0xff] }
 0x36e   :  { %10502 = vmatmul.mubr.msk.f32.gmra.mxu1 %vm1506_vm9, %v2543_v53  ;;  %2820 = vmatprep.subr.mxu0 %v2747_v29  ;;  %v2949_v56 = vsel %vm1300_vm8, %v2943_v32, %v2945_v44  ;;  %v3288_v29 = vld [vmem:[#allocation10 + $0x50] sm:$0xff]  ;;  %v3287_v32 = vld [vmem:[#allocation10 + $0x48] sm:$0xff]  ;;  %v12693_v53 = vpop.f32.mrf.mxu0 }
 0x36f   :  { %3006 = vmatprep.subr.mxu1 %v2945_v44  ;;  %2678 = vmatprep.mubr.f32.mxu1 %v15983_v22  ;;  %v2935_v36 = vpop.permute.xlu1 %2934  ;;  %v3386_v44 = vld [vmem:[#allocation10 + $0xe8] sm:$0xff] }
 0x370   :  { %10500 = vmatmul.mubr.msk.f32.gmra.mxu0 %vm1506_vm9, %v2359_v55  ;;  %3007 = vmatpush1.msra.mxu1 %v2949_v56  ;;  %v3280_v55 = vld [vmem:[#allocation10 + $0x10] sm:$0xff]  ;;  %v3385_v56 = vld [vmem:[#allocation10 + $0xe0] sm:$0xff] }
 0x371   :  { %2821 = vmatpush1.msra.mxu0 %v2757_v54  ;;  %3008 = vmatprep.subr.mxu1 %v2941_v34  ;;  %v2937_v58 = vpop.permute.xlu0 %2936  ;;  %v3286_v34 = vld [vmem:[#allocation10 + $0x40] sm:$0xff]  ;;  %v3384_v54 = vld [vmem:[#allocation10 + $0xd8] sm:$0xff] }
 0x372   :  { %10503 = vmatmul.mubr.msk.f32.gmra.mxu1 %vm1506_vm9, %v2544_v46  ;;  %2822 = vmatprep.subr.mxu0 %v2743_v48  ;;  %v2947_v61 = vsel %vm1300_vm8, %v2935_v36, %v2937_v58  ;;  %v3390_v48 = vld [vmem:[#allocation10 + $0x108] sm:$0xff]  ;;  %v12699_v36 = vpop.f32.mrf.mxu0 }
 0x373   :  { %2823 = vmatpush1.msra.mxu0 %v2756_v38  ;;  %2856 = vmatprep.mubr.f32.mxu0 %v15983_v22  ;;  %v2931_v62 = vpop.permute.xlu1 %2930  ;;  %v3279_v46 = vld [vmem:[#allocation10 + $0x8] sm:$0xff] }
 0x374   :  { %3009 = vmatpush1.msra.mxu1 %v2948_v49  ;;  %10509 = vmatmul.mubr.msk.f32.vlgmr.msra.gmra.mxu0 %vm1506_vm9, %v2732_v59  ;;  %v3383_v59 = vld [vmem:[#allocation10 + $0xd0] sm:$0xff]  ;;  %v12705_v38 = vpop.f32.mrf.mxu0  ;;  %v3301_v49 = vld [vmem:[#allocation10 + $0xb8] sm:$0xf] }
 0x375   :  { %3010 = vmatprep.subr.mxu1 %v2937_v58  ;;  %2684 = vmatprep.mubr.f32.mxu1 %v15983_v22  ;;  %v2933_v63 = vpop.permute.xlu0 %2932  ;;  %v3278_v58 = vld [vmem:[#allocation10] sm:$0xff] }
 0x376   :  { %3011 = vmatpush1.msra.mxu1 %v2947_v61  ;;  %2862 = vmatprep.mubr.f32.mxu0 %v15983_v22  ;;  %v2946_v2 = vsel %vm1300_vm8, %v2931_v62, %v2933_v63  ;;  %v3382_v61 = vld [vmem:[#allocation10 + $0xc8] sm:$0xff]  ;;  %v3381_v62 = vld [vmem:[#allocation10 + $0xc0] sm:$0xff]  ;;  %vm8350_vm8 = vcmask 736256  }
 0x377   :  { %10504 = vmatmul.mubr.msk.f32.gmra.mxu1 %vm1506_vm9, %v2545_v57  ;;  %3012 = vmatprep.subr.mxu1 %v2933_v63  ;;  %v3300_v57 = vld [vmem:[#allocation10 + $0xb0] sm:$0xff] }
 0x378   :  { %10510 = vmatmul.mubr.msk.f32.gmra.mxu0 %vm1506_vm9, %v2733_v1  ;;  %2690 = vmatprep.mubr.f32.mxu1 %v15983_v22  ;;  %v12714_v1 = vpop.f32.mrf.mxu0 }
 0x379   :  { %3013 = vmatpush1.msra.mxu1 %v2946_v2  ;;  %2868 = vmatprep.mubr.f32.mxu0 %v15983_v22  ;;  %v3299_v2 = vld [vmem:[#allocation10 + $0xa8] sm:$0xff] }
 0x37a   :  { %10927 = vmatprep.subr.mxu0 %v15983_v22  ;;  %3309 = vmatprep.subr.mxu1 %v15983_v22 }
 0x37b   :  { %10505 = vmatmul.mubr.msk.f32.gmra.mxu1 %vm1506_vm9, %v2546_v3  ;;  %10928 = vmatpush3.msk.msra.mxu0 %vm3204_vm10, %v3192_v14  ;;  %v3404_v3 = vld [vmem:[#allocation10 + $0x178] sm:$0xf] }
 0x37c   :  { %10511 = vmatmul.mubr.msk.f32.gmra.mxu0 %vm1506_vm9, %v2734_v60  ;;  %2696 = vmatprep.mubr.f32.mxu1 %v15983_v22 }
 0x37d   :  { %2874 = vmatprep.mubr.f32.mxu0 %v15983_v22  ;;  %10929 = vmatprep.subr.mxu0 %v15983_v22 }
 0x37e   :  { %10930 = vmatpush3.msra.mxu0 %v3191_v4  ;;  %v3399_v4 = vld [vmem:[#allocation10 + $0x150] sm:$0xff] }
 0x37f   :  { %10506 = vmatmul.mubr.msk.f32.gmra.mxu1 %vm1506_vm9, %v2547_v9  ;;  %3411 = vmatprep.subr.mxu0 %v15983_v22  ;;  %v3298_v9 = vld [vmem:[#allocation10 + $0xa0] sm:$0xff] }
 0x380   :  { %10512 = vmatmul.mubr.msk.f32.gmra.mxu0 %vm1506_vm9, %v2735_v19  ;;  %2702 = vmatprep.mubr.f32.mxu1 %v15983_v22  ;;  %v3403_v19 = vld [vmem:[#allocation10 + $0x170] sm:$0xff] }
 0x381   :  { %2880 = vmatprep.mubr.f32.mxu0 %v15983_v22 }
 0x383   :  { %10507 = vmatmul.mubr.msk.f32.gmra.mxu1 %vm1506_vm9, %v2548_v10 }
 0x384   :  { %10513 = vmatmul.mubr.msk.f32.gmra.mxu0 %vm1506_vm9, %v2736_v21  ;;  %2708 = vmatprep.mubr.f32.mxu1 %v15983_v22  ;;  %v12723_v21 = vpop.f32.mrf.mxu0 }
 0x385   :  { %2886 = vmatprep.mubr.f32.mxu0 %v15983_v22 }
 0x386   :  { %v12731_v14 = vpop.f32.mrf.mxu0 }
 0x387   :  { %10508 = vmatmul.mubr.msk.f32.gmra.mxu1 %vm1506_vm9, %v2549_v35  ;;  %v3297_v35 = vld [vmem:[#allocation10 + $0x98] sm:$0xff] }
 0x388   :  { %10514 = vmatmul.mubr.msk.f32.gmra.mxu0 %vm1506_vm9, %v2737_v7  ;;  %3046 = vmatprep.mubr.f32.mxu1 %v15983_v22  ;;  %v3402_v7 = vld [vmem:[#allocation10 + $0x168] sm:$0xff] }
 0x389   :  { %2892 = vmatprep.mubr.f32.mxu0 %v15983_v22 }
 0x38b   :  { %10517 = vmatmul.mubr.msk.f32.vlgmr.msra.gmra.mxu1 %vm1506_vm9, %v2922_v11 }
 0x38c   :  { %10515 = vmatmul.mubr.msk.f32.gmra.mxu0 %vm1506_vm9, %v2738_v15  ;;  %3052 = vmatprep.mubr.f32.mxu1 %v15983_v22  ;;  %v3296_v15 = vld [vmem:[#allocation10 + $0x90] sm:$0xff] }
 0x38d   :  { %2898 = vmatprep.mubr.f32.mxu0 %v15983_v22  ;;  %3310 = vmatpush1.msra.mxu1 %v3293_v0  ;;  %v3398_v0 = vld [vmem:[#allocation10 + $0x148] sm:$0xff] }
 0x38e   :  { %3311 = vmatprep.subr.mxu1 %v15983_v22 }
 0x38f   :  { %10518 = vmatmul.mubr.msk.f32.gmra.mxu1 %vm1506_vm9, %v2923_v23  ;;  %v3401_v23 = vld [vmem:[#allocation10 + $0x160] sm:$0xff] }
 0x390   :  { %10516 = vmatmul.mubr.msk.f32.gmra.mxu0 %vm1506_vm9, %v2739_v8  ;;  %3058 = vmatprep.mubr.f32.mxu1 %v15983_v22 }
 0x391   :  { %10931 = vmatprep.mubr.msk.f32.mxu0 %vm11938_vm11, %v15983_v22  ;;  %3312 = vmatpush1.msra.mxu1 %v3292_v13 }
 0x392   :  { %3313 = vmatprep.subr.mxu1 %v15983_v22 }
 0x393   :  { %10519 = vmatmul.mubr.msk.f32.gmra.mxu1 %vm1506_vm9, %v2924_v17  ;;  %v3295_v17 = vld [vmem:[#allocation10 + $0x88] sm:$0xff] }
 0x394   :  { %3064 = vmatprep.mubr.f32.mxu1 %v15983_v22  ;;  %10932 = vmatmul.mubr.msk.f32.vlgmr.msra.gmra.mxu0 %vm3200_vm12, %v335_v26  ;;  %v3397_v26 = vld [vmem:[#allocation10 + $0x140] sm:$0xff] }
 0x395   :  { %3412 = vmatpush1.msra.mxu0 %v3396_v27  ;;  %3314 = vmatpush1.msra.mxu1 %v3291_v33 }
 0x396   :  { %3413 = vmatprep.subr.mxu0 %v15983_v22  ;;  %3315 = vmatprep.subr.mxu1 %v15983_v22 }
 0x397   :  { %10520 = vmatmul.mubr.msk.f32.gmra.mxu1 %vm1506_vm9, %v2925_v24  ;;  %3414 = vmatpush1.msra.mxu0 %v3395_v39  ;;  %v3400_v24 = vld [vmem:[#allocation10 + $0x158] sm:$0xff] }
 0x398   :  { %3070 = vmatprep.mubr.f32.mxu1 %v15983_v22  ;;  %3316 = vmatpush1.msra.mxu1 %v3290_v37 }
 0x399   :  { %3415 = vmatprep.subr.mxu0 %v15983_v22  ;;  %3317 = vmatprep.subr.mxu1 %v15983_v22 }
 0x39a   :  { %3416 = vmatpush1.msra.mxu0 %v3394_v31  ;;  %3318 = vmatpush1.msra.mxu1 %v3289_v20 }
 0x39b   :  { %10521 = vmatmul.mubr.msk.f32.gmra.mxu1 %vm1506_vm9, %v2926_v25  ;;  %3417 = vmatprep.subr.mxu0 %v15983_v22 }
 0x39c   :  { %3076 = vmatprep.mubr.f32.mxu1 %v15983_v22  ;;  %3319 = vmatprep.subr.mxu1 %v15983_v22 }
 0x39d   :  { %3418 = vmatpush1.msra.mxu0 %v3393_v28  ;;  %3320 = vmatpush1.msra.mxu1 %v3288_v29 }
 0x39e   :  { %3419 = vmatprep.subr.mxu0 %v15983_v22  ;;  %3321 = vmatprep.subr.mxu1 %v15983_v22 }
 0x39f   :  { %10522 = vmatmul.mubr.msk.f32.gmra.mxu1 %vm1506_vm9, %v2927_v5  ;;  %3420 = vmatpush1.msra.mxu0 %v3392_v30  ;;  %v3294_v5 = vld [vmem:[#allocation10 + $0x80] sm:$0xff] }
 0x3a0   :  { %3082 = vmatprep.mubr.f32.mxu1 %v15983_v22  ;;  %3322 = vmatpush1.msra.mxu1 %v3287_v32 }
 0x3a1   :  { %3421 = vmatprep.subr.mxu0 %v15983_v22  ;;  %3323 = vmatprep.subr.mxu1 %v15983_v22 }
 0x3a2   :  { %3422 = vmatpush1.msra.mxu0 %v3391_v41  ;;  %3324 = vmatpush1.msra.mxu1 %v3286_v34 }
 0x3a3   :  { %10523 = vmatmul.mubr.msk.f32.gmra.mxu1 %vm1506_vm9, %v2928_v12  ;;  %3423 = vmatprep.subr.mxu0 %v15983_v22 }
 0x3a4   :  { %3088 = vmatprep.mubr.f32.mxu1 %v15983_v22  ;;  %3325 = vmatprep.subr.mxu1 %v15983_v22 }
 0x3a5   :  { %3424 = vmatpush1.msra.mxu0 %v3390_v48  ;;  %3326 = vmatpush1.msra.mxu1 %v3285_v45 }
 0x3a6   :  { %3425 = vmatprep.subr.mxu0 %v15983_v22  ;;  %3327 = vmatprep.subr.mxu1 %v15983_v22 }
 0x3a7   :  { %10524 = vmatmul.mubr.msk.f32.gmra.mxu1 %vm1506_vm9, %v2929_v6  ;;  %3426 = vmatpush1.msra.mxu0 %v3389_v50  ;;  %v1758_v6 = vpop.f32.mrf.mxu0 }
 0x3a8   :  { %3328 = vmatpush1.msra.mxu1 %v3284_v16  ;;  %3427 = vmatprep.subr.mxu0 %v15983_v22 }
 0x3a9   :  { %3329 = vmatprep.subr.mxu1 %v15983_v22  ;;  %3428 = vmatpush1.msra.mxu0 %v3388_v51  ;;  %v12744_v27 = vpop.f32.mrf.mxu0 }
 0x3aa   :  { %3330 = vmatpush1.msra.mxu1 %v3283_v47  ;;  %3429 = vmatprep.subr.mxu0 %v15983_v22  ;;  %15985 = vst [vmem:[#allocation42_spill] sm:$0xff] %v12744_v27 }
 0x3ab   :  { %3331 = vmatprep.subr.mxu1 %v15983_v22  ;;  %3430 = vmatpush1.msra.mxu0 %v3387_v43  ;;  %v1764_v20 = vpop.f32.mrf.mxu0 }
 0x3ac   :  { %3332 = vmatpush1.msra.mxu1 %v3282_v52  ;;  %3431 = vmatprep.subr.mxu0 %v15983_v22 }
 0x3ad   :  { %3333 = vmatprep.subr.mxu1 %v15983_v22  ;;  %3432 = vmatpush1.msra.mxu0 %v3386_v44  ;;  %v12751_v29 = vpop.f32.mrf.mxu0 }
 0x3ae   :  { %3334 = vmatpush1.msra.mxu1 %v3281_v42  ;;  %3433 = vmatprep.subr.mxu0 %v15983_v22  ;;  %15988 = vst [vmem:[#allocation47_spill] sm:$0xff] %v12751_v29 }
 0x3af   :  { %3335 = vmatprep.subr.mxu1 %v15983_v22  ;;  %3434 = vmatpush1.msra.mxu0 %v3385_v56  ;;  %v1770_v30 = vpop.f32.mrf.mxu0 }
 0x3b0   :  { %3336 = vmatpush1.msra.mxu1 %v3280_v55  ;;  %3435 = vmatprep.subr.mxu0 %v15983_v22 }
 0x3b1   :  { %3337 = vmatprep.subr.mxu1 %v15983_v22  ;;  %3436 = vmatpush1.msra.mxu0 %v3384_v54  ;;  %v12759_v48 = vpop.f32.mrf.mxu0 }
 0x3b2   :  { %3338 = vmatpush1.msra.mxu1 %v3279_v46  ;;  %3437 = vmatprep.subr.mxu0 %v15983_v22 }
 0x3b3   :  { %3339 = vmatprep.subr.mxu1 %v15983_v22  ;;  %3438 = vmatpush1.msra.mxu0 %v3383_v59  ;;  %v1776_v52 = vpop.f32.mrf.mxu0 }
 0x3b4   :  { %3340 = vmatpush1.msra.mxu1 %v3278_v58  ;;  %3439 = vmatprep.subr.mxu0 %v15983_v22 }
 0x3b5   :  { %3357 = vmatprep.subr.mxu1 %v15983_v22  ;;  %3440 = vmatpush1.msra.mxu0 %v3382_v61  ;;  %v12771_v56 = vpop.f32.mrf.mxu0 }
 0x3b6   :  { %10528 = vmatpush2.msk.msra.mxu1 %vm3204_vm10, %v3301_v49  ;;  %3441 = vmatprep.subr.mxu0 %v15983_v22 }
 0x3b7   :  { %3359 = vmatprep.subr.mxu1 %v15983_v22  ;;  %3442 = vmatpush1.msra.mxu0 %v3381_v62 }
 0x3b8   :  { %3360 = vmatpush2.msra.mxu1 %v3300_v57  ;;  %3459 = vmatprep.subr.mxu0 %v15983_v22 }
 0x3b9   :  { %3361 = vmatprep.subr.mxu1 %v15983_v22  ;;  %10530 = vmatpush2.msk.msra.mxu0 %vm3204_vm10, %v3404_v3 }
 0x3ba   :  { %3362 = vmatpush2.msra.mxu1 %v3299_v2  ;;  %3461 = vmatprep.subr.mxu0 %v15983_v22 }
 0x3bb   :  { %3363 = vmatprep.subr.mxu1 %v15983_v22  ;;  %3462 = vmatpush2.msra.mxu0 %v3403_v19 }
 0x3bc   :  { %3364 = vmatpush2.msra.mxu1 %v3298_v9  ;;  %3463 = vmatprep.subr.mxu0 %v15983_v22 }
 0x3bd   :  { %3365 = vmatprep.subr.mxu1 %v15983_v22  ;;  %3464 = vmatpush2.msra.mxu0 %v3402_v7 }
 0x3be   :  { %3366 = vmatpush2.msra.mxu1 %v3297_v35  ;;  %3465 = vmatprep.subr.mxu0 %v15983_v22 }
 0x3bf   :  { %3367 = vmatprep.subr.mxu1 %v15983_v22  ;;  %3466 = vmatpush2.msra.mxu0 %v3401_v23 }
 0x3c0   :  { %3368 = vmatpush2.msra.mxu1 %v3296_v15  ;;  %3467 = vmatprep.subr.mxu0 %v15983_v22 }
 0x3c1   :  { %3369 = vmatprep.subr.mxu1 %v15983_v22  ;;  %3468 = vmatpush2.msra.mxu0 %v3400_v24 }
 0x3c2   :  { %3370 = vmatpush2.msra.mxu1 %v3295_v17  ;;  %3469 = vmatprep.subr.mxu0 %v15983_v22 }
 0x3c3   :  { %3371 = vmatprep.subr.mxu1 %v15983_v22  ;;  %3470 = vmatpush2.msra.mxu0 %v3399_v4 }
 0x3c4   :  { %3372 = vmatpush2.msra.mxu1 %v3294_v5  ;;  %3471 = vmatprep.subr.mxu0 %v15983_v22 }
 0x3c5   :  { %3513 = vmatprep.subr.mxu1 %v15983_v22  ;;  %3472 = vmatpush2.msra.mxu0 %v3398_v0 }
 0x3c6   :  { %3473 = vmatprep.subr.mxu0 %v15983_v22 }
 0x3c7   :  { %3474 = vmatpush2.msra.mxu0 %v3397_v26 }
 0x3c8   :  { %v12712_v63 = vpop.f32.mrf.mxu1  ;;  %3615 = vmatprep.subr.mxu0 %v15983_v22 }
 0x3c9   :  { %v1735_v45 = vadd.f32 %v12681_v40, %v12712_v63 }
 0x3ca   :  { %v12719_v60 = vpop.f32.mrf.mxu1 }
 0x3cc   :  { %v1603_v10 = vpop.f32.mrf.mxu1 }
 0x3cd   :  { %v1741_v51 = vadd.f32 %v12693_v53, %v1603_v10 }
 0x3ce   :  { %v12727_v11 = vpop.f32.mrf.mxu1 }
 0x3d0   :  { %v1609_v8 = vpop.f32.mrf.mxu1 }
 0x3d1   :  { %v1747_v55 = vadd.f32 %v12705_v38, %v1609_v8 }
 0x3d2   :  { %v12735_v25 = vpop.f32.mrf.mxu1 }
 0x3d4   :  { %v1615_v12 = vpop.f32.mrf.mxu1 }
 0x3d5   :  { %v1753_v59 = vadd.f32 %v12723_v21, %v1615_v12 }
 0x3d6   :  { %v12741_v13 = vpop.f32.mrf.mxu1 }
 0x3d8   :  { %v1621_v33 = vpop.f32.mrf.mxu1 }
 0x3d9   :  { %v1759_v63 = vadd.f32 %v1758_v6, %v1621_v33 }
 0x3da   :  { %v12747_v37 = vpop.f32.mrf.mxu1 }
 0x3db   :  { %15986 = vst [vmem:[#allocation43_spill] sm:$0xff] %v12747_v37 }
 0x3dc   :  { %v1627_v39 = vpop.f32.mrf.mxu1 }
 0x3dd   :  { %v1765_v35 = vadd.f32 %v1764_v20, %v1627_v39 }
 0x3de   :  { %v12749_v31 = vpop.f32.mrf.mxu1 }
 0x3df   :  { %15987 = vst [vmem:[#allocation45_spill] sm:$0xff] %v12749_v31 }
 0x3e0   :  { %v1633_v28 = vpop.f32.mrf.mxu1 }
 0x3e1   :  { %v1771_v24 = vadd.f32 %v1770_v30, %v1633_v28 }
 0x3e2   :  { %v12753_v32 = vpop.f32.mrf.mxu1 }
 0x3e4   :  { %v1639_v34 = vpop.f32.mrf.mxu1 }
 0x3e5   :  { %v1777_v33 = vadd.f32 %v1776_v52, %v1639_v34 }
 0x3e6   :  { %v12755_v41 = vpop.f32.mrf.mxu1 }
 0x3e8   :  { %v1908_v16 = vpop.f32.mrf.mxu1 }
 0x3e9   :  { %v12761_v50 = vadd.f32 %v1908_v16, %v1735_v45 }
 0x3ea   :  { %v12763_v47 = vpop.f32.mrf.mxu1 }
 0x3ec   :  { %v1914_v43 = vpop.f32.mrf.mxu1 }
 0x3ed   :  { %v12766_v42 = vadd.f32 %v1914_v43, %v1741_v51 }
 0x3ee   :  { %v12768_v44 = vpop.f32.mrf.mxu1 }
 0x3f0   :  { %v1920_v40 = vpop.f32.mrf.mxu1 }
 0x3f1   :  { %v1959_v46 = vadd.f32 %v1920_v40, %v1747_v55 }
 0x3f2   :  { %v12773_v54 = vpop.f32.mrf.mxu1  ;;  %v12775_v58 = vpop.f32.mrf.mxu0 }
 0x3f4   :  { %v12778_v49 = vpop.f32.mrf.mxu0 }
 0x3f5   :  { %v1926_v53 = vpop.f32.mrf.mxu1 }
 0x3f6   :  { %v1961_v61 = vadd.f32 %v1926_v53, %v1753_v59  ;;  %v12780_v57 = vpop.f32.mrf.mxu0 }
 0x3f7   :  { %v12782_v62 = vpop.f32.mrf.mxu1 }
 0x3f8   :  { %v12784_v38 = vpop.f32.mrf.mxu0 }
 0x3f9   :  { %v1932_v2 = vpop.f32.mrf.mxu1 }
 0x3fa   :  { %v1963_v3 = vadd.f32 %v1932_v2, %v1759_v63  ;;  %v2110_v9 = vpop.f32.mrf.mxu0 }
 0x3fb   :  { %v12786_v19 = vpop.f32.mrf.mxu1  ;;  %v2149_v10 = vadd.f32 %v2110_v9, %v1959_v46 }
 0x3fc   :  { %15989 = vst [vmem:[#allocation48_spill] sm:$0xff] %v12786_v19  ;;  %v12788_v7 = vpop.f32.mrf.mxu0 }
 0x3fd   :  { %v1938_v21 = vpop.f32.mrf.mxu1 }
 0x3fe   :  { %v1965_v15 = vadd.f32 %v1938_v21, %v1765_v35  ;;  %v2116_v23 = vpop.f32.mrf.mxu0 }
 0x3ff   :  { %v12790_v8 = vpop.f32.mrf.mxu1  ;;  %v2151_v17 = vadd.f32 %v2116_v23, %v1961_v61 }
 0x400   :  { %15990 = vst [vmem:[#allocation44_spill] sm:$0xff] %v12790_v8  ;;  %v12792_v5 = vpop.f32.mrf.mxu0 }
 0x401   :  { %v1944_v4 = vpop.f32.mrf.mxu1 }
 0x402   :  { %v1967_v12 = vadd.f32 %v1944_v4, %v1771_v24  ;;  %v2122_v6 = vpop.f32.mrf.mxu0 }
 0x403   :  { %v12794_v0 = vpop.f32.mrf.mxu1  ;;  %v2153_v26 = vadd.f32 %v2122_v6, %v1963_v3 }
 0x404   :  { %v12796_v45 = vpop.f32.mrf.mxu0 }
 0x405   :  { %15991 = vst [vmem:[#allocation46_spill] sm:$0xff] %v12796_v45  ;;  %v1950_v39 = vpop.f32.mrf.mxu1 }
 0x406   :  { %v1969_v20 = vadd.f32 %v1950_v39, %v1777_v33  ;;  %v2128_v16 = vpop.f32.mrf.mxu0 }
 0x407   :  { %v12798_v51 = vpop.f32.mrf.mxu1  ;;  %v2155_v43 = vadd.f32 %v2128_v16, %v1965_v15 }
 0x408   :  { %v12800_v55 = vpop.f32.mrf.mxu0 }
 0x409   :  { %15992 = vst [vmem:[#allocation49_spill] sm:$0xff] %v12800_v55  ;;  %v12802_v28 = vpop.f32.mrf.mxu1 }
 0x40a   :  { %v2134_v30 = vpop.f32.mrf.mxu0 }
 0x40b   :  { %v2157_v40 = vadd.f32 %v2134_v30, %v1967_v12  ;;  %v12804_v46 = vpop.f32.mrf.mxu1 }
 0x40c   :  { %v12806_v59 = vpop.f32.mrf.mxu0 }
 0x40d   :  { %v12808_v53 = vpop.f32.mrf.mxu1 }
 0x40e   :  { %v2140_v34 = vpop.f32.mrf.mxu0 }
 0x40f   :  { %v2159_v52 = vadd.f32 %v2140_v34, %v1969_v20  ;;  %v12810_v61 = vpop.f32.mrf.mxu1 }
 0x410   :  { %v12812_v63 = vpop.f32.mrf.mxu0 }
 0x411   :  { %v2300_v2 = vpop.f32.mrf.mxu1 }
 0x412   :  { %v2339_v3 = vadd.f32 %v2300_v2, %v2149_v10 }
 0x413   :  { %v12814_v9 = vpop.f32.mrf.mxu1 }
 0x414   :  { %v12816_v35 = vpop.f32.mrf.mxu0 }
 0x416   :  { %v2306_v21 = vpop.f32.mrf.mxu1  ;;  %v12818_v15 = vpop.f32.mrf.mxu0 }
 0x417   :  { %v2341_v23 = vadd.f32 %v2306_v21, %v2151_v17 }
 0x418   :  { %v12820_v24 = vpop.f32.mrf.mxu1  ;;  %v12822_v4 = vpop.f32.mrf.mxu0 }
 0x419   :  { %15993 = vst [vmem:[#allocation50_spill] sm:$0xff] %v12820_v24 }
 0x41a   :  { %v2312_v12 = vpop.f32.mrf.mxu1  ;;  %v12824_v6 = vpop.f32.mrf.mxu0 }
 0x41b   :  { %v2343_v33 = vadd.f32 %v2312_v12, %v2153_v26 }
 0x41c   :  { %v12826_v39 = vpop.f32.mrf.mxu1  ;;  %v2490_v20 = vpop.f32.mrf.mxu0 }
 0x41d   :  { %15994 = vst [vmem:[#allocation51_spill] sm:$0xff] %v12826_v39  ;;  %v2529_v10 = vadd.f32 %v2490_v20, %v2339_v3 }
 0x41e   :  { %v2318_v16 = vpop.f32.mrf.mxu1  ;;  %v12828_v30 = vpop.f32.mrf.mxu0 }
 0x41f   :  { %15995 = vst [vmem:[#allocation52_spill] sm:$0xff] %v12828_v30  ;;  %v2345_v34 = vadd.f32 %v2318_v16, %v2155_v43 }
 0x420   :  { %v12830_v2 = vpop.f32.mrf.mxu1  ;;  %v2496_v55 = vpop.f32.mrf.mxu0 }
 0x421   :  { %15996 = vst [vmem:[#allocation53_spill] sm:$0xff] %v12830_v2  ;;  %v2531_v17 = vadd.f32 %v2496_v55, %v2341_v23 }
 0x422   :  { %v2324_v21 = vpop.f32.mrf.mxu1  ;;  %v12832_v8 = vpop.f32.mrf.mxu0 }
 0x423   :  { %15997 = vst [vmem:[#allocation54_spill] sm:$0xff] %v12832_v8  ;;  %v2347_v29 = vadd.f32 %v2324_v21, %v2157_v40 }
 0x424   :  { %v12834_v31 = vpop.f32.mrf.mxu1  ;;  %v2502_v45 = vpop.f32.mrf.mxu0 }
 0x425   :  { %v2533_v26 = vadd.f32 %v2502_v45, %v2343_v33 }
 0x426   :  { %v2330_v12 = vpop.f32.mrf.mxu1  ;;  %v12836_v39 = vpop.f32.mrf.mxu0 }
 0x427   :  { %15998 = vst [vmem:[#allocation55_spill] sm:$0xff] %v12836_v39  ;;  %v2349_v3 = vadd.f32 %v2330_v12, %v2159_v52 }
 0x428   :  { %v12838_v20 = vpop.f32.mrf.mxu1  ;;  %v2508_v19 = vpop.f32.mrf.mxu0 }
 0x429   :  { %v2535_v43 = vadd.f32 %v2508_v19, %v2345_v34 }
 0x42a   :  { %v12840_v16 = vpop.f32.mrf.mxu0  ;;  %v2668_v2 = vpop.f32.mrf.mxu1 }
 0x42b   :  { %15999 = vst [vmem:[#allocation56_spill] sm:$0xff] %v12840_v16 }
 0x42c   :  { %v2514_v55 = vpop.f32.mrf.mxu0  ;;  %v12842_v23 = vpop.f32.mrf.mxu1 }
 0x42d   :  { %v2537_v27 = vadd.f32 %v2514_v55, %v2347_v29 }
 0x42e   :  { %v12844_v40 = vpop.f32.mrf.mxu0  ;;  %v12846_v21 = vpop.f32.mrf.mxu1 }
 0x430   :  { %v2520_v45 = vpop.f32.mrf.mxu0  ;;  %v12848_v33 = vpop.f32.mrf.mxu1 }
 0x431   :  { %v2539_v39 = vadd.f32 %v2520_v45, %v2349_v3 }
 0x432   :  { %v12850_v52 = vpop.f32.mrf.mxu0  ;;  %v2680_v12 = vpop.f32.mrf.mxu1 }
 0x433   :  { %16000 = vst [vmem:[#allocation57_spill] sm:$0xff] %v12850_v52  ;;  %v12852_v37 = vadd.f32 %v2680_v12, %v2529_v10 }
 0x434   :  { %v12854_v19 = vpop.f32.mrf.mxu1  ;;  %v2858_v34 = vpop.f32.mrf.mxu0 }
 0x435   :  { %16001 = vst [vmem:[#allocation58_spill] sm:$0xff] %v12852_v37  ;;  %v1737_v37 = vadd.f32 %v12687_v18, %v12719_v60 }
 0x436   :  { %v2860_v16 = vpop.f32.mrf.mxu0 }
 0x437   :  { %v2686_v22 = vpop.f32.mrf.mxu1 }
 0x438   :  { %v12856_v8 = vadd.f32 %v2686_v22, %v2531_v17  ;;  %v12858_v29 = vpop.f32.mrf.mxu0 }
 0x439   :  { %v12860_v55 = vpop.f32.mrf.mxu1 }
 0x43a   :  { %16002 = vst [vmem:[#allocation59_spill] sm:$0xff] %v12856_v8  ;;  %16003 = vst [vmem:[#allocation60_spill] sm:$0xff] %v12860_v55  ;;  %v12862_v24 = vpop.f32.mrf.mxu0  ;;  %v1956_v55 = vadd.f32 %v12763_v47, %v1737_v37 }
 0x43b   :  { %v2692_v30 = vpop.f32.mrf.mxu1 }
 0x43c   :  { %v2723_v3 = vadd.f32 %v2692_v30, %v2533_v26  ;;  %v12864_v45 = vpop.f32.mrf.mxu0  ;;  %v2145_v30 = vadd.f32 %v12775_v58, %v12761_v50  ;;  %v2146_v18 = vadd.f32 %v12778_v49, %v1956_v55 }
 0x43d   :  { %16004 = vst [vmem:[#allocation61_spill] sm:$0xff] %v12864_v45  ;;  %v12866_v52 = vpop.f32.mrf.mxu1  ;;  %v1743_v45 = vadd.f32 %v12699_v36, %v12727_v11  ;;  %v2147_v36 = vadd.f32 %v12780_v57, %v12766_v42 }
 0x43e   :  { %16005 = vst [vmem:[#allocation62_spill] sm:$0xff] %v12866_v52  ;;  %v12868_v10 = vpop.f32.mrf.mxu0  ;;  %v1773_v52 = vadd.f32 %v12759_v48, %v12753_v32  ;;  %v2335_v60 = vadd.f32 %v12802_v28, %v2145_v30  ;;  %v2336_v11 = vadd.f32 %v12804_v46, %v2146_v18 }
 0x43f   :  { %16006 = vst [vmem:[#allocation63_spill] sm:$0xff] %v12868_v10  ;;  %v2698_v12 = vpop.f32.mrf.mxu1  ;;  %v1958_v37 = vadd.f32 %v12768_v44, %v1743_v45  ;;  %v1779_v44 = vadd.f32 %v12771_v56, %v12755_v41 }
 0x440   :  { %v2725_v22 = vadd.f32 %v2698_v12, %v2535_v43  ;;  %v12872_v17 = vpop.f32.mrf.mxu0  ;;  %v1968_v47 = vadd.f32 %v12794_v0, %v1773_v52  ;;  %v2525_v32 = vadd.f32 %v12816_v35, %v2335_v60  ;;  %v2337_v52 = vadd.f32 %v12808_v53, %v2147_v36  ;;  %v16007_v60 = vld [vmem:[#allocation57_spill] sm:$0xff] }
 0x441   :  { %v12874_v8 = vpop.f32.mrf.mxu1  ;;  %v2148_v49 = vadd.f32 %v12784_v38, %v1958_v37  ;;  %v2526_v42 = vadd.f32 %v12818_v15, %v2336_v11 }
 0x442   :  { %v12879_v26 = vpop.f32.mrf.mxu0  ;;  %v2158_v0 = vadd.f32 %v12806_v59, %v1968_v47  ;;  %v2715_v57 = vadd.f32 %v2668_v2, %v2525_v32  ;;  %v2527_v38 = vadd.f32 %v12822_v4, %v2337_v52 }
 0x443   :  { %v2704_v10 = vpop.f32.mrf.mxu1  ;;  %v2338_v56 = vadd.f32 %v12810_v61, %v2148_v49  ;;  %v2716_v59 = vadd.f32 %v12842_v23, %v2526_v42 }
 0x444   :  { %v2727_v43 = vadd.f32 %v2704_v10, %v2537_v27  ;;  %v2882_v12 = vpop.f32.mrf.mxu0  ;;  %v1749_v27 = vadd.f32 %v12714_v1, %v12735_v25  ;;  %v2348_v1 = vadd.f32 %v12834_v31, %v2158_v0  ;;  %v2905_v53 = vadd.f32 %v2858_v34, %v2715_v57 }
 0x445   :  { %v2706_v50 = vpop.f32.mrf.mxu1  ;;  %v12889_v58 = vadd.f32 %v2882_v12, %v2723_v3  ;;  %v1970_v3 = vadd.f32 %v12798_v51, %v1779_v44  ;;  %v2528_v45 = vadd.f32 %v12824_v6, %v2338_v56  ;;  %v2717_v61 = vadd.f32 %v12846_v21, %v2527_v38 }
 0x446   :  { %v12895_v48 = vpop.f32.mrf.mxu0  ;;  %v1960_v55 = vadd.f32 %v12773_v54, %v1749_v27  ;;  %v2538_v31 = vadd.f32 %v12844_v40, %v2348_v1  ;;  %v2906_v4 = vadd.f32 %v2860_v16, %v2716_v59  ;;  %v3127_v27 = vpop.permute.xlu0 %3126  ;;  %v16011_v1 = vld [vmem:[#allocation63_spill] sm:$0xff]  ;;  %v16012_v59 = vld [vmem:[#allocation60_spill] sm:$0xff] }
 0x447   :  { %v2710_v28 = vpop.f32.mrf.mxu1  ;;  %v2160_v51 = vadd.f32 %v12812_v63, %v1970_v3  ;;  %v2718_v40 = vadd.f32 %v12848_v33, %v2528_v45  ;;  %v2907_v6 = vadd.f32 %v12858_v29, %v2717_v61  ;;  %v16010_v3 = vld [vmem:[#allocation54_spill] sm:$0xff] }
 0x448   :  { %v2729_v46 = vadd.f32 %v2710_v28, %v2539_v39  ;;  %v2888_v35 = vpop.f32.mrf.mxu0  ;;  %v1755_v39 = vadd.f32 %v12731_v14, %v12741_v13  ;;  %v2150_v54 = vadd.f32 %v12788_v7, %v1960_v55  ;;  %v2728_v30 = vadd.f32 %v2706_v50, %v2538_v31  ;;  %v3122_v7 = vpop.permute.xlu1 %3121  ;;  %v3498_v55 = vld [vmem:[#allocation10 + $0x1f8] sm:$0xff]  ;;  %v3496_v61 = vld [vmem:[#allocation10 + $0x1e8] sm:$0xff] }
 0x449   :  { %v2712_v25 = vpop.f32.mrf.mxu1  ;;  %v12908_v41 = vadd.f32 %v2888_v35, %v2725_v22  ;;  %v2350_v22 = vadd.f32 %v12838_v20, %v2160_v51  ;;  %v2908_v50 = vadd.f32 %v12862_v24, %v2718_v40 }
 0x44a   :  { %v12913_v15 = vpop.f32.mrf.mxu0  ;;  %v1962_v34 = vadd.f32 %v12782_v62, %v1755_v39  ;;  %v2340_v63 = vadd.f32 %v12814_v9, %v2150_v54 }
 0x44b   :  { %v3048_v2 = vpop.f32.mrf.mxu1  ;;  %v2540_v12 = vadd.f32 %v16007_v60, %v2350_v22  ;;  %v3495_v22 = vld [vmem:[#allocation10 + $0x1e0] sm:$0xff]  ;;  %v3492_v60 = vld [vmem:[#allocation10 + $0x1c8] sm:$0xff] }
 0x44c   :  { %v3095_v10 = vadd.f32 %v3048_v2, %v2905_v53  ;;  %v2894_v23 = vpop.f32.mrf.mxu0  ;;  %v2152_v16 = vadd.f32 %v12792_v5, %v1962_v34  ;;  %v16009_v5 = vld [vmem:[#allocation50_spill] sm:$0xff]  ;;  %v12947_v51 = vpop.permute.xlu1 %3131  ;;  %v16013_v2 = vmov 0.0  }
 0x44d   :  { %v12924_v14 = vadd.f32 %v2894_v23, %v2727_v43  ;;  %v3050_v13 = vpop.f32.mrf.mxu1  ;;  %v16008_v43 = vld [vmem:[#allocation52_spill] sm:$0xff]  ;;  %v2730_v33 = vadd.f32 %v2712_v25, %v2540_v12 }
 0x44e   :  { %v3096_v18 = vadd.f32 %v3050_v13, %v2906_v4  ;;  %v2896_v21 = vpop.f32.mrf.mxu0  ;;  %v3159_v62 = vadd.f32 %v3122_v7, %v3095_v10  ;;  %v2530_v47 = vadd.f32 %v16008_v43, %v2340_v63  ;;  %v2342_v44 = vadd.f32 %v16009_v5, %v2152_v16  ;;  %v3600_v4 = vld [vmem:[#allocation10 + $0x2b8] sm:$0xff]  ;;  %v12956_v63 = vpop.permute.xlu0 %3136  ;;  %v3597_v16 = vld [vmem:[#allocation10 + $0x2a0] sm:$0xff]  ;;  %v3590_v5 = vld [vmem:[#allocation10 + $0x268] sm:$0xff] }
 0x44f   :  { %v12931_v37 = vadd.f32 %v2896_v21, %v2728_v30  ;;  %v3054_v20 = vpop.f32.mrf.mxu1  ;;  %v3599_v30 = vld [vmem:[#allocation10 + $0x2b0] sm:$0xff]  ;;  %v3596_v12 = vld [vmem:[#allocation10 + $0x298] sm:$0xff] }
 0x450   :  { %v3160_v36 = vadd.f32 %v3122_v7, %v3096_v18  ;;  %v3097_v9 = vadd.f32 %v3054_v20, %v2907_v6  ;;  %v2900_v11 = vpop.f32.mrf.mxu0  ;;  %v2720_v49 = vadd.f32 %v12854_v19, %v2530_v47  ;;  %v3175_v42 = vmax.f32 %v3159_v62, 0.0  ;;  %v3497_v19 = vld [vmem:[#allocation10 + $0x1f0] sm:$0xff]  ;;  %v3598_v6 = vld [vmem:[#allocation10 + $0x2a8] sm:$0xff]  ;;  %v3491_v62 = vld [vmem:[#allocation10 + $0x1c0] sm:$0xff] }
 0x451   :  { %v12935_v32 = vadd.f32 %v2900_v11, %v2729_v46  ;;  %v3056_v29 = vpop.f32.mrf.mxu1  ;;  %v2532_v46 = vadd.f32 %v16010_v3, %v2342_v44  ;;  %v3493_v18 = vld [vmem:[#allocation10 + $0x1d0] sm:$0xff]  ;;  %v3490_v43 = vld [vmem:[#allocation10 + $0x1b8] sm:$0xff]  ;;  %v3594_v47 = vld [vmem:[#allocation10 + $0x288] sm:$0xff] }
 0x452   :  { %v3176_v0 = vmax.f32 %v3160_v36, 0.0  ;;  %v3098_v28 = vadd.f32 %v3056_v29, %v2908_v50  ;;  %v2902_v52 = vpop.f32.mrf.mxu0  ;;  %v3161_v57 = vadd.f32 %v3127_v27, %v3097_v9  ;;  %v2910_v25 = vadd.f32 %v16011_v1, %v2720_v49  ;;  %v3595_v20 = vld [vmem:[#allocation10 + $0x290] sm:$0xff]  ;;  %v3593_v36 = vld [vmem:[#allocation10 + $0x280] sm:$0xff]  ;;  %v3488_v9 = vld [vmem:[#allocation10 + $0x1a8] sm:$0xff] }
 0x453   :  { %v12939_v35 = vadd.f32 %v2902_v52, %v2730_v33  ;;  %v12941_v24 = vpop.f32.mrf.mxu1  ;;  %v2722_v53 = vadd.f32 %v16012_v59, %v2532_v46  ;;  %v3489_v50 = vld [vmem:[#allocation10 + $0x1b0] sm:$0xff]  ;;  %v3592_v11 = vld [vmem:[#allocation10 + $0x278] sm:$0xff]  ;;  %v3487_v33 = vld [vmem:[#allocation10 + $0x1a0] sm:$0xff] }
 0x454   :  { %v3162_v56 = vadd.f32 %v3127_v27, %v3098_v28  ;;  %10529 = vmatprep.mubr.msk.f32.mxu1 %vm3302_vm13, %v3176_v0  ;;  %v3177_v31 = vmax.f32 %v3161_v57, 0.0  ;;  %v3591_v29 = vld [vmem:[#allocation10 + $0x270] sm:$0xff]  ;;  %v3486_v27 = vld [vmem:[#allocation10 + $0x198] sm:$0xff]  ;;  %v12979_v44 = vpop.f32.mrf.mxu0  ;;  %v3589_v0 = vld [vmem:[#allocation10 + $0x260] sm:$0xff] }
 0x455   :  { %v3062_v38 = vpop.f32.mrf.mxu1  ;;  %3374 = vmatmul.mubr.f32.vlgmr.msra.gmra.mxu1 %v3175_v42  ;;  %v2912_v10 = vadd.f32 %v12879_v26, %v2722_v53  ;;  %v3494_v26 = vld [vmem:[#allocation10 + $0x1d8] sm:$0xff]  ;;  %v3485_v49 = vld [vmem:[#allocation10 + $0x190] sm:$0xff]  ;;  %v16015_v42 = vld [vmem:[#allocation42_spill] sm:$0xff] }
 0x456   :  { %v3178_v39 = vmax.f32 %v3162_v56, 0.0  ;;  %v3100_v54 = vadd.f32 %v3062_v38, %v2910_v25  ;;  %3514 = vmatpush1.msra.mxu1 %v3498_v55  ;;  %v10933_v28 = vpop.f32.mrf.mxu0  ;;  %v16014_v52 = vld [vmem:[#allocation43_spill] sm:$0xff]  ;;  %v3588_v3 = vld [vmem:[#allocation10 + $0x258] sm:$0xff]  ;;  %v3483_v25 = vld [vmem:[#allocation10 + $0x180] sm:$0xff] }
 0x457   :  { %3515 = vmatprep.subr.mxu1 %v16013_v2  ;;  %v12950_v45 = vpop.f32.mrf.mxu1  ;;  %v1761_v57 = vadd.f32 %v16015_v42, %v16014_v52  ;;  %v3484_v55 = vld [vmem:[#allocation10 + $0x188] sm:$0xff]  ;;  %v16016_v46 = vld [vmem:[#allocation48_spill] sm:$0xff]  ;;  %v3605_v28 = vld [vmem:[#allocation10 + $0x2e0] sm:$0xff] }
 0x458   :  { %v3164_v23 = vadd.f32 %v12947_v51, %v3100_v54  ;;  %3516 = vmatpush1.msra.mxu1 %v3497_v19  ;;  %10531 = vmatprep.mubr.msk.f32.mxu0 %vm3302_vm13, %v3178_v39  ;;  %v3587_v56 = vld [vmem:[#allocation10 + $0x250] sm:$0xff]  ;;  %v16017_v38 = vld [vmem:[#allocation46_spill] sm:$0xff]  ;;  %v3506_v53 = vld [vmem:[#allocation10 + $0x238] sm:$0xf] }
 0x459   :  { %3517 = vmatprep.subr.mxu1 %v16013_v2  ;;  %v3068_v34 = vpop.f32.mrf.mxu1  ;;  %3476 = vmatmul.mubr.f32.vlgmr.msra.gmra.mxu0 %v3177_v31  ;;  %v1964_v1 = vadd.f32 %v16016_v46, %v1761_v57  ;;  %v3586_v39 = vld [vmem:[#allocation10 + $0x248] sm:$0xff]  ;;  %v16018_v54 = vld [vmem:[#allocation45_spill] sm:$0xff] }
 0x45a   :  { %v3180_v13 = vmax.f32 %v3164_v23, 0.0  ;;  %v3102_v7 = vadd.f32 %v3068_v34, %v2912_v10  ;;  %3518 = vmatpush1.msra.mxu1 %v3496_v61  ;;  %3616 = vmatpush1.msra.mxu0 %v3600_v4  ;;  %v16019_v31 = vld [vmem:[#allocation47_spill] sm:$0xff]  ;;  %v3585_v34 = vld [vmem:[#allocation10 + $0x240] sm:$0xff]  ;;  %v3604_v46 = vld [vmem:[#allocation10 + $0x2d8] sm:$0xff] }
 0x45b   :  { %3519 = vmatprep.subr.mxu1 %v16013_v2  ;;  %3617 = vmatprep.subr.mxu0 %v16013_v2  ;;  %v2154_v19 = vadd.f32 %v16017_v38, %v1964_v1  ;;  %v12991_v59 = vpop.f32.mrf.mxu1  ;;  %v1767_v61 = vadd.f32 %v16019_v31, %v16018_v54  ;;  %v16020_v4 = vld [vmem:[#allocation51_spill] sm:$0xff]  ;;  %v13028_v1 = vpop.permute.xlu1 %3141 }
 0x45c   :  { %v3166_v40 = vadd.f32 %v12956_v63, %v3102_v7  ;;  %3520 = vmatpush1.msra.mxu1 %v3495_v22  ;;  %3618 = vmatpush1.msra.mxu0 %v3599_v30  ;;  %v3505_v23 = vld [vmem:[#allocation10 + $0x230] sm:$0xff] }
 0x45d   :  { %3521 = vmatprep.subr.mxu1 %v16013_v2  ;;  %10533 = vmatprep.mubr.msk.f32.mxu1 %vm3302_vm13, %v3180_v13  ;;  %v2344_v10 = vadd.f32 %v16020_v4, %v2154_v19  ;;  %v16021_v22 = vld [vmem:[#allocation44_spill] sm:$0xff]  ;;  %v16022_v13 = vld [vmem:[#allocation55_spill] sm:$0xff] }
 0x45e   :  { %v3182_v21 = vmax.f32 %v3166_v40, 0.0  ;;  %3619 = vmatprep.subr.mxu0 %v16013_v2  ;;  %3522 = vmatpush1.msra.mxu1 %v3494_v26  ;;  %v1966_v30 = vadd.f32 %v16021_v22, %v1767_v61  ;;  %v3074_v26 = vpop.f32.mrf.mxu1  ;;  %v3504_v40 = vld [vmem:[#allocation10 + $0x228] sm:$0xff]  ;;  %v3601_v61 = vld [vmem:[#allocation10 + $0x2c0] sm:$0xff]  ;;  %v3701_v4 = vld [vmem:[#allocation10 + $0x370] sm:$0xff] }
 0x45f   :  { %3620 = vmatpush1.msra.mxu0 %v3598_v6  ;;  %3523 = vmatprep.subr.mxu1 %v16013_v2  ;;  %v2534_v7 = vadd.f32 %v16022_v13, %v2344_v10  ;;  %v3608_v6 = vld [vmem:[#allocation10 + $0x2f8] sm:$0xf]  ;;  %v16029_v52 = vld [vmem:[#allocation59_spill] sm:$0xff]  ;;  %v3699_v22 = vld [vmem:[#allocation10 + $0x360] sm:$0xff] }
 0x460   :  { %3621 = vmatprep.subr.mxu0 %v16013_v2  ;;  %3524 = vmatpush1.msra.mxu1 %v3493_v18  ;;  %v16023_v18 = vld [vmem:[#allocation49_spill] sm:$0xff]  ;;  %v2911_v42 = vadd.f32 %v12872_v17, %v16029_v52  ;;  %v3700_v10 = vld [vmem:[#allocation10 + $0x368] sm:$0xff] }
 0x461   :  { %3622 = vmatpush1.msra.mxu0 %v3597_v16  ;;  %3525 = vmatprep.subr.mxu1 %v16013_v2  ;;  %v16024_v16 = vld [vmem:[#allocation62_spill] sm:$0xff]  ;;  %v3698_v13 = vld [vmem:[#allocation10 + $0x358] sm:$0xff] }
 0x462   :  { %3623 = vmatprep.subr.mxu0 %v16013_v2  ;;  %10535 = vmatprep.mubr.msk.f32.mxu0 %vm3302_vm13, %v3182_v21  ;;  %v2156_v21 = vadd.f32 %v16023_v18, %v1966_v30  ;;  %v3803_v30 = vld [vmem:[#allocation10 + $0x430] sm:$0xff]  ;;  %v3800_v18 = vld [vmem:[#allocation10 + $0x418] sm:$0xff]  ;;  %v3790_v52 = vld [vmem:[#allocation10 + $0x3c8] sm:$0xff] }
 0x463   :  { %3526 = vmatpush1.msra.mxu1 %v3492_v60  ;;  %3624 = vmatpush1.msra.mxu0 %v3596_v12  ;;  %v2724_v60 = vadd.f32 %v16024_v16, %v2534_v7  ;;  %v16025_v12 = vld [vmem:[#allocation58_spill] sm:$0xff]  ;;  %v3799_v16 = vld [vmem:[#allocation10 + $0x410] sm:$0xff] }
 0x464   :  { %3527 = vmatprep.subr.mxu1 %v16013_v2  ;;  %3625 = vmatprep.subr.mxu0 %v16013_v2  ;;  %v3802_v7 = vld [vmem:[#allocation10 + $0x428] sm:$0xff] }
 0x465   :  { %3528 = vmatpush1.msra.mxu1 %v3491_v62  ;;  %3626 = vmatpush1.msra.mxu0 %v3595_v20  ;;  %v16026_v62 = vld [vmem:[#allocation61_spill] sm:$0xff] }
 0x466   :  { %3529 = vmatprep.subr.mxu1 %v16013_v2  ;;  %3627 = vmatprep.subr.mxu0 %v16013_v2  ;;  %v2909_v20 = vadd.f32 %v16026_v62, %v16025_v12  ;;  %v3798_v12 = vld [vmem:[#allocation10 + $0x408] sm:$0xff]  ;;  %v3693_v62 = vld [vmem:[#allocation10 + $0x330] sm:$0xff] }
 0x467   :  { %3530 = vmatpush1.msra.mxu1 %v3490_v43  ;;  %3628 = vmatpush1.msra.mxu0 %v3594_v47  ;;  %v3503_v43 = vld [vmem:[#allocation10 + $0x220] sm:$0xff]  ;;  %v3607_v47 = vld [vmem:[#allocation10 + $0x2f0] sm:$0xff] }
 0x468   :  { %3531 = vmatprep.subr.mxu1 %v16013_v2  ;;  %3629 = vmatprep.subr.mxu0 %v16013_v2 }
 0x469   :  { %3532 = vmatpush1.msra.mxu1 %v3489_v50  ;;  %3630 = vmatpush1.msra.mxu0 %v3593_v36  ;;  %v16027_v50 = vld [vmem:[#allocation53_spill] sm:$0xff] }
 0x46a   :  { %3533 = vmatprep.subr.mxu1 %v16013_v2  ;;  %3631 = vmatprep.subr.mxu0 %v16013_v2  ;;  %v2346_v36 = vadd.f32 %v16027_v50, %v2156_v21  ;;  %v3695_v21 = vld [vmem:[#allocation10 + $0x340] sm:$0xff] }
 0x46b   :  { %3534 = vmatpush1.msra.mxu1 %v3488_v9  ;;  %3632 = vmatpush1.msra.mxu0 %v3592_v11  ;;  %v2914_v9 = vadd.f32 %v12895_v48, %v2724_v60  ;;  %v3099_v11 = vadd.f32 %v12941_v24, %v2909_v20  ;;  %v3501_v48 = vld [vmem:[#allocation10 + $0x210] sm:$0xff]  ;;  %v3694_v60 = vld [vmem:[#allocation10 + $0x338] sm:$0xff]  ;;  %v3797_v20 = vld [vmem:[#allocation10 + $0x400] sm:$0xff] }
 0x46c   :  { %3535 = vmatprep.subr.mxu1 %v16013_v2  ;;  %3633 = vmatprep.subr.mxu0 %v16013_v2  ;;  %v3691_v50 = vld [vmem:[#allocation10 + $0x320] sm:$0xff] }
 0x46d   :  { %3536 = vmatpush1.msra.mxu1 %v3487_v33  ;;  %3634 = vmatpush1.msra.mxu0 %v3591_v29  ;;  %v13015_v33 = vpop.f32.mrf.mxu1  ;;  %v3502_v29 = vld [vmem:[#allocation10 + $0x218] sm:$0xff]  ;;  %v3163_v57 = vadd.f32 %v12947_v51, %v3099_v11  ;;  %v3499_v51 = vld [vmem:[#allocation10 + $0x200] sm:$0xff]  ;;  %v3794_v11 = vld [vmem:[#allocation10 + $0x3e8] sm:$0xff] }
 0x46e   :  { %3537 = vmatprep.subr.mxu1 %v16013_v2  ;;  %3635 = vmatprep.subr.mxu0 %v16013_v2 }
 0x46f   :  { %3538 = vmatpush1.msra.mxu1 %v3486_v27  ;;  %3636 = vmatpush1.msra.mxu0 %v3590_v5  ;;  %v3606_v27 = vld [vmem:[#allocation10 + $0x2e8] sm:$0xff]  ;;  %v16028_v5 = vld [vmem:[#allocation56_spill] sm:$0xff]  ;;  %v3179_v19 = vmax.f32 %v3163_v57, 0.0  ;;  %v3789_v57 = vld [vmem:[#allocation10 + $0x3c0] sm:$0xff] }
 0x470   :  { %3539 = vmatprep.subr.mxu1 %v16013_v2  ;;  %3637 = vmatprep.subr.mxu0 %v16013_v2 }
 0x471   :  { %3540 = vmatpush1.msra.mxu1 %v3485_v49  ;;  %3638 = vmatpush1.msra.mxu0 %v3589_v0  ;;  %v2536_v49 = vadd.f32 %v16028_v5, %v2346_v36  ;;  %v3104_v0 = vadd.f32 %v3074_v26, %v2914_v9  ;;  %v3697_v26 = vld [vmem:[#allocation10 + $0x350] sm:$0xff]  ;;  %v3690_v9 = vld [vmem:[#allocation10 + $0x318] sm:$0xff]  ;;  %v3688_v5 = vld [vmem:[#allocation10 + $0x308] sm:$0xff] }
 0x472   :  { %3541 = vmatprep.subr.mxu1 %v16013_v2  ;;  %3639 = vmatprep.subr.mxu0 %v16013_v2  ;;  %v3795_v36 = vld [vmem:[#allocation10 + $0x3f0] sm:$0xff] }
 0x473   :  { %3542 = vmatpush1.msra.mxu1 %v3484_v55  ;;  %3640 = vmatpush1.msra.mxu0 %v3588_v3  ;;  %v2726_v24 = vadd.f32 %v12874_v8, %v2536_v49  ;;  %v3080_v55 = vpop.f32.mrf.mxu1  ;;  %v3500_v3 = vld [vmem:[#allocation10 + $0x208] sm:$0xff]  ;;  %v3101_v8 = vadd.f32 %v12950_v45, %v2911_v42  ;;  %v3168_v17 = vadd.f32 %v13028_v1, %v3104_v0  ;;  %v3792_v49 = vld [vmem:[#allocation10 + $0x3d8] sm:$0xff]  ;;  %v3687_v0 = vld [vmem:[#allocation10 + $0x300] sm:$0xff] }
 0x474   :  { %3543 = vmatprep.subr.mxu1 %v16013_v2  ;;  %3641 = vmatprep.subr.mxu0 %v16013_v2  ;;  %v3709_v42 = vld [vmem:[#allocation10 + $0x3b0] sm:$0xff] }
 0x475   :  { %3544 = vmatpush1.msra.mxu1 %v3483_v25  ;;  %3642 = vmatpush1.msra.mxu0 %v3587_v56  ;;  %v2916_v25 = vadd.f32 %v12913_v15, %v2726_v24  ;;  %v3603_v56 = vld [vmem:[#allocation10 + $0x2d0] sm:$0xff]  ;;  %v3602_v15 = vld [vmem:[#allocation10 + $0x2c8] sm:$0xff]  ;;  %v3165_v45 = vadd.f32 %v12956_v63, %v3101_v8  ;;  %v3184_v54 = vmax.f32 %v3168_v17, 0.0  ;;  %v3710_v24 = vld [vmem:[#allocation10 + $0x3b8] sm:$0xf]  ;;  %v3103_v17 = vadd.f32 %v12991_v59, %v12889_v58 }
 0x476   :  { %3561 = vmatprep.subr.mxu1 %v16013_v2  ;;  %3643 = vmatprep.subr.mxu0 %v16013_v2  ;;  %v3811_v8 = vld [vmem:[#allocation10 + $0x470] sm:$0xff] }
 0x477   :  { %10532 = vmatpush2.msk.msra.mxu1 %vm3204_vm10, %v3506_v53  ;;  %3644 = vmatpush1.msra.mxu0 %v3586_v39  ;;  %v3106_v38 = vadd.f32 %v3080_v55, %v2916_v25  ;;  %v3702_v53 = vld [vmem:[#allocation10 + $0x378] sm:$0xff]  ;;  %v13038_v39 = vpop.permute.xlu0 %3146  ;;  %v3181_v63 = vmax.f32 %v3165_v45, 0.0  ;;  %v3707_v25 = vld [vmem:[#allocation10 + $0x3a0] sm:$0xff]  ;;  %v3167_v58 = vadd.f32 %v13028_v1, %v3103_v17 }
 0x478   :  { %3563 = vmatprep.subr.mxu1 %v16013_v2  ;;  %3645 = vmatprep.subr.mxu0 %v16013_v2  ;;  %v3809_v45 = vld [vmem:[#allocation10 + $0x460] sm:$0xff] }
 0x479   :  { %3564 = vmatpush2.msra.mxu1 %v3505_v23  ;;  %3646 = vmatpush1.msra.mxu0 %v3585_v34  ;;  %v3170_v31 = vadd.f32 %v13038_v39, %v3106_v38  ;;  %v3804_v23 = vld [vmem:[#allocation10 + $0x438] sm:$0xff]  ;;  %v3810_v38 = vld [vmem:[#allocation10 + $0x468] sm:$0xff]  ;;  %v3703_v1 = vld [vmem:[#allocation10 + $0x380] sm:$0xff] }
 0x47a   :  { %3565 = vmatprep.subr.mxu1 %v16013_v2  ;;  %3663 = vmatprep.subr.mxu0 %v16013_v2  ;;  %v3993_v17 = vld [vmem:[#allocation10 + $0x540] sm:$0xff] }
 0x47b   :  { %3566 = vmatpush2.msra.mxu1 %v3504_v40  ;;  %10534 = vmatpush2.msk.msra.mxu0 %vm3204_vm10, %v3608_v6  ;;  %v3186_v34 = vmax.f32 %v3170_v31, 0.0  ;;  %v3801_v40 = vld [vmem:[#allocation10 + $0x420] sm:$0xff]  ;;  %v3696_v6 = vld [vmem:[#allocation10 + $0x348] sm:$0xff]  ;;  %v13097_v31 = vpop.permute.xlu1 %3151 }
 0x47c   :  { %3567 = vmatprep.subr.mxu1 %v16013_v2  ;;  %3665 = vmatprep.subr.mxu0 %v16013_v2 }
 0x47d   :  { %3568 = vmatpush2.msra.mxu1 %v3503_v43  ;;  %3666 = vmatpush2.msra.mxu0 %v3607_v47  ;;  %v3692_v43 = vld [vmem:[#allocation10 + $0x328] sm:$0xff]  ;;  %v3796_v47 = vld [vmem:[#allocation10 + $0x3f8] sm:$0xff] }
 0x47e   :  { %3569 = vmatprep.subr.mxu1 %v16013_v2  ;;  %3667 = vmatprep.subr.mxu0 %v16013_v2 }
 0x47f   :  { %3570 = vmatpush2.msra.mxu1 %v3502_v29  ;;  %3668 = vmatpush2.msra.mxu0 %v3606_v27  ;;  %v3689_v29 = vld [vmem:[#allocation10 + $0x310] sm:$0xff]  ;;  %v3793_v27 = vld [vmem:[#allocation10 + $0x3e0] sm:$0xff] }
 0x480   :  { %3571 = vmatprep.subr.mxu1 %v16013_v2  ;;  %3669 = vmatprep.subr.mxu0 %v16013_v2 }
 0x481   :  { %3572 = vmatpush2.msra.mxu1 %v3501_v48  ;;  %3670 = vmatpush2.msra.mxu0 %v3605_v28  ;;  %v3791_v48 = vld [vmem:[#allocation10 + $0x3d0] sm:$0xff]  ;;  %v13073_v28 = vpop.f32.mrf.mxu1 }
 0x482   :  { %3573 = vmatprep.subr.mxu1 %v16013_v2  ;;  %3671 = vmatprep.subr.mxu0 %v16013_v2 }
 0x483   :  { %3574 = vmatpush2.msra.mxu1 %v3500_v3  ;;  %3672 = vmatpush2.msra.mxu0 %v3604_v46  ;;  %v3086_v55 = vpop.f32.mrf.mxu1  ;;  %v3708_v3 = vld [vmem:[#allocation10 + $0x3a8] sm:$0xff]  ;;  %v3812_v46 = vld [vmem:[#allocation10 + $0x478] sm:$0xf] }
 0x484   :  { %3575 = vmatprep.subr.mxu1 %v16013_v2  ;;  %3673 = vmatprep.subr.mxu0 %v16013_v2 }
 0x485   :  { %3576 = vmatpush2.msra.mxu1 %v3499_v51  ;;  %3674 = vmatpush2.msra.mxu0 %v3603_v56  ;;  %v13087_v51 = vpop.f32.mrf.mxu1  ;;  %v3706_v56 = vld [vmem:[#allocation10 + $0x398] sm:$0xff] }
 0x486   :  { %3578 = vmatmul.mubr.f32.vlgmr.msra.gmra.mxu1 %v3179_v19  ;;  %3675 = vmatprep.subr.mxu0 %v16013_v2  ;;  %v3108_v19 = vadd.f32 %v3086_v55, %v12931_v37  ;;  %v3105_v37 = vadd.f32 %v13015_v33, %v12908_v41  ;;  %v3806_v41 = vld [vmem:[#allocation10 + $0x448] sm:$0xff]  ;;  %v3891_v55 = vld [vmem:[#allocation10 + $0x480] sm:$0xff] }
 0x487   :  { %3717 = vmatprep.subr.mxu1 %v16013_v2  ;;  %3676 = vmatpush2.msra.mxu0 %v3602_v15  ;;  %v3705_v15 = vld [vmem:[#allocation10 + $0x390] sm:$0xff]  ;;  %v3092_v59 = vpop.f32.mrf.mxu1 }
 0x488   :  { %3718 = vmatpush1.msra.mxu1 %v3702_v53  ;;  %10537 = vmatprep.mubr.msk.f32.mxu1 %vm3302_vm13, %v3184_v54  ;;  %v3704_v53 = vld [vmem:[#allocation10 + $0x388] sm:$0xff]  ;;  %v3808_v54 = vld [vmem:[#allocation10 + $0x458] sm:$0xff]  ;;  %v3169_v33 = vadd.f32 %v13038_v39, %v3105_v37 }
 0x489   :  { %3677 = vmatprep.subr.mxu0 %v16013_v2  ;;  %3719 = vmatprep.subr.mxu1 %v16013_v2 }
 0x48a   :  { %3678 = vmatpush2.msra.mxu0 %v3601_v61  ;;  %3720 = vmatpush1.msra.mxu1 %v3701_v4  ;;  %v3172_v61 = vadd.f32 %v13097_v31, %v3108_v19  ;;  %v3807_v4 = vld [vmem:[#allocation10 + $0x450] sm:$0xff]  ;;  %v3185_v39 = vmax.f32 %v3169_v33, 0.0  ;;  %v3911_v19 = vld [vmem:[#allocation10 + $0x520] sm:$0xff] }
 0x48b   :  { %3680 = vmatmul.mubr.f32.vlgmr.msra.gmra.mxu0 %v3181_v63  ;;  %3721 = vmatprep.subr.mxu1 %v16013_v2  ;;  %v3110_v63 = vadd.f32 %v3092_v59, %v12939_v35  ;;  %v4014_v59 = vld [vmem:[#allocation10 + $0x5e8] sm:$0xff] }
 0x48c   :  { %3819 = vmatprep.subr.mxu0 %v16013_v2  ;;  %3722 = vmatpush1.msra.mxu1 %v3700_v10  ;;  %v3183_v10 = vmax.f32 %v3167_v58, 0.0  ;;  %v3910_v58 = vld [vmem:[#allocation10 + $0x518] sm:$0xff]  ;;  %v4101_v33 = vld [vmem:[#allocation14 + $0x30] sm:$0xff] }
 0x48d   :  { %3820 = vmatpush1.msra.mxu0 %v3804_v23  ;;  %10539 = vmatprep.mubr.msk.f32.mxu0 %vm3302_vm13, %v3186_v34  ;;  %v3906_v23 = vld [vmem:[#allocation10 + $0x4f8] sm:$0xff]  ;;  %v13108_v34 = vpop.permute.xlu0 %3156 }
 0x48e   :  { %3723 = vmatprep.subr.mxu1 %v16013_v2  ;;  %3821 = vmatprep.subr.mxu0 %v16013_v2  ;;  %v3174_v35 = vadd.f32 %v13108_v34, %v3110_v63 }
 0x48f   :  { %3724 = vmatpush1.msra.mxu1 %v3699_v22  ;;  %3822 = vmatpush1.msra.mxu0 %v3803_v30  ;;  %v3188_v22 = vmax.f32 %v3172_v61, 0.0  ;;  %v3805_v30 = vld [vmem:[#allocation10 + $0x440] sm:$0xff]  ;;  %v4012_v61 = vld [vmem:[#allocation10 + $0x5d8] sm:$0xff] }
 0x490   :  { %3725 = vmatprep.subr.mxu1 %v16013_v2  ;;  %3823 = vmatprep.subr.mxu0 %v16013_v2 }
 0x491   :  { %3726 = vmatpush1.msra.mxu1 %v3698_v13  ;;  %3824 = vmatpush1.msra.mxu0 %v3802_v7  ;;  %v3905_v13 = vld [vmem:[#allocation10 + $0x4f0] sm:$0xff]  ;;  %v3904_v7 = vld [vmem:[#allocation10 + $0x4e8] sm:$0xff] }
 0x492   :  { %3727 = vmatprep.subr.mxu1 %v16013_v2  ;;  %3825 = vmatprep.subr.mxu0 %v16013_v2 }
 0x493   :  { %3728 = vmatpush1.msra.mxu1 %v3697_v26  ;;  %3826 = vmatpush1.msra.mxu0 %v3801_v40  ;;  %v4008_v26 = vld [vmem:[#allocation10 + $0x5b8] sm:$0xff]  ;;  %v3190_v40 = vmax.f32 %v3174_v35, 0.0 }
 0x494   :  { %3729 = vmatprep.subr.mxu1 %v16013_v2  ;;  %3827 = vmatprep.subr.mxu0 %v16013_v2 }
 0x495   :  { %3730 = vmatpush1.msra.mxu1 %v3696_v6  ;;  %3828 = vmatpush1.msra.mxu0 %v3800_v18  ;;  %v3903_v6 = vld [vmem:[#allocation10 + $0x4e0] sm:$0xff]  ;;  %v4007_v18 = vld [vmem:[#allocation10 + $0x5b0] sm:$0xff] }
 0x496   :  { %3731 = vmatprep.subr.mxu1 %v16013_v2  ;;  %3829 = vmatprep.subr.mxu0 %v16013_v2 }
 0x497   :  { %3732 = vmatpush1.msra.mxu1 %v3695_v21  ;;  %3830 = vmatpush1.msra.mxu0 %v3799_v16  ;;  %v3902_v21 = vld [vmem:[#allocation10 + $0x4d8] sm:$0xff]  ;;  %v4006_v16 = vld [vmem:[#allocation10 + $0x5a8] sm:$0xff] }
 0x498   :  { %3733 = vmatprep.subr.mxu1 %v16013_v2  ;;  %3831 = vmatprep.subr.mxu0 %v16013_v2 }
 0x499   :  { %3734 = vmatpush1.msra.mxu1 %v3694_v60  ;;  %3832 = vmatpush1.msra.mxu0 %v3798_v12  ;;  %v3901_v60 = vld [vmem:[#allocation10 + $0x4d0] sm:$0xff]  ;;  %v4005_v12 = vld [vmem:[#allocation10 + $0x5a0] sm:$0xff] }
 0x49a   :  { %3735 = vmatprep.subr.mxu1 %v16013_v2  ;;  %3833 = vmatprep.subr.mxu0 %v16013_v2 }
 0x49b   :  { %3736 = vmatpush1.msra.mxu1 %v3693_v62  ;;  %3834 = vmatpush1.msra.mxu0 %v3797_v20  ;;  %v3900_v62 = vld [vmem:[#allocation10 + $0x4c8] sm:$0xff]  ;;  %v4004_v20 = vld [vmem:[#allocation10 + $0x598] sm:$0xff] }
 0x49c   :  { %3737 = vmatprep.subr.mxu1 %v16013_v2  ;;  %3835 = vmatprep.subr.mxu0 %v16013_v2 }
 0x49d   :  { %3738 = vmatpush1.msra.mxu1 %v3692_v43  ;;  %3836 = vmatpush1.msra.mxu0 %v3796_v47  ;;  %v3899_v43 = vld [vmem:[#allocation10 + $0x4c0] sm:$0xff]  ;;  %v4003_v47 = vld [vmem:[#allocation10 + $0x590] sm:$0xff] }
 0x49e   :  { %3739 = vmatprep.subr.mxu1 %v16013_v2  ;;  %3837 = vmatprep.subr.mxu0 %v16013_v2 }
 0x49f   :  { %3740 = vmatpush1.msra.mxu1 %v3691_v50  ;;  %3838 = vmatpush1.msra.mxu0 %v3795_v36  ;;  %v3898_v50 = vld [vmem:[#allocation10 + $0x4b8] sm:$0xff]  ;;  %v4002_v36 = vld [vmem:[#allocation10 + $0x588] sm:$0xff] }
 0x4a0   :  { %3741 = vmatprep.subr.mxu1 %v16013_v2  ;;  %3839 = vmatprep.subr.mxu0 %v16013_v2 }
 0x4a1   :  { %3742 = vmatpush1.msra.mxu1 %v3690_v9  ;;  %3840 = vmatpush1.msra.mxu0 %v3794_v11  ;;  %v3897_v9 = vld [vmem:[#allocation10 + $0x4b0] sm:$0xff]  ;;  %v4001_v11 = vld [vmem:[#allocation10 + $0x580] sm:$0xff] }
 0x4a2   :  { %3743 = vmatprep.subr.mxu1 %v16013_v2  ;;  %3841 = vmatprep.subr.mxu0 %v16013_v2 }
 0x4a3   :  { %3744 = vmatpush1.msra.mxu1 %v3689_v29  ;;  %3842 = vmatpush1.msra.mxu0 %v3793_v27  ;;  %v3896_v29 = vld [vmem:[#allocation10 + $0x4a8] sm:$0xff]  ;;  %v4000_v27 = vld [vmem:[#allocation10 + $0x578] sm:$0xff] }
 0x4a4   :  { %3745 = vmatprep.subr.mxu1 %v16013_v2  ;;  %3843 = vmatprep.subr.mxu0 %v16013_v2 }
 0x4a5   :  { %3746 = vmatpush1.msra.mxu1 %v3688_v5  ;;  %3844 = vmatpush1.msra.mxu0 %v3792_v49  ;;  %v3895_v5 = vld [vmem:[#allocation10 + $0x4a0] sm:$0xff]  ;;  %v3999_v49 = vld [vmem:[#allocation10 + $0x570] sm:$0xff] }
 0x4a6   :  { %3747 = vmatprep.subr.mxu1 %v16013_v2  ;;  %3845 = vmatprep.subr.mxu0 %v16013_v2 }
 0x4a7   :  { %3748 = vmatpush1.msra.mxu1 %v3687_v0  ;;  %3846 = vmatpush1.msra.mxu0 %v3791_v48  ;;  %v3894_v0 = vld [vmem:[#allocation10 + $0x498] sm:$0xff]  ;;  %v3998_v48 = vld [vmem:[#allocation10 + $0x568] sm:$0xff] }
 0x4a8   :  { %3765 = vmatprep.subr.mxu1 %v16013_v2  ;;  %3847 = vmatprep.subr.mxu0 %v16013_v2 }
 0x4a9   :  { %10536 = vmatpush2.msk.msra.mxu1 %vm3204_vm10, %v3710_v24  ;;  %3848 = vmatpush1.msra.mxu0 %v3790_v52  ;;  %v3893_v24 = vld [vmem:[#allocation10 + $0x490] sm:$0xff]  ;;  %v3997_v52 = vld [vmem:[#allocation10 + $0x560] sm:$0xff] }
 0x4aa   :  { %3767 = vmatprep.subr.mxu1 %v16013_v2  ;;  %3849 = vmatprep.subr.mxu0 %v16013_v2 }
 0x4ab   :  { %3768 = vmatpush2.msra.mxu1 %v3709_v42  ;;  %3850 = vmatpush1.msra.mxu0 %v3789_v57  ;;  %v3892_v42 = vld [vmem:[#allocation10 + $0x488] sm:$0xff]  ;;  %v3996_v57 = vld [vmem:[#allocation10 + $0x558] sm:$0xff] }
 0x4ac   :  { %3769 = vmatprep.subr.mxu1 %v16013_v2  ;;  %3867 = vmatprep.subr.mxu0 %v16013_v2 }
 0x4ad   :  { %3770 = vmatpush2.msra.mxu1 %v3708_v3  ;;  %10538 = vmatpush2.msk.msra.mxu0 %vm3204_vm10, %v3812_v46  ;;  %v3995_v3 = vld [vmem:[#allocation10 + $0x550] sm:$0xff]  ;;  %v3914_v46 = vld [vmem:[#allocation10 + $0x538] sm:$0xf] }
 0x4ae   :  { %3771 = vmatprep.subr.mxu1 %v16013_v2  ;;  %3869 = vmatprep.subr.mxu0 %v16013_v2 }
 0x4af   :  { %3772 = vmatpush2.msra.mxu1 %v3707_v25  ;;  %3870 = vmatpush2.msra.mxu0 %v3811_v8  ;;  %v3994_v25 = vld [vmem:[#allocation10 + $0x548] sm:$0xff]  ;;  %v3913_v8 = vld [vmem:[#allocation10 + $0x530] sm:$0xff] }
 0x4b0   :  { %3773 = vmatprep.subr.mxu1 %v16013_v2  ;;  %3871 = vmatprep.subr.mxu0 %v16013_v2 }
 0x4b1   :  { %3774 = vmatpush2.msra.mxu1 %v3706_v56  ;;  %3872 = vmatpush2.msra.mxu0 %v3810_v38  ;;  %v3912_v56 = vld [vmem:[#allocation10 + $0x528] sm:$0xff]  ;;  %v4016_v38 = vld [vmem:[#allocation10 + $0x5f8] sm:$0xf] }
 0x4b2   :  { %3775 = vmatprep.subr.mxu1 %v16013_v2  ;;  %3873 = vmatprep.subr.mxu0 %v16013_v2 }
 0x4b3   :  { %3776 = vmatpush2.msra.mxu1 %v3705_v15  ;;  %3874 = vmatpush2.msra.mxu0 %v3809_v45  ;;  %v4015_v15 = vld [vmem:[#allocation10 + $0x5f0] sm:$0xff]  ;;  %v3107_v45 = vadd.f32 %v13073_v28, %v12924_v14  ;;  %v3109_v14 = vadd.f32 %v13087_v51, %v12935_v32  ;;  %v3908_v28 = vld [vmem:[#allocation10 + $0x508] sm:$0xff]  ;;  %v4009_v51 = vld [vmem:[#allocation10 + $0x5c0] sm:$0xff] }
 0x4b4   :  { %3777 = vmatprep.subr.mxu1 %v16013_v2  ;;  %3875 = vmatprep.subr.mxu0 %v16013_v2  ;;  %v4010_v32 = vld [vmem:[#allocation10 + $0x5c8] sm:$0xff] }
 0x4b5   :  { %3778 = vmatpush2.msra.mxu1 %v3704_v53  ;;  %3876 = vmatpush2.msra.mxu0 %v3808_v54  ;;  %v3909_v53 = vld [vmem:[#allocation10 + $0x510] sm:$0xff]  ;;  %v4013_v54 = vld [vmem:[#allocation10 + $0x5e0] sm:$0xff]  ;;  %v3171_v37 = vadd.f32 %v13097_v31, %v3107_v45  ;;  %v3173_v63 = vadd.f32 %v13108_v34, %v3109_v14 }
 0x4b6   :  { %3779 = vmatprep.subr.mxu1 %v16013_v2  ;;  %3877 = vmatprep.subr.mxu0 %v16013_v2  ;;  %v10525_v34 = vld [vmem:[#allocation13] ss:$0 sm:$0xff]  ;;  %v336_v14 = vld [vmem:[%s16030_s20] sm:$0xff]  ;;  %s11943_s20 = smov 90  }
 0x4b7   :  { %3780 = vmatpush2.msra.mxu1 %v3703_v1  ;;  %3878 = vmatpush2.msra.mxu0 %v3807_v4  ;;  %v3907_v1 = vld [vmem:[#allocation10 + $0x500] sm:$0xff]  ;;  %v4011_v4 = vld [vmem:[#allocation10 + $0x5d0] sm:$0xff]  ;;  %v3187_v31 = vmax.f32 %v3171_v37, 0.0 }
 0x4b8   :  { %3782 = vmatmul.mubr.f32.vlgmr.msra.gmra.mxu1 %v3183_v10  ;;  %3879 = vmatprep.subr.mxu0 %v16013_v2  ;;  %v3189_v10 = vmax.f32 %v3173_v63, 0.0  ;;  %v4363_v63 = vld [vmem:[#allocation23 + $0x8] sm:$0xff] }
 0x4b9   :  { %3921 = vmatprep.subr.mxu1 %v16013_v2  ;;  %3880 = vmatpush2.msra.mxu0 %v3806_v41  ;;  %v4102_v41 = vld [vmem:[#allocation14 + $0x38] sm:$0xff] }
 0x4ba   :  { %3922 = vmatpush1.msra.mxu1 %v3906_v23  ;;  %10541 = vmatprep.mubr.msk.f32.mxu1 %vm3302_vm13, %v3188_v22  ;;  %v4100_v23 = vld [vmem:[#allocation14 + $0x28] sm:$0xff]  ;;  %v3275_v22 = vadd.f32 %v10525_v34, %v12979_v44  ;;  %v4095_v44 = vld [vmem:[#allocation14] sm:$0xff] }
 0x4bb   :  { %3881 = vmatprep.subr.mxu0 %v16013_v2  ;;  %3923 = vmatprep.subr.mxu1 %v16013_v2  ;;  %v4450_v34 = vld [vmem:[%s15865_s18 + $0x18] sm:$0xff] }
 0x4bc   :  { %3882 = vmatpush2.msra.mxu0 %v3805_v30  ;;  %3924 = vmatpush1.msra.mxu1 %v3905_v13 }
 0x4bd   :  { %3884 = vmatmul.mubr.f32.vlgmr.msra.gmra.mxu0 %v3185_v39  ;;  %3925 = vmatprep.subr.mxu1 %v16013_v2 }
 0x4be   :  { %4023 = vmatprep.subr.mxu0 %v16013_v2  ;;  %3926 = vmatpush1.msra.mxu1 %v3904_v7 }
 0x4bf   :  { %4024 = vmatpush1.msra.mxu0 %v4008_v26  ;;  %10543 = vmatprep.mubr.msk.f32.mxu0 %vm3302_vm13, %v3190_v40  ;;  %v4099_v40 = vld [vmem:[#allocation14 + $0x20] sm:$0xff] }
 0x4c0   :  { %3927 = vmatprep.subr.mxu1 %v16013_v2  ;;  %4025 = vmatprep.subr.mxu0 %v16013_v2 }
 0x4c1   :  { %3928 = vmatpush1.msra.mxu1 %v3903_v6  ;;  %4026 = vmatpush1.msra.mxu0 %v4007_v18  ;;  %v4098_v6 = vld [vmem:[#allocation14 + $0x18] sm:$0xff]  ;;  %v4097_v18 = vld [vmem:[#allocation14 + $0x10] sm:$0xff] }
 0x4c2   :  { %3929 = vmatprep.subr.mxu1 %v16013_v2  ;;  %4027 = vmatprep.subr.mxu0 %v16013_v2 }
 0x4c3   :  { %3930 = vmatpush1.msra.mxu1 %v3902_v21  ;;  %4028 = vmatpush1.msra.mxu0 %v4006_v16  ;;  %v4096_v21 = vld [vmem:[#allocation14 + $0x8] sm:$0xff]  ;;  %v4188_v16 = vld [vmem:[#allocation17 + $0x18] sm:$0xff] }
 0x4c4   :  { %3931 = vmatprep.subr.mxu1 %v16013_v2  ;;  %4029 = vmatprep.subr.mxu0 %v16013_v2 }
 0x4c5   :  { %3932 = vmatpush1.msra.mxu1 %v3901_v60  ;;  %4030 = vmatpush1.msra.mxu0 %v4005_v12 }
 0x4c6   :  { %3933 = vmatprep.subr.mxu1 %v16013_v2  ;;  %4031 = vmatprep.subr.mxu0 %v16013_v2 }
 0x4c7   :  { %3934 = vmatpush1.msra.mxu1 %v3900_v62  ;;  %4032 = vmatpush1.msra.mxu0 %v4004_v20 }
 0x4c8   :  { %3935 = vmatprep.subr.mxu1 %v16013_v2  ;;  %4033 = vmatprep.subr.mxu0 %v16013_v2 }
 0x4c9   :  { %3936 = vmatpush1.msra.mxu1 %v3899_v43  ;;  %4034 = vmatpush1.msra.mxu0 %v4003_v47 }
 0x4ca   :  { %3937 = vmatprep.subr.mxu1 %v16013_v2  ;;  %4035 = vmatprep.subr.mxu0 %v16013_v2 }
 0x4cb   :  { %3938 = vmatpush1.msra.mxu1 %v3898_v50  ;;  %4036 = vmatpush1.msra.mxu0 %v4002_v36 }
 0x4cc   :  { %3939 = vmatprep.subr.mxu1 %v16013_v2  ;;  %4037 = vmatprep.subr.mxu0 %v16013_v2 }
 0x4cd   :  { %3940 = vmatpush1.msra.mxu1 %v3897_v9  ;;  %4038 = vmatpush1.msra.mxu0 %v4001_v11 }
 0x4ce   :  { %3941 = vmatprep.subr.mxu1 %v16013_v2  ;;  %4039 = vmatprep.subr.mxu0 %v16013_v2 }
 0x4cf   :  { %3942 = vmatpush1.msra.mxu1 %v3896_v29  ;;  %4040 = vmatpush1.msra.mxu0 %v4000_v27 }
 0x4d0   :  { %3943 = vmatprep.subr.mxu1 %v16013_v2  ;;  %4041 = vmatprep.subr.mxu0 %v16013_v2 }
 0x4d1   :  { %3944 = vmatpush1.msra.mxu1 %v3895_v5  ;;  %4042 = vmatpush1.msra.mxu0 %v3999_v49 }
 0x4d2   :  { %3945 = vmatprep.subr.mxu1 %v16013_v2  ;;  %4043 = vmatprep.subr.mxu0 %v16013_v2 }
 0x4d3   :  { %3946 = vmatpush1.msra.mxu1 %v3894_v0  ;;  %4044 = vmatpush1.msra.mxu0 %v3998_v48 }
 0x4d4   :  { %3947 = vmatprep.subr.mxu1 %v16013_v2  ;;  %4045 = vmatprep.subr.mxu0 %v16013_v2 }
 0x4d5   :  { %3948 = vmatpush1.msra.mxu1 %v3893_v24  ;;  %4046 = vmatpush1.msra.mxu0 %v3997_v52 }
 0x4d6   :  { %3949 = vmatprep.subr.mxu1 %v16013_v2  ;;  %4047 = vmatprep.subr.mxu0 %v16013_v2 }
 0x4d7   :  { %3950 = vmatpush1.msra.mxu1 %v3892_v42  ;;  %4048 = vmatpush1.msra.mxu0 %v3996_v57  ;;  %v4187_v57 = vld [vmem:[#allocation17 + $0x10] sm:$0xff] }
 0x4d8   :  { %3951 = vmatprep.subr.mxu1 %v16013_v2  ;;  %4049 = vmatprep.subr.mxu0 %v16013_v2 }
 0x4d9   :  { %3952 = vmatpush1.msra.mxu1 %v3891_v55  ;;  %4050 = vmatpush1.msra.mxu0 %v3995_v3  ;;  %v4186_v55 = vld [vmem:[#allocation17 + $0x8] sm:$0xff]  ;;  %v4185_v3 = vld [vmem:[#allocation17] sm:$0xff] }
 0x4da   :  { %3969 = vmatprep.subr.mxu1 %v16013_v2  ;;  %4051 = vmatprep.subr.mxu0 %v16013_v2 }
 0x4db   :  { %10540 = vmatpush2.msk.msra.mxu1 %vm3204_vm10, %v3914_v46  ;;  %4052 = vmatpush1.msra.mxu0 %v3994_v25  ;;  %v10544_v46 = vld [vmem:[#allocation16] ss:$0 sm:$0xff] }
 0x4dc   :  { %3971 = vmatprep.subr.mxu1 %v16013_v2  ;;  %4053 = vmatprep.subr.mxu0 %v16013_v2 }
 0x4dd   :  { %3972 = vmatpush2.msra.mxu1 %v3913_v8  ;;  %4054 = vmatpush1.msra.mxu0 %v3993_v17 }
 0x4de   :  { %3973 = vmatprep.subr.mxu1 %v16013_v2  ;;  %4071 = vmatprep.subr.mxu0 %v16013_v2 }
 0x4df   :  { %3974 = vmatpush2.msra.mxu1 %v3912_v56  ;;  %10542 = vmatpush2.msk.msra.mxu0 %vm3204_vm10, %v4016_v38  ;;  %v10546_v38 = vld [vmem:[#allocation19] ss:$0 sm:$0xff] }
 0x4e0   :  { %3975 = vmatprep.subr.mxu1 %v16013_v2  ;;  %4073 = vmatprep.subr.mxu0 %v16013_v2 }
 0x4e1   :  { %3976 = vmatpush2.msra.mxu1 %v3911_v19  ;;  %4074 = vmatpush2.msra.mxu0 %v4015_v15 }
 0x4e2   :  { %3977 = vmatprep.subr.mxu1 %v16013_v2  ;;  %4075 = vmatprep.subr.mxu0 %v16013_v2 }
 0x4e3   :  { %3978 = vmatpush2.msra.mxu1 %v3910_v58  ;;  %4076 = vmatpush2.msra.mxu0 %v4014_v59 }
 0x4e4   :  { %3979 = vmatprep.subr.mxu1 %v16013_v2  ;;  %4077 = vmatprep.subr.mxu0 %v16013_v2 }
 0x4e5   :  { %3980 = vmatpush2.msra.mxu1 %v3909_v53  ;;  %4078 = vmatpush2.msra.mxu0 %v4013_v54  ;;  %v4279_v53 = vld [vmem:[#allocation20 + $0x8] sm:$0xff]  ;;  %v4278_v54 = vld [vmem:[#allocation20] sm:$0xff] }
 0x4e6   :  { %3981 = vmatprep.subr.mxu1 %v16013_v2  ;;  %4079 = vmatprep.subr.mxu0 %v16013_v2 }
 0x4e7   :  { %3982 = vmatpush2.msra.mxu1 %v3908_v28  ;;  %4080 = vmatpush2.msra.mxu0 %v4012_v61 }
 0x4e8   :  { %3983 = vmatprep.subr.mxu1 %v16013_v2  ;;  %4081 = vmatprep.subr.mxu0 %v16013_v2 }
 0x4e9   :  { %3984 = vmatpush2.msra.mxu1 %v3907_v1  ;;  %4082 = vmatpush2.msra.mxu0 %v4011_v4  ;;  %v4365_v4 = vld [vmem:[#allocation23 + $0x18] sm:$0xff] }
 0x4ea   :  { %3986 = vmatmul.mubr.f32.vlgmr.msra.gmra.mxu1 %v3187_v31  ;;  %4083 = vmatprep.subr.mxu0 %v16013_v2  ;;  %v4364_v31 = vld [vmem:[#allocation23 + $0x10] sm:$0xff] }
 0x4eb   :  { %4084 = vmatpush2.msra.mxu0 %v4010_v32  ;;  %10934 = vmatprep.subr.mxu1 %v16013_v2  ;;  %v4362_v32 = vld [vmem:[#allocation23] sm:$0xff] }
 0x4ec   :  { %4085 = vmatprep.subr.mxu0 %v16013_v2  ;;  %10950 = vmatprep.mubr.msk.f32.mxu1 %vm11938_vm11, %v16013_v2 }
 0x4ed   :  { %4086 = vmatpush2.msra.mxu0 %v4009_v51  ;;  %10935 = vmatpush3.msra.mxu1 %v4102_v41  ;;  %v4557_v51 = vld [vmem:[#allocation25 + $0xb0] sm:$0xff]  ;;  %v4453_v41 = vld [vmem:[%s15865_s18 + $0x30] sm:$0xff] }
 0x4ee   :  { %4088 = vmatmul.mubr.f32.vlgmr.msra.gmra.mxu0 %v3189_v10  ;;  %10953 = vmatprep.subr.mxu0 %v16013_v2  ;;  %v4454_v10 = vld [vmem:[%s15865_s18 + $0x38] sm:$0xff] }
 0x4ef   :  { %10961 = vmatprep.mubr.msk.f32.mxu0 %vm11938_vm11, %v16013_v2  ;;  %10936 = vmatprep.subr.mxu1 %v16013_v2 }
 0x4f0   :  { %10937 = vmatpush3.msra.mxu1 %v4101_v33  ;;  %10954 = vmatpush3.msra.mxu0 %v4188_v16  ;;  %v4452_v33 = vld [vmem:[%s15865_s18 + $0x28] sm:$0xff] }
 0x4f1   :  { %10938 = vmatprep.subr.mxu1 %v16013_v2  ;;  %10955 = vmatprep.subr.mxu0 %v16013_v2  ;;  %v4547_v16 = vld [vmem:[#allocation25 + $0x60] sm:$0xff] }
 0x4f2   :  { %10939 = vmatpush3.msra.mxu1 %v4100_v23  ;;  %10956 = vmatpush3.msra.mxu0 %v4187_v57  ;;  %v4451_v23 = vld [vmem:[%s15865_s18 + $0x20] sm:$0xff]  ;;  %v4555_v57 = vld [vmem:[#allocation25 + $0xa0] sm:$0xff] }
 0x4f3   :  { %10940 = vmatprep.subr.mxu1 %v16013_v2  ;;  %10957 = vmatprep.subr.mxu0 %v16013_v2 }
 0x4f4   :  { %10941 = vmatpush3.msra.mxu1 %v4099_v40  ;;  %10958 = vmatpush3.msra.mxu0 %v4186_v55  ;;  %v4554_v40 = vld [vmem:[#allocation25 + $0x98] sm:$0xff]  ;;  %v4740_v55 = vld [vmem:[#allocation25 + $0x150] sm:$0xff] }
 0x4f5   :  { %10942 = vmatprep.subr.mxu1 %v16013_v2  ;;  %10959 = vmatprep.subr.mxu0 %v16013_v2 }
 0x4f6   :  { %10943 = vmatpush3.msra.mxu1 %v4098_v6  ;;  %10960 = vmatpush3.msra.mxu0 %v4185_v3  ;;  %v4553_v6 = vld [vmem:[#allocation25 + $0x90] sm:$0xff]  ;;  %v4738_v3 = vld [vmem:[#allocation25 + $0x140] sm:$0xff] }
 0x4f7   :  { %10944 = vmatprep.subr.mxu1 %v16013_v2  ;;  %10982 = vmatprep.subr.mxu0 %v16013_v2 }
 0x4f8   :  { %10945 = vmatpush3.msra.mxu1 %v4097_v18  ;;  %v4551_v18 = vld [vmem:[#allocation25 + $0x80] sm:$0xff] }
 0x4f9   :  { %10946 = vmatprep.subr.mxu1 %v16013_v2 }
 0x4fa   :  { %10947 = vmatpush3.msra.mxu1 %v4096_v21  ;;  %v4550_v21 = vld [vmem:[#allocation25 + $0x78] sm:$0xff] }
 0x4fb   :  { %10948 = vmatprep.subr.mxu1 %v16013_v2 }
 0x4fc   :  { %10949 = vmatpush3.msra.mxu1 %v4095_v44  ;;  %v4548_v44 = vld [vmem:[#allocation25 + $0x68] sm:$0xff] }
 0x4fd   :  { %10964 = vmatprep.subr.mxu1 %v16013_v2 }
 0x515   :  { %v3375_v35 = vpop.f32.mrf.mxu1 }
 0x516   :  { %v3379_v30 = vadd.f32 %v3375_v35, %v3275_v22  ;;  %v4449_v22 = vld [vmem:[%s15865_s18 + $0x10] sm:$0xff]  ;;  %v10548_v35 = vld [vmem:[#allocation22] ss:$0 sm:$0xff] }
 0x517   :  { %v3377_v13 = vpop.f32.mrf.mxu1 }
 0x519   :  { %v3477_v39 = vpop.f32.mrf.mxu0 }
 0x51a   :  { %v3481_v7 = vadd.f32 %v3477_v39, %v3379_v30 }
 0x51b   :  { %v3479_v26 = vpop.f32.mrf.mxu0 }
 0x51c   :  { %v4556_v26 = vld [vmem:[#allocation25 + $0xa8] sm:$0xff] }
 0x546   :  { %v3579_v60 = vpop.f32.mrf.mxu1 }
 0x547   :  { %v3583_v12 = vadd.f32 %v3579_v60, %v3481_v7  ;;  %v4545_v60 = vld [vmem:[#allocation25 + $0x50] sm:$0xff] }
 0x548   :  { %v3581_v62 = vpop.f32.mrf.mxu1 }
 0x549   :  { %v4542_v62 = vld [vmem:[#allocation25 + $0x38] sm:$0xff] }
 0x54b   :  { %v3681_v20 = vpop.f32.mrf.mxu0 }
 0x54c   :  { %v3685_v43 = vadd.f32 %v3681_v20, %v3583_v12  ;;  %v4544_v12 = vld [vmem:[#allocation25 + $0x48] sm:$0xff]  ;;  %v4541_v20 = vld [vmem:[#allocation25 + $0x30] sm:$0xff] }
 0x54d   :  { %v3683_v47 = vpop.f32.mrf.mxu0 }
 0x54e   :  { %v4448_v47 = vld [vmem:[%s15865_s18 + $0x8] sm:$0xff] }
 0x578   :  { %v3783_v50 = vpop.f32.mrf.mxu1 }
 0x579   :  { %v3787_v29 = vadd.f32 %v3783_v50, %v3685_v43  ;;  %v4539_v43 = vld [vmem:[#allocation25 + $0x20] sm:$0xff]  ;;  %v4538_v50 = vld [vmem:[#allocation25 + $0x18] sm:$0xff] }
 0x57a   :  { %v3785_v36 = vpop.f32.mrf.mxu1 }
 0x57b   :  { %v4536_v36 = vld [vmem:[#allocation25 + $0x8] sm:$0xff] }
 0x57d   :  { %v3885_v9 = vpop.f32.mrf.mxu0 }
 0x57e   :  { %v3889_v5 = vadd.f32 %v3885_v9, %v3787_v29  ;;  %v4447_v9 = vld [vmem:[%s15865_s18] sm:$0xff]  ;;  %v4744_v29 = vld [vmem:[#allocation25 + $0x170] sm:$0xff]  ;;  %s11940_s18 = smov 108  }
 0x57f   :  { %v3887_v11 = vpop.f32.mrf.mxu0 }
 0x580   :  { %v4535_v11 = vld [vmem:[#allocation25] sm:$0xff] }
 0x5aa   :  { %v3987_v27 = vpop.f32.mrf.mxu1 }
 0x5ab   :  { %v3991_v0 = vadd.f32 %v3987_v27, %v3889_v5  ;;  %v10550_v27 = vld [vmem:[%s15864_s17] ss:$0 sm:$0xff]  ;;  %s11939_s17 = smov 109  }
 0x5ac   :  { %v3989_v49 = vpop.f32.mrf.mxu1 }
 0x5ae   :  { %v4089_v48 = vpop.f32.mrf.mxu0 }
 0x5af   :  { %v4093_v24 = vadd.f32 %v4089_v48, %v3991_v0 }
 0x5b0   :  { %v4091_v52 = vpop.f32.mrf.mxu0 }
 0x5b1   :  { %v4094_v42 = vmax.f32 %v4093_v24, 0.0  ;;  %v4558_v24 = vld [vmem:[#allocation25 + $0xb8] sm:$0xff]  ;;  %v4743_v52 = vld [vmem:[#allocation25 + $0x168] sm:$0xff] }
 0x5b3   :  { %10951 = vmatmul.mubr.msk.f32.vlgmr.msra.gmra.mxu1 %vm4110_vm14, %v4094_v42  ;;  %v4741_v42 = vld [vmem:[#allocation25 + $0x158] sm:$0xff] }
 0x5b4   :  { %10968 = vmatprep.mubr.msk.f32.mxu1 %vm11938_vm11, %v16013_v2  ;;  %10965 = vmatpush3.msra.mxu1 %v4279_v53  ;;  %v4726_v53 = vld [vmem:[#allocation25 + $0xe0] sm:$0xff] }
 0x5b5   :  { %10966 = vmatprep.subr.mxu1 %v16013_v2 }
 0x5b6   :  { %10967 = vmatpush3.msra.mxu1 %v4278_v54  ;;  %v4540_v54 = vld [vmem:[#allocation25 + $0x28] sm:$0xff] }
 0x5b7   :  { %10971 = vmatprep.subr.mxu1 %v16013_v2 }
 0x673   :  { %v4180_v25 = vpop.f32.mrf.mxu1 }
 0x674   :  { %v4181_v8 = vadd.f32 %v10544_v46, %v4180_v25  ;;  %v4552_v46 = vld [vmem:[#allocation25 + $0x88] sm:$0xff]  ;;  %v4737_v25 = vld [vmem:[#allocation25 + $0x138] sm:$0xff] }
 0x675   :  { %v10952_v17 = vpop.f32.mrf.mxu1 }
 0x676   :  { %v4184_v56 = vmax.f32 %v4181_v8, 0.0  ;;  %v4735_v8 = vld [vmem:[#allocation25 + $0x128] sm:$0xff]  ;;  %v4549_v17 = vld [vmem:[#allocation25 + $0x70] sm:$0xff] }
 0x678   :  { %10962 = vmatmul.mubr.msk.f32.vlgmr.msra.gmra.mxu0 %vm1506_vm9, %v4184_v56  ;;  %v4734_v56 = vld [vmem:[#allocation25 + $0x120] sm:$0xff] }
 0x679   :  { %10998 = vmatprep.mubr.msk.f32.mxu0 %vm11938_vm11, %v16013_v2  ;;  %10983 = vmatpush3.msra.mxu0 %v4454_v10  ;;  %v4927_v10 = vld [vmem:[#allocation25 + $0x210] sm:$0xff] }
 0x67a   :  { %10984 = vmatprep.subr.mxu0 %v16013_v2 }
 0x67b   :  { %10985 = vmatpush3.msra.mxu0 %v4453_v41  ;;  %v4925_v41 = vld [vmem:[#allocation25 + $0x200] sm:$0xff] }
 0x67c   :  { %10986 = vmatprep.subr.mxu0 %v16013_v2 }
 0x67d   :  { %10987 = vmatpush3.msra.mxu0 %v4452_v33  ;;  %v4739_v33 = vld [vmem:[#allocation25 + $0x148] sm:$0xff] }
 0x67e   :  { %10988 = vmatprep.subr.mxu0 %v16013_v2 }
 0x67f   :  { %10989 = vmatpush3.msra.mxu0 %v4451_v23  ;;  %v4924_v23 = vld [vmem:[#allocation25 + $0x1f8] sm:$0xff] }
 0x680   :  { %10990 = vmatprep.subr.mxu0 %v16013_v2 }
 0x681   :  { %10991 = vmatpush3.msra.mxu0 %v4450_v34  ;;  %v4922_v34 = vld [vmem:[#allocation25 + $0x1e8] sm:$0xff] }
 0x682   :  { %10992 = vmatprep.subr.mxu0 %v16013_v2 }
 0x683   :  { %10993 = vmatpush3.msra.mxu0 %v4449_v22  ;;  %v4736_v22 = vld [vmem:[#allocation25 + $0x130] sm:$0xff] }
 0x684   :  { %10994 = vmatprep.subr.mxu0 %v16013_v2 }
 0x685   :  { %10995 = vmatpush3.msra.mxu0 %v4448_v47  ;;  %v4929_v47 = vld [vmem:[#allocation25 + $0x220] sm:$0xff] }
 0x686   :  { %10996 = vmatprep.subr.mxu0 %v16013_v2 }
 0x687   :  { %10997 = vmatpush3.msra.mxu0 %v4447_v9  ;;  %v4926_v9 = vld [vmem:[#allocation25 + $0x208] sm:$0xff] }
 0x688   :  { %11001 = vmatprep.subr.mxu0 %v16013_v2 }
 0x738   :  { %v4265_v19 = vpop.f32.mrf.mxu0 }
 0x739   :  { %v4266_v15 = vadd.f32 %v10546_v38, %v4265_v19  ;;  %v4732_v38 = vld [vmem:[#allocation25 + $0x110] sm:$0xff]  ;;  %v4546_v19 = vld [vmem:[#allocation25 + $0x58] sm:$0xff] }
 0x73a   :  { %v10963_v45 = vpop.f32.mrf.mxu0 }
 0x73b   :  { %v4269_v58 = vmul.f32 0.5, %v4266_v15  ;;  %10373 = vst.msk [vmem:[%s15874_s27] sm:$0xff] %vm1506_vm9, %v4266_v15  ;;  %v4729_v45 = vld [vmem:[#allocation25 + $0xf8] sm:$0xff] }
 0x73d   :  { %v4270_v59 = vmul.f32 1.442695, %v4269_v58  ;;  %v4543_v58 = vld [vmem:[#allocation25 + $0x40] sm:$0xff] }
 0x73f   :  { %11495 = vpow2.f32 %v4270_v59  ;;  %v4728_v59 = vld [vmem:[#allocation25 + $0xf0] sm:$0xff] }
 0x74c   :  { %v11496_v37 = vpop.eup %11495 }
 0x74d   :  { %4273 = vrot.lane.b32.xlu1 %v11496_v37, %s11931_s0  ;;  %v4725_v37 = vld [vmem:[#allocation25 + $0xd8] sm:$0xff] }
 0x7bf   :  { %v4274_v28 = vpop.permute.xlu1 %4273 }
 0x7c0   :  { %v4276_v61 = vmul.f32 %v4274_v28, %v336_v14  ;;  %v4723_v14 = vld [vmem:[#allocation25 + $0xc8] sm:$0xff]  ;;  %v4537_v28 = vld [vmem:[#allocation25 + $0x10] sm:$0xff] }
 0x7c2   :  { %v13206_v1 = vadd.f32 %v4276_v61, %v4266_v15  ;;  %v4731_v15 = vld [vmem:[#allocation25 + $0x108] sm:$0xff]  ;;  %v4722_v61 = vld [vmem:[#allocation25 + $0xc0] sm:$0xff] }
 0x7c4   :  { %16031 = vst [vmem:[#allocation57_spill] sm:$0xff] %v13206_v1  ;;  %10969 = vmatmul.mubr.msk.f32.vlgmr.msra.gmra.mxu1 %vm4287_vm15, %v13206_v1 }
 0x7c5   :  { %10972 = vmatpush3.msra.mxu1 %v4365_v4  ;;  %10979 = vmatprep.mubr.msk.f32.mxu1 %vm11938_vm11, %v16013_v2  ;;  %v4931_v4 = vld [vmem:[#allocation25 + $0x230] sm:$0xff] }
 0x7c6   :  { %10973 = vmatprep.subr.mxu1 %v16013_v2 }
 0x7c7   :  { %10974 = vmatpush3.msra.mxu1 %v4364_v31  ;;  %v4745_v31 = vld [vmem:[#allocation25 + $0x178] sm:$0xff] }
 0x7c8   :  { %10975 = vmatprep.subr.mxu1 %v16013_v2 }
 0x7c9   :  { %10976 = vmatpush3.msra.mxu1 %v4363_v63  ;;  %v4930_v63 = vld [vmem:[#allocation25 + $0x228] sm:$0xff] }
 0x7ca   :  { %10977 = vmatprep.subr.mxu1 %v16013_v2 }
 0x7cb   :  { %10978 = vmatpush3.msra.mxu1 %v4362_v32  ;;  %v4928_v32 = vld [vmem:[#allocation25 + $0x218] sm:$0xff] }
 0x7cc   :  { %4592 = vmatprep.subr.mxu1 %v4557_v51  ;;  %v4742_v51 = vld [vmem:[#allocation25 + $0x160] sm:$0xff] }
 0x884   :  { %v4357_v30 = vpop.f32.mrf.mxu1 }
 0x885   :  { %v4358_v13 = vadd.f32 %v10548_v35, %v4357_v30  ;;  %v4921_v35 = vld [vmem:[#allocation25 + $0x1e0] sm:$0xff]  ;;  %v4919_v30 = vld [vmem:[#allocation25 + $0x1d0] sm:$0xff] }
 0x886   :  { %v10970_v39 = vpop.f32.mrf.mxu1 }
 0x887   :  { %v4361_v7 = vmax.f32 %v4358_v13, 0.0  ;;  %v4733_v13 = vld [vmem:[#allocation25 + $0x118] sm:$0xff]  ;;  %v4918_v39 = vld [vmem:[#allocation25 + $0x1c8] sm:$0xff] }
 0x889   :  { %10980 = vmatmul.mubr.msk.f32.vlgmr.msra.gmra.mxu1 %vm1506_vm9, %v4361_v7  ;;  %v4916_v7 = vld [vmem:[#allocation25 + $0x1b8] sm:$0xff] }
 0x88a   :  { %4593 = vmatpush1.msra.mxu1 %v4556_v26  ;;  %4640 = vmatprep.mubr.f32.mxu1 %v16013_v2  ;;  %v4730_v26 = vld [vmem:[#allocation25 + $0x100] sm:$0xff] }
 0x88b   :  { %4594 = vmatprep.subr.mxu1 %v4554_v40  ;;  %v4915_v40 = vld [vmem:[#allocation25 + $0x1b0] sm:$0xff] }
 0x88c   :  { %4595 = vmatpush1.msra.mxu1 %v4553_v6  ;;  %v4913_v6 = vld [vmem:[#allocation25 + $0x1a0] sm:$0xff] }
 0x88d   :  { %4596 = vmatprep.subr.mxu1 %v4551_v18  ;;  %v4727_v18 = vld [vmem:[#allocation25 + $0xe8] sm:$0xff] }
 0x88e   :  { %4597 = vmatpush1.msra.mxu1 %v4550_v21  ;;  %v4912_v21 = vld [vmem:[#allocation25 + $0x198] sm:$0xff] }
 0x88f   :  { %4598 = vmatprep.subr.mxu1 %v4548_v44  ;;  %v4910_v44 = vld [vmem:[#allocation25 + $0x188] sm:$0xff] }
 0x890   :  { %4599 = vmatpush1.msra.mxu1 %v4547_v16  ;;  %v4724_v16 = vld [vmem:[#allocation25 + $0xd0] sm:$0xff] }
 0x891   :  { %4600 = vmatprep.subr.mxu1 %v4545_v60  ;;  %v4909_v60 = vld [vmem:[#allocation25 + $0x180] sm:$0xff] }
 0x892   :  { %4601 = vmatpush1.msra.mxu1 %v4544_v12  ;;  %v5118_v12 = vld [vmem:[#allocation25 + $0x2f0] sm:$0xff] }
 0x893   :  { %4602 = vmatprep.subr.mxu1 %v4542_v62  ;;  %v4932_v62 = vld [vmem:[#allocation25 + $0x238] sm:$0xff] }
 0x894   :  { %4603 = vmatpush1.msra.mxu1 %v4541_v20  ;;  %v5117_v20 = vld [vmem:[#allocation25 + $0x2e8] sm:$0xff] }
 0x895   :  { %4604 = vmatprep.subr.mxu1 %v4539_v43  ;;  %v5115_v43 = vld [vmem:[#allocation25 + $0x2d8] sm:$0xff] }
 0x896   :  { %4605 = vmatpush1.msra.mxu1 %v4538_v50  ;;  %v5114_v50 = vld [vmem:[#allocation25 + $0x2d0] sm:$0xff] }
 0x897   :  { %4606 = vmatprep.subr.mxu1 %v4536_v36  ;;  %v5112_v36 = vld [vmem:[#allocation25 + $0x2c0] sm:$0xff] }
 0x898   :  { %4607 = vmatpush1.msra.mxu1 %v4535_v11  ;;  %v5111_v11 = vld [vmem:[#allocation25 + $0x2b8] sm:$0xff] }
 0x899   :  { %4780 = vmatprep.subr.mxu1 %v4744_v29  ;;  %v5109_v29 = vld [vmem:[#allocation25 + $0x2a8] sm:$0xff] }
 0x949   :  { %v4442_v5 = vpop.f32.mrf.mxu1 }
 0x94a   :  { %v4443_v49 = vadd.f32 %v10550_v27, %v4442_v5  ;;  %v4923_v27 = vld [vmem:[#allocation25 + $0x1f0] sm:$0xff]  ;;  %v5108_v5 = vld [vmem:[#allocation25 + $0x2a0] sm:$0xff] }
 0x94b   :  { %v10981_v0 = vpop.f32.mrf.mxu1 }
 0x94c   :  { %v13251_v48 = vmax.f32 %v4443_v49, 0.0  ;;  %v5106_v49 = vld [vmem:[#allocation25 + $0x290] sm:$0xff]  ;;  %v4920_v0 = vld [vmem:[#allocation25 + $0x1d8] sm:$0xff] }
 0x94e   :  { %10999 = vmatmul.mubr.msk.f32.vlgmr.msra.gmra.mxu0 %vm4110_vm14, %v13251_v48  ;;  %10554 = vmatmul.mubr.msk.f32.vlgmr.msra.gmra.mxu1 %vm4110_vm14, %v13251_v48 }
 0x94f   :  { %11002 = vmatpush3.msra.mxu0 %v4558_v24  ;;  %4781 = vmatpush1.msra.mxu1 %v4743_v52  ;;  %v5105_v24 = vld [vmem:[#allocation25 + $0x288] sm:$0xff]  ;;  %v5103_v52 = vld [vmem:[#allocation25 + $0x278] sm:$0xff] }
 0x950   :  { %11003 = vmatprep.subr.mxu0 %v16013_v2  ;;  %4782 = vmatprep.subr.mxu1 %v4741_v42  ;;  %v4917_v42 = vld [vmem:[#allocation25 + $0x1c0] sm:$0xff] }
 0x951   :  { %11004 = vmatpush3.msra.mxu0 %v4555_v57  ;;  %4783 = vmatpush1.msra.mxu1 %v4740_v55  ;;  %v5102_v57 = vld [vmem:[#allocation25 + $0x270] sm:$0xff]  ;;  %v5100_v55 = vld [vmem:[#allocation25 + $0x260] sm:$0xff] }
 0x952   :  { %11005 = vmatprep.subr.mxu0 %v16013_v2  ;;  %4784 = vmatprep.subr.mxu1 %v4738_v3  ;;  %v4914_v3 = vld [vmem:[#allocation25 + $0x1a8] sm:$0xff] }
 0x953   :  { %11006 = vmatpush3.msra.mxu0 %v4552_v46  ;;  %4785 = vmatpush1.msra.mxu1 %v4737_v25  ;;  %v5099_v46 = vld [vmem:[#allocation25 + $0x258] sm:$0xff]  ;;  %v5097_v25 = vld [vmem:[#allocation25 + $0x248] sm:$0xff] }
 0x954   :  { %11007 = vmatprep.subr.mxu0 %v16013_v2  ;;  %4786 = vmatprep.subr.mxu1 %v4735_v8  ;;  %v4911_v8 = vld [vmem:[#allocation25 + $0x190] sm:$0xff] }
 0x955   :  { %11008 = vmatpush3.msra.mxu0 %v4549_v17  ;;  %4787 = vmatpush1.msra.mxu1 %v4734_v56  ;;  %v5096_v17 = vld [vmem:[#allocation25 + $0x240] sm:$0xff]  ;;  %v5305_v56 = vld [vmem:[#allocation25 + $0x3b0] sm:$0xff] }
 0x956   :  { %11009 = vmatprep.subr.mxu0 %v16013_v2  ;;  %4788 = vmatprep.subr.mxu1 %v4732_v38  ;;  %v5119_v38 = vld [vmem:[#allocation25 + $0x2f8] sm:$0xff] }
 0x957   :  { %11010 = vmatpush3.msra.mxu0 %v4546_v19  ;;  %4789 = vmatpush1.msra.mxu1 %v4731_v15  ;;  %v5304_v19 = vld [vmem:[#allocation25 + $0x3a8] sm:$0xff]  ;;  %v5302_v15 = vld [vmem:[#allocation25 + $0x398] sm:$0xff] }
 0x958   :  { %11011 = vmatprep.subr.mxu0 %v16013_v2  ;;  %4790 = vmatprep.subr.mxu1 %v4729_v45  ;;  %v5116_v45 = vld [vmem:[#allocation25 + $0x2e0] sm:$0xff] }
 0x959   :  { %11012 = vmatpush3.msra.mxu0 %v4543_v58  ;;  %4791 = vmatpush1.msra.mxu1 %v4728_v59  ;;  %v5301_v58 = vld [vmem:[#allocation25 + $0x390] sm:$0xff]  ;;  %v5299_v59 = vld [vmem:[#allocation25 + $0x380] sm:$0xff] }
 0x95a   :  { %11013 = vmatprep.subr.mxu0 %v16013_v2  ;;  %4792 = vmatprep.subr.mxu1 %v4726_v53  ;;  %v5113_v53 = vld [vmem:[#allocation25 + $0x2c8] sm:$0xff] }
 0x95b   :  { %11014 = vmatpush3.msra.mxu0 %v4540_v54  ;;  %4793 = vmatpush1.msra.mxu1 %v4725_v37  ;;  %v5298_v54 = vld [vmem:[#allocation25 + $0x378] sm:$0xff]  ;;  %v5296_v37 = vld [vmem:[#allocation25 + $0x368] sm:$0xff] }
 0x95c   :  { %11015 = vmatprep.subr.mxu0 %v16013_v2  ;;  %4794 = vmatprep.subr.mxu1 %v4723_v14  ;;  %v5110_v14 = vld [vmem:[#allocation25 + $0x2b0] sm:$0xff] }
 0x95d   :  { %11016 = vmatpush3.msra.mxu0 %v4537_v28  ;;  %11017 = vmatprep.mubr.msk.f32.mxu0 %vm11938_vm11, %v16013_v2  ;;  %v5295_v28 = vld [vmem:[#allocation25 + $0x360] sm:$0xff] }
 0x95e   :  { %4795 = vmatpush1.msra.mxu1 %v4722_v61  ;;  %4828 = vmatprep.mubr.f32.mxu1 %v16013_v2  ;;  %v5293_v61 = vld [vmem:[#allocation25 + $0x350] sm:$0xff] }
 0x95f   :  { %11018 = vmatmul.mubr.msk.f32.vlgmr.msra.gmra.mxu0 %vm4110_vm14, %v13251_v48  ;;  %10556 = vmatmul.mubr.msk.f32.vlgmr.msra.gmra.mxu1 %vm4110_vm14, %v13251_v48 }
 0x960   :  { %11020 = vmatprep.subr.mxu0 %v16013_v2  ;;  %4967 = vmatprep.subr.mxu1 %v4931_v4  ;;  %v5107_v4 = vld [vmem:[#allocation25 + $0x298] sm:$0xff] }
 0x961   :  { %11021 = vmatpush3.msra.mxu0 %v4745_v31  ;;  %4968 = vmatpush1.msra.mxu1 %v4930_v63  ;;  %v5292_v31 = vld [vmem:[#allocation25 + $0x348] sm:$0xff]  ;;  %v5290_v63 = vld [vmem:[#allocation25 + $0x338] sm:$0xff] }
 0x962   :  { %11022 = vmatprep.subr.mxu0 %v16013_v2  ;;  %4969 = vmatprep.subr.mxu1 %v4928_v32  ;;  %v5104_v32 = vld [vmem:[#allocation25 + $0x280] sm:$0xff] }
 0x963   :  { %11023 = vmatpush3.msra.mxu0 %v4742_v51  ;;  %4970 = vmatpush1.msra.mxu1 %v4927_v10  ;;  %v5289_v51 = vld [vmem:[#allocation25 + $0x330] sm:$0xff]  ;;  %v5287_v10 = vld [vmem:[#allocation25 + $0x320] sm:$0xff] }
 0x964   :  { %11024 = vmatprep.subr.mxu0 %v16013_v2  ;;  %4971 = vmatprep.subr.mxu1 %v4925_v41  ;;  %v5101_v41 = vld [vmem:[#allocation25 + $0x268] sm:$0xff] }
 0x965   :  { %11025 = vmatpush3.msra.mxu0 %v4739_v33  ;;  %4972 = vmatpush1.msra.mxu1 %v4924_v23  ;;  %v5286_v33 = vld [vmem:[#allocation25 + $0x318] sm:$0xff]  ;;  %v5284_v23 = vld [vmem:[#allocation25 + $0x308] sm:$0xff] }
 0x966   :  { %11026 = vmatprep.subr.mxu0 %v16013_v2  ;;  %4973 = vmatprep.subr.mxu1 %v4922_v34  ;;  %v5098_v34 = vld [vmem:[#allocation25 + $0x250] sm:$0xff] }
 0x967   :  { %11027 = vmatpush3.msra.mxu0 %v4736_v22  ;;  %4974 = vmatpush1.msra.mxu1 %v4921_v35  ;;  %v5283_v22 = vld [vmem:[#allocation25 + $0x300] sm:$0xff]  ;;  %v5492_v35 = vld [vmem:[#allocation25 + $0x470] sm:$0xff] }
 0x968   :  { %11028 = vmatprep.subr.mxu0 %v16013_v2  ;;  %4975 = vmatprep.subr.mxu1 %v4919_v30  ;;  %v5306_v30 = vld [vmem:[#allocation25 + $0x3b8] sm:$0xff] }
 0x969   :  { %11029 = vmatpush3.msra.mxu0 %v4733_v13  ;;  %4976 = vmatpush1.msra.mxu1 %v4918_v39  ;;  %v5491_v13 = vld [vmem:[#allocation25 + $0x468] sm:$0xff]  ;;  %v5489_v39 = vld [vmem:[#allocation25 + $0x458] sm:$0xff] }
 0x96a   :  { %11030 = vmatprep.subr.mxu0 %v16013_v2  ;;  %4977 = vmatprep.subr.mxu1 %v4916_v7  ;;  %v5303_v7 = vld [vmem:[#allocation25 + $0x3a0] sm:$0xff] }
 0x96b   :  { %11031 = vmatpush3.msra.mxu0 %v4730_v26  ;;  %4978 = vmatpush1.msra.mxu1 %v4915_v40  ;;  %v5488_v26 = vld [vmem:[#allocation25 + $0x450] sm:$0xff]  ;;  %v5486_v40 = vld [vmem:[#allocation25 + $0x440] sm:$0xff] }
 0x96c   :  { %11032 = vmatprep.subr.mxu0 %v16013_v2  ;;  %4979 = vmatprep.subr.mxu1 %v4913_v6  ;;  %v5300_v6 = vld [vmem:[#allocation25 + $0x388] sm:$0xff] }
 0x96d   :  { %11033 = vmatpush3.msra.mxu0 %v4727_v18  ;;  %4980 = vmatpush1.msra.mxu1 %v4912_v21  ;;  %v5485_v18 = vld [vmem:[#allocation25 + $0x438] sm:$0xff]  ;;  %v5483_v21 = vld [vmem:[#allocation25 + $0x428] sm:$0xff] }
 0x96e   :  { %11034 = vmatprep.subr.mxu0 %v16013_v2  ;;  %4981 = vmatprep.subr.mxu1 %v4910_v44  ;;  %v5297_v44 = vld [vmem:[#allocation25 + $0x370] sm:$0xff] }
 0x96f   :  { %11035 = vmatpush3.msra.mxu0 %v4724_v16  ;;  %11036 = vmatprep.mubr.msk.f32.mxu0 %vm11938_vm11, %v16013_v2  ;;  %v5482_v16 = vld [vmem:[#allocation25 + $0x420] sm:$0xff] }
 0x970   :  { %4982 = vmatpush1.msra.mxu1 %v4909_v60  ;;  %5015 = vmatprep.mubr.f32.mxu1 %v16013_v2  ;;  %v5480_v60 = vld [vmem:[#allocation25 + $0x410] sm:$0xff] }
 0x971   :  { %11037 = vmatmul.mubr.msk.f32.vlgmr.msra.gmra.mxu0 %vm4110_vm14, %v13251_v48  ;;  %10558 = vmatmul.mubr.msk.f32.vlgmr.msra.gmra.mxu1 %vm4110_vm14, %v13251_v48 }
 0x972   :  { %11039 = vmatprep.subr.mxu0 %v16013_v2  ;;  %5154 = vmatprep.subr.mxu1 %v5118_v12  ;;  %v5294_v12 = vld [vmem:[#allocation25 + $0x358] sm:$0xff] }
 0x973   :  { %11040 = vmatpush3.msra.mxu0 %v4932_v62  ;;  %5155 = vmatpush1.msra.mxu1 %v5117_v20  ;;  %v5479_v62 = vld [vmem:[#allocation25 + $0x408] sm:$0xff]  ;;  %v5477_v20 = vld [vmem:[#allocation25 + $0x3f8] sm:$0xff] }
 0x974   :  { %11041 = vmatprep.subr.mxu0 %v16013_v2  ;;  %5156 = vmatprep.subr.mxu1 %v5115_v43  ;;  %v5291_v43 = vld [vmem:[#allocation25 + $0x340] sm:$0xff] }
 0x975   :  { %11042 = vmatpush3.msra.mxu0 %v4929_v47  ;;  %5157 = vmatpush1.msra.mxu1 %v5114_v50  ;;  %v5476_v47 = vld [vmem:[#allocation25 + $0x3f0] sm:$0xff]  ;;  %v5474_v50 = vld [vmem:[#allocation25 + $0x3e0] sm:$0xff] }
 0x976   :  { %11043 = vmatprep.subr.mxu0 %v16013_v2  ;;  %5158 = vmatprep.subr.mxu1 %v5112_v36  ;;  %v5288_v36 = vld [vmem:[#allocation25 + $0x328] sm:$0xff] }
 0x977   :  { %11044 = vmatpush3.msra.mxu0 %v4926_v9  ;;  %5159 = vmatpush1.msra.mxu1 %v5111_v11  ;;  %v5473_v9 = vld [vmem:[#allocation25 + $0x3d8] sm:$0xff]  ;;  %v5471_v11 = vld [vmem:[#allocation25 + $0x3c8] sm:$0xff] }
 0x978   :  { %11045 = vmatprep.subr.mxu0 %v16013_v2  ;;  %5160 = vmatprep.subr.mxu1 %v5109_v29  ;;  %v5285_v29 = vld [vmem:[#allocation25 + $0x310] sm:$0xff] }
 0x979   :  { %11046 = vmatpush3.msra.mxu0 %v4923_v27  ;;  %5161 = vmatpush1.msra.mxu1 %v5108_v5  ;;  %v5470_v27 = vld [vmem:[#allocation25 + $0x3c0] sm:$0xff]  ;;  %v5679_v5 = vld [vmem:[#allocation25 + $0x530] sm:$0xff] }
 0x97a   :  { %11047 = vmatprep.subr.mxu0 %v16013_v2  ;;  %5162 = vmatprep.subr.mxu1 %v5106_v49  ;;  %v5493_v49 = vld [vmem:[#allocation25 + $0x478] sm:$0xff] }
 0x97b   :  { %11048 = vmatpush3.msra.mxu0 %v4920_v0  ;;  %5163 = vmatpush1.msra.mxu1 %v5105_v24  ;;  %v5678_v0 = vld [vmem:[#allocation25 + $0x528] sm:$0xff]  ;;  %v5676_v24 = vld [vmem:[#allocation25 + $0x518] sm:$0xff] }
 0x97c   :  { %11049 = vmatprep.subr.mxu0 %v16013_v2  ;;  %5164 = vmatprep.subr.mxu1 %v5103_v52  ;;  %v5490_v52 = vld [vmem:[#allocation25 + $0x460] sm:$0xff] }
 0x97d   :  { %11050 = vmatpush3.msra.mxu0 %v4917_v42  ;;  %5165 = vmatpush1.msra.mxu1 %v5102_v57  ;;  %v5675_v42 = vld [vmem:[#allocation25 + $0x510] sm:$0xff]  ;;  %v5673_v57 = vld [vmem:[#allocation25 + $0x500] sm:$0xff] }
 0x97e   :  { %11051 = vmatprep.subr.mxu0 %v16013_v2  ;;  %5166 = vmatprep.subr.mxu1 %v5100_v55  ;;  %v5487_v55 = vld [vmem:[#allocation25 + $0x448] sm:$0xff] }
 0x97f   :  { %11052 = vmatpush3.msra.mxu0 %v4914_v3  ;;  %5167 = vmatpush1.msra.mxu1 %v5099_v46  ;;  %v5672_v3 = vld [vmem:[#allocation25 + $0x4f8] sm:$0xff]  ;;  %v5670_v46 = vld [vmem:[#allocation25 + $0x4e8] sm:$0xff] }
 0x980   :  { %11053 = vmatprep.subr.mxu0 %v16013_v2  ;;  %5168 = vmatprep.subr.mxu1 %v5097_v25  ;;  %v5484_v25 = vld [vmem:[#allocation25 + $0x430] sm:$0xff] }
 0x981   :  { %11054 = vmatpush3.msra.mxu0 %v4911_v8  ;;  %11055 = vmatprep.mubr.msk.f32.mxu0 %vm11938_vm11, %v16013_v2  ;;  %v5669_v8 = vld [vmem:[#allocation25 + $0x4e0] sm:$0xff] }
 0x982   :  { %5169 = vmatpush1.msra.mxu1 %v5096_v17  ;;  %5202 = vmatprep.mubr.f32.mxu1 %v16013_v2  ;;  %v5667_v17 = vld [vmem:[#allocation25 + $0x4d0] sm:$0xff] }
 0x983   :  { %11056 = vmatmul.mubr.msk.f32.vlgmr.msra.gmra.mxu0 %vm4110_vm14, %v13251_v48  ;;  %10560 = vmatmul.mubr.msk.f32.vlgmr.msra.gmra.mxu1 %vm4110_vm14, %v13251_v48 }
 0x984   :  { %11058 = vmatprep.subr.mxu0 %v16013_v2  ;;  %5341 = vmatprep.subr.mxu1 %v5305_v56  ;;  %v5481_v56 = vld [vmem:[#allocation25 + $0x418] sm:$0xff] }
 0x985   :  { %11059 = vmatpush3.msra.mxu0 %v5119_v38  ;;  %5342 = vmatpush1.msra.mxu1 %v5304_v19  ;;  %v5666_v38 = vld [vmem:[#allocation25 + $0x4c8] sm:$0xff]  ;;  %v5664_v19 = vld [vmem:[#allocation25 + $0x4b8] sm:$0xff] }
 0x986   :  { %11060 = vmatprep.subr.mxu0 %v16013_v2  ;;  %5343 = vmatprep.subr.mxu1 %v5302_v15  ;;  %v5478_v15 = vld [vmem:[#allocation25 + $0x400] sm:$0xff] }
 0x987   :  { %11061 = vmatpush3.msra.mxu0 %v5116_v45  ;;  %5344 = vmatpush1.msra.mxu1 %v5301_v58  ;;  %v5663_v45 = vld [vmem:[#allocation25 + $0x4b0] sm:$0xff]  ;;  %v5661_v58 = vld [vmem:[#allocation25 + $0x4a0] sm:$0xff] }
 0x988   :  { %11062 = vmatprep.subr.mxu0 %v16013_v2  ;;  %5345 = vmatprep.subr.mxu1 %v5299_v59  ;;  %v5475_v59 = vld [vmem:[#allocation25 + $0x3e8] sm:$0xff] }
 0x989   :  { %11063 = vmatpush3.msra.mxu0 %v5113_v53  ;;  %5346 = vmatpush1.msra.mxu1 %v5298_v54  ;;  %v5660_v53 = vld [vmem:[#allocation25 + $0x498] sm:$0xff]  ;;  %v5658_v54 = vld [vmem:[#allocation25 + $0x488] sm:$0xff] }
 0x98a   :  { %11064 = vmatprep.subr.mxu0 %v16013_v2  ;;  %5347 = vmatprep.subr.mxu1 %v5296_v37  ;;  %v5472_v37 = vld [vmem:[#allocation25 + $0x3d0] sm:$0xff] }
 0x98b   :  { %11065 = vmatpush3.msra.mxu0 %v5110_v14  ;;  %5348 = vmatpush1.msra.mxu1 %v5295_v28  ;;  %v5657_v14 = vld [vmem:[#allocation25 + $0x480] sm:$0xff]  ;;  %v5866_v28 = vld [vmem:[#allocation25 + $0x5f0] sm:$0xff] }
 0x98c   :  { %11066 = vmatprep.subr.mxu0 %v16013_v2  ;;  %5349 = vmatprep.subr.mxu1 %v5293_v61  ;;  %v5680_v61 = vld [vmem:[#allocation25 + $0x538] sm:$0xff] }
 0x98d   :  { %11067 = vmatpush3.msra.mxu0 %v5107_v4  ;;  %5350 = vmatpush1.msra.mxu1 %v5292_v31  ;;  %v5865_v4 = vld [vmem:[#allocation25 + $0x5e8] sm:$0xff]  ;;  %v5863_v31 = vld [vmem:[#allocation25 + $0x5d8] sm:$0xff] }
 0x98e   :  { %11068 = vmatprep.subr.mxu0 %v16013_v2  ;;  %5351 = vmatprep.subr.mxu1 %v5290_v63  ;;  %v5677_v63 = vld [vmem:[#allocation25 + $0x520] sm:$0xff] }
 0x98f   :  { %11069 = vmatpush3.msra.mxu0 %v5104_v32  ;;  %5352 = vmatpush1.msra.mxu1 %v5289_v51  ;;  %v5862_v32 = vld [vmem:[#allocation25 + $0x5d0] sm:$0xff]  ;;  %v5860_v51 = vld [vmem:[#allocation25 + $0x5c0] sm:$0xff] }
 0x990   :  { %11070 = vmatprep.subr.mxu0 %v16013_v2  ;;  %5353 = vmatprep.subr.mxu1 %v5287_v10  ;;  %v5674_v10 = vld [vmem:[#allocation25 + $0x508] sm:$0xff] }
 0x991   :  { %11071 = vmatpush3.msra.mxu0 %v5101_v41  ;;  %5354 = vmatpush1.msra.mxu1 %v5286_v33  ;;  %v5859_v41 = vld [vmem:[#allocation25 + $0x5b8] sm:$0xff]  ;;  %v5857_v33 = vld [vmem:[#allocation25 + $0x5a8] sm:$0xff] }
 0x992   :  { %11072 = vmatprep.subr.mxu0 %v16013_v2  ;;  %5355 = vmatprep.subr.mxu1 %v5284_v23  ;;  %v5671_v23 = vld [vmem:[#allocation25 + $0x4f0] sm:$0xff] }
 0x993   :  { %11073 = vmatpush3.msra.mxu0 %v5098_v34  ;;  %11074 = vmatprep.mubr.msk.f32.mxu0 %vm11938_vm11, %v16013_v2  ;;  %v5856_v34 = vld [vmem:[#allocation25 + $0x5a0] sm:$0xff] }
 0x994   :  { %5356 = vmatpush1.msra.mxu1 %v5283_v22  ;;  %5389 = vmatprep.mubr.f32.mxu1 %v16013_v2  ;;  %v5854_v22 = vld [vmem:[#allocation25 + $0x590] sm:$0xff] }
 0x995   :  { %11075 = vmatmul.mubr.msk.f32.vlgmr.msra.gmra.mxu0 %vm4110_vm14, %v13251_v48  ;;  %10562 = vmatmul.mubr.msk.f32.vlgmr.msra.gmra.mxu1 %vm4110_vm14, %v13251_v48 }
 0x996   :  { %11077 = vmatprep.subr.mxu0 %v16013_v2  ;;  %5528 = vmatprep.subr.mxu1 %v5492_v35  ;;  %v5668_v35 = vld [vmem:[#allocation25 + $0x4d8] sm:$0xff] }
 0x997   :  { %11078 = vmatpush3.msra.mxu0 %v5306_v30  ;;  %5529 = vmatpush1.msra.mxu1 %v5491_v13  ;;  %v5853_v30 = vld [vmem:[#allocation25 + $0x588] sm:$0xff]  ;;  %v5851_v13 = vld [vmem:[#allocation25 + $0x578] sm:$0xff] }
 0x998   :  { %11079 = vmatprep.subr.mxu0 %v16013_v2  ;;  %5530 = vmatprep.subr.mxu1 %v5489_v39  ;;  %v5665_v39 = vld [vmem:[#allocation25 + $0x4c0] sm:$0xff] }
 0x999   :  { %11080 = vmatpush3.msra.mxu0 %v5303_v7  ;;  %5531 = vmatpush1.msra.mxu1 %v5488_v26  ;;  %v5850_v7 = vld [vmem:[#allocation25 + $0x570] sm:$0xff]  ;;  %v5848_v26 = vld [vmem:[#allocation25 + $0x560] sm:$0xff] }
 0x99a   :  { %11081 = vmatprep.subr.mxu0 %v16013_v2  ;;  %5532 = vmatprep.subr.mxu1 %v5486_v40  ;;  %v5662_v40 = vld [vmem:[#allocation25 + $0x4a8] sm:$0xff] }
 0x99b   :  { %11082 = vmatpush3.msra.mxu0 %v5300_v6  ;;  %5533 = vmatpush1.msra.mxu1 %v5485_v18  ;;  %v5847_v6 = vld [vmem:[#allocation25 + $0x558] sm:$0xff]  ;;  %v5845_v18 = vld [vmem:[#allocation25 + $0x548] sm:$0xff] }
 0x99c   :  { %11083 = vmatprep.subr.mxu0 %v16013_v2  ;;  %5534 = vmatprep.subr.mxu1 %v5483_v21  ;;  %v5659_v21 = vld [vmem:[#allocation25 + $0x490] sm:$0xff] }
 0x99d   :  { %11084 = vmatpush3.msra.mxu0 %v5297_v44  ;;  %5535 = vmatpush1.msra.mxu1 %v5482_v16  ;;  %v5844_v44 = vld [vmem:[#allocation25 + $0x540] sm:$0xff]  ;;  %v5867_v16 = vld [vmem:[#allocation25 + $0x5f8] sm:$0xff] }
 0x99e   :  { %11085 = vmatprep.subr.mxu0 %v16013_v2  ;;  %5536 = vmatprep.subr.mxu1 %v5480_v60  ;;  %v5864_v60 = vld [vmem:[#allocation25 + $0x5e0] sm:$0xff] }
 0x99f   :  { %11086 = vmatpush3.msra.mxu0 %v5294_v12  ;;  %5537 = vmatpush1.msra.mxu1 %v5479_v62  ;;  %v5861_v12 = vld [vmem:[#allocation25 + $0x5c8] sm:$0xff]  ;;  %v5858_v62 = vld [vmem:[#allocation25 + $0x5b0] sm:$0xff] }
 0x9a0   :  { %11087 = vmatprep.subr.mxu0 %v16013_v2  ;;  %5538 = vmatprep.subr.mxu1 %v5477_v20  ;;  %v5855_v20 = vld [vmem:[#allocation25 + $0x598] sm:$0xff] }
 0x9a1   :  { %11088 = vmatpush3.msra.mxu0 %v5291_v43  ;;  %5539 = vmatpush1.msra.mxu1 %v5476_v47  ;;  %v5852_v43 = vld [vmem:[#allocation25 + $0x580] sm:$0xff]  ;;  %v5849_v47 = vld [vmem:[#allocation25 + $0x568] sm:$0xff] }
 0x9a2   :  { %11089 = vmatprep.subr.mxu0 %v16013_v2  ;;  %5540 = vmatprep.subr.mxu1 %v5474_v50  ;;  %v5846_v50 = vld [vmem:[#allocation25 + $0x550] sm:$0xff] }
 0x9a3   :  { %11090 = vmatpush3.msra.mxu0 %v5288_v36  ;;  %5541 = vmatpush1.msra.mxu1 %v5473_v9  ;;  %v4561_v36 = vlaneseq }
 0x9a4   :  { %11091 = vmatprep.subr.mxu0 %v16013_v2  ;;  %5542 = vmatprep.subr.mxu1 %v5471_v11 }
 0x9a5   :  { %11092 = vmatpush3.msra.mxu0 %v5285_v29  ;;  %11093 = vmatprep.mubr.msk.f32.mxu0 %vm11938_vm11, %v16013_v2  ;;  %v4562_v9 = vshrl.u32 %v4561_v36, 7  ;;  %v4559_v29 = vld [vmem:[#allocation26] sm:$0x7] }
 0x9a6   :  { %5543 = vmatpush1.msra.mxu1 %v5470_v27  ;;  %5576 = vmatprep.mubr.f32.mxu1 %v16013_v2 }
 0x9a7   :  { %11094 = vmatmul.mubr.msk.f32.vlgmr.msra.gmra.mxu0 %vm4110_vm14, %v13251_v48  ;;  %10564 = vmatmul.mubr.msk.f32.vlgmr.msra.gmra.mxu1 %vm4110_vm14, %v13251_v48  ;;  %v13374_v11 = vsub.s32 0, %v4562_v9  ;;  %v13376_v27 = vsub.s32 1, %v4562_v9 }
 0x9a8   :  { %11096 = vmatprep.subr.mxu0 %v16013_v2  ;;  %5715 = vmatprep.subr.mxu1 %v5679_v5 }
 0x9a9   :  { %11097 = vmatpush3.msra.mxu0 %v5493_v49  ;;  %5716 = vmatpush1.msra.mxu1 %v5678_v0  ;;  %16032 = vst [vmem:[#allocation52_spill] sm:$0xff] %v13374_v11  ;;  %16033 = vst [vmem:[#allocation50_spill] sm:$0xff] %v13376_v27  ;;  %v4564_v5 = vrot.slane %v4559_v29, %v13374_v11  ;;  %v4568_v49 = vrot.slane %v4559_v29, %v13376_v27 }
 0x9aa   :  { %11098 = vmatprep.subr.mxu0 %v16013_v2  ;;  %5717 = vmatprep.subr.mxu1 %v5676_v24 }
 0x9ab   :  { %11099 = vmatpush3.msra.mxu0 %v5490_v52  ;;  %5718 = vmatpush1.msra.mxu1 %v5675_v42 }
 0x9ac   :  { %11100 = vmatprep.subr.mxu0 %v16013_v2  ;;  %5719 = vmatprep.subr.mxu1 %v5673_v57 }
 0x9ad   :  { %11101 = vmatpush3.msra.mxu0 %v5487_v55  ;;  %5720 = vmatpush1.msra.mxu1 %v5672_v3  ;;  %v13392_v55 = vsub.s32 2, %v4562_v9  ;;  %v4747_v3 = vld [vmem:[#allocation26 + $0x3] sm:$0x7] }
 0x9ae   :  { %11102 = vmatprep.subr.mxu0 %v16013_v2  ;;  %5721 = vmatprep.subr.mxu1 %v5670_v46 }
 0x9af   :  { %11103 = vmatpush3.msra.mxu0 %v5484_v25  ;;  %5722 = vmatpush1.msra.mxu1 %v5669_v8  ;;  %16035 = vst [vmem:[#allocation63_spill] sm:$0xff] %v13392_v55  ;;  %v4572_v46 = vrot.slane %v4559_v29, %v13392_v55  ;;  %v4752_v25 = vrot.slane %v4747_v3, %v13374_v11 }
 0x9b0   :  { %11104 = vmatprep.subr.mxu0 %v16013_v2  ;;  %5723 = vmatprep.subr.mxu1 %v5667_v17  ;;  %v4756_v8 = vrot.slane %v4747_v3, %v13376_v27 }
 0x9b1   :  { %11105 = vmatpush3.msra.mxu0 %v5481_v56  ;;  %5724 = vmatpush1.msra.mxu1 %v5666_v38 }
 0x9b2   :  { %11106 = vmatprep.subr.mxu0 %v16013_v2  ;;  %5725 = vmatprep.subr.mxu1 %v5664_v19 }
 0x9b3   :  { %11107 = vmatpush3.msra.mxu0 %v5478_v15  ;;  %5726 = vmatpush1.msra.mxu1 %v5663_v45 }
 0x9b4   :  { %11108 = vmatprep.subr.mxu0 %v16013_v2  ;;  %5727 = vmatprep.subr.mxu1 %v5661_v58 }
 0x9b5   :  { %11109 = vmatpush3.msra.mxu0 %v5475_v59  ;;  %5728 = vmatpush1.msra.mxu1 %v5660_v53  ;;  %v4934_v53 = vld [vmem:[#allocation26 + $0x6] sm:$0x7] }
 0x9b6   :  { %11110 = vmatprep.subr.mxu0 %v16013_v2  ;;  %5729 = vmatprep.subr.mxu1 %v5658_v54  ;;  %v4760_v54 = vrot.slane %v4747_v3, %v13392_v55 }
 0x9b7   :  { %11111 = vmatpush3.msra.mxu0 %v5472_v37  ;;  %11112 = vmatprep.mubr.msk.f32.mxu0 %vm11938_vm11, %v16013_v2  ;;  %v4939_v37 = vrot.slane %v4934_v53, %v13374_v11 }
 0x9b8   :  { %5730 = vmatpush1.msra.mxu1 %v5657_v14  ;;  %5763 = vmatprep.mubr.f32.mxu1 %v16013_v2  ;;  %v4943_v14 = vrot.slane %v4934_v53, %v13376_v27 }
 0x9b9   :  { %11113 = vmatmul.mubr.msk.f32.vlgmr.msra.gmra.mxu0 %vm4110_vm14, %v13251_v48  ;;  %10566 = vmatmul.mubr.msk.f32.vlgmr.msra.gmra.mxu1 %vm4110_vm14, %v13251_v48 }
 0x9ba   :  { %11115 = vmatprep.subr.mxu0 %v16013_v2  ;;  %5902 = vmatprep.subr.mxu1 %v5866_v28 }
 0x9bb   :  { %11116 = vmatpush3.msra.mxu0 %v5680_v61  ;;  %5903 = vmatpush1.msra.mxu1 %v5865_v4 }
 0x9bc   :  { %11117 = vmatprep.subr.mxu0 %v16013_v2  ;;  %5904 = vmatprep.subr.mxu1 %v5863_v31 }
 0x9bd   :  { %11118 = vmatpush3.msra.mxu0 %v5677_v63  ;;  %5905 = vmatpush1.msra.mxu1 %v5862_v32 }
 0x9be   :  { %11119 = vmatprep.subr.mxu0 %v16013_v2  ;;  %5906 = vmatprep.subr.mxu1 %v5860_v51 }
 0x9bf   :  { %11120 = vmatpush3.msra.mxu0 %v5674_v10  ;;  %5907 = vmatpush1.msra.mxu1 %v5859_v41  ;;  %v5121_v41 = vld [vmem:[#allocation26 + $0x9] sm:$0x7] }
 0x9c0   :  { %11121 = vmatprep.subr.mxu0 %v16013_v2  ;;  %5908 = vmatprep.subr.mxu1 %v5857_v33  ;;  %v4947_v33 = vrot.slane %v4934_v53, %v13392_v55 }
 0x9c1   :  { %11122 = vmatpush3.msra.mxu0 %v5671_v23  ;;  %5909 = vmatpush1.msra.mxu1 %v5856_v34  ;;  %v5126_v23 = vrot.slane %v5121_v41, %v13374_v11  ;;  %v5130_v34 = vrot.slane %v5121_v41, %v13376_v27 }
 0x9c2   :  { %11123 = vmatprep.subr.mxu0 %v16013_v2  ;;  %5910 = vmatprep.subr.mxu1 %v5854_v22 }
 0x9c3   :  { %11124 = vmatpush3.msra.mxu0 %v5668_v35  ;;  %5911 = vmatpush1.msra.mxu1 %v5853_v30 }
 0x9c4   :  { %11125 = vmatprep.subr.mxu0 %v16013_v2  ;;  %5912 = vmatprep.subr.mxu1 %v5851_v13 }
 0x9c5   :  { %11126 = vmatpush3.msra.mxu0 %v5665_v39  ;;  %5913 = vmatpush1.msra.mxu1 %v5850_v7 }
 0x9c6   :  { %11127 = vmatprep.subr.mxu0 %v16013_v2  ;;  %5914 = vmatprep.subr.mxu1 %v5848_v26 }
 0x9c7   :  { %11128 = vmatpush3.msra.mxu0 %v5662_v40  ;;  %5915 = vmatpush1.msra.mxu1 %v5847_v6  ;;  %v5308_v40 = vld [vmem:[#allocation26 + $0xc] sm:$0x7]  ;;  %v5134_v6 = vrot.slane %v5121_v41, %v13392_v55 }
 0x9c8   :  { %11129 = vmatprep.subr.mxu0 %v16013_v2  ;;  %5916 = vmatprep.subr.mxu1 %v5845_v18  ;;  %v5313_v18 = vrot.slane %v5308_v40, %v13374_v11 }
 0x9c9   :  { %11130 = vmatpush3.msra.mxu0 %v5659_v21  ;;  %11131 = vmatprep.mubr.msk.f32.mxu0 %vm11938_vm11, %v16013_v2  ;;  %v5317_v21 = vrot.slane %v5308_v40, %v13376_v27 }
 0x9ca   :  { %5917 = vmatpush1.msra.mxu1 %v5844_v44  ;;  %5950 = vmatprep.mubr.f32.mxu1 %v16013_v2 }
 0x9cb   :  { %11132 = vmatmul.mubr.msk.f32.vlgmr.msra.gmra.mxu0 %vm4110_vm14, %v13251_v48  ;;  %10568 = vmatmul.mubr.msk.f32.vlgmr.msra.gmra.mxu1 %vm4110_vm14, %v13251_v48 }
 0x9cc   :  { %11134 = vmatprep.subr.mxu0 %v16013_v2  ;;  %11150 = vmatprep.mubr.msk.f32.mxu0 %vm11938_vm11, %v16013_v2 }
 0x9cd   :  { %11135 = vmatpush3.msra.mxu0 %v5867_v16  ;;  %6251 = vmatprep.mubr.f32.mxu1 %v16013_v2 }
 0x9ce   :  { %11136 = vmatprep.subr.mxu0 %v16013_v2 }
 0x9cf   :  { %11137 = vmatpush3.msra.mxu0 %v5864_v60 }
 0x9d0   :  { %11138 = vmatprep.subr.mxu0 %v16013_v2 }
 0x9d1   :  { %11139 = vmatpush3.msra.mxu0 %v5861_v12 }
 0x9d2   :  { %11140 = vmatprep.subr.mxu0 %v16013_v2 }
 0x9d3   :  { %11141 = vmatpush3.msra.mxu0 %v5858_v62 }
 0x9d4   :  { %11142 = vmatprep.subr.mxu0 %v16013_v2 }
 0x9d5   :  { %11143 = vmatpush3.msra.mxu0 %v5855_v20 }
 0x9d6   :  { %11144 = vmatprep.subr.mxu0 %v16013_v2 }
 0x9d7   :  { %11145 = vmatpush3.msra.mxu0 %v5852_v43 }
 0x9d8   :  { %11146 = vmatprep.subr.mxu0 %v16013_v2 }
 0x9d9   :  { %11147 = vmatpush3.msra.mxu0 %v5849_v47  ;;  %v5495_v47 = vld [vmem:[#allocation26 + $0xf] sm:$0x7] }
 0x9da   :  { %11148 = vmatprep.subr.mxu0 %v16013_v2  ;;  %v5500_v36 = vrot.slane %v5495_v47, %v13374_v11  ;;  %v5504_v29 = vrot.slane %v5495_v47, %v13376_v27 }
 0x9db   :  { %11149 = vmatpush3.msra.mxu0 %v5846_v50  ;;  %v5321_v50 = vrot.slane %v5308_v40, %v13392_v55 }
 0x9dc   :  { %11151 = vmatmul.mubr.msk.f32.vlgmr.msra.gmra.mxu0 %vm4110_vm14, %v13251_v48 }
 0xa0e   :  { %v13380_v0 = vpop.f32.mrf.mxu0  ;;  %v4642_v24 = vpop.f32.mrf.mxu1 }
 0xa0f   :  { %16034 = vst [vmem:[#allocation54_spill] sm:$0xff] %v13380_v0  ;;  %v13382_v52 = vadd.f32 %v4642_v24, %v4564_v5 }
 0xa10   :  { %v11000_v42 = vpop.f32.mrf.mxu0  ;;  %v4644_v57 = vpop.f32.mrf.mxu1 }
 0xa11   :  { %4717 = vst [vmem:[#allocation2] sm:$0xff] %v13382_v52  ;;  %v13385_v48 = vadd.f32 %v4644_v57, %v4568_v49  ;;  %6087 = vrot.lane.b32.xlu1 %v13382_v52, %s11929_s28 }
 0xa13   :  { %4718 = vst [vmem:[#allocation2 + $0x8] sm:$0xff] %v13385_v48 }
 0xa15   :  { %6552 = vrot.lane.b32.xlu1 %v13382_v52, %s11930_s7 }
 0xa19   :  { %6843 = vrot.lane.b32.xlu1 %v13382_v52, %s11933_s13 }
 0xa1d   :  { %7134 = vrot.lane.b32.xlu1 %v13382_v52, %s11939_s17 }
 0xa1f   :  { %v4713_v17 = vpop.f32.mrf.mxu0  ;;  %v4830_v56 = vpop.f32.mrf.mxu1 }
 0xa20   :  { %v4714_v38 = vadd.f32 %v4713_v17, %v4572_v46  ;;  %v13401_v19 = vadd.f32 %v4830_v56, %v4752_v25  ;;  %v5682_v25 = vld [vmem:[#allocation26 + $0x12] sm:$0x7] }
 0xa21   :  { %v11019_v15 = vpop.f32.mrf.mxu0  ;;  %v4832_v45 = vpop.f32.mrf.mxu1  ;;  %7426 = vrot.lane.b32.xlu1 %v13382_v52, %s11940_s18  ;;  %v5687_v17 = vrot.slane %v5682_v25, %v13374_v11  ;;  %v5691_v56 = vrot.slane %v5682_v25, %v13376_v27 }
 0xa22   :  { %4720 = vst.msk [vmem:[#allocation2 + $0x10] sm:$0xff] %vm4719_vm0, %v4714_v38  ;;  %4905 = vst [vmem:[#allocation2 + $0x18] sm:$0xff] %v13401_v19  ;;  %v13407_v58 = vadd.f32 %v4832_v45, %v4756_v8  ;;  %6093 = vrot.lane.b32.xlu0 %v13401_v19, %s11929_s28  ;;  %v5508_v8 = vrot.slane %v5495_v47, %v13392_v55 }
 0xa24   :  { %4906 = vst [vmem:[#allocation2 + $0x20] sm:$0xff] %v13407_v58 }
 0xa25   :  { %6089 = vrot.lane.b32.xlu1 %v13385_v48, %s11929_s28 }
 0xa29   :  { %v13414_v59 = vld [vmem:[#allocation2 + $0x10] sm:$0xff]  ;;  %6554 = vrot.lane.b32.xlu1 %v13385_v48, %s11930_s7 }
 0xa2a   :  { %6091 = vrot.lane.b32.xlu0 %v13414_v59, %s11929_s28 }
 0xa2d   :  { %6845 = vrot.lane.b32.xlu1 %v13385_v48, %s11933_s13 }
 0xa2e   :  { %6558 = vrot.lane.b32.xlu0 %v13401_v19, %s11930_s7 }
 0xa31   :  { %v4901_v28 = vpop.f32.mrf.mxu0  ;;  %v5017_v61 = vpop.f32.mrf.mxu1  ;;  %7136 = vrot.lane.b32.xlu1 %v13385_v48, %s11939_s17 }
 0xa32   :  { %v4902_v4 = vadd.f32 %v4901_v28, %v4760_v54  ;;  %v13429_v31 = vadd.f32 %v5017_v61, %v4939_v37  ;;  %6556 = vrot.lane.b32.xlu0 %v13414_v59, %s11930_s7 }
 0xa33   :  { %v11038_v63 = vpop.f32.mrf.mxu0  ;;  %v5019_v32 = vpop.f32.mrf.mxu1 }
 0xa34   :  { %4907 = vst.msk [vmem:[#allocation2 + $0x28] sm:$0xff] %vm4719_vm0, %v4902_v4  ;;  %5092 = vst [vmem:[#allocation2 + $0x30] sm:$0xff] %v13429_v31  ;;  %v13435_v51 = vadd.f32 %v5019_v32, %v4943_v14  ;;  %v5869_v4 = vld [vmem:[#allocation26 + $0x15] sm:$0x7]  ;;  %v5695_v32 = vrot.slane %v5682_v25, %v13392_v55 }
 0xa35   :  { %7428 = vrot.lane.b32.xlu1 %v13385_v48, %s11940_s18  ;;  %v5874_v41 = vrot.slane %v5869_v4, %v13374_v11 }
 0xa36   :  { %6849 = vrot.lane.b32.xlu0 %v13401_v19, %s11933_s13 }
 0xa39   :  { %6099 = vrot.lane.b32.xlu1 %v13429_v31, %s11929_s28 }
 0xa3a   :  { %6847 = vrot.lane.b32.xlu0 %v13414_v59, %s11933_s13 }
 0xa3b   :  { %v13445_v10 = vld [vmem:[#allocation2 + $0x28] sm:$0xff] }
 0xa3d   :  { %6097 = vrot.lane.b32.xlu1 %v13445_v10, %s11929_s28 }
 0xa3e   :  { %7140 = vrot.lane.b32.xlu0 %v13401_v19, %s11939_s17 }
 0xa41   :  { %6564 = vrot.lane.b32.xlu1 %v13429_v31, %s11930_s7 }
 0xa42   :  { %7138 = vrot.lane.b32.xlu0 %v13414_v59, %s11939_s17 }
 0xa43   :  { %v5088_v22 = vpop.f32.mrf.mxu0  ;;  %v5204_v35 = vpop.f32.mrf.mxu1 }
 0xa44   :  { %v5089_v30 = vadd.f32 %v5088_v22, %v4947_v33  ;;  %v13458_v13 = vadd.f32 %v5204_v35, %v5126_v23  ;;  %v5878_v33 = vrot.slane %v5869_v4, %v13376_v27 }
 0xa45   :  { %v11057_v39 = vpop.f32.mrf.mxu0  ;;  %v5206_v7 = vpop.f32.mrf.mxu1  ;;  %6562 = vrot.lane.b32.xlu1 %v13445_v10, %s11930_s7 }
 0xa46   :  { %5094 = vst.msk [vmem:[#allocation2 + $0x40] sm:$0xff] %vm4719_vm0, %v5089_v30  ;;  %v13463_v26 = vadd.f32 %v5206_v7, %v5130_v34  ;;  %7432 = vrot.lane.b32.xlu0 %v13401_v19, %s11940_s18 }
 0xa49   :  { %6855 = vrot.lane.b32.xlu1 %v13429_v31, %s11933_s13 }
 0xa4a   :  { %7430 = vrot.lane.b32.xlu0 %v13414_v59, %s11940_s18 }
 0xa4d   :  { %6853 = vrot.lane.b32.xlu1 %v13445_v10, %s11933_s13  ;;  %v13505_v9 = vld [vmem:[#allocation2 + $0x40] sm:$0xff] }
 0xa4e   :  { %6095 = vrot.lane.b32.xlu0 %v13407_v58, %s11929_s28 }
 0xa51   :  { %7146 = vrot.lane.b32.xlu1 %v13429_v31, %s11939_s17 }
 0xa52   :  { %6560 = vrot.lane.b32.xlu0 %v13407_v58, %s11930_s7 }
 0xa55   :  { %v5275_v44 = vpop.f32.mrf.mxu0  ;;  %v5391_v16 = vpop.f32.mrf.mxu1  ;;  %7144 = vrot.lane.b32.xlu1 %v13445_v10, %s11939_s17 }
 0xa56   :  { %v5276_v60 = vadd.f32 %v5275_v44, %v5134_v6  ;;  %v13484_v12 = vadd.f32 %v5391_v16, %v5313_v18  ;;  %6851 = vrot.lane.b32.xlu0 %v13407_v58, %s11933_s13  ;;  %v5882_v16 = vrot.slane %v5869_v4, %v13392_v55 }
 0xa57   :  { %v11076_v62 = vpop.f32.mrf.mxu0  ;;  %v5393_v20 = vpop.f32.mrf.mxu1 }
 0xa58   :  { %5281 = vst.msk [vmem:[#allocation2 + $0x58] sm:$0xff] %vm4719_vm0, %v5276_v60  ;;  %v13489_v43 = vadd.f32 %v5393_v20, %v5317_v21 }
 0xa59   :  { %7438 = vrot.lane.b32.xlu1 %v13429_v31, %s11940_s18 }
 0xa5a   :  { %7142 = vrot.lane.b32.xlu0 %v13407_v58, %s11939_s17 }
 0xa5d   :  { %7436 = vrot.lane.b32.xlu1 %v13445_v10, %s11940_s18 }
 0xa5e   :  { %7434 = vrot.lane.b32.xlu0 %v13407_v58, %s11940_s18 }
 0xa5f   :  { %v13536_v38 = vld [vmem:[#allocation2 + $0x58] sm:$0xff] }
 0xa61   :  { %6101 = vrot.lane.b32.xlu1 %v13435_v51, %s11929_s28 }
 0xa62   :  { %6105 = vrot.lane.b32.xlu0 %v13458_v13, %s11929_s28 }
 0xa65   :  { %6566 = vrot.lane.b32.xlu1 %v13435_v51, %s11930_s7 }
 0xa66   :  { %6103 = vrot.lane.b32.xlu0 %v13505_v9, %s11929_s28 }
 0xa67   :  { %v5462_v5 = vpop.f32.mrf.mxu0  ;;  %v5578_v49 = vpop.f32.mrf.mxu1 }
 0xa68   :  { %v5463_v24 = vadd.f32 %v5462_v5, %v5321_v50  ;;  %v13512_v42 = vadd.f32 %v5578_v49, %v5500_v36 }
 0xa69   :  { %v11095_v57 = vpop.f32.mrf.mxu0  ;;  %v5580_v3 = vpop.f32.mrf.mxu1  ;;  %6857 = vrot.lane.b32.xlu1 %v13435_v51, %s11933_s13 }
 0xa6a   :  { %5468 = vst.msk [vmem:[#allocation2 + $0x70] sm:$0xff] %vm4719_vm0, %v5463_v24  ;;  %v13517_v46 = vadd.f32 %v5580_v3, %v5504_v29  ;;  %6570 = vrot.lane.b32.xlu0 %v13458_v13, %s11930_s7 }
 0xa6d   :  { %7148 = vrot.lane.b32.xlu1 %v13435_v51, %s11939_s17 }
 0xa6e   :  { %6568 = vrot.lane.b32.xlu0 %v13505_v9, %s11930_s7 }
 0xa71   :  { %7440 = vrot.lane.b32.xlu1 %v13435_v51, %s11940_s18  ;;  %v13613_v29 = vld [vmem:[#allocation2 + $0x70] sm:$0xff] }
 0xa72   :  { %6861 = vrot.lane.b32.xlu0 %v13458_v13, %s11933_s13 }
 0xa75   :  { %6111 = vrot.lane.b32.xlu1 %v13484_v12, %s11929_s28 }
 0xa76   :  { %6859 = vrot.lane.b32.xlu0 %v13505_v9, %s11933_s13 }
 0xa79   :  { %v5649_v15 = vpop.f32.mrf.mxu0  ;;  %v5765_v45 = vpop.f32.mrf.mxu1  ;;  %6109 = vrot.lane.b32.xlu1 %v13536_v38, %s11929_s28 }
 0xa7a   :  { %v5650_v53 = vadd.f32 %v5649_v15, %v5508_v8  ;;  %v13540_v54 = vadd.f32 %v5765_v45, %v5687_v17  ;;  %7152 = vrot.lane.b32.xlu0 %v13458_v13, %s11939_s17 }
 0xa7b   :  { %v11114_v37 = vpop.f32.mrf.mxu0  ;;  %v5767_v14 = vpop.f32.mrf.mxu1 }
 0xa7c   :  { %5655 = vst.msk [vmem:[#allocation2 + $0x88] sm:$0xff] %vm4719_vm0, %v5650_v53  ;;  %v13545_v28 = vadd.f32 %v5767_v14, %v5691_v56 }
 0xa7d   :  { %6576 = vrot.lane.b32.xlu1 %v13484_v12, %s11930_s7 }
 0xa7e   :  { %7150 = vrot.lane.b32.xlu0 %v13505_v9, %s11939_s17 }
 0xa81   :  { %6574 = vrot.lane.b32.xlu1 %v13536_v38, %s11930_s7 }
 0xa82   :  { %7444 = vrot.lane.b32.xlu0 %v13458_v13, %s11940_s18 }
 0xa83   :  { %v13555_v61 = vpop.permute.xlu1 %6087  ;;  %v13663_v37 = vld [vmem:[#allocation2 + $0x88] sm:$0xff] }
 0xa85   :  { %6867 = vrot.lane.b32.xlu1 %v13484_v12, %s11933_s13 }
 0xa86   :  { %7442 = vrot.lane.b32.xlu0 %v13505_v9, %s11940_s18 }
 0xa87   :  { %v13561_v63 = vpop.permute.xlu1 %6552 }
 0xa88   :  { %16036 = vst [vmem:[#allocation60_spill] sm:$0xff] %v13561_v63 }
 0xa89   :  { %6865 = vrot.lane.b32.xlu1 %v13536_v38, %s11933_s13 }
 0xa8a   :  { %6107 = vrot.lane.b32.xlu0 %v13463_v26, %s11929_s28 }
 0xa8b   :  { %v5836_v23 = vpop.f32.mrf.mxu0  ;;  %v5952_v34 = vpop.f32.mrf.mxu1 }
 0xa8c   :  { %v5837_v22 = vadd.f32 %v5836_v23, %v5695_v32  ;;  %v13570_v35 = vadd.f32 %v5952_v34, %v5874_v41  ;;  %v13572_v30 = vpop.permute.xlu1 %6843 }
 0xa8d   :  { %16037 = vst [vmem:[#allocation43_spill] sm:$0xff] %v13572_v30  ;;  %v11133_v39 = vpop.f32.mrf.mxu0  ;;  %v5954_v7 = vpop.f32.mrf.mxu1  ;;  %7158 = vrot.lane.b32.xlu1 %v13484_v12, %s11939_s17 }
 0xa8e   :  { %5842 = vst.msk [vmem:[#allocation2 + $0xa0] sm:$0xff] %vm4719_vm0, %v5837_v22  ;;  %v13577_v40 = vadd.f32 %v5954_v7, %v5878_v33  ;;  %6572 = vrot.lane.b32.xlu0 %v13463_v26, %s11930_s7 }
 0xa90   :  { %v13581_v6 = vpop.permute.xlu1 %7134 }
 0xa91   :  { %16038 = vst [vmem:[#allocation42_spill] sm:$0xff] %v13581_v6  ;;  %7156 = vrot.lane.b32.xlu1 %v13536_v38, %s11939_s17 }
 0xa92   :  { %6863 = vrot.lane.b32.xlu0 %v13463_v26, %s11933_s13 }
 0xa94   :  { %v13587_v18 = vpop.permute.xlu1 %7426  ;;  %v13593_v21 = vpop.permute.xlu0 %6093 }
 0xa95   :  { %16039 = vst [vmem:[#allocation48_spill] sm:$0xff] %v13587_v18  ;;  %7450 = vrot.lane.b32.xlu1 %v13484_v12, %s11940_s18 }
 0xa96   :  { %7154 = vrot.lane.b32.xlu0 %v13463_v26, %s11939_s17 }
 0xa98   :  { %v13595_v44 = vpop.permute.xlu1 %6089 }
 0xa99   :  { %7448 = vrot.lane.b32.xlu1 %v13536_v38, %s11940_s18 }
 0xa9a   :  { %7446 = vrot.lane.b32.xlu0 %v13463_v26, %s11940_s18 }
 0xa9c   :  { %v6023_v60 = vpop.f32.mrf.mxu0  ;;  %v13602_v62 = vpop.permute.xlu0 %6091 }
 0xa9d   :  { %v6024_v20 = vadd.f32 %v6023_v60, %v5882_v16  ;;  %v13604_v47 = vpop.permute.xlu1 %6554  ;;  %6113 = vrot.lane.b32.xlu1 %v13489_v43, %s11929_s28 }
 0xa9e   :  { %16040 = vst [vmem:[#allocation46_spill] sm:$0xff] %v13604_v47  ;;  %v11152_v50 = vpop.f32.mrf.mxu0  ;;  %6117 = vrot.lane.b32.xlu0 %v13512_v42, %s11929_s28 }
 0xa9f   :  { %6029 = vst.msk [vmem:[#allocation2 + $0xb8] sm:$0xff] %vm4719_vm0, %v6024_v20 }
 0xaa0   :  { %v13611_v36 = vpop.permute.xlu0 %6558 }
 0xaa1   :  { %16041 = vst [vmem:[#allocation45_spill] sm:$0xff] %v13611_v36  ;;  %v13615_v5 = vpop.permute.xlu1 %6845  ;;  %6578 = vrot.lane.b32.xlu1 %v13489_v43, %s11930_s7 }
 0xaa2   :  { %16042 = vst [vmem:[#allocation47_spill] sm:$0xff] %v13615_v5  ;;  %6115 = vrot.lane.b32.xlu0 %v13613_v29, %s11929_s28 }
 0xaa4   :  { %v13621_v49 = vpop.permute.xlu0 %6556 }
 0xaa5   :  { %v13623_v24 = vpop.permute.xlu1 %7136  ;;  %6869 = vrot.lane.b32.xlu1 %v13489_v43, %s11933_s13 }
 0xaa6   :  { %16043 = vst [vmem:[#allocation51_spill] sm:$0xff] %v13623_v24  ;;  %6582 = vrot.lane.b32.xlu0 %v13512_v42, %s11930_s7 }
 0xaa8   :  { %v13629_v57 = vpop.permute.xlu0 %6849 }
 0xaa9   :  { %16044 = vst [vmem:[#allocation44_spill] sm:$0xff] %v13629_v57  ;;  %v13631_v3 = vpop.permute.xlu1 %7428  ;;  %7160 = vrot.lane.b32.xlu1 %v13489_v43, %s11939_s17  ;;  %v13821_v57 = vld [vmem:[#allocation28 + $0x20] sm:$0xff] }
 0xaaa   :  { %16045 = vst [vmem:[#allocation55_spill] sm:$0xff] %v13631_v3  ;;  %6580 = vrot.lane.b32.xlu0 %v13613_v29, %s11930_s7  ;;  %11169 = vmatprep.mubr.msk.f32.mxu0 %vm4110_vm14, %v13821_v57 }
 0xaac   :  { %v13637_v25 = vpop.permute.xlu0 %6847 }
 0xaad   :  { %16046 = vst [vmem:[#allocation49_spill] sm:$0xff] %v13637_v25  ;;  %v13639_v8 = vpop.permute.xlu1 %6099  ;;  %7452 = vrot.lane.b32.xlu1 %v13489_v43, %s11940_s18 }
 0xaae   :  { %6873 = vrot.lane.b32.xlu0 %v13512_v42, %s11933_s13 }
 0xab0   :  { %v13645_v17 = vpop.permute.xlu0 %7140 }
 0xab1   :  { %16047 = vst [vmem:[#allocation62_spill] sm:$0xff] %v13645_v17  ;;  %v13647_v56 = vpop.permute.xlu1 %6097  ;;  %7744 = vrot.lane.b32.xlu1 %v13489_v43, %s11941_s21 }
 0xab2   :  { %6871 = vrot.lane.b32.xlu0 %v13613_v29, %s11933_s13 }
 0xab4   :  { %v13653_v15 = vpop.permute.xlu0 %7138 }
 0xab5   :  { %16048 = vst [vmem:[#allocation58_spill] sm:$0xff] %v13653_v15  ;;  %v13655_v45 = vpop.permute.xlu1 %6564  ;;  %6123 = vrot.lane.b32.xlu1 %v13540_v54, %s11929_s28 }
 0xab6   :  { %16049 = vst [vmem:[#allocation61_spill] sm:$0xff] %v13655_v45  ;;  %7164 = vrot.lane.b32.xlu0 %v13512_v42, %s11939_s17 }
 0xab8   :  { %v13661_v53 = vpop.permute.xlu0 %7432 }
 0xab9   :  { %16050 = vst [vmem:[#allocation53_spill] sm:$0xff] %v13661_v53  ;;  %v13665_v14 = vpop.permute.xlu1 %6562  ;;  %6121 = vrot.lane.b32.xlu1 %v13663_v37, %s11929_s28 }
 0xaba   :  { %7162 = vrot.lane.b32.xlu0 %v13613_v29, %s11939_s17 }
 0xabc   :  { %v13671_v4 = vpop.permute.xlu0 %7430 }
 0xabd   :  { %16051 = vst [vmem:[#allocation56_spill] sm:$0xff] %v13671_v4  ;;  %v13673_v32 = vpop.permute.xlu1 %6855  ;;  %6588 = vrot.lane.b32.xlu1 %v13540_v54, %s11930_s7 }
 0xabe   :  { %16052 = vst [vmem:[#allocation59_spill] sm:$0xff] %v13673_v32  ;;  %7456 = vrot.lane.b32.xlu0 %v13512_v42, %s11940_s18 }
 0xac0   :  { %v13679_v41 = vpop.permute.xlu0 %6095 }
 0xac1   :  { %v13681_v33 = vpop.permute.xlu1 %6853  ;;  %6586 = vrot.lane.b32.xlu1 %v13663_v37, %s11930_s7 }
 0xac2   :  { %16053 = vst [vmem:[#allocation64_spill] sm:$0xff] %v13681_v33  ;;  %7454 = vrot.lane.b32.xlu0 %v13613_v29, %s11940_s18 }
 0xac4   :  { %v13687_v23 = vpop.permute.xlu0 %6560 }
 0xac5   :  { %16054 = vst [vmem:[#allocation65_spill] sm:$0xff] %v13687_v23  ;;  %v13689_v34 = vpop.permute.xlu1 %7146  ;;  %6879 = vrot.lane.b32.xlu1 %v13540_v54, %s11933_s13 }
 0xac6   :  { %16055 = vst [vmem:[#allocation66_spill] sm:$0xff] %v13689_v34  ;;  %7748 = vrot.lane.b32.xlu0 %v13512_v42, %s11941_s21 }
 0xac8   :  { %v13695_v22 = vpop.permute.xlu0 %6851 }
 0xac9   :  { %16056 = vst [vmem:[#allocation67_spill] sm:$0xff] %v13695_v22  ;;  %v13697_v39 = vpop.permute.xlu1 %7144  ;;  %6877 = vrot.lane.b32.xlu1 %v13663_v37, %s11933_s13 }
 0xaca   :  { %16057 = vst [vmem:[#allocation68_spill] sm:$0xff] %v13697_v39  ;;  %6119 = vrot.lane.b32.xlu0 %v13517_v46, %s11929_s28 }
 0xacc   :  { %v13703_v7 = vpop.permute.xlu0 %7142 }
 0xacd   :  { %16058 = vst [vmem:[#allocation69_spill] sm:$0xff] %v13703_v7  ;;  %v13705_v16 = vpop.permute.xlu1 %7438  ;;  %7170 = vrot.lane.b32.xlu1 %v13540_v54, %s11939_s17 }
 0xace   :  { %16059 = vst [vmem:[#allocation70_spill] sm:$0xff] %v13705_v16  ;;  %6584 = vrot.lane.b32.xlu0 %v13517_v46, %s11930_s7 }
 0xad0   :  { %v13711_v60 = vpop.permute.xlu0 %7434 }
 0xad1   :  { %16060 = vst [vmem:[#allocation71_spill] sm:$0xff] %v13711_v60  ;;  %v13713_v20 = vpop.permute.xlu1 %7436  ;;  %7168 = vrot.lane.b32.xlu1 %v13663_v37, %s11939_s17  ;;  %v13753_v60 = vld [vmem:[#allocation2 + $0xa0] sm:$0xff] }
 0xad2   :  { %16061 = vst [vmem:[#allocation72_spill] sm:$0xff] %v13713_v20  ;;  %6875 = vrot.lane.b32.xlu0 %v13517_v46, %s11933_s13 }
 0xad4   :  { %v13719_v50 = vpop.permute.xlu0 %6105 }
 0xad5   :  { %v13721_v0 = vpop.permute.xlu1 %6101  ;;  %7462 = vrot.lane.b32.xlu1 %v13540_v54, %s11940_s18 }
 0xad6   :  { %7166 = vrot.lane.b32.xlu0 %v13517_v46, %s11939_s17 }
 0xad8   :  { %v13727_v1 = vpop.permute.xlu0 %6103 }
 0xad9   :  { %v13729_v27 = vpop.permute.xlu1 %6566  ;;  %7460 = vrot.lane.b32.xlu1 %v13663_v37, %s11940_s18 }
 0xada   :  { %16062 = vst [vmem:[#allocation73_spill] sm:$0xff] %v13729_v27  ;;  %7458 = vrot.lane.b32.xlu0 %v13517_v46, %s11940_s18 }
 0xadc   :  { %v13735_v11 = vpop.permute.xlu0 %6570 }
 0xadd   :  { %16063 = vst [vmem:[#allocation74_spill] sm:$0xff] %v13735_v11  ;;  %v13737_v55 = vpop.permute.xlu1 %6857  ;;  %7754 = vrot.lane.b32.xlu1 %v13540_v54, %s11941_s21 }
 0xade   :  { %16064 = vst [vmem:[#allocation75_spill] sm:$0xff] %v13737_v55  ;;  %7750 = vrot.lane.b32.xlu0 %v13517_v46, %s11941_s21 }
 0xae0   :  { %v13743_v18 = vpop.permute.xlu0 %6568 }
 0xae1   :  { %v13745_v3 = vpop.permute.xlu1 %7148  ;;  %7752 = vrot.lane.b32.xlu1 %v13663_v37, %s11941_s21 }
 0xae2   :  { %16065 = vst [vmem:[#allocation76_spill] sm:$0xff] %v13745_v3  ;;  %6129 = vrot.lane.b32.xlu0 %v13570_v35, %s11929_s28 }
 0xae4   :  { %v13751_v53 = vpop.permute.xlu0 %6861 }
 0xae5   :  { %16066 = vst [vmem:[#allocation77_spill] sm:$0xff] %v13751_v53  ;;  %v13755_v16 = vpop.permute.xlu1 %7440  ;;  %6125 = vrot.lane.b32.xlu1 %v13545_v28, %s11929_s28 }
 0xae6   :  { %16067 = vst [vmem:[#allocation78_spill] sm:$0xff] %v13755_v16  ;;  %6127 = vrot.lane.b32.xlu0 %v13753_v60, %s11929_s28 }
 0xae8   :  { %v13761_v4 = vpop.permute.xlu0 %6859 }
 0xae9   :  { %16068 = vst [vmem:[#allocation79_spill] sm:$0xff] %v13761_v4  ;;  %v13763_v6 = vpop.permute.xlu1 %6111  ;;  %6590 = vrot.lane.b32.xlu1 %v13545_v28, %s11930_s7 }
 0xaea   :  { %6594 = vrot.lane.b32.xlu0 %v13570_v35, %s11930_s7 }
 0xaec   :  { %v13769_v24 = vpop.permute.xlu0 %7152 }
 0xaed   :  { %16069 = vst [vmem:[#allocation80_spill] sm:$0xff] %v13769_v24  ;;  %v13771_v20 = vpop.permute.xlu1 %6109  ;;  %6881 = vrot.lane.b32.xlu1 %v13545_v28, %s11933_s13 }
 0xaee   :  { %6592 = vrot.lane.b32.xlu0 %v13753_v60, %s11930_s7 }
 0xaf0   :  { %v13777_v16 = vpop.permute.xlu0 %7150 }
 0xaf1   :  { %16070 = vst [vmem:[#allocation81_spill] sm:$0xff] %v13777_v16  ;;  %v13779_v17 = vpop.permute.xlu1 %6576  ;;  %7172 = vrot.lane.b32.xlu1 %v13545_v28, %s11939_s17 }
 0xaf2   :  { %16071 = vst [vmem:[#allocation82_spill] sm:$0xff] %v13779_v17  ;;  %6885 = vrot.lane.b32.xlu0 %v13570_v35, %s11933_s13 }
 0xaf4   :  { %v13785_v7 = vpop.permute.xlu0 %7444 }
 0xaf5   :  { %16072 = vst [vmem:[#allocation83_spill] sm:$0xff] %v13785_v7  ;;  %v13787_v34 = vpop.permute.xlu1 %6574  ;;  %7464 = vrot.lane.b32.xlu1 %v13545_v28, %s11940_s18  ;;  %v13803_v7 = vld [vmem:[#allocation2 + $0xb8] sm:$0xff] }
 0xaf6   :  { %6883 = vrot.lane.b32.xlu0 %v13753_v60, %s11933_s13 }
 0xaf8   :  { %v13793_v3 = vpop.permute.xlu0 %7442 }
 0xaf9   :  { %16073 = vst [vmem:[#allocation84_spill] sm:$0xff] %v13793_v3  ;;  %v13795_v24 = vpop.permute.xlu1 %6867  ;;  %7756 = vrot.lane.b32.xlu1 %v13545_v28, %s11941_s21 }
 0xafa   :  { %16074 = vst [vmem:[#allocation85_spill] sm:$0xff] %v13795_v24  ;;  %7176 = vrot.lane.b32.xlu0 %v13570_v35, %s11939_s17 }
 0xafc   :  { %v13801_v15 = vpop.permute.xlu0 %6107 }
 0xafd   :  { %v13805_v30 = vpop.permute.xlu1 %6865  ;;  %6133 = vrot.lane.b32.xlu1 %v13803_v7, %s11929_s28 }
 0xafe   :  { %16075 = vst [vmem:[#allocation86_spill] sm:$0xff] %v13805_v30  ;;  %7174 = vrot.lane.b32.xlu0 %v13753_v60, %s11939_s17 }
 0xb00   :  { %v13811_v3 = vpop.permute.xlu0 %6572 }
 0xb01   :  { %16076 = vst [vmem:[#allocation87_spill] sm:$0xff] %v13811_v3  ;;  %v13813_v5 = vpop.permute.xlu1 %7158  ;;  %7742 = vrot.lane.b32.xlu1 %v13484_v12, %s11941_s21 }
 0xb02   :  { %16077 = vst [vmem:[#allocation88_spill] sm:$0xff] %v13813_v5  ;;  %7468 = vrot.lane.b32.xlu0 %v13570_v35, %s11940_s18 }
 0xb04   :  { %v13819_v39 = vpop.permute.xlu0 %6863 }
 0xb05   :  { %16078 = vst [vmem:[#allocation89_spill] sm:$0xff] %v13819_v39  ;;  %v13823_v22 = vpop.permute.xlu1 %7156  ;;  %7740 = vrot.lane.b32.xlu1 %v13536_v38, %s11941_s21 }
 0xb06   :  { %16079 = vst [vmem:[#allocation90_spill] sm:$0xff] %v13823_v22  ;;  %7466 = vrot.lane.b32.xlu0 %v13753_v60, %s11940_s18 }
 0xb08   :  { %v13831_v5 = vpop.permute.xlu0 %7154 }
 0xb09   :  { %16080 = vst [vmem:[#allocation91_spill] sm:$0xff] %v13831_v5  ;;  %v13833_v32 = vpop.permute.xlu1 %7450  ;;  %7732 = vrot.lane.b32.xlu1 %v13435_v51, %s11941_s21 }
 0xb0a   :  { %16081 = vst [vmem:[#allocation92_spill] sm:$0xff] %v13833_v32  ;;  %7760 = vrot.lane.b32.xlu0 %v13570_v35, %s11941_s21 }
 0xb0c   :  { %v13839_v16 = vpop.permute.xlu0 %7446 }
 0xb0d   :  { %16082 = vst [vmem:[#allocation93_spill] sm:$0xff] %v13839_v16  ;;  %v13841_v55 = vpop.permute.xlu1 %7448  ;;  %7730 = vrot.lane.b32.xlu1 %v13429_v31, %s11941_s21 }
 0xb0e   :  { %16083 = vst [vmem:[#allocation94_spill] sm:$0xff] %v13841_v55  ;;  %7758 = vrot.lane.b32.xlu0 %v13753_v60, %s11941_s21 }
 0xb10   :  { %v13847_v22 = vpop.permute.xlu0 %6117 }
 0xb11   :  { %v13849_v5 = vpop.permute.xlu1 %6113  ;;  %7728 = vrot.lane.b32.xlu1 %v13445_v10, %s11941_s21 }
 0xb12   :  { %6131 = vrot.lane.b32.xlu0 %v13577_v40, %s11929_s28 }
 0xb14   :  { %v13855_v32 = vpop.permute.xlu0 %6115 }
 0xb15   :  { %v13857_v16 = vpop.permute.xlu1 %6578  ;;  %7720 = vrot.lane.b32.xlu1 %v13385_v48, %s11941_s21 }
 0xb16   :  { %16084 = vst [vmem:[#allocation95_spill] sm:$0xff] %v13857_v16  ;;  %7746 = vrot.lane.b32.xlu0 %v13613_v29, %s11941_s21 }
 0xb18   :  { %v13863_v55 = vpop.permute.xlu0 %6582 }
 0xb19   :  { %16085 = vst [vmem:[#allocation96_spill] sm:$0xff] %v13863_v55  ;;  %v13865_v53 = vpop.permute.xlu1 %6869  ;;  %7718 = vrot.lane.b32.xlu1 %v13382_v52, %s11941_s21 }
 0xb1a   :  { %16086 = vst [vmem:[#allocation97_spill] sm:$0xff] %v13865_v53  ;;  %6596 = vrot.lane.b32.xlu0 %v13577_v40, %s11930_s7 }
 0xb1c   :  { %v13871_v39 = vpop.permute.xlu0 %6580 }
 0xb1d   :  { %v13873_v24 = vpop.permute.xlu1 %7160  ;;  %6598 = vrot.lane.b32.xlu1 %v13803_v7, %s11930_s7 }
 0xb1e   :  { %16087 = vst [vmem:[#allocation98_spill] sm:$0xff] %v13873_v24  ;;  %6887 = vrot.lane.b32.xlu0 %v13577_v40, %s11933_s13 }
 0xb20   :  { %v13879_v25 = vpop.permute.xlu0 %6873 }
 0xb21   :  { %16088 = vst [vmem:[#allocation99_spill] sm:$0xff] %v13879_v25  ;;  %v13881_v63 = vpop.permute.xlu1 %7452  ;;  %8048 = vrot.lane.b32.xlu1 %v13545_v28, %s11942_s3 }
 0xb22   :  { %16089 = vst [vmem:[#allocation100_spill] sm:$0xff] %v13881_v63  ;;  %7178 = vrot.lane.b32.xlu0 %v13577_v40, %s11939_s17 }
 0xb24   :  { %v13887_v53 = vpop.permute.xlu0 %6871 }
 0xb25   :  { %16090 = vst [vmem:[#allocation101_spill] sm:$0xff] %v13887_v53  ;;  %v13889_v24 = vpop.permute.xlu1 %7744  ;;  %8046 = vrot.lane.b32.xlu1 %v13540_v54, %s11942_s3 }
 0xb26   :  { %16091 = vst [vmem:[#allocation102_spill] sm:$0xff] %v13889_v24  ;;  %7470 = vrot.lane.b32.xlu0 %v13577_v40, %s11940_s18 }
 0xb28   :  { %v13895_v25 = vpop.permute.xlu0 %7164 }
 0xb29   :  { %16092 = vst [vmem:[#allocation103_spill] sm:$0xff] %v13895_v25  ;;  %v13897_v63 = vpop.permute.xlu1 %6123  ;;  %8044 = vrot.lane.b32.xlu1 %v13663_v37, %s11942_s3 }
 0xb2a   :  { %7762 = vrot.lane.b32.xlu0 %v13577_v40, %s11941_s21 }
 0xb2c   :  { %v13903_v47 = vpop.permute.xlu0 %7162 }
 0xb2d   :  { %16093 = vst [vmem:[#allocation104_spill] sm:$0xff] %v13903_v47  ;;  %v13905_v33 = vpop.permute.xlu1 %6121  ;;  %6889 = vrot.lane.b32.xlu1 %v13803_v7, %s11933_s13 }
 0xb2e   :  { %7738 = vrot.lane.b32.xlu0 %v13463_v26, %s11941_s21 }
 0xb30   :  { %v13911_v24 = vpop.permute.xlu0 %7456 }
 0xb31   :  { %16094 = vst [vmem:[#allocation105_spill] sm:$0xff] %v13911_v24  ;;  %v13913_v25 = vpop.permute.xlu1 %6588  ;;  %8036 = vrot.lane.b32.xlu1 %v13489_v43, %s11942_s3 }
 0xb32   :  { %7736 = vrot.lane.b32.xlu0 %v13458_v13, %s11941_s21 }
 0xb34   :  { %v13919_v36 = vpop.permute.xlu0 %7454 }
 0xb35   :  { %16095 = vst [vmem:[#allocation106_spill] sm:$0xff] %v13919_v36  ;;  %v13921_v47 = vpop.permute.xlu1 %6586  ;;  %8034 = vrot.lane.b32.xlu1 %v13484_v12, %s11942_s3 }
 0xb36   :  { %7734 = vrot.lane.b32.xlu0 %v13505_v9, %s11941_s21 }
 0xb38   :  { %v13927_v23 = vpop.permute.xlu0 %7748 }
 0xb39   :  { %16096 = vst [vmem:[#allocation107_spill] sm:$0xff] %v13927_v23  ;;  %v13929_v24 = vpop.permute.xlu1 %6879  ;;  %8032 = vrot.lane.b32.xlu1 %v13536_v38, %s11942_s3 }
 0xb3a   :  { %16097 = vst [vmem:[#allocation108_spill] sm:$0xff] %v13929_v24  ;;  %7726 = vrot.lane.b32.xlu0 %v13407_v58, %s11941_s21 }
 0xb3c   :  { %v13935_v45 = vpop.permute.xlu0 %6119 }
 0xb3d   :  { %v13937_v36 = vpop.permute.xlu1 %6877  ;;  %7180 = vrot.lane.b32.xlu1 %v13803_v7, %s11939_s17 }
 0xb3e   :  { %16098 = vst [vmem:[#allocation109_spill] sm:$0xff] %v13937_v36  ;;  %7724 = vrot.lane.b32.xlu0 %v13401_v19, %s11941_s21 }
 0xb40   :  { %v13943_v4 = vpop.permute.xlu0 %6584 }
 0xb41   :  { %16099 = vst [vmem:[#allocation110_spill] sm:$0xff] %v13943_v4  ;;  %v13945_v23 = vpop.permute.xlu1 %7170  ;;  %8024 = vrot.lane.b32.xlu1 %v13435_v51, %s11942_s3 }
 0xb42   :  { %16100 = vst [vmem:[#allocation111_spill] sm:$0xff] %v13945_v23  ;;  %7722 = vrot.lane.b32.xlu0 %v13414_v59, %s11941_s21 }
 0xb44   :  { %v13951_v24 = vpop.permute.xlu0 %6875 }
 0xb45   :  { %16101 = vst [vmem:[#allocation112_spill] sm:$0xff] %v13951_v24  ;;  %v13953_v27 = vpop.permute.xlu1 %7168  ;;  %8022 = vrot.lane.b32.xlu1 %v13429_v31, %s11942_s3 }
 0xb46   :  { %16102 = vst [vmem:[#allocation113_spill] sm:$0xff] %v13953_v27  ;;  %8054 = vrot.lane.b32.xlu0 %v13577_v40, %s11942_s3 }
 0xb48   :  { %v13959_v30 = vpop.permute.xlu0 %7166 }
 0xb49   :  { %16103 = vst [vmem:[#allocation114_spill] sm:$0xff] %v13959_v30  ;;  %v13961_v11 = vpop.permute.xlu1 %7462  ;;  %8020 = vrot.lane.b32.xlu1 %v13445_v10, %s11942_s3 }
 0xb4a   :  { %16104 = vst [vmem:[#allocation115_spill] sm:$0xff] %v13961_v11  ;;  %8052 = vrot.lane.b32.xlu0 %v13570_v35, %s11942_s3 }
 0xb4c   :  { %v13967_v23 = vpop.permute.xlu0 %7458 }
 0xb4d   :  { %16105 = vst [vmem:[#allocation116_spill] sm:$0xff] %v13967_v23  ;;  %v13969_v24 = vpop.permute.xlu1 %7460  ;;  %7472 = vrot.lane.b32.xlu1 %v13803_v7, %s11940_s18 }
 0xb4e   :  { %16106 = vst [vmem:[#allocation117_spill] sm:$0xff] %v13969_v24  ;;  %8050 = vrot.lane.b32.xlu0 %v13753_v60, %s11942_s3 }
 0xb50   :  { %v13975_v27 = vpop.permute.xlu0 %7750 }
 0xb51   :  { %16107 = vst [vmem:[#allocation118_spill] sm:$0xff] %v13975_v27  ;;  %v13977_v30 = vpop.permute.xlu1 %7754  ;;  %8012 = vrot.lane.b32.xlu1 %v13385_v48, %s11942_s3 }
 0xb52   :  { %16108 = vst [vmem:[#allocation119_spill] sm:$0xff] %v13977_v30  ;;  %8042 = vrot.lane.b32.xlu0 %v13517_v46, %s11942_s3 }
 0xb54   :  { %v13983_v11 = vpop.permute.xlu0 %6129 }
 0xb55   :  { %v13985_v23 = vpop.permute.xlu1 %7752  ;;  %8010 = vrot.lane.b32.xlu1 %v13382_v52, %s11942_s3 }
 0xb56   :  { %16109 = vst [vmem:[#allocation120_spill] sm:$0xff] %v13985_v23  ;;  %8040 = vrot.lane.b32.xlu0 %v13512_v42, %s11942_s3 }
 0xb58   :  { %v13991_v24 = vpop.permute.xlu0 %6127 }
 0xb59   :  { %v13993_v27 = vpop.permute.xlu1 %6125  ;;  %8340 = vrot.lane.b32.xlu1 %v13545_v28, %s11943_s20 }
 0xb5a   :  { %8038 = vrot.lane.b32.xlu0 %v13613_v29, %s11942_s3 }
 0xb5c   :  { %v13999_v30 = vpop.permute.xlu0 %6594 }
 0xb5d   :  { %v14001_v23 = vpop.permute.xlu1 %6590  ;;  %7764 = vrot.lane.b32.xlu1 %v13803_v7, %s11941_s21 }
 0xb5e   :  { %8030 = vrot.lane.b32.xlu0 %v13463_v26, %s11942_s3 }
 0xb60   :  { %v14007_v3 = vpop.permute.xlu0 %6592 }
 0xb61   :  { %v14009_v17 = vpop.permute.xlu1 %6881  ;;  %8338 = vrot.lane.b32.xlu1 %v13540_v54, %s11943_s20 }
 0xb62   :  { %16110 = vst [vmem:[#allocation121_spill] sm:$0xff] %v14009_v17  ;;  %8028 = vrot.lane.b32.xlu0 %v13458_v13, %s11942_s3 }
 0xb64   :  { %v14015_v53 = vpop.permute.xlu0 %6885 }
 0xb65   :  { %16111 = vst [vmem:[#allocation122_spill] sm:$0xff] %v14015_v53  ;;  %v14017_v16 = vpop.permute.xlu1 %7172  ;;  %8336 = vrot.lane.b32.xlu1 %v13663_v37, %s11943_s20 }
 0xb66   :  { %16112 = vst [vmem:[#allocation123_spill] sm:$0xff] %v14017_v16  ;;  %8026 = vrot.lane.b32.xlu0 %v13505_v9, %s11942_s3 }
 0xb68   :  { %v14023_v36 = vpop.permute.xlu0 %6883 }
 0xb69   :  { %v14025_v55 = vpop.permute.xlu1 %7464  ;;  %8328 = vrot.lane.b32.xlu1 %v13489_v43, %s11943_s20 }
 0xb6a   :  { %16113 = vst [vmem:[#allocation124_spill] sm:$0xff] %v14025_v55  ;;  %8018 = vrot.lane.b32.xlu0 %v13407_v58, %s11942_s3 }
 0xb6c   :  { %v14031_v17 = vpop.permute.xlu0 %7176 }
 0xb6d   :  { %16114 = vst [vmem:[#allocation125_spill] sm:$0xff] %v14031_v17  ;;  %v14033_v53 = vpop.permute.xlu1 %7756  ;;  %8056 = vrot.lane.b32.xlu1 %v13803_v7, %s11942_s3 }
 0xb6e   :  { %16115 = vst [vmem:[#allocation126_spill] sm:$0xff] %v14033_v53  ;;  %8016 = vrot.lane.b32.xlu0 %v13401_v19, %s11942_s3 }
 0xb70   :  { %v14039_v16 = vpop.permute.xlu0 %7174 }
 0xb71   :  { %16116 = vst [vmem:[#allocation127_spill] sm:$0xff] %v14039_v16  ;;  %v6134_v4 = vpop.permute.xlu1 %6133  ;;  %8326 = vrot.lane.b32.xlu1 %v13484_v12, %s11943_s20 }
 0xb72   :  { %8014 = vrot.lane.b32.xlu0 %v13414_v59, %s11942_s3  ;;  %11153 = vmatprep.subr.mxu0 %v6134_v4 }
 0xb73   :  { %11154 = vmatpush3.msra.mxu0 %v6134_v4 }
 0xb74   :  { %v14045_v55 = vpop.permute.xlu0 %7468  ;;  %11155 = vmatprep.subr.mxu0 %v13991_v24 }
 0xb75   :  { %16117 = vst [vmem:[#allocation128_spill] sm:$0xff] %v14045_v55  ;;  %11156 = vmatpush3.msra.mxu0 %v13991_v24  ;;  %v14049_v53 = vpop.permute.xlu1 %7742  ;;  %8324 = vrot.lane.b32.xlu1 %v13536_v38, %s11943_s20 }
 0xb76   :  { %16118 = vst [vmem:[#allocation129_spill] sm:$0xff] %v14049_v53  ;;  %8346 = vrot.lane.b32.xlu0 %v13577_v40, %s11943_s20  ;;  %11157 = vmatprep.subr.mxu0 %v13905_v33 }
 0xb77   :  { %11158 = vmatpush3.msra.mxu0 %v13905_v33 }
 0xb78   :  { %v14057_v19 = vpop.permute.xlu0 %7466  ;;  %11159 = vmatprep.subr.mxu0 %v13855_v32 }
 0xb79   :  { %16119 = vst [vmem:[#allocation130_spill] sm:$0xff] %v14057_v19  ;;  %11160 = vmatpush3.msra.mxu0 %v13855_v32  ;;  %v14061_v55 = vpop.permute.xlu1 %7740  ;;  %8316 = vrot.lane.b32.xlu1 %v13435_v51, %s11943_s20 }
 0xb7a   :  { %16120 = vst [vmem:[#allocation131_spill] sm:$0xff] %v14061_v55  ;;  %8344 = vrot.lane.b32.xlu0 %v13570_v35, %s11943_s20  ;;  %11161 = vmatprep.subr.mxu0 %v13771_v20 }
 0xb7b   :  { %11162 = vmatpush3.msra.mxu0 %v13771_v20 }
 0xb7c   :  { %v14069_v53 = vpop.permute.xlu0 %7760  ;;  %11163 = vmatprep.subr.mxu0 %v13727_v1 }
 0xb7d   :  { %16121 = vst [vmem:[#allocation132_spill] sm:$0xff] %v14069_v53  ;;  %11164 = vmatpush3.msra.mxu0 %v13727_v1  ;;  %v14073_v19 = vpop.permute.xlu1 %7732  ;;  %8348 = vrot.lane.b32.xlu1 %v13803_v7, %s11943_s20  ;;  %v14084_v53 = vld [vmem:[#allocation28 + $0x28] sm:$0xff] }
 0xb7e   :  { %16122 = vst [vmem:[#allocation133_spill] sm:$0xff] %v14073_v19  ;;  %8342 = vrot.lane.b32.xlu0 %v13753_v60, %s11943_s20  ;;  %11165 = vmatprep.subr.mxu0 %v13647_v56  ;;  %v14091_v19 = vld [vmem:[#allocation28 + $0x30] sm:$0xff] }
 0xb7f   :  { %11166 = vmatpush3.msra.mxu0 %v13647_v56 }
 0xb80   :  { %v14081_v55 = vpop.permute.xlu0 %7758  ;;  %11167 = vmatprep.subr.mxu0 %v13602_v62 }
 0xb81   :  { %16123 = vst [vmem:[#allocation134_spill] sm:$0xff] %v14081_v55  ;;  %11168 = vmatpush3.msra.mxu0 %v13602_v62  ;;  %v14087_v17 = vpop.permute.xlu1 %7730  ;;  %8314 = vrot.lane.b32.xlu1 %v13429_v31, %s11943_s20 }
 0xb82   :  { %16124 = vst [vmem:[#allocation135_spill] sm:$0xff] %v14087_v17  ;;  %8334 = vrot.lane.b32.xlu0 %v13517_v46, %s11943_s20  ;;  %11175 = vmatprep.subr.mxu0 %v13803_v7 }
 0xb83   :  { %11170 = vmatmul.mubr.msk.f32.vlgmr.msra.gmra.mxu0 %vm4110_vm14, %v14084_v53 }
 0xb84   :  { %v6132_v55 = vpop.permute.xlu0 %6131  ;;  %11176 = vmatpush3.msra.mxu0 %v13803_v7  ;;  %11172 = vmatprep.mubr.msk.f32.mxu0 %vm4110_vm14, %v14091_v19  ;;  %v6148_v7 = vsel %vm352_vm1, %v13993_v27, %v13991_v24  ;;  %v6145_v24 = vsel %vm352_vm1, %v13847_v22, %v13935_v45 }
 0xb85   :  { %v6150_v17 = vsel %vm352_vm1, %v6132_v55, %v6134_v4  ;;  %v6149_v31 = vsel %vm352_vm1, %v13983_v11, %v6132_v55  ;;  %11177 = vmatprep.subr.mxu0 %v13753_v60  ;;  %v14105_v16 = vpop.permute.xlu1 %7728  ;;  %8312 = vrot.lane.b32.xlu1 %v13445_v10, %s11943_s20  ;;  %v6147_v11 = vsel %vm352_vm1, %v13897_v63, %v13993_v27 }
 0xb86   :  { %8332 = vrot.lane.b32.xlu0 %v13512_v42, %s11943_s20  ;;  %6203 = vmatprep.subr.mxu1 %v6150_v17  ;;  %v6146_v55 = vsel %vm352_vm1, %v13935_v45, %v13905_v33  ;;  %v6144_v27 = vsel %vm352_vm1, %v13849_v5, %v13855_v32  ;;  %v6142_v45 = vsel %vm352_vm1, %v13801_v15, %v13771_v20  ;;  %v14279_v20 = vld [vmem:[#allocation28 + $0x48] sm:$0xff] }
 0xb87   :  { %6204 = vmatpush1.msra.mxu1 %v6149_v31  ;;  %11178 = vmatpush3.msra.mxu0 %v13753_v60  ;;  %v6141_v32 = vsel %vm352_vm1, %v13719_v50, %v13801_v15  ;;  %v11502_v60 = vld [vmem:[#allocation2] sm:$0xff] }
 0xb88   :  { %v14115_v4 = vpop.permute.xlu0 %7746  ;;  %6205 = vmatprep.subr.mxu1 %v6148_v7  ;;  %11179 = vmatprep.subr.mxu0 %v13663_v37 }
 0xb89   :  { %6206 = vmatpush1.msra.mxu1 %v6147_v11  ;;  %11180 = vmatpush3.msra.mxu0 %v13663_v37  ;;  %v14125_v17 = vpop.permute.xlu1 %7720  ;;  %v6143_v37 = vsel %vm352_vm1, %v13763_v6, %v13849_v5  ;;  %v6140_v6 = vsel %vm352_vm1, %v13721_v0, %v13727_v1  ;;  %v6139_v5 = vsel %vm352_vm1, %v13639_v8, %v13721_v0 }
 0xb8a   :  { %8330 = vrot.lane.b32.xlu0 %v13613_v29, %s11943_s20  ;;  %6207 = vmatprep.subr.mxu1 %v6146_v55  ;;  %v6138_v1 = vsel %vm352_vm1, %v13679_v41, %v13647_v56  ;;  %v6137_v0 = vsel %vm352_vm1, %v13593_v21, %v13679_v41  ;;  %v6136_v8 = vsel %vm352_vm1, %v13595_v44, %v13602_v62  ;;  %v8591_v21 = vld [vmem:[#allocation29 + $0x10] sm:$0xff]  ;;  %v14202_v62 = vld [vmem:[#allocation28 + $0x8] sm:$0xff]  ;;  %v8592_v41 = vld [vmem:[#allocation29 + $0x18] sm:$0xff] }
 0xb8b   :  { %6208 = vmatpush1.msra.mxu1 %v6145_v24  ;;  %11181 = vmatprep.subr.mxu0 %v13613_v29  ;;  %v6135_v56 = vsel %vm352_vm1, %v13555_v61, %v13595_v44  ;;  %v6613_v11 = vsel %vm568_vm2, %v14001_v23, %v14007_v3  ;;  %v14302_v55 = vld [vmem:[#allocation28 + $0x50] sm:$0xff] }
 0xb8c   :  { %v14136_v63 = vpop.permute.xlu0 %6596  ;;  %6209 = vmatprep.subr.mxu1 %v6144_v27  ;;  %11182 = vmatpush3.msra.mxu0 %v13613_v29  ;;  %v8590_v27 = vld [vmem:[#allocation29 + $0x8] sm:$0xff] }
 0xb8d   :  { %6210 = vmatpush1.msra.mxu1 %v6143_v37  ;;  %11183 = vmatprep.subr.mxu0 %v13536_v38  ;;  %v14146_v33 = vpop.permute.xlu1 %7718  ;;  %v6614_v31 = vsel %vm568_vm2, %v13999_v30, %v14136_v63  ;;  %v6612_v30 = vsel %vm568_vm2, %v13913_v25, %v14001_v23  ;;  %v16126_v23 = vld [vmem:[#allocation96_spill] sm:$0xff] }
 0xb8e   :  { %8322 = vrot.lane.b32.xlu0 %v13463_v26, %s11943_s20  ;;  %6211 = vmatprep.subr.mxu1 %v6142_v45 }
 0xb8f   :  { %8304 = vrot.lane.b32.xlu1 %v13385_v48, %s11943_s20  ;;  %6212 = vmatpush1.msra.mxu1 %v6141_v32  ;;  %v14173_v48 = vld [vmem:[#allocation28 + $0x38] sm:$0xff] }
 0xb90   :  { %11184 = vmatpush3.msra.mxu0 %v13536_v38  ;;  %v14159_v29 = vpop.permute.xlu0 %6887  ;;  %6213 = vmatprep.subr.mxu1 %v6140_v6  ;;  %v16127_v6 = vld [vmem:[#allocation109_spill] sm:$0xff] }
 0xb91   :  { %11185 = vmatprep.subr.mxu0 %v13505_v9  ;;  %6214 = vmatpush1.msra.mxu1 %v6139_v5  ;;  %v14165_v15 = vpop.permute.xlu1 %6598  ;;  %v16128_v5 = vld [vmem:[#allocation95_spill] sm:$0xff] }
 0xb92   :  { %11186 = vmatpush3.msra.mxu0 %v13505_v9  ;;  %8320 = vrot.lane.b32.xlu0 %v13458_v13, %s11943_s20 }
 0xb93   :  { %6215 = vmatprep.subr.mxu1 %v6138_v1  ;;  %11187 = vmatprep.subr.mxu0 %v13445_v10  ;;  %v16130_v1 = vld [vmem:[#allocation82_spill] sm:$0xff] }
 0xb94   :  { %8302 = vrot.lane.b32.xlu1 %v13382_v52, %s11943_s20  ;;  %6216 = vmatpush1.msra.mxu1 %v6137_v0  ;;  %v14181_v38 = vpop.permute.xlu0 %7178  ;;  %v14194_v52 = vld [vmem:[#allocation28] sm:$0xff] }
 0xb95   :  { %11173 = vmatmul.mubr.msk.f32.gmra.mxu0 %vm4110_vm14, %v14173_v48  ;;  %6217 = vmatprep.subr.mxu1 %v6136_v8  ;;  %v14191_v22 = vpop.permute.xlu1 %8048  ;;  %v16131_v8 = vld [vmem:[#allocation87_spill] sm:$0xff] }
 0xb96   :  { %11188 = vmatpush3.msra.mxu0 %v13445_v10  ;;  %6218 = vmatpush1.msra.mxu1 %v6135_v56  ;;  %v16132_v56 = vld [vmem:[#allocation74_spill] sm:$0xff] }
 0xb97   :  { %11189 = vmatprep.subr.mxu0 %v13414_v59  ;;  %8318 = vrot.lane.b32.xlu0 %v13505_v9, %s11943_s20  ;;  %v8589_v9 = vld [vmem:[#allocation29] sm:$0xff] }
 0xb98   :  { %11190 = vmatpush3.msra.mxu0 %v13414_v59  ;;  %10570 = vmatmul.mubr.msk.f32.vlgmr.msra.gmra.mxu1 %vm4110_vm14, %v13821_v57  ;;  %v14204_v61 = vpop.permute.xlu0 %7470  ;;  %v11501_v57 = vld [vmem:[#allocation2 + $0x8] sm:$0xff] }
 0xb99   :  { %6389 = vmatprep.subr.mxu1 %v13577_v40  ;;  %11191 = vmatprep.mubr.msk.f32.mxu0 %vm4110_vm14, %v14194_v52  ;;  %v14213_v59 = vpop.permute.xlu1 %8046 }
 0xb9a   :  { %11197 = vmatprep.subr.mxu0 %v14165_v15  ;;  %8605 = vperm.xlu1 %11494, %v8591_v21   ;;  %v16133_v21 = vld [vmem:[#allocation86_spill] sm:$0xff] }
 0xb9b   :  { %6390 = vmatpush1.msra.mxu1 %v13570_v35  ;;  %11192 = vmatmul.mubr.msk.f32.vlgmr.msra.gmra.mxu0 %vm4110_vm14, %v14202_v62 }
 0xb9c   :  { %11198 = vmatpush3.msra.mxu0 %v14165_v15  ;;  %6391 = vmatprep.subr.mxu1 %v13545_v28  ;;  %v14217_v10 = vpop.permute.xlu0 %7762 }
 0xb9d   :  { %11199 = vmatprep.subr.mxu0 %v14007_v3  ;;  %6257 = vmatprep.mubr.f32.mxu1 %v16013_v2  ;;  %v14232_v35 = vpop.permute.xlu1 %8044 }
 0xb9e   :  { %6392 = vmatpush1.msra.mxu1 %v13540_v54  ;;  %11200 = vmatpush3.msra.mxu0 %v14007_v3  ;;  %v11498_v54 = vld [vmem:[#allocation2 + $0x30] sm:$0xff]  ;;  %v16125_v3 = vld [vmem:[#allocation110_spill] sm:$0xff] }
 0xb9f   :  { %8310 = vrot.lane.b32.xlu0 %v13407_v58, %s11943_s20  ;;  %10571 = vmatmul.mubr.msk.f32.gmra.mxu1 %vm4110_vm14, %v14084_v53  ;;  %v14274_v53 = vld [vmem:[#allocation28 + $0x40] sm:$0xff]  ;;  %v6611_v37 = vsel %vm568_vm2, %v16125_v3, %v13921_v47  ;;  %v6610_v45 = vsel %vm568_vm2, %v16126_v23, %v16125_v3 }
 0xba0   :  { %6393 = vmatprep.subr.mxu1 %v13517_v46  ;;  %11201 = vmatprep.subr.mxu0 %v13921_v47  ;;  %v14229_v28 = vpop.permute.xlu0 %7738  ;;  %v11497_v46 = vld [vmem:[#allocation2 + $0x18] sm:$0xff] }
 0xba1   :  { %8595 = vperm.xlu1 %11494, %v8589_v9   ;;  %6394 = vmatpush1.msra.mxu1 %v13512_v42  ;;  %v16142_v3 = vld [vmem:[#allocation49_spill] sm:$0xff] }
 0xba2   :  { %11202 = vmatpush3.msra.mxu0 %v13921_v47  ;;  %6395 = vmatprep.subr.mxu1 %v13489_v43  ;;  %v14249_v43 = vld [vmem:[#allocation28 + $0x10] sm:$0xff]  ;;  %v16129_v47 = vld [vmem:[#allocation101_spill] sm:$0xff] }
 0xba3   :  { %11203 = vmatprep.subr.mxu0 %v13871_v39  ;;  %6263 = vmatprep.mubr.f32.mxu1 %v16013_v2 }
 0xba4   :  { %6396 = vmatpush1.msra.mxu1 %v13484_v12  ;;  %11204 = vmatpush3.msra.mxu0 %v13871_v39  ;;  %v14240_v58 = vpop.permute.xlu0 %7736  ;;  %v14251_v12 = vpop.permute.xlu1 %6889 }
 0xba5   :  { %8308 = vrot.lane.b32.xlu0 %v11497_v46, %s11943_s20  ;;  %10572 = vmatmul.mubr.msk.f32.gmra.mxu1 %vm4110_vm14, %v14091_v19  ;;  %v6615_v19 = vsel %vm568_vm2, %v14136_v63, %v14165_v15  ;;  %v14311_v63 = vld [vmem:[#allocation28 + $0x58] sm:$0xff]  ;;  %v6609_v15 = vsel %vm568_vm2, %v16128_v5, %v13871_v39  ;;  %v6607_v39 = vsel %vm568_vm2, %v16131_v8, %v13787_v34 }
 0xba6   :  { %6397 = vmatprep.subr.mxu1 %v13463_v26  ;;  %11205 = vmatprep.subr.mxu0 %v13787_v34  ;;  %v14258_v26 = vld [vmem:[#allocation28 + $0x18] sm:$0xff] }
 0xba7   :  { %6398 = vmatpush1.msra.mxu1 %v13458_v13  ;;  %11206 = vmatpush3.msra.mxu0 %v13787_v34  ;;  %v11499_v13 = vld [vmem:[#allocation2 + $0x10] sm:$0xff] }
 0xba8   :  { %6399 = vmatprep.subr.mxu1 %v13435_v51  ;;  %11207 = vmatprep.subr.mxu0 %v13743_v18  ;;  %v14255_v42 = vpop.permute.xlu0 %7734  ;;  %v11500_v51 = vld [vmem:[#allocation2 + $0x20] sm:$0xff]  ;;  %v14271_v44 = vpop.permute.xlu1 %8036 }
 0xba9   :  { %6269 = vmatprep.mubr.f32.mxu1 %v16013_v2  ;;  %6400 = vmatpush1.msra.mxu1 %v11498_v54  ;;  %v16136_v54 = vld [vmem:[#allocation61_spill] sm:$0xff] }
 0xbaa   :  { %11194 = vmatprep.mubr.msk.f32.mxu0 %vm4110_vm14, %v14249_v43  ;;  %11208 = vmatpush3.msra.mxu0 %v13743_v18 }
 0xbab   :  { %8306 = vrot.lane.b32.xlu0 %v11499_v13, %s11943_s20  ;;  %10573 = vmatmul.mubr.msk.f32.gmra.mxu1 %vm4110_vm14, %v14173_v48  ;;  %v6608_v48 = vsel %vm568_vm2, %v16130_v1, %v16128_v5  ;;  %v14411_v1 = vld [vmem:[#allocation28 + $0x70] sm:$0xff] }
 0xbac   :  { %6401 = vmatprep.subr.mxu1 %v11500_v51  ;;  %11195 = vmatmul.mubr.msk.f32.gmra.mxu0 %vm4110_vm14, %v14258_v26  ;;  %v14268_v40 = vpop.permute.xlu0 %7726  ;;  %v14296_v7 = vpop.permute.xlu1 %8034 }
 0xbad   :  { %11209 = vmatprep.subr.mxu0 %v13665_v14  ;;  %6402 = vmatpush1.msra.mxu1 %v11497_v46 }
 0xbae   :  { %11210 = vmatpush3.msra.mxu0 %v13665_v14  ;;  %6403 = vmatprep.subr.mxu1 %v11501_v57  ;;  %v16138_v57 = vld [vmem:[#allocation45_spill] sm:$0xff] }
 0xbaf   :  { %11211 = vmatprep.subr.mxu0 %v13621_v49  ;;  %6404 = vmatpush1.msra.mxu1 %v11502_v60  ;;  %v16139_v60 = vld [vmem:[#allocation64_spill] sm:$0xff] }
 0xbb0   :  { %6437 = vmatprep.mubr.f32.mxu1 %v16013_v2  ;;  %11212 = vmatpush3.msra.mxu0 %v13621_v49  ;;  %v14281_v50 = vpop.permute.xlu0 %7724  ;;  %v14328_v32 = vpop.permute.xlu1 %8032 }
 0xbb1   :  { %11213 = vmatprep.mubr.msk.f32.mxu0 %vm4110_vm14, %v14274_v53  ;;  %8610 = vperm.xlu0 %11493, %v8592_v41  }
 0xbb2   :  { %10578 = vmatmul.mubr.msk.f32.vlgmr.msra.gmra.mxu1 %vm4110_vm14, %v14194_v52  ;;  %6668 = vmatprep.subr.mxu1 %v6615_v19  ;;  %v6606_v52 = vsel %vm568_vm2, %v16132_v56, %v16131_v8  ;;  %v16140_v19 = vld [vmem:[#allocation46_spill] sm:$0xff] }
 0xbb3   :  { %11214 = vmatmul.mubr.msk.f32.vlgmr.msra.gmra.mxu0 %vm4110_vm14, %v14279_v20  ;;  %11219 = vmatprep.subr.mxu0 %v14251_v12 }
 0xbb4   :  { %6669 = vmatpush1.msra.mxu1 %v6614_v31  ;;  %11220 = vmatpush3.msra.mxu0 %v14251_v12  ;;  %v14304_v24 = vpop.permute.xlu0 %7722  ;;  %v14355_v46 = vpop.permute.xlu1 %7180  ;;  %v6601_v31 = vsel %vm568_vm2, %v16140_v19, %v13621_v49  ;;  %v6906_v49 = vsel %vm934_vm4, %v14159_v29, %v14251_v12 }
 0xbb5   :  { %6670 = vmatprep.subr.mxu1 %v6613_v11  ;;  %11221 = vmatprep.subr.mxu0 %v14023_v36 }
 0xbb6   :  { %6443 = vmatprep.mubr.f32.mxu1 %v16013_v2  ;;  %6671 = vmatpush1.msra.mxu1 %v6612_v30  ;;  %v14384_v30 = vld [vmem:[#allocation28 + $0x60] sm:$0xff] }
 0xbb7   :  { %11216 = vmatprep.mubr.msk.f32.mxu0 %vm4110_vm14, %v14302_v55  ;;  %11222 = vmatpush3.msra.mxu0 %v14023_v36 }
 0xbb8   :  { %8600 = vperm.xlu0 %11493, %v8590_v27   ;;  %10579 = vmatmul.mubr.msk.f32.gmra.mxu1 %vm4110_vm14, %v14202_v62  ;;  %v14321_v25 = vpop.permute.xlu0 %8054  ;;  %v16134_v62 = vld [vmem:[#allocation73_spill] sm:$0xff]  ;;  %v14386_v27 = vpop.permute.xlu1 %8024 }
 0xbb9   :  { %6672 = vmatprep.subr.mxu1 %v6611_v37  ;;  %11217 = vmatmul.mubr.msk.f32.gmra.mxu0 %vm4110_vm14, %v14311_v63  ;;  %v6605_v9 = vsel %vm568_vm2, %v16134_v62, %v13743_v18  ;;  %v6604_v13 = vsel %vm568_vm2, %v16136_v54, %v16134_v62  ;;  %v16137_v18 = vld [vmem:[#allocation65_spill] sm:$0xff]  ;;  %v14389_v37 = vld [vmem:[#allocation28 + $0x68] sm:$0xff] }
 0xbba   :  { %11223 = vmatprep.subr.mxu0 %v16127_v6  ;;  %6673 = vmatpush1.msra.mxu1 %v6610_v45  ;;  %v6603_v51 = vsel %vm568_vm2, %v16137_v18, %v13665_v14  ;;  %v6602_v41 = vsel %vm568_vm2, %v16138_v57, %v16137_v18  ;;  %v16141_v14 = vld [vmem:[#allocation60_spill] sm:$0xff]  ;;  %v16143_v45 = vld [vmem:[#allocation122_spill] sm:$0xff]  ;;  %v16148_v62 = vld [vmem:[#allocation99_spill] sm:$0xff] }
 0xbbb   :  { %11224 = vmatpush3.msra.mxu0 %v16127_v6  ;;  %6674 = vmatprep.subr.mxu1 %v6609_v15  ;;  %v6905_v5 = vsel %vm934_vm4, %v16143_v45, %v14159_v29  ;;  %v16144_v15 = vld [vmem:[#allocation121_spill] sm:$0xff]  ;;  %v16146_v29 = vld [vmem:[#allocation108_spill] sm:$0xff] }
 0xbbc   :  { %11225 = vmatprep.subr.mxu0 %v16129_v47  ;;  %6449 = vmatprep.mubr.f32.mxu1 %v16013_v2  ;;  %v14340_v0 = vpop.permute.xlu0 %8052  ;;  %v14414_v12 = vpop.permute.xlu1 %8022  ;;  %v6903_v8 = vsel %vm934_vm4, %v16146_v29, %v16144_v15  ;;  %v16149_v54 = vld [vmem:[#allocation113_spill] sm:$0xff] }
 0xbbd   :  { %6675 = vmatpush1.msra.mxu1 %v6608_v48  ;;  %11226 = vmatpush3.msra.mxu0 %v16129_v47  ;;  %v16145_v48 = vld [vmem:[#allocation127_spill] sm:$0xff]  ;;  %v16152_v57 = vld [vmem:[#allocation85_spill] sm:$0xff] }
 0xbbe   :  { %10580 = vmatmul.mubr.msk.f32.gmra.mxu1 %vm4110_vm14, %v14249_v43  ;;  %6676 = vmatprep.subr.mxu1 %v6607_v39  ;;  %v16135_v43 = vld [vmem:[#allocation79_spill] sm:$0xff]  ;;  %v14421_v39 = vld [vmem:[#allocation28 + $0x78] sm:$0xff] }
 0xbbf   :  { %11227 = vmatprep.subr.mxu0 %v16133_v21  ;;  %6677 = vmatpush1.msra.mxu1 %v6606_v52 }
 0xbc0   :  { %11228 = vmatpush3.msra.mxu0 %v16133_v21  ;;  %6678 = vmatprep.subr.mxu1 %v6605_v9  ;;  %v14358_v34 = vpop.permute.xlu0 %8050 }
 0xbc1   :  { %11229 = vmatprep.subr.mxu0 %v16135_v43  ;;  %6455 = vmatprep.mubr.f32.mxu1 %v16013_v2 }
 0xbc2   :  { %6679 = vmatpush1.msra.mxu1 %v6604_v13  ;;  %11230 = vmatpush3.msra.mxu0 %v16135_v43  ;;  %v16150_v13 = vld [vmem:[#allocation97_spill] sm:$0xff] }
 0xbc3   :  { %10581 = vmatmul.mubr.msk.f32.gmra.mxu1 %vm4110_vm14, %v14258_v26  ;;  %6680 = vmatprep.subr.mxu1 %v6603_v51  ;;  %v6600_v26 = vsel %vm568_vm2, %v16141_v14, %v16140_v19  ;;  %v6900_v18 = vsel %vm934_vm4, %v16150_v13, %v16129_v47  ;;  %v16151_v51 = vld [vmem:[#allocation104_spill] sm:$0xff]  ;;  %v16153_v47 = vld [vmem:[#allocation89_spill] sm:$0xff] }
 0xbc4   :  { %11231 = vmatprep.subr.mxu0 %v16139_v60  ;;  %6681 = vmatpush1.msra.mxu1 %v6602_v41  ;;  %v14378_v11 = vpop.permute.xlu0 %8042  ;;  %v6899_v41 = vsel %vm934_vm4, %v16152_v57, %v16150_v13  ;;  %v6898_v19 = vsel %vm934_vm4, %v16153_v47, %v16133_v21  ;;  %v14495_v57 = vld [vmem:[#allocation28 + $0x88] sm:$0xff] }
 0xbc5   :  { %11232 = vmatpush3.msra.mxu0 %v16139_v60  ;;  %6682 = vmatprep.subr.mxu1 %v6601_v31  ;;  %v16154_v31 = vld [vmem:[#allocation77_spill] sm:$0xff] }
 0xbc6   :  { %11233 = vmatprep.subr.mxu0 %v16142_v3  ;;  %6683 = vmatpush1.msra.mxu1 %v6600_v26  ;;  %v6897_v14 = vsel %vm934_vm4, %v16154_v31, %v16153_v47  ;;  %v16155_v26 = vld [vmem:[#allocation90_spill] sm:$0xff]  ;;  %v7198_v47 = vsel %vm7182_vm3, %v14181_v38, %v14355_v46 }
 0xbc7   :  { %6716 = vmatprep.mubr.f32.mxu1 %v16013_v2  ;;  %11234 = vmatpush3.msra.mxu0 %v16142_v3 }
 0xbc8   :  { %11235 = vmatprep.mubr.msk.f32.mxu0 %vm4110_vm14, %v14384_v30  ;;  %10586 = vmatmul.mubr.msk.f32.vlgmr.msra.gmra.mxu1 %vm4110_vm14, %v14274_v53  ;;  %v14400_v23 = vpop.permute.xlu0 %8040  ;;  %v6904_v53 = vsel %vm934_vm4, %v16144_v15, %v14023_v36  ;;  %v16147_v36 = vld [vmem:[#allocation112_spill] sm:$0xff] }
 0xbc9   :  { %6959 = vmatprep.subr.mxu1 %v6906_v49  ;;  %11236 = vmatmul.mubr.msk.f32.vlgmr.msra.gmra.mxu0 %vm4110_vm14, %v14389_v37  ;;  %v6902_v52 = vsel %vm934_vm4, %v16147_v36, %v16127_v6  ;;  %v6901_v9 = vsel %vm934_vm4, %v16148_v62, %v16147_v36  ;;  %v16156_v49 = vld [vmem:[#allocation75_spill] sm:$0xff] }
 0xbca   :  { %11241 = vmatprep.subr.mxu0 %v14355_v46  ;;  %6960 = vmatpush1.msra.mxu1 %v6905_v5  ;;  %v6896_v45 = vsel %vm934_vm4, %v16156_v49, %v16135_v43  ;;  %v16157_v5 = vld [vmem:[#allocation81_spill] sm:$0xff]  ;;  %v16159_v43 = vld [vmem:[#allocation67_spill] sm:$0xff] }
 0xbcb   :  { %11242 = vmatpush3.msra.mxu0 %v14355_v46  ;;  %6961 = vmatprep.subr.mxu1 %v6904_v53  ;;  %v6894_v29 = vsel %vm934_vm4, %v16159_v43, %v16139_v60  ;;  %v16162_v62 = vld [vmem:[#allocation47_spill] sm:$0xff]  ;;  %v16167_v46 = vld [vmem:[#allocation130_spill] sm:$0xff] }
 0xbcc   :  { %11243 = vmatprep.subr.mxu0 %v16145_v48  ;;  %6722 = vmatprep.mubr.f32.mxu1 %v16013_v2  ;;  %v14423_v56 = vpop.permute.xlu0 %8038  ;;  %v16163_v60 = vld [vmem:[#allocation43_spill] sm:$0xff] }
 0xbcd   :  { %6962 = vmatpush1.msra.mxu1 %v6903_v8  ;;  %11238 = vmatprep.mubr.msk.f32.mxu0 %vm4110_vm14, %v14411_v1  ;;  %v16160_v8 = vld [vmem:[#allocation44_spill] sm:$0xff]  ;;  %v6891_v13 = vsel %vm934_vm4, %v16163_v60, %v16162_v62 }
 0xbce   :  { %11244 = vmatpush3.msra.mxu0 %v16145_v48  ;;  %10587 = vmatmul.mubr.msk.f32.gmra.mxu1 %vm4110_vm14, %v14279_v20  ;;  %v14443_v20 = vpop.permute.xlu1 %8020  ;;  %v6893_v36 = vsel %vm934_vm4, %v16160_v8, %v16159_v43  ;;  %v16169_v43 = vld [vmem:[#allocation114_spill] sm:$0xff]  ;;  %v16170_v8 = vld [vmem:[#allocation103_spill] sm:$0xff] }
 0xbcf   :  { %6963 = vmatprep.subr.mxu1 %v6902_v52  ;;  %11239 = vmatmul.mubr.msk.f32.gmra.mxu0 %vm4110_vm14, %v14421_v39  ;;  %v16161_v52 = vld [vmem:[#allocation68_spill] sm:$0xff] }
 0xbd0   :  { %11245 = vmatprep.subr.mxu0 %v16149_v54  ;;  %6964 = vmatpush1.msra.mxu1 %v6901_v9  ;;  %v14445_v6 = vpop.permute.xlu0 %8030  ;;  %v6892_v9 = vsel %vm934_vm4, %v16162_v62, %v16142_v3  ;;  %v16171_v62 = vld [vmem:[#allocation117_spill] sm:$0xff] }
 0xbd1   :  { %11246 = vmatpush3.msra.mxu0 %v16149_v54  ;;  %6965 = vmatprep.subr.mxu1 %v6900_v18  ;;  %v16164_v18 = vld [vmem:[#allocation58_spill] sm:$0xff] }
 0xbd2   :  { %11247 = vmatprep.subr.mxu0 %v16151_v51  ;;  %6728 = vmatprep.mubr.f32.mxu1 %v16013_v2  ;;  %v14471_v15 = vpop.permute.xlu1 %7472 }
 0xbd3   :  { %6966 = vmatpush1.msra.mxu1 %v6899_v41  ;;  %11248 = vmatpush3.msra.mxu0 %v16151_v51 }
 0xbd4   :  { %10588 = vmatmul.mubr.msk.f32.gmra.mxu1 %vm4110_vm14, %v14302_v55  ;;  %6967 = vmatprep.subr.mxu1 %v6898_v19  ;;  %v16158_v55 = vld [vmem:[#allocation59_spill] sm:$0xff]  ;;  %v14473_v53 = vpop.permute.xlu0 %8028  ;;  %v16165_v19 = vld [vmem:[#allocation125_spill] sm:$0xff] }
 0xbd5   :  { %11249 = vmatprep.subr.mxu0 %v16155_v26  ;;  %6968 = vmatpush1.msra.mxu1 %v6897_v14  ;;  %v6895_v21 = vsel %vm934_vm4, %v16158_v55, %v16156_v49  ;;  %v7197_v31 = vsel %vm7182_vm3, %v16165_v19, %v14181_v38  ;;  %v16166_v14 = vld [vmem:[#allocation123_spill] sm:$0xff]  ;;  %v14527_v55 = vld [vmem:[#allocation28 + $0x98] sm:$0xff] }
 0xbd6   :  { %11250 = vmatpush3.msra.mxu0 %v16155_v26  ;;  %6969 = vmatprep.subr.mxu1 %v6896_v45  ;;  %v14499_v3 = vpop.permute.xlu1 %8012  ;;  %v7196_v49 = vsel %vm7182_vm3, %v16166_v14, %v16145_v48  ;;  %v16168_v45 = vld [vmem:[#allocation111_spill] sm:$0xff] }
 0xbd7   :  { %11251 = vmatprep.subr.mxu0 %v16157_v5  ;;  %6734 = vmatprep.mubr.f32.mxu1 %v16013_v2  ;;  %v7195_v38 = vsel %vm7182_vm3, %v16168_v45, %v16166_v14  ;;  %v16176_v14 = vld [vmem:[#allocation80_spill] sm:$0xff]  ;;  %v16177_v45 = vld [vmem:[#allocation94_spill] sm:$0xff] }
 0xbd8   :  { %6970 = vmatpush1.msra.mxu1 %v6895_v21  ;;  %11252 = vmatpush3.msra.mxu0 %v16157_v5  ;;  %v14501_v41 = vpop.permute.xlu0 %8026 }
 0xbd9   :  { %10589 = vmatmul.mubr.msk.f32.gmra.mxu1 %vm4110_vm14, %v14311_v63  ;;  %6971 = vmatprep.subr.mxu1 %v6894_v29  ;;  %v14492_v63 = vld [vmem:[#allocation28 + $0x80] sm:$0xff]  ;;  %v7194_v29 = vsel %vm7182_vm3, %v16169_v43, %v16149_v54  ;;  %v16174_v54 = vld [vmem:[#allocation88_spill] sm:$0xff] }
 0xbda   :  { %11253 = vmatprep.subr.mxu0 %v16161_v52  ;;  %6972 = vmatpush1.msra.mxu1 %v6893_v36  ;;  %v14531_v48 = vpop.permute.xlu1 %8010  ;;  %v7193_v36 = vsel %vm7182_vm3, %v16170_v8, %v16169_v43  ;;  %v16181_v8 = vld [vmem:[#allocation69_spill] sm:$0xff] }
 0xbdb   :  { %11254 = vmatpush3.msra.mxu0 %v16161_v52  ;;  %6973 = vmatprep.subr.mxu1 %v6892_v9  ;;  %v16172_v9 = vld [vmem:[#allocation98_spill] sm:$0xff] }
 0xbdc   :  { %11255 = vmatprep.subr.mxu0 %v16164_v18  ;;  %6974 = vmatpush1.msra.mxu1 %v6891_v13  ;;  %v14533_v21 = vpop.permute.xlu0 %8018  ;;  %v7192_v60 = vsel %vm7182_vm3, %v16172_v9, %v16151_v51  ;;  %v7191_v13 = vsel %vm7182_vm3, %v16174_v54, %v16172_v9 }
 0xbdd   :  { %7007 = vmatprep.mubr.f32.mxu1 %v16013_v2  ;;  %11256 = vmatpush3.msra.mxu0 %v16164_v18 }
 0xbde   :  { %11257 = vmatprep.mubr.msk.f32.mxu0 %vm4110_vm14, %v14492_v63  ;;  %10594 = vmatmul.mubr.msk.f32.vlgmr.msra.gmra.mxu1 %vm4110_vm14, %v14384_v30  ;;  %v14519_v30 = vld [vmem:[#allocation28 + $0x90] sm:$0xff] }
 0xbdf   :  { %7251 = vmatprep.subr.mxu1 %v7198_v47  ;;  %11258 = vmatmul.mubr.msk.f32.vlgmr.msra.gmra.mxu0 %vm4110_vm14, %v14495_v57  ;;  %v16175_v47 = vld [vmem:[#allocation91_spill] sm:$0xff] }
 0xbe0   :  { %11263 = vmatprep.subr.mxu0 %v14471_v15  ;;  %7252 = vmatpush1.msra.mxu1 %v7197_v31  ;;  %v7190_v19 = vsel %vm7182_vm3, %v16175_v47, %v16155_v26  ;;  %v14560_v31 = vpop.permute.xlu1 %8340  ;;  %v14562_v51 = vpop.permute.xlu0 %8016  ;;  %v16179_v26 = vld [vmem:[#allocation84_spill] sm:$0xff] }
 0xbe1   :  { %11264 = vmatpush3.msra.mxu0 %v14471_v15  ;;  %7253 = vmatprep.subr.mxu1 %v7196_v49  ;;  %v7189_v49 = vsel %vm7182_vm3, %v16176_v14, %v16175_v47  ;;  %v16184_v47 = vld [vmem:[#allocation51_spill] sm:$0xff]  ;;  %v14600_v14 = vld [vmem:[#allocation28 + $0xa0] sm:$0xff] }
 0xbe2   :  { %11265 = vmatprep.subr.mxu0 %v16167_v46  ;;  %7013 = vmatprep.mubr.f32.mxu1 %v16013_v2 }
 0xbe3   :  { %7254 = vmatpush1.msra.mxu1 %v7195_v38  ;;  %11260 = vmatprep.mubr.msk.f32.mxu0 %vm4110_vm14, %v14519_v30  ;;  %v16178_v38 = vld [vmem:[#allocation76_spill] sm:$0xff] }
 0xbe4   :  { %11266 = vmatpush3.msra.mxu0 %v16167_v46  ;;  %10595 = vmatmul.mubr.msk.f32.gmra.mxu1 %vm4110_vm14, %v14389_v37  ;;  %v16173_v37 = vld [vmem:[#allocation106_spill] sm:$0xff]  ;;  %v7188_v43 = vsel %vm7182_vm3, %v16178_v38, %v16157_v5  ;;  %v14590_v54 = vpop.permute.xlu0 %8014 }
 0xbe5   :  { %7255 = vmatprep.subr.mxu1 %v7194_v29  ;;  %11261 = vmatmul.mubr.msk.f32.gmra.mxu0 %vm4110_vm14, %v14527_v55  ;;  %v16182_v5 = vld [vmem:[#allocation62_spill] sm:$0xff] }
 0xbe6   :  { %11267 = vmatprep.subr.mxu0 %v16171_v62  ;;  %7256 = vmatpush1.msra.mxu1 %v7193_v36  ;;  %v7186_v36 = vsel %vm7182_vm3, %v16181_v8, %v16161_v52  ;;  %v7185_v9 = vsel %vm7182_vm3, %v16182_v5, %v16181_v8  ;;  %v16189_v5 = vld [vmem:[#allocation134_spill] sm:$0xff] }
 0xbe7   :  { %11268 = vmatpush3.msra.mxu0 %v16171_v62  ;;  %7257 = vmatprep.subr.mxu1 %v7192_v60  ;;  %v14588_v60 = vpop.permute.xlu1 %7764 }
 0xbe8   :  { %11269 = vmatprep.subr.mxu0 %v16173_v37  ;;  %7019 = vmatprep.mubr.f32.mxu1 %v16013_v2  ;;  %v14621_v8 = vpop.permute.xlu0 %8346 }
 0xbe9   :  { %7258 = vmatpush1.msra.mxu1 %v7191_v13  ;;  %11270 = vmatpush3.msra.mxu0 %v16173_v37  ;;  %v16183_v13 = vld [vmem:[#allocation72_spill] sm:$0xff] }
 0xbea   :  { %10596 = vmatmul.mubr.msk.f32.gmra.mxu1 %vm4110_vm14, %v14411_v1  ;;  %7259 = vmatprep.subr.mxu1 %v7190_v19  ;;  %v16180_v1 = vld [vmem:[#allocation66_spill] sm:$0xff]  ;;  %v7184_v19 = vsel %vm7182_vm3, %v16184_v47, %v16164_v18  ;;  %v7490_v18 = vsel %vm7474_vm5, %v14204_v61, %v14471_v15  ;;  %v14627_v15 = vld [vmem:[#allocation28 + $0xb0] sm:$0xff] }
 0xbeb   :  { %11271 = vmatprep.subr.mxu0 %v16177_v45  ;;  %7260 = vmatpush1.msra.mxu1 %v7189_v49  ;;  %v7187_v29 = vsel %vm7182_vm3, %v16180_v1, %v16178_v38  ;;  %v16186_v49 = vld [vmem:[#allocation56_spill] sm:$0xff]  ;;  %v14603_v38 = vld [vmem:[#allocation28 + $0xa8] sm:$0xff] }
 0xbec   :  { %11272 = vmatpush3.msra.mxu0 %v16177_v45  ;;  %7261 = vmatprep.subr.mxu1 %v7188_v43  ;;  %v16187_v43 = vld [vmem:[#allocation128_spill] sm:$0xff] }
 0xbed   :  { %11273 = vmatprep.subr.mxu0 %v16179_v26  ;;  %7025 = vmatprep.mubr.f32.mxu1 %v16013_v2  ;;  %v7489_v1 = vsel %vm7474_vm5, %v16187_v43, %v14204_v61  ;;  %v16190_v61 = vld [vmem:[#allocation115_spill] sm:$0xff]  ;;  %v14652_v43 = vpop.permute.xlu0 %8344 }
 0xbee   :  { %7262 = vmatpush1.msra.mxu1 %v7187_v29  ;;  %11274 = vmatpush3.msra.mxu0 %v16179_v26  ;;  %v14619_v29 = vpop.permute.xlu1 %8338 }
 0xbef   :  { %10597 = vmatmul.mubr.msk.f32.gmra.mxu1 %vm4110_vm14, %v14421_v39  ;;  %7263 = vmatprep.subr.mxu1 %v7186_v36  ;;  %v16185_v39 = vld [vmem:[#allocation42_spill] sm:$0xff] }
 0xbf0   :  { %11275 = vmatprep.subr.mxu0 %v16183_v13  ;;  %7264 = vmatpush1.msra.mxu1 %v7185_v9  ;;  %v7183_v52 = vsel %vm7182_vm3, %v16185_v39, %v16184_v47  ;;  %v14635_v47 = vld [vmem:[#allocation28 + $0xb8] sm:$0xff] }
 0xbf1   :  { %11276 = vmatpush3.msra.mxu0 %v16183_v13  ;;  %7265 = vmatprep.subr.mxu1 %v7184_v19  ;;  %v16192_v39 = vld [vmem:[#allocation105_spill] sm:$0xff] }
 0xbf2   :  { %11277 = vmatprep.subr.mxu0 %v16186_v49  ;;  %7266 = vmatpush1.msra.mxu1 %v7183_v52 }
 0xbf3   :  { %7299 = vmatprep.mubr.f32.mxu1 %v16013_v2  ;;  %11278 = vmatpush3.msra.mxu0 %v16186_v49 }
 0xbf4   :  { %11279 = vmatprep.mubr.msk.f32.mxu0 %vm4110_vm14, %v14600_v14  ;;  %10602 = vmatmul.mubr.msk.f32.vlgmr.msra.gmra.mxu1 %vm4110_vm14, %v14492_v63  ;;  %v16188_v63 = vld [vmem:[#allocation124_spill] sm:$0xff] }
 0xbf5   :  { %7543 = vmatprep.subr.mxu1 %v7490_v18  ;;  %11280 = vmatmul.mubr.msk.f32.vlgmr.msra.gmra.mxu0 %vm4110_vm14, %v14603_v38  ;;  %v7488_v36 = vsel %vm7474_vm5, %v16188_v63, %v16167_v46  ;;  %v7487_v9 = vsel %vm7474_vm5, %v16190_v61, %v16188_v63  ;;  %v16191_v46 = vld [vmem:[#allocation116_spill] sm:$0xff]  ;;  %v14650_v18 = vpop.permute.xlu1 %8336  ;;  %v16196_v61 = vld [vmem:[#allocation93_spill] sm:$0xff] }
 0xbf6   :  { %11285 = vmatprep.subr.mxu0 %v14588_v60  ;;  %7544 = vmatpush1.msra.mxu1 %v7489_v1  ;;  %v7486_v19 = vsel %vm7474_vm5, %v16191_v46, %v16171_v62  ;;  %v7485_v52 = vsel %vm7474_vm5, %v16192_v39, %v16191_v46  ;;  %v16193_v1 = vld [vmem:[#allocation120_spill] sm:$0xff]  ;;  %v16199_v39 = vld [vmem:[#allocation78_spill] sm:$0xff] }
 0xbf7   :  { %11286 = vmatpush3.msra.mxu0 %v14588_v60  ;;  %7545 = vmatprep.subr.mxu1 %v7488_v36  ;;  %v16195_v62 = vld [vmem:[#allocation92_spill] sm:$0xff] }
 0xbf8   :  { %11287 = vmatprep.subr.mxu0 %v16189_v5  ;;  %7305 = vmatprep.mubr.f32.mxu1 %v16013_v2 }
 0xbf9   :  { %7546 = vmatpush1.msra.mxu1 %v7487_v9  ;;  %11282 = vmatprep.mubr.msk.f32.mxu0 %vm4110_vm14, %v14627_v15  ;;  %v7482_v9 = vsel %vm7474_vm5, %v16196_v61, %v16177_v45 }
 0xbfa   :  { %11288 = vmatpush3.msra.mxu0 %v16189_v5  ;;  %10603 = vmatmul.mubr.msk.f32.gmra.mxu1 %vm4110_vm14, %v14495_v57  ;;  %v16194_v57 = vld [vmem:[#allocation100_spill] sm:$0xff] }
 0xbfb   :  { %7547 = vmatprep.subr.mxu1 %v7486_v19  ;;  %11283 = vmatmul.mubr.msk.f32.gmra.mxu0 %vm4110_vm14, %v14635_v47  ;;  %v7484_v63 = vsel %vm7474_vm5, %v16194_v57, %v16173_v37  ;;  %v7483_v36 = vsel %vm7474_vm5, %v16195_v62, %v16194_v57  ;;  %v16197_v37 = vld [vmem:[#allocation83_spill] sm:$0xff]  ;;  %v14677_v57 = vpop.permute.xlu1 %8328 }
 0xbfc   :  { %11289 = vmatprep.subr.mxu0 %v16193_v1  ;;  %7548 = vmatpush1.msra.mxu1 %v7485_v52  ;;  %v7481_v46 = vsel %vm7474_vm5, %v16197_v37, %v16196_v61  ;;  %v16198_v19 = vld [vmem:[#allocation131_spill] sm:$0xff]  ;;  %v7480_v52 = vsel %vm7474_vm5, %v16199_v39, %v16179_v26 }
 0xbfd   :  { %11290 = vmatpush3.msra.mxu0 %v16193_v1  ;;  %7549 = vmatprep.subr.mxu1 %v7484_v63  ;;  %v14679_v63 = vpop.permute.xlu0 %8342  ;;  %v16201_v26 = vld [vmem:[#allocation71_spill] sm:$0xff] }
 0xbfe   :  { %11291 = vmatprep.subr.mxu0 %v14115_v4  ;;  %7311 = vmatprep.mubr.f32.mxu1 %v16013_v2  ;;  %v7478_v62 = vsel %vm7474_vm5, %v16201_v26, %v16183_v13  ;;  %v16204_v13 = vld [vmem:[#allocation48_spill] sm:$0xff] }
 0xbff   :  { %7550 = vmatpush1.msra.mxu1 %v7483_v36  ;;  %11292 = vmatpush3.msra.mxu0 %v14115_v4  ;;  %v16202_v36 = vld [vmem:[#allocation53_spill] sm:$0xff] }
 0xc00   :  { %10604 = vmatmul.mubr.msk.f32.gmra.mxu1 %vm4110_vm14, %v14519_v30  ;;  %7551 = vmatprep.subr.mxu1 %v7482_v9  ;;  %v16200_v30 = vld [vmem:[#allocation70_spill] sm:$0xff]  ;;  %v7477_v61 = vsel %vm7474_vm5, %v16202_v36, %v16201_v26  ;;  %v16203_v9 = vld [vmem:[#allocation55_spill] sm:$0xff] }
 0xc01   :  { %11293 = vmatprep.subr.mxu0 %v16198_v19  ;;  %7552 = vmatpush1.msra.mxu1 %v7481_v46  ;;  %v7479_v45 = vsel %vm7474_vm5, %v16200_v30, %v16199_v39  ;;  %v7476_v37 = vsel %vm7474_vm5, %v16203_v9, %v16186_v49  ;;  %v7475_v46 = vsel %vm7474_vm5, %v16204_v13, %v16203_v9  ;;  %v14706_v39 = vpop.permute.xlu1 %8056  ;;  %v14711_v30 = vld [vmem:[#allocation28 + $0xc8] sm:$0xff] }
 0xc02   :  { %11294 = vmatpush3.msra.mxu0 %v16198_v19  ;;  %7553 = vmatprep.subr.mxu1 %v7480_v52  ;;  %v14708_v52 = vpop.permute.xlu0 %8334  ;;  %v7782_v49 = vsel %vm7766_vm6, %v14217_v10, %v14588_v60 }
 0xc03   :  { %11295 = vmatprep.subr.mxu0 %v14255_v42  ;;  %7317 = vmatprep.mubr.f32.mxu1 %v16013_v2 }
 0xc04   :  { %7554 = vmatpush1.msra.mxu1 %v7479_v45  ;;  %11296 = vmatpush3.msra.mxu0 %v14255_v42  ;;  %v16205_v45 = vld [vmem:[#allocation132_spill] sm:$0xff] }
 0xc05   :  { %10605 = vmatmul.mubr.msk.f32.gmra.mxu1 %vm4110_vm14, %v14527_v55  ;;  %7555 = vmatprep.subr.mxu1 %v7478_v62  ;;  %v14704_v55 = vld [vmem:[#allocation28 + $0xc0] sm:$0xff]  ;;  %v7781_v26 = vsel %vm7766_vm6, %v16205_v45, %v14217_v10  ;;  %v14734_v60 = vpop.permute.xlu1 %8326  ;;  %v16207_v10 = vld [vmem:[#allocation119_spill] sm:$0xff] }
 0xc06   :  { %11297 = vmatprep.subr.mxu0 %v14105_v16  ;;  %7556 = vmatpush1.msra.mxu1 %v7477_v61  ;;  %v16206_v62 = vld [vmem:[#allocation126_spill] sm:$0xff]  ;;  %v14736_v61 = vpop.permute.xlu0 %8332 }
 0xc07   :  { %11298 = vmatpush3.msra.mxu0 %v14105_v16  ;;  %7557 = vmatprep.subr.mxu1 %v7476_v37  ;;  %v7780_v36 = vsel %vm7766_vm6, %v16206_v62, %v16189_v5  ;;  %v7779_v9 = vsel %vm7766_vm6, %v16207_v10, %v16206_v62  ;;  %v14743_v37 = vld [vmem:[#allocation28 + $0xd8] sm:$0xff]  ;;  %v16208_v5 = vld [vmem:[#allocation118_spill] sm:$0xff]  ;;  %v7773_v10 = vsel %vm7766_vm6, %v14240_v58, %v14229_v28 }
 0xc08   :  { %11299 = vmatprep.subr.mxu0 %v14304_v24  ;;  %7558 = vmatpush1.msra.mxu1 %v7475_v46  ;;  %v7778_v13 = vsel %vm7766_vm6, %v16208_v5, %v16193_v1  ;;  %v16209_v46 = vld [vmem:[#allocation107_spill] sm:$0xff]  ;;  %v16210_v45 = vld [vmem:[#allocation102_spill] sm:$0xff]  ;;  %v16211_v62 = vld [vmem:[#allocation129_spill] sm:$0xff] }
 0xc09   :  { %7591 = vmatprep.mubr.f32.mxu1 %v16013_v2  ;;  %11300 = vmatpush3.msra.mxu0 %v14304_v24 }
 0xc0a   :  { %11301 = vmatprep.mubr.msk.f32.mxu0 %vm4110_vm14, %v14704_v55  ;;  %10610 = vmatmul.mubr.msk.f32.vlgmr.msra.gmra.mxu1 %vm4110_vm14, %v14600_v14  ;;  %v14731_v14 = vld [vmem:[#allocation28 + $0xd0] sm:$0xff]  ;;  %v14765_v1 = vpop.permute.xlu0 %8330 }
 0xc0b   :  { %7835 = vmatprep.subr.mxu1 %v7782_v49  ;;  %11302 = vmatmul.mubr.msk.f32.vlgmr.msra.gmra.mxu0 %vm4110_vm14, %v14711_v30  ;;  %v7777_v49 = vsel %vm7766_vm6, %v16209_v46, %v16208_v5  ;;  %v7768_v46 = vsel %vm7766_vm6, %v14125_v17, %v14304_v24 }
 0xc0c   :  { %11307 = vmatprep.subr.mxu0 %v14706_v39  ;;  %7836 = vmatpush1.msra.mxu1 %v7781_v26  ;;  %v7776_v26 = vsel %vm7766_vm6, %v16210_v45, %v14115_v4  ;;  %v7774_v4 = vsel %vm7766_vm6, %v14229_v28, %v16198_v19  ;;  %v16213_v19 = vld [vmem:[#allocation135_spill] sm:$0xff] }
 0xc0d   :  { %11308 = vmatpush3.msra.mxu0 %v14706_v39  ;;  %7837 = vmatprep.subr.mxu1 %v7780_v36  ;;  %v7775_v36 = vsel %vm7766_vm6, %v16211_v62, %v16210_v45 }
 0xc0e   :  { %11309 = vmatprep.subr.mxu0 %v14358_v34  ;;  %7597 = vmatprep.mubr.f32.mxu1 %v16013_v2  ;;  %v14793_v58 = vpop.permute.xlu0 %8322 }
 0xc0f   :  { %7838 = vmatpush1.msra.mxu1 %v7779_v9  ;;  %11304 = vmatprep.mubr.msk.f32.mxu0 %vm4110_vm14, %v14731_v14  ;;  %v16212_v9 = vld [vmem:[#allocation133_spill] sm:$0xff] }
 0xc10   :  { %11310 = vmatpush3.msra.mxu0 %v14358_v34  ;;  %10611 = vmatmul.mubr.msk.f32.gmra.mxu1 %vm4110_vm14, %v14603_v38  ;;  %v14763_v38 = vpop.permute.xlu1 %8324  ;;  %v7772_v5 = vsel %vm7766_vm6, %v16212_v9, %v14255_v42  ;;  %v7770_v42 = vsel %vm7766_vm6, %v14268_v40, %v14105_v16  ;;  %v14812_v16 = vld [vmem:[#allocation28 + $0xe0] sm:$0xff] }
 0xc11   :  { %7839 = vmatprep.subr.mxu1 %v7778_v13  ;;  %11305 = vmatmul.mubr.msk.f32.gmra.mxu0 %vm4110_vm14, %v14743_v37  ;;  %v7771_v13 = vsel %vm7766_vm6, %v16213_v19, %v16212_v9 }
 0xc12   :  { %11311 = vmatprep.subr.mxu0 %v14232_v35  ;;  %7840 = vmatpush1.msra.mxu1 %v7777_v49  ;;  %v7767_v49 = vsel %vm7766_vm6, %v14146_v33, %v14125_v17  ;;  %v14821_v24 = vpop.permute.xlu0 %8320  ;;  %v8074_v17 = vsel %vm8058_vm7, %v14321_v25, %v14706_v39  ;;  %v8073_v33 = vsel %vm8058_vm7, %v14340_v0, %v14321_v25  ;;  %v14847_v0 = vld [vmem:[#allocation28 + $0xf8] sm:$0xff] }
 0xc13   :  { %11312 = vmatpush3.msra.mxu0 %v14232_v35  ;;  %7841 = vmatprep.subr.mxu1 %v7776_v26  ;;  %v8071_v25 = vsel %vm8058_vm7, %v14213_v59, %v14191_v22  ;;  %v8069_v59 = vsel %vm8058_vm7, %v14400_v23, %v14378_v11  ;;  %v8068_v39 = vsel %vm8058_vm7, %v14271_v44, %v14423_v56 }
 0xc14   :  { %11313 = vmatprep.subr.mxu0 %v14423_v56  ;;  %7603 = vmatprep.mubr.f32.mxu1 %v16013_v2  ;;  %v14791_v28 = vpop.permute.xlu1 %8316  ;;  %v8064_v23 = vsel %vm8058_vm7, %v14386_v27, %v14501_v41 }
 0xc15   :  { %7842 = vmatpush1.msra.mxu1 %v7775_v36  ;;  %11314 = vmatpush3.msra.mxu0 %v14423_v56  ;;  %v8062_v56 = vsel %vm8058_vm7, %v14533_v21, %v14443_v20 }
 0xc16   :  { %10612 = vmatmul.mubr.msk.f32.gmra.mxu1 %vm4110_vm14, %v14627_v15  ;;  %7843 = vmatprep.subr.mxu1 %v7774_v4  ;;  %v7769_v15 = vsel %vm7766_vm6, %v14281_v50, %v14268_v40  ;;  %v14815_v40 = vld [vmem:[#allocation28 + $0xe8] sm:$0xff] }
 0xc17   :  { %11315 = vmatprep.subr.mxu0 %v14328_v32  ;;  %7844 = vmatpush1.msra.mxu1 %v7773_v10 }
 0xc18   :  { %11316 = vmatpush3.msra.mxu0 %v14328_v32  ;;  %7845 = vmatprep.subr.mxu1 %v7772_v5  ;;  %v14819_v50 = vpop.permute.xlu1 %8348 }
 0xc19   :  { %11317 = vmatprep.subr.mxu0 %v14501_v41  ;;  %7609 = vmatprep.mubr.f32.mxu1 %v16013_v2 }
 0xc1a   :  { %7846 = vmatpush1.msra.mxu1 %v7771_v13  ;;  %11318 = vmatpush3.msra.mxu0 %v14501_v41  ;;  %v8366_v41 = vsel %vm8350_vm8, %v14621_v8, %v14819_v50 }
 0xc1b   :  { %10613 = vmatmul.mubr.msk.f32.gmra.mxu1 %vm4110_vm14, %v14635_v47  ;;  %7847 = vmatprep.subr.mxu1 %v7770_v42  ;;  %v8072_v47 = vsel %vm8058_vm7, %v14191_v22, %v14358_v34  ;;  %v14851_v34 = vpop.permute.xlu0 %8318  ;;  %v8070_v22 = vsel %vm8058_vm7, %v14378_v11, %v14232_v35  ;;  %v8066_v35 = vsel %vm8058_vm7, %v14445_v6, %v14328_v32 }
 0xc1c   :  { %11319 = vmatprep.subr.mxu0 %v14443_v20  ;;  %7848 = vmatpush1.msra.mxu1 %v7769_v15  ;;  %v8063_v32 = vsel %vm8058_vm7, %v14414_v12, %v14386_v27  ;;  %v8060_v27 = vsel %vm8058_vm7, %v14499_v3, %v14590_v54 }
 0xc1d   :  { %11320 = vmatpush3.msra.mxu0 %v14443_v20  ;;  %7849 = vmatprep.subr.mxu1 %v7768_v46  ;;  %v8059_v20 = vsel %vm8058_vm7, %v14531_v48, %v14499_v3  ;;  %v8364_v3 = vsel %vm8350_vm8, %v14560_v31, %v14679_v63  ;;  %v8363_v48 = vsel %vm8350_vm8, %v14619_v29, %v14560_v31 }
 0xc1e   :  { %11321 = vmatprep.subr.mxu0 %v14590_v54  ;;  %7850 = vmatpush1.msra.mxu1 %v7767_v49  ;;  %v8360_v31 = vsel %vm8350_vm8, %v14677_v57, %v14765_v1  ;;  %v8359_v29 = vsel %vm8350_vm8, %v14734_v60, %v14677_v57  ;;  %v8356_v57 = vsel %vm8350_vm8, %v14791_v28, %v14851_v34 }
 0xc1f   :  { %7883 = vmatprep.mubr.f32.mxu1 %v16013_v2  ;;  %11322 = vmatpush3.msra.mxu0 %v14590_v54  ;;  %v14879_v11 = vpop.permute.xlu0 %8310 }
 0xc20   :  { %11323 = vmatprep.mubr.msk.f32.mxu0 %vm4110_vm14, %v14812_v16  ;;  %10618 = vmatmul.mubr.msk.f32.vlgmr.msra.gmra.mxu1 %vm4110_vm14, %v14704_v55  ;;  %v14839_v55 = vld [vmem:[#allocation28 + $0xf0] sm:$0xff] }
 0xc21   :  { %8127 = vmatprep.subr.mxu1 %v8074_v17  ;;  %11324 = vmatmul.mubr.msk.f32.vlgmr.msra.gmra.mxu0 %vm4110_vm14, %v14815_v40 }
 0xc22   :  { %11329 = vmatprep.subr.mxu0 %v14819_v50  ;;  %8128 = vmatpush1.msra.mxu1 %v8073_v33 }
 0xc23   :  { %11330 = vmatpush3.msra.mxu0 %v14819_v50  ;;  %8129 = vmatprep.subr.mxu1 %v8072_v47  ;;  %v8309_v12 = vpop.permute.xlu0 %8308 }
 0xc24   :  { %11331 = vmatprep.subr.mxu0 %v14679_v63  ;;  %7889 = vmatprep.mubr.f32.mxu1 %v16013_v2 }
 0xc25   :  { %8130 = vmatpush1.msra.mxu1 %v8071_v25  ;;  %11326 = vmatprep.mubr.msk.f32.mxu0 %vm4110_vm14, %v14839_v55 }
 0xc26   :  { %11332 = vmatpush3.msra.mxu0 %v14679_v63  ;;  %10619 = vmatmul.mubr.msk.f32.gmra.mxu1 %vm4110_vm14, %v14711_v30  ;;  %v8067_v30 = vsel %vm8058_vm7, %v14296_v7, %v14271_v44  ;;  %v8065_v44 = vsel %vm8058_vm7, %v14473_v53, %v14445_v6  ;;  %v8315_v7 = vpop.permute.xlu1 %8314  ;;  %v8061_v6 = vsel %vm8058_vm7, %v14562_v51, %v14533_v21  ;;  %v8298_v63 = vld [vmem:[#allocation28 + $0x100] sm:$0xff] }
 0xc27   :  { %8131 = vmatprep.subr.mxu1 %v8070_v22  ;;  %11327 = vmatmul.mubr.msk.f32.gmra.mxu0 %vm4110_vm14, %v14847_v0  ;;  %v8365_v21 = vsel %vm8350_vm8, %v14652_v43, %v14621_v8  ;;  %v8362_v51 = vsel %vm8350_vm8, %v14708_v52, %v14650_v18  ;;  %v8307_v54 = vpop.permute.xlu0 %8306  ;;  %v8361_v8 = vsel %vm8350_vm8, %v14736_v61, %v14708_v52 }
 0xc28   :  { %11333 = vmatprep.subr.mxu0 %v14650_v18  ;;  %8132 = vmatpush1.msra.mxu1 %v8069_v59  ;;  %v8357_v52 = vsel %vm8350_vm8, %v14821_v24, %v14793_v58  ;;  %v8355_v60 = vsel %vm8350_vm8, %v8315_v7, %v14791_v28  ;;  %v8353_v61 = vsel %vm8350_vm8, %v8309_v12, %v14879_v11 }
 0xc29   :  { %11334 = vmatpush3.msra.mxu0 %v14650_v18  ;;  %8133 = vmatprep.subr.mxu1 %v8068_v39  ;;  %v8358_v18 = vsel %vm8350_vm8, %v14793_v58, %v14763_v38 }
 0xc2a   :  { %7895 = vmatprep.mubr.f32.mxu1 %v16013_v2  ;;  %8134 = vmatpush1.msra.mxu1 %v8067_v30  ;;  %v8313_v53 = vpop.permute.xlu1 %8312 }
 0xc2b   :  { %11335 = vmatprep.subr.mxu0 %v14765_v1  ;;  %10620 = vmatmul.mubr.msk.f32.gmra.mxu1 %vm4110_vm14, %v14731_v14  ;;  %v8299_v14 = vld [vmem:[#allocation28 + $0x108] sm:$0xff]  ;;  %v8354_v45 = vsel %vm8350_vm8, %v14879_v11, %v8313_v53 }
 0xc2c   :  { %8135 = vmatprep.subr.mxu1 %v8066_v35  ;;  %11336 = vmatpush3.msra.mxu0 %v14765_v1  ;;  %v8301_v1 = vld [vmem:[#allocation28 + $0x118] sm:$0xff] }
 0xc2d   :  { %8136 = vmatpush1.msra.mxu1 %v8065_v44  ;;  %11337 = vmatprep.subr.mxu0 %v14763_v38 }
 0xc2e   :  { %8137 = vmatprep.subr.mxu1 %v8064_v23  ;;  %11338 = vmatpush3.msra.mxu0 %v14763_v38  ;;  %v8305_v43 = vpop.permute.xlu1 %8304  ;;  %v8300_v38 = vld [vmem:[#allocation28 + $0x110] sm:$0xff] }
 0xc2f   :  { %7901 = vmatprep.mubr.f32.mxu1 %v16013_v2  ;;  %8138 = vmatpush1.msra.mxu1 %v8063_v32  ;;  %v8352_v26 = vsel %vm8350_vm8, %v8305_v43, %v8307_v54 }
 0xc30   :  { %10621 = vmatmul.mubr.msk.f32.gmra.mxu1 %vm4110_vm14, %v14743_v37  ;;  %8139 = vmatprep.subr.mxu1 %v8062_v56 }
 0xc31   :  { %8140 = vmatpush1.msra.mxu1 %v8061_v6  ;;  %8175 = vmatprep.mubr.f32.mxu1 %v16013_v2 }
 0xc32   :  { %8141 = vmatprep.subr.mxu1 %v8060_v27  ;;  %11339 = vmatprep.subr.mxu0 %v14851_v34  ;;  %v8303_v37 = vpop.permute.xlu1 %8302 }
 0xc33   :  { %8142 = vmatpush1.msra.mxu1 %v8059_v20  ;;  %11340 = vmatpush3.msra.mxu0 %v14851_v34  ;;  %v8351_v62 = vsel %vm8350_vm8, %v8303_v37, %v8305_v43 }
 0xc34   :  { %10626 = vmatmul.mubr.msk.f32.vlgmr.msra.gmra.mxu1 %vm4110_vm14, %v14812_v16  ;;  %8419 = vmatprep.subr.mxu1 %v8366_v41 }
 0xc35   :  { %8420 = vmatpush1.msra.mxu1 %v8365_v21  ;;  %8181 = vmatprep.mubr.f32.mxu1 %v16013_v2 }
 0xc36   :  { %8421 = vmatprep.subr.mxu1 %v8364_v3  ;;  %11341 = vmatprep.subr.mxu0 %v8313_v53 }
 0xc37   :  { %8422 = vmatpush1.msra.mxu1 %v8363_v48  ;;  %11342 = vmatpush3.msra.mxu0 %v8313_v53 }
 0xc38   :  { %10627 = vmatmul.mubr.msk.f32.gmra.mxu1 %vm4110_vm14, %v14815_v40  ;;  %8423 = vmatprep.subr.mxu1 %v8362_v51 }
 0xc39   :  { %8424 = vmatpush1.msra.mxu1 %v8361_v8  ;;  %8187 = vmatprep.mubr.f32.mxu1 %v16013_v2 }
 0xc3a   :  { %8425 = vmatprep.subr.mxu1 %v8360_v31  ;;  %11343 = vmatprep.subr.mxu0 %v8307_v54 }
 0xc3b   :  { %8426 = vmatpush1.msra.mxu1 %v8359_v29  ;;  %11344 = vmatpush3.msra.mxu0 %v8307_v54 }
 0xc3c   :  { %10628 = vmatmul.mubr.msk.f32.gmra.mxu1 %vm4110_vm14, %v14839_v55  ;;  %8427 = vmatprep.subr.mxu1 %v8358_v18 }
 0xc3d   :  { %8428 = vmatpush1.msra.mxu1 %v8357_v52  ;;  %8193 = vmatprep.mubr.f32.mxu1 %v16013_v2 }
 0xc3e   :  { %8429 = vmatprep.subr.mxu1 %v8356_v57  ;;  %11345 = vmatprep.mubr.msk.f32.mxu0 %vm4110_vm14, %v8298_v63 }
 0xc3f   :  { %8430 = vmatpush1.msra.mxu1 %v8355_v60  ;;  %11346 = vmatmul.mubr.msk.f32.vlgmr.msra.gmra.mxu0 %vm4110_vm14, %v8299_v14 }
 0xc40   :  { %10629 = vmatmul.mubr.msk.f32.gmra.mxu1 %vm4110_vm14, %v14847_v0  ;;  %8431 = vmatprep.subr.mxu1 %v8354_v45 }
 0xc41   :  { %8432 = vmatpush1.msra.mxu1 %v8353_v61  ;;  %8467 = vmatprep.mubr.f32.mxu1 %v16013_v2 }
 0xc42   :  { %8433 = vmatprep.subr.mxu1 %v8352_v26  ;;  %11348 = vmatprep.mubr.msk.f32.mxu0 %vm4110_vm14, %v8300_v38 }
 0xc43   :  { %8434 = vmatpush1.msra.mxu1 %v8351_v62  ;;  %11349 = vmatmul.mubr.msk.f32.gmra.mxu0 %vm4110_vm14, %v8301_v1  ;;  %v14979_v36 = vpop.f32.mrf.mxu0 }
 0xc44   :  { %10634 = vmatmul.mubr.msk.f32.vlgmr.msra.gmra.mxu1 %vm4110_vm14, %v8298_v63  ;;  %11351 = vmatprep.subr.mxu0 %v16013_v2 }
 0xc45   :  { %8473 = vmatprep.mubr.f32.mxu1 %v16013_v2  ;;  %11359 = vmatprep.mubr.msk.f32.mxu0 %vm11938_vm11, %v16013_v2  ;;  %v14981_v10 = vpop.f32.mrf.mxu0 }
 0xc48   :  { %10635 = vmatmul.mubr.msk.f32.gmra.mxu1 %vm4110_vm14, %v8299_v14 }
 0xc49   :  { %8479 = vmatprep.mubr.f32.mxu1 %v16013_v2 }
 0xc4c   :  { %10636 = vmatmul.mubr.msk.f32.gmra.mxu1 %vm4110_vm14, %v8300_v38 }
 0xc4d   :  { %8485 = vmatprep.mubr.f32.mxu1 %v16013_v2 }
 0xc50   :  { %10637 = vmatmul.mubr.msk.f32.gmra.mxu1 %vm4110_vm14, %v8301_v1 }
 0xc51   :  { %8792 = vmatprep.mubr.f32.mxu1 %v16013_v2 }
 0xc55   :  { %v11174_v5 = vpop.f32.mrf.mxu0 }
 0xc57   :  { %v6352_v28 = vpop.f32.mrf.mxu0 }
 0xc58   :  { %v6253_v4 = vpop.f32.mrf.mxu1 }
 0xc5a   :  { %v6255_v9 = vpop.f32.mrf.mxu1 }
 0xc5b   :  { %v14983_v42 = vpop.f32.mrf.mxu0 }
 0xc5d   :  { %v14985_v46 = vpop.f32.mrf.mxu0 }
 0xc5f   :  { %v6259_v19 = vpop.f32.mrf.mxu1 }
 0xc61   :  { %v6261_v13 = vpop.f32.mrf.mxu1 }
 0xc65   :  { %v6265_v58 = vpop.f32.mrf.mxu1 }
 0xc67   :  { %v6267_v15 = vpop.f32.mrf.mxu1 }
 0xc6b   :  { %v6271_v49 = vpop.f32.mrf.mxu1 }
 0xc6c   :  { %v11196_v16 = vpop.f32.mrf.mxu0 }
 0xc6d   :  { %v6544_v40 = vadd.f32 %v11196_v16, %v11174_v5  ;;  %v6273_v50 = vpop.f32.mrf.mxu1 }
 0xc6e   :  { %v6538_v24 = vpop.f32.mrf.mxu0 }
 0xc6f   :  { %v6539_v17 = vadd.f32 %v6538_v24, %v6352_v28 }
 0xc72   :  { %v6439_v33 = vpop.f32.mrf.mxu1 }
 0xc73   :  { %v6440_v47 = vadd.f32 %v6439_v33, %v6253_v4  ;;  %v14987_v55 = vpop.f32.mrf.mxu0 }
 0xc74   :  { %v6441_v25 = vpop.f32.mrf.mxu1 }
 0xc75   :  { %v6442_v0 = vadd.f32 %v6441_v25, %v6255_v9  ;;  %v14989_v34 = vpop.f32.mrf.mxu0 }
 0xc78   :  { %v6445_v22 = vpop.f32.mrf.mxu1 }
 0xc79   :  { %v6446_v59 = vadd.f32 %v6445_v22, %v6259_v19  ;;  %v11218_v39 = vpop.f32.mrf.mxu0 }
 0xc7a   :  { %v6837_v30 = vadd.f32 %v11218_v39, %v6544_v40  ;;  %v6447_v35 = vpop.f32.mrf.mxu1 }
 0xc7b   :  { %v6448_v11 = vadd.f32 %v6447_v35, %v6261_v13  ;;  %v6817_v44 = vpop.f32.mrf.mxu0 }
 0xc7c   :  { %v6834_v7 = vadd.f32 %v6817_v44, %v6539_v17 }
 0xc7e   :  { %v6451_v23 = vpop.f32.mrf.mxu1 }
 0xc7f   :  { %v6452_v32 = vadd.f32 %v6451_v23, %v6265_v58 }
 0xc80   :  { %v6453_v56 = vpop.f32.mrf.mxu1 }
 0xc81   :  { %v6454_v6 = vadd.f32 %v6453_v56, %v6267_v15 }
 0xc83   :  { %v6457_v27 = vpop.f32.mrf.mxu1 }
 0xc84   :  { %v6458_v12 = vadd.f32 %v6457_v27, %v6271_v49 }
 0xc85   :  { %v6459_v20 = vpop.f32.mrf.mxu1 }
 0xc86   :  { %v6460_v53 = vadd.f32 %v6459_v20, %v6273_v50 }
 0xc88   :  { %v6718_v41 = vpop.f32.mrf.mxu1 }
 0xc89   :  { %v6826_v21 = vadd.f32 %v6718_v41, %v6440_v47  ;;  %v14991_v3 = vpop.f32.mrf.mxu0 }
 0xc8a   :  { %v6720_v48 = vpop.f32.mrf.mxu1 }
 0xc8b   :  { %v6827_v51 = vadd.f32 %v6720_v48, %v6442_v0  ;;  %v14993_v54 = vpop.f32.mrf.mxu0 }
 0xc8e   :  { %v6724_v8 = vpop.f32.mrf.mxu1 }
 0xc8f   :  { %v6829_v43 = vadd.f32 %v6724_v8, %v6446_v59  ;;  %v11240_v31 = vpop.f32.mrf.mxu0 }
 0xc90   :  { %v7128_v29 = vadd.f32 %v11240_v31, %v6837_v30  ;;  %v6726_v18 = vpop.f32.mrf.mxu1 }
 0xc91   :  { %v6830_v63 = vadd.f32 %v6726_v18, %v6448_v11  ;;  %v7108_v52 = vpop.f32.mrf.mxu0 }
 0xc92   :  { %v7125_v14 = vadd.f32 %v7108_v52, %v6834_v7 }
 0xc94   :  { %v6730_v57 = vpop.f32.mrf.mxu1 }
 0xc95   :  { %v6832_v60 = vadd.f32 %v6730_v57, %v6452_v32 }
 0xc96   :  { %v6732_v61 = vpop.f32.mrf.mxu1 }
 0xc97   :  { %v6833_v37 = vadd.f32 %v6732_v61, %v6454_v6 }
 0xc99   :  { %v6736_v45 = vpop.f32.mrf.mxu1 }
 0xc9a   :  { %v6835_v26 = vadd.f32 %v6736_v45, %v6458_v12 }
 0xc9b   :  { %v6738_v38 = vpop.f32.mrf.mxu1 }
 0xc9c   :  { %v6836_v1 = vadd.f32 %v6738_v38, %v6460_v53 }
 0xc9e   :  { %v7009_v62 = vpop.f32.mrf.mxu1 }
 0xc9f   :  { %v14995_v4 = vadd.f32 %v7009_v62, %v6826_v21  ;;  %v14997_v9 = vpop.f32.mrf.mxu0 }
 0xca0   :  { %v7011_v5 = vpop.f32.mrf.mxu1 }
 0xca1   :  { %v7118_v19 = vadd.f32 %v7011_v5, %v6827_v51  ;;  %v14999_v13 = vpop.f32.mrf.mxu0 }
 0xca4   :  { %v7015_v28 = vpop.f32.mrf.mxu1 }
 0xca5   :  { %v15001_v58 = vadd.f32 %v7015_v28, %v6829_v43  ;;  %v11262_v15 = vpop.f32.mrf.mxu0 }
 0xca6   :  { %v7420_v49 = vadd.f32 %v11262_v15, %v7128_v29  ;;  %v7017_v16 = vpop.f32.mrf.mxu1 }
 0xca7   :  { %v7121_v40 = vadd.f32 %v7017_v16, %v6830_v63  ;;  %v7400_v50 = vpop.f32.mrf.mxu0 }
 0xca8   :  { %v15003_v24 = vadd.f32 %v7400_v50, %v7125_v14 }
 0xcaa   :  { %v7021_v17 = vpop.f32.mrf.mxu1 }
 0xcab   :  { %v7123_v33 = vadd.f32 %v7021_v17, %v6832_v60 }
 0xcac   :  { %v7023_v47 = vpop.f32.mrf.mxu1 }
 0xcad   :  { %v7124_v25 = vadd.f32 %v7023_v47, %v6833_v37 }
 0xcaf   :  { %v7027_v0 = vpop.f32.mrf.mxu1 }
 0xcb0   :  { %v7126_v22 = vadd.f32 %v7027_v0, %v6835_v26 }
 0xcb1   :  { %v7029_v59 = vpop.f32.mrf.mxu1 }
 0xcb2   :  { %v7127_v39 = vadd.f32 %v7029_v59, %v6836_v1 }
 0xcb4   :  { %v15005_v30 = vpop.f32.mrf.mxu1 }
 0xcb5   :  { %v15007_v35 = vpop.f32.mrf.mxu0 }
 0xcb6   :  { %v7303_v11 = vpop.f32.mrf.mxu1 }
 0xcb7   :  { %v7410_v44 = vadd.f32 %v7303_v11, %v7118_v19  ;;  %v15009_v7 = vpop.f32.mrf.mxu0 }
 0xcba   :  { %v15011_v23 = vpop.f32.mrf.mxu1 }
 0xcbb   :  { %v11284_v32 = vpop.f32.mrf.mxu0 }
 0xcbc   :  { %v7712_v56 = vadd.f32 %v11284_v32, %v7420_v49  ;;  %v7309_v6 = vpop.f32.mrf.mxu1 }
 0xcbd   :  { %v7413_v27 = vadd.f32 %v7309_v6, %v7121_v40  ;;  %v15013_v43 = vpop.f32.mrf.mxu0 }
 0xcc0   :  { %v7313_v12 = vpop.f32.mrf.mxu1 }
 0xcc1   :  { %v7415_v20 = vadd.f32 %v7313_v12, %v7123_v33  ;;  %v6529_v12 = vadd.f32 %v14985_v46, %v14981_v10  ;;  %v15048_v46 = vpop.permute.xlu0 %8610 }
 0xcc2   :  { %v7315_v53 = vpop.f32.mrf.mxu1 }
 0xcc3   :  { %v7416_v41 = vadd.f32 %v7315_v53, %v7124_v25 }
 0xcc5   :  { %v7319_v21 = vpop.f32.mrf.mxu1 }
 0xcc6   :  { %v7418_v48 = vadd.f32 %v7319_v21, %v7126_v22 }
 0xcc7   :  { %v7321_v51 = vpop.f32.mrf.mxu1 }
 0xcc8   :  { %v7419_v8 = vadd.f32 %v7321_v51, %v7127_v39 }
 0xcca   :  { %v15015_v31 = vpop.f32.mrf.mxu1 }
 0xccb   :  { %v11303_v29 = vpop.f32.mrf.mxu0 }
 0xccc   :  { %v7595_v18 = vpop.f32.mrf.mxu1 }
 0xccd   :  { %v15017_v63 = vadd.f32 %v7595_v18, %v7410_v44  ;;  %v7974_v52 = vpop.f32.mrf.mxu0 }
 0xcd0   :  { %v15019_v14 = vpop.f32.mrf.mxu1 }
 0xcd1   :  { %v11306_v57 = vpop.f32.mrf.mxu0 }
 0xcd2   :  { %v8004_v60 = vadd.f32 %v11306_v57, %v7712_v56  ;;  %v7601_v61 = vpop.f32.mrf.mxu1  ;;  %v6534_v56 = vadd.f32 %v14983_v42, %v14979_v36 }
 0xcd3   :  { %v7705_v37 = vadd.f32 %v7601_v61, %v7413_v27  ;;  %v15021_v15 = vpop.f32.mrf.mxu0 }
 0xcd6   :  { %v7605_v45 = vpop.f32.mrf.mxu1 }
 0xcd7   :  { %v7707_v26 = vadd.f32 %v7605_v45, %v7415_v20  ;;  %v6831_v20 = vadd.f32 %v14987_v55, %v6534_v56 }
 0xcd8   :  { %v7607_v38 = vpop.f32.mrf.mxu1 }
 0xcd9   :  { %v7708_v1 = vadd.f32 %v7607_v38, %v7416_v41  ;;  %v6828_v41 = vadd.f32 %v14989_v34, %v6529_v12  ;;  %v7122_v21 = vadd.f32 %v14991_v3, %v6831_v20  ;;  %v15051_v3 = vpop.permute.xlu1 %8605  ;;  %v7412_v12 = vadd.f32 %v15011_v23, %v15001_v58 }
 0xcdb   :  { %v7611_v62 = vpop.f32.mrf.mxu1  ;;  %v7119_v51 = vadd.f32 %v14993_v54, %v6828_v41 }
 0xcdc   :  { %v7710_v5 = vadd.f32 %v7611_v62, %v7418_v48  ;;  %v15055_v62 = vpop.permute.xlu0 %8600 }
 0xcdd   :  { %v7613_v19 = vpop.f32.mrf.mxu1  ;;  %v7411_v42 = vadd.f32 %v14999_v13, %v7119_v51 }
 0xcde   :  { %v7711_v28 = vadd.f32 %v7613_v19, %v7419_v8  ;;  %v7414_v8 = vadd.f32 %v14997_v9, %v7122_v21  ;;  %v7704_v21 = vadd.f32 %v15019_v14, %v7412_v12 }
 0xcdf   :  { %v7703_v55 = vadd.f32 %v15009_v7, %v7411_v42 }
 0xce0   :  { %v15023_v49 = vpop.f32.mrf.mxu1  ;;  %v7706_v18 = vadd.f32 %v15007_v35, %v7414_v8 }
 0xce1   :  { %v11325_v16 = vpop.f32.mrf.mxu0  ;;  %v7995_v61 = vadd.f32 %v7974_v52, %v7703_v55  ;;  %v15061_v52 = vpop.permute.xlu1 %8595 }
 0xce2   :  { %v15025_v40 = vpop.f32.mrf.mxu1  ;;  %v7998_v34 = vadd.f32 %v11303_v29, %v7706_v18 }
 0xce3   :  { %v8266_v50 = vpop.f32.mrf.mxu0 }
 0xce4   :  { %v8290_v9 = vadd.f32 %v11325_v16, %v7998_v34  ;;  %v8287_v35 = vadd.f32 %v8266_v50, %v7995_v61 }
 0xce6   :  { %v15027_v17 = vpop.f32.mrf.mxu1 }
 0xce7   :  { %v11328_v33 = vpop.f32.mrf.mxu0  ;;  %v7996_v23 = vadd.f32 %v15027_v17, %v7704_v21  ;;  %v16215_v17 = vld [vmem:[#allocation52_spill] sm:$0xff] }
 0xce8   :  { %v8296_v47 = vadd.f32 %v11328_v33, %v8004_v60  ;;  %v7893_v25 = vpop.f32.mrf.mxu1 }
 0xce9   :  { %v15029_v0 = vadd.f32 %v7893_v25, %v7705_v37  ;;  %v15053_v60 = vpop.f32.mrf.mxu0 }
 0xceb   :  { %v7897_v22 = vpop.f32.mrf.mxu1 }
 0xcec   :  { %v7999_v59 = vadd.f32 %v7897_v22, %v7707_v26  ;;  %v8637_v26 = vld [vmem:[#allocation31] sm:$0x7] }
 0xced   :  { %v7899_v39 = vpop.f32.mrf.mxu1 }
 0xcee   :  { %v8000_v11 = vadd.f32 %v7899_v39, %v7708_v1 }
 0xcf0   :  { %v7903_v44 = vpop.f32.mrf.mxu1 }
 0xcf1   :  { %v8002_v32 = vadd.f32 %v7903_v44, %v7710_v5 }
 0xcf2   :  { %v7905_v6 = vpop.f32.mrf.mxu1 }
 0xcf3   :  { %v8003_v27 = vadd.f32 %v7905_v6, %v7711_v28  ;;  %v16214_v28 = vld [vmem:[#allocation63_spill] sm:$0xff] }
 0xcf4   :  { %v15036_v53 = vpop.f32.mrf.mxu1  ;;  %v15059_v33 = vrot.slane %v8637_v26, %v16214_v28 }
 0xcf6   :  { %v15040_v48 = vpop.f32.mrf.mxu1 }
 0xcf8   :  { %v8183_v36 = vpop.f32.mrf.mxu1 }
 0xcfa   :  { %v15046_v10 = vpop.f32.mrf.mxu1 }
 0xcfc   :  { %v8189_v57 = vpop.f32.mrf.mxu1 }
 0xcfd   :  { %v8291_v54 = vadd.f32 %v8189_v57, %v7999_v59 }
 0xcfe   :  { %v8191_v37 = vpop.f32.mrf.mxu1 }
 0xcff   :  { %v8292_v45 = vadd.f32 %v8191_v37, %v8000_v11  ;;  %v11347_v13 = vpop.f32.mrf.mxu0 }
 0xd00   :  { %v8195_v38 = vpop.f32.mrf.mxu1  ;;  %v8582_v1 = vadd.f32 %v11347_v13, %v8290_v9  ;;  %v8642_v9 = vrot.slane %v8637_v26, %v16215_v17  ;;  %v16216_v13 = vld [vmem:[#allocation50_spill] sm:$0xff] }
 0xd01   :  { %v8294_v5 = vadd.f32 %v8195_v38, %v8002_v32  ;;  %v8558_v7 = vpop.f32.mrf.mxu0 }
 0xd02   :  { %v8197_v29 = vpop.f32.mrf.mxu1  ;;  %v8618_v19 = vadd.f32 %v15055_v62, %v8582_v1  ;;  %v8579_v25 = vadd.f32 %v8558_v7, %v8287_v35  ;;  %v15101_v35 = vrot.slane %v8637_v26, %v16216_v13 }
 0xd03   :  { %v8295_v16 = vadd.f32 %v8197_v29, %v8003_v27  ;;  %v11350_v22 = vpop.f32.mrf.mxu0 }
 0xd04   :  { %v8630_v59 = vmax.f32 %v8618_v19, 0.0  ;;  %v8469_v39 = vpop.f32.mrf.mxu1  ;;  %v8615_v50 = vadd.f32 %v15061_v52, %v8579_v25  ;;  %v8588_v11 = vadd.f32 %v11350_v22, %v8296_v47  ;;  %v7409_v47 = vadd.f32 %v15005_v30, %v14995_v4 }
 0xd05   :  { %v8288_v30 = vadd.f32 %v8183_v36, %v7996_v23 }
 0xd06   :  { %v15065_v44 = vmul.f32 %v15059_v33, %v8630_v59  ;;  %v8627_v32 = vmax.f32 %v8615_v50, 0.0  ;;  %v15067_v56 = vpop.f32.mrf.mxu1  ;;  %v8624_v6 = vadd.f32 %v15048_v46, %v8588_v11  ;;  %v7701_v58 = vadd.f32 %v15015_v31, %v7409_v47 }
 0xd07   :  { %v7709_v11 = vadd.f32 %v15013_v43, %v15003_v24 }
 0xd08   :  { %v15073_v20 = vmul.f32 %v15059_v33, %v8627_v32  ;;  %v8636_v27 = vmax.f32 %v8624_v6, 0.0  ;;  %v8475_v41 = vpop.f32.mrf.mxu1  ;;  %8691 = vrot.lane.b32.xlu1 %v15065_v44, %s11929_s28  ;;  %v7993_v4 = vadd.f32 %v15023_v49, %v7701_v58  ;;  %v7994_v32 = vadd.f32 %v15025_v40, %v15017_v63 }
 0xd09   :  { %v8580_v31 = vadd.f32 %v8475_v41, %v8288_v30  ;;  %v8001_v6 = vadd.f32 %v15021_v15, %v7709_v11 }
 0xd0a   :  { %v15081_v51 = vmul.f32 %v15059_v33, %v8636_v27  ;;  %v15083_v8 = vpop.f32.mrf.mxu1  ;;  %8685 = vrot.lane.b32.xlu0 %v15073_v20, %s11929_s28  ;;  %v8285_v57 = vadd.f32 %v15036_v53, %v7993_v4  ;;  %v8286_v12 = vadd.f32 %v15040_v48, %v7994_v32  ;;  %v8568_v27 = vpop.f32.mrf.mxu0 }
 0xd0b   :  { %v8616_v29 = vadd.f32 %v15055_v62, %v8580_v31  ;;  %v8293_v41 = vadd.f32 %v15053_v60, %v8001_v6 }
 0xd0c   :  { %v8481_v42 = vpop.f32.mrf.mxu1  ;;  %9025 = vrot.lane.b32.xlu1 %v15065_v44, %s11930_s7  ;;  %v8577_v37 = vadd.f32 %v8469_v39, %v8285_v57  ;;  %v8578_v47 = vadd.f32 %v15067_v56, %v8286_v12 }
 0xd0d   :  { %v8583_v18 = vadd.f32 %v8481_v42, %v8291_v54  ;;  %v8585_v24 = vadd.f32 %v8568_v27, %v8293_v41 }
 0xd0e   :  { %v8483_v14 = vpop.f32.mrf.mxu1  ;;  %9019 = vrot.lane.b32.xlu0 %v15073_v20, %s11930_s7  ;;  %v8613_v28 = vadd.f32 %v15061_v52, %v8577_v37  ;;  %v8614_v43 = vadd.f32 %v15061_v52, %v8578_v47 }
 0xd0f   :  { %v8619_v55 = vadd.f32 %v15051_v3, %v8583_v18  ;;  %v8584_v34 = vadd.f32 %v8483_v14, %v8292_v45  ;;  %v8621_v63 = vadd.f32 %v15051_v3, %v8585_v24 }
 0xd10   :  { %v8487_v61 = vpop.f32.mrf.mxu1  ;;  %9218 = vrot.lane.b32.xlu1 %v15065_v44, %s11933_s13  ;;  %v8625_v39 = vmax.f32 %v8613_v28, 0.0  ;;  %v8626_v15 = vmax.f32 %v8614_v43, 0.0  ;;  %v15419_v43 = vld [vmem:[%s15872_s25 + $0x8] sm:$0xff] }
 0xd11   :  { %v8631_v54 = vmax.f32 %v8619_v55, 0.0  ;;  %v8620_v49 = vadd.f32 %v15051_v3, %v8584_v34  ;;  %v8586_v36 = vadd.f32 %v8487_v61, %v8294_v5  ;;  %v8633_v40 = vmax.f32 %v8621_v63, 0.0 }
 0xd12   :  { %v8489_v38 = vpop.f32.mrf.mxu1  ;;  %9212 = vrot.lane.b32.xlu0 %v15073_v20, %s11933_s13  ;;  %v15131_v50 = vmul.f32 %v8642_v9, %v8625_v39  ;;  %v15164_v48 = vmul.f32 %v15101_v35, %v8626_v15  ;;  %v8289_v3 = vadd.f32 %v15046_v10, %v15029_v0 }
 0xd13   :  { %v15105_v53 = vmul.f32 %v8642_v9, %v8631_v54  ;;  %v8632_v45 = vmax.f32 %v8620_v49, 0.0  ;;  %v8622_v1 = vadd.f32 %v15048_v46, %v8586_v36  ;;  %v8587_v7 = vadd.f32 %v8489_v38, %v8295_v16 }
 0xd14   :  { %9411 = vrot.lane.b32.xlu1 %v15065_v44, %s11939_s17  ;;  %v8628_v16 = vmax.f32 %v8616_v29, 0.0  ;;  %v15169_v60 = vmul.f32 %v15059_v33, %v8633_v40  ;;  %v8581_v33 = vadd.f32 %v15083_v8, %v8289_v3  ;;  %v10364_v40 = vld [vmem:[%s15873_s26] sm:$0xff] }
 0xd15   :  { %v15112_v5 = vmul.f32 %v15101_v35, %v8632_v45  ;;  %v8634_v26 = vmax.f32 %v8622_v1, 0.0  ;;  %v8623_v19 = vadd.f32 %v15048_v46, %v8587_v7 }
 0xd16   :  { %9405 = vrot.lane.b32.xlu0 %v15073_v20, %s11939_s17  ;;  %v15127_v46 = vmul.f32 %v8642_v9, %v8628_v16  ;;  %v8617_v52 = vadd.f32 %v15055_v62, %v8581_v33  ;;  %v16222_v33 = vld [vmem:[#allocation57_spill] sm:$0xff] }
 0xd17   :  { %v15118_v25 = vmul.f32 %v8642_v9, %v8634_v26  ;;  %v8635_v22 = vmax.f32 %v8623_v19, 0.0 }
 0xd18   :  { %9604 = vrot.lane.b32.xlu1 %v15065_v44, %s11940_s18  ;;  %v8629_v0 = vmax.f32 %v8617_v52, 0.0  ;;  %v10552_v52 = vld [vmem:[%s15866_s19] ss:$0 sm:$0xff] }
 0xd19   :  { %v15123_v59 = vmul.f32 %v15101_v35, %v8635_v22 }
 0xd1a   :  { %9598 = vrot.lane.b32.xlu0 %v15073_v20, %s11940_s18  ;;  %v15200_v10 = vmul.f32 %v15101_v35, %v8629_v0 }
 0xd1c   :  { %9797 = vrot.lane.b32.xlu1 %v15065_v44, %s11941_s21 }
 0xd1e   :  { %8687 = vrot.lane.b32.xlu0 %v15127_v46, %s11929_s28 }
 0xd20   :  { %8681 = vrot.lane.b32.xlu1 %v15131_v50, %s11929_s28 }
 0xd22   :  { %9021 = vrot.lane.b32.xlu0 %v15127_v46, %s11930_s7 }
 0xd24   :  { %9015 = vrot.lane.b32.xlu1 %v15131_v50, %s11930_s7 }
 0xd26   :  { %9214 = vrot.lane.b32.xlu0 %v15127_v46, %s11933_s13 }
 0xd28   :  { %9208 = vrot.lane.b32.xlu1 %v15131_v50, %s11933_s13 }
 0xd2a   :  { %9407 = vrot.lane.b32.xlu0 %v15127_v46, %s11939_s17 }
 0xd2c   :  { %9401 = vrot.lane.b32.xlu1 %v15131_v50, %s11939_s17 }
 0xd2e   :  { %9600 = vrot.lane.b32.xlu0 %v15127_v46, %s11940_s18 }
 0xd30   :  { %9594 = vrot.lane.b32.xlu1 %v15131_v50, %s11940_s18 }
 0xd32   :  { %9793 = vrot.lane.b32.xlu0 %v15127_v46, %s11941_s21 }
 0xd34   :  { %8683 = vrot.lane.b32.xlu1 %v15164_v48, %s11929_s28 }
 0xd36   :  { %8697 = vrot.lane.b32.xlu0 %v15169_v60, %s11929_s28 }
 0xd38   :  { %9017 = vrot.lane.b32.xlu1 %v15164_v48, %s11930_s7 }
 0xd3a   :  { %9031 = vrot.lane.b32.xlu0 %v15169_v60, %s11930_s7 }
 0xd3c   :  { %9210 = vrot.lane.b32.xlu1 %v15164_v48, %s11933_s13 }
 0xd3e   :  { %9224 = vrot.lane.b32.xlu0 %v15169_v60, %s11933_s13 }
 0xd40   :  { %9403 = vrot.lane.b32.xlu1 %v15164_v48, %s11939_s17 }
 0xd42   :  { %9417 = vrot.lane.b32.xlu0 %v15169_v60, %s11939_s17 }
 0xd44   :  { %9596 = vrot.lane.b32.xlu1 %v15164_v48, %s11940_s18 }
 0xd46   :  { %9610 = vrot.lane.b32.xlu0 %v15169_v60, %s11940_s18 }
 0xd48   :  { %9789 = vrot.lane.b32.xlu1 %v15164_v48, %s11941_s21 }
 0xd4a   :  { %9803 = vrot.lane.b32.xlu0 %v15169_v60, %s11941_s21 }
 0xd4c   :  { %8703 = vrot.lane.b32.xlu1 %v15081_v51, %s11929_s28 }
 0xd4e   :  { %8689 = vrot.lane.b32.xlu0 %v15200_v10, %s11929_s28 }
 0xd50   :  { %9037 = vrot.lane.b32.xlu1 %v15081_v51, %s11930_s7 }
 0xd52   :  { %9023 = vrot.lane.b32.xlu0 %v15200_v10, %s11930_s7 }
 0xd54   :  { %9230 = vrot.lane.b32.xlu1 %v15081_v51, %s11933_s13 }
 0xd56   :  { %9216 = vrot.lane.b32.xlu0 %v15200_v10, %s11933_s13 }
 0xd58   :  { %9423 = vrot.lane.b32.xlu1 %v15081_v51, %s11939_s17 }
 0xd5a   :  { %9409 = vrot.lane.b32.xlu0 %v15200_v10, %s11939_s17 }
 0xd5c   :  { %9616 = vrot.lane.b32.xlu1 %v15081_v51, %s11940_s18 }
 0xd5e   :  { %9602 = vrot.lane.b32.xlu0 %v15200_v10, %s11940_s18 }
 0xd60   :  { %9809 = vrot.lane.b32.xlu1 %v15081_v51, %s11941_s21 }
 0xd62   :  { %9795 = vrot.lane.b32.xlu0 %v15200_v10, %s11941_s21 }
 0xd64   :  { %8693 = vrot.lane.b32.xlu1 %v15105_v53, %s11929_s28 }
 0xd66   :  { %8699 = vrot.lane.b32.xlu0 %v15118_v25, %s11929_s28 }
 0xd68   :  { %9027 = vrot.lane.b32.xlu1 %v15105_v53, %s11930_s7 }
 0xd6a   :  { %9033 = vrot.lane.b32.xlu0 %v15118_v25, %s11930_s7 }
 0xd6c   :  { %9220 = vrot.lane.b32.xlu1 %v15105_v53, %s11933_s13 }
 0xd6e   :  { %9226 = vrot.lane.b32.xlu0 %v15118_v25, %s11933_s13 }
 0xd70   :  { %9413 = vrot.lane.b32.xlu1 %v15105_v53, %s11939_s17 }
 0xd72   :  { %9419 = vrot.lane.b32.xlu0 %v15118_v25, %s11939_s17 }
 0xd74   :  { %9606 = vrot.lane.b32.xlu1 %v15105_v53, %s11940_s18 }
 0xd76   :  { %9612 = vrot.lane.b32.xlu0 %v15118_v25, %s11940_s18 }
 0xd78   :  { %9799 = vrot.lane.b32.xlu1 %v15105_v53, %s11941_s21 }
 0xd7a   :  { %9805 = vrot.lane.b32.xlu0 %v15118_v25, %s11941_s21  ;;  %v15250_v62 = vpop.permute.xlu1 %8691 }
 0xd7c   :  { %v15252_v56 = vpop.permute.xlu0 %8685  ;;  %8695 = vrot.lane.b32.xlu1 %v15112_v5, %s11929_s28 }
 0xd7e   :  { %8701 = vrot.lane.b32.xlu0 %v15123_v59, %s11929_s28  ;;  %v15258_v21 = vpop.permute.xlu1 %9025 }
 0xd80   :  { %v15260_v8 = vpop.permute.xlu0 %9019  ;;  %9029 = vrot.lane.b32.xlu1 %v15112_v5, %s11930_s7 }
 0xd82   :  { %9791 = vrot.lane.b32.xlu0 %v15073_v20, %s11941_s21  ;;  %v15266_v58 = vpop.permute.xlu1 %9218 }
 0xd84   :  { %v15268_v23 = vpop.permute.xlu0 %9212  ;;  %9222 = vrot.lane.b32.xlu1 %v15112_v5, %s11933_s13 }
 0xd86   :  { %9998 = vrot.lane.b32.xlu0 %v15118_v25, %s11942_s3  ;;  %v15274_v42 = vpop.permute.xlu1 %9411 }
 0xd88   :  { %v15276_v18 = vpop.permute.xlu0 %9405  ;;  %9415 = vrot.lane.b32.xlu1 %v15112_v5, %s11939_s17 }
 0xd8a   :  { %9996 = vrot.lane.b32.xlu0 %v15169_v60, %s11942_s3  ;;  %v15282_v4 = vpop.permute.xlu1 %9604 }
 0xd8b   :  { %16217 = vst [vmem:[#allocation110_spill] sm:$0xff] %v15282_v4 }
 0xd8c   :  { %v15284_v30 = vpop.permute.xlu0 %9598  ;;  %9608 = vrot.lane.b32.xlu1 %v15112_v5, %s11940_s18 }
 0xd8d   :  { %16218 = vst [vmem:[#allocation96_spill] sm:$0xff] %v15284_v30 }
 0xd8e   :  { %9035 = vrot.lane.b32.xlu0 %v15123_v59, %s11930_s7  ;;  %v15290_v14 = vpop.permute.xlu1 %9797 }
 0xd90   :  { %v15292_v55 = vpop.permute.xlu0 %8687  ;;  %9801 = vrot.lane.b32.xlu1 %v15112_v5, %s11941_s21 }
 0xd92   :  { %9988 = vrot.lane.b32.xlu0 %v15200_v10, %s11942_s3  ;;  %v8682_v34 = vpop.permute.xlu1 %8681 }
 0xd94   :  { %v15298_v57 = vpop.permute.xlu0 %9021  ;;  %9787 = vrot.lane.b32.xlu1 %v15131_v50, %s11941_s21 }
 0xd96   :  { %9228 = vrot.lane.b32.xlu0 %v15123_v59, %s11933_s13  ;;  %v9016_v31 = vpop.permute.xlu1 %9015 }
 0xd98   :  { %v15304_v61 = vpop.permute.xlu0 %9214  ;;  %10002 = vrot.lane.b32.xlu1 %v15081_v51, %s11942_s3 }
 0xd9a   :  { %9986 = vrot.lane.b32.xlu0 %v15127_v46, %s11942_s3  ;;  %v9209_v17 = vpop.permute.xlu1 %9208 }
 0xd9c   :  { %v15310_v9 = vpop.permute.xlu0 %9407  ;;  %9994 = vrot.lane.b32.xlu1 %v15112_v5, %s11942_s3 }
 0xd9e   :  { %9421 = vrot.lane.b32.xlu0 %v15123_v59, %s11939_s17  ;;  %v9402_v54 = vpop.permute.xlu1 %9401 }
 0xda0   :  { %v15316_v49 = vpop.permute.xlu0 %9600  ;;  %9992 = vrot.lane.b32.xlu1 %v15105_v53, %s11942_s3 }
 0xda2   :  { %9984 = vrot.lane.b32.xlu0 %v15073_v20, %s11942_s3  ;;  %v9595_v36 = vpop.permute.xlu1 %9594 }
 0xda4   :  { %v15322_v37 = vpop.permute.xlu0 %9793  ;;  %9990 = vrot.lane.b32.xlu1 %v15065_v44, %s11942_s3 }
 0xda6   :  { %9614 = vrot.lane.b32.xlu0 %v15123_v59, %s11940_s18  ;;  %v15328_v13 = vpop.permute.xlu1 %8683 }
 0xda7   :  { %v15332_v35 = vsel %vm352_vm1, %v8682_v34, %v15328_v13  ;;  %v16223_v34 = vld [vmem:[#allocation54_spill] sm:$0xff] }
 0xda8   :  { %v15334_v38 = vpop.permute.xlu0 %8697  ;;  %9982 = vrot.lane.b32.xlu1 %v15164_v48, %s11942_s3 }
 0xdaa   :  { %10191 = vrot.lane.b32.xlu0 %v15118_v25, %s11943_s20  ;;  %v15340_v45 = vpop.permute.xlu1 %9017 }
 0xdab   :  { %v15344_v1 = vsel %vm568_vm2, %v9016_v31, %v15340_v45 }
 0xdac   :  { %v15346_v7 = vpop.permute.xlu0 %9031  ;;  %9980 = vrot.lane.b32.xlu1 %v15131_v50, %s11942_s3 }
 0xdae   :  { %9807 = vrot.lane.b32.xlu0 %v15123_v59, %s11941_s21  ;;  %v15352_v29 = vpop.permute.xlu1 %9210  ;;  %s11945_s21 = smov 60  }
 0xdaf   :  { %v15356_v26 = vsel %vm934_vm4, %v9209_v17, %v15352_v29 }
 0xdb0   :  { %v15358_v19 = vpop.permute.xlu0 %9224  ;;  %10195 = vrot.lane.b32.xlu1 %v15081_v51, %s11943_s20 }
 0xdb2   :  { %10189 = vrot.lane.b32.xlu0 %v15169_v60, %s11943_s20  ;;  %v15364_v28 = vpop.permute.xlu1 %9403 }
 0xdb3   :  { %v15368_v22 = vsel %vm7182_vm3, %v9402_v54, %v15364_v28 }
 0xdb4   :  { %v15370_v16 = vpop.permute.xlu0 %9417  ;;  %10187 = vrot.lane.b32.xlu1 %v15112_v5, %s11943_s20 }
 0xdb6   :  { %10000 = vrot.lane.b32.xlu0 %v15123_v59, %s11942_s3  ;;  %v15376_v39 = vpop.permute.xlu1 %9596 }
 0xdb7   :  { %16219 = vst [vmem:[#allocation109_spill] sm:$0xff] %v15376_v39  ;;  %v15380_v11 = vsel %vm7474_vm5, %v9595_v36, %v15376_v39  ;;  %v15499_v36 = vld [vmem:[%s15872_s25 + $0x10] sm:$0xff] }
 0xdb8   :  { %16220 = vst [vmem:[#allocation95_spill] sm:$0xff] %v15380_v11  ;;  %v15382_v32 = vpop.permute.xlu0 %9610  ;;  %10185 = vrot.lane.b32.xlu1 %v15105_v53, %s11943_s20  ;;  %v15550_v11 = vld [vmem:[%s15872_s25 + $0x20] sm:$0xff] }
 0xdb9   :  { %16230 = vst [vmem:[#allocation61_spill] sm:$0xff] %v15550_v11 }
 0xdba   :  { %10181 = vrot.lane.b32.xlu0 %v15200_v10, %s11943_s20  ;;  %v15388_v6 = vpop.permute.xlu1 %9789 }
 0xdbb   :  { %16221 = vst [vmem:[#allocation101_spill] sm:$0xff] %v15388_v6 }
 0xdbc   :  { %v15390_v12 = vpop.permute.xlu0 %9803  ;;  %10183 = vrot.lane.b32.xlu1 %v15065_v44, %s11943_s20 }
 0xdbe   :  { %10193 = vrot.lane.b32.xlu0 %v15123_v59, %s11943_s20  ;;  %v15396_v27 = vpop.permute.xlu1 %8703 }
 0xdbf   :  { %11352 = vmatpush3.msra.mxu0 %v15396_v27 }
 0xdc0   :  { %v15399_v41 = vpop.permute.xlu0 %8689  ;;  %10175 = vrot.lane.b32.xlu1 %v15164_v48, %s11943_s20  ;;  %11353 = vmatprep.subr.mxu0 %v16013_v2 }
 0xdc1   :  { %11354 = vmatpush3.msra.mxu0 %v15334_v38 }
 0xdc2   :  { %10179 = vrot.lane.b32.xlu0 %v15127_v46, %s11943_s20  ;;  %11355 = vmatprep.subr.mxu0 %v16013_v2  ;;  %v15408_v47 = vpop.permute.xlu1 %9037 }
 0xdc3   :  { %11356 = vmatpush3.msra.mxu0 %v15250_v62 }
 0xdc4   :  { %v15411_v24 = vpop.permute.xlu0 %9023  ;;  %10173 = vrot.lane.b32.xlu1 %v15131_v50, %s11943_s20  ;;  %11357 = vmatprep.subr.mxu0 %v16013_v2 }
 0xdc5   :  { %v15424_v63 = vsel %vm568_vm2, %v15298_v57, %v15411_v24  ;;  %11358 = vmatpush3.msra.mxu0 %v15252_v56  ;;  %v4532_v57 = vadd.f32 %v10552_v52, %v16223_v34  ;;  %v15525_v34 = vld [vmem:[%s15872_s25 + $0x18] sm:$0xff] }
 0xdc6   :  { %10177 = vrot.lane.b32.xlu0 %v15073_v20, %s11943_s20  ;;  %11362 = vmatprep.subr.mxu0 %v16013_v2  ;;  %v15430_v15 = vpop.permute.xlu1 %9230 }
 0xdc7   :  { %11360 = vmatmul.mubr.msk.f32.vlgmr.msra.gmra.mxu0 %vm1506_vm9, %v15419_v43 }
 0xdc8   :  { %11363 = vmatpush3.msra.mxu0 %v15081_v51  ;;  %v15438_v3 = vpop.permute.xlu0 %9216  ;;  %10374 = vrot.lane.b32.xlu1 %v16222_v33, %s11944_s14 }
 0xdc9   :  { %v15447_v0 = vsel %vm934_vm4, %v15304_v61, %v15438_v3  ;;  %11364 = vmatprep.subr.mxu0 %v16013_v2  ;;  %11370 = vmatprep.mubr.msk.f32.mxu0 %vm11938_vm11, %v16013_v2  ;;  %v15463_v61 = vld [vmem:[%s15872_s25] sm:$0xff] }
 0xdca   :  { %11365 = vmatpush3.msra.mxu0 %v15169_v60  ;;  %10367 = vperm.xlu0 %11493, %v10364_v40   ;;  %v15453_v51 = vpop.permute.xlu1 %9423 }
 0xdcb   :  { %11366 = vmatprep.subr.mxu0 %v16013_v2 }
 0xdcc   :  { %11367 = vmatpush3.msra.mxu0 %v15065_v44  ;;  %v15458_v31 = vpop.permute.xlu0 %9409 }
 0xdcd   :  { %v15468_v60 = vsel %vm7182_vm3, %v15310_v9, %v15458_v31  ;;  %11368 = vmatprep.subr.mxu0 %v16013_v2 }
 0xdce   :  { %11369 = vmatpush3.msra.mxu0 %v15073_v20  ;;  %10380 = vrot.lane.b32.xlu0 %v4532_v57, %s11913_s4  ;;  %v15473_v17 = vpop.permute.xlu1 %9616 }
 0xdcf   :  { %16224 = vst [vmem:[#allocation82_spill] sm:$0xff] %v15473_v17  ;;  %11373 = vmatprep.subr.mxu0 %v16013_v2  ;;  %11371 = vmatmul.mubr.msk.f32.vlgmr.msra.gmra.mxu0 %vm1506_vm9, %v15463_v61 }
 0xdd0   :  { %11374 = vmatpush3.msra.mxu0 %v15408_v47  ;;  %v15479_v44 = vpop.permute.xlu0 %9602  ;;  %11381 = vmatprep.mubr.msk.f32.mxu0 %vm11938_vm11, %v16013_v2 }
 0xdd1   :  { %16225 = vst [vmem:[#allocation87_spill] sm:$0xff] %v15479_v44  ;;  %v15486_v20 = vsel %vm7474_vm5, %v15316_v49, %v15479_v44  ;;  %11375 = vmatprep.subr.mxu0 %v16013_v2 }
 0xdd2   :  { %16226 = vst [vmem:[#allocation74_spill] sm:$0xff] %v15486_v20  ;;  %11376 = vmatpush3.msra.mxu0 %v15346_v7  ;;  %v15490_v9 = vpop.permute.xlu1 %9809 }
 0xdd3   :  { %16227 = vst [vmem:[#allocation86_spill] sm:$0xff] %v15490_v9  ;;  %11377 = vmatprep.subr.mxu0 %v16013_v2 }
 0xdd4   :  { %11378 = vmatpush3.msra.mxu0 %v15258_v21  ;;  %v15494_v54 = vpop.permute.xlu0 %9795 }
 0xdd5   :  { %16228 = vst [vmem:[#allocation73_spill] sm:$0xff] %v15494_v54  ;;  %v15504_v49 = vsel %vm7766_vm6, %v15322_v37, %v15494_v54  ;;  %11379 = vmatprep.subr.mxu0 %v16013_v2 }
 0xdd6   :  { %16229 = vst [vmem:[#allocation79_spill] sm:$0xff] %v15504_v49  ;;  %11380 = vmatpush3.msra.mxu0 %v15260_v8  ;;  %v8694_v40 = vpop.permute.xlu1 %8693 }
 0xdd7   :  { %11384 = vmatprep.subr.mxu0 %v16013_v2  ;;  %11382 = vmatmul.mubr.msk.f32.vlgmr.msra.gmra.mxu0 %vm1506_vm9, %v15499_v36 }
 0xdd8   :  { %11385 = vmatpush3.msra.mxu0 %v15430_v15  ;;  %v8700_v33 = vpop.permute.xlu0 %8699  ;;  %11392 = vmatprep.mubr.msk.f32.mxu0 %vm11938_vm11, %v16013_v2 }
 0xdd9   :  { %11386 = vmatprep.subr.mxu0 %v16013_v2 }
 0xdda   :  { %11387 = vmatpush3.msra.mxu0 %v15358_v19  ;;  %v15516_v37 = vpop.permute.xlu1 %9027 }
 0xddb   :  { %11388 = vmatprep.subr.mxu0 %v16013_v2 }
 0xddc   :  { %11389 = vmatpush3.msra.mxu0 %v15266_v58  ;;  %v15520_v52 = vpop.permute.xlu0 %9033 }
 0xddd   :  { %11390 = vmatprep.subr.mxu0 %v16013_v2 }
 0xdde   :  { %11391 = vmatpush3.msra.mxu0 %v15268_v23  ;;  %v15529_v57 = vpop.permute.xlu1 %9220 }
 0xddf   :  { %11395 = vmatprep.subr.mxu0 %v16013_v2  ;;  %11393 = vmatmul.mubr.msk.f32.vlgmr.msra.gmra.mxu0 %vm1506_vm9, %v15525_v34 }
 0xde0   :  { %11396 = vmatpush3.msra.mxu0 %v15453_v51  ;;  %v15535_v6 = vpop.permute.xlu0 %9226  ;;  %11403 = vmatprep.mubr.msk.f32.mxu0 %vm11938_vm11, %v16013_v2 }
 0xde1   :  { %11397 = vmatprep.subr.mxu0 %v16013_v2 }
 0xde2   :  { %11398 = vmatpush3.msra.mxu0 %v15370_v16  ;;  %v15541_v49 = vpop.permute.xlu1 %9413 }
 0xde3   :  { %11399 = vmatprep.subr.mxu0 %v16013_v2 }
 0xde4   :  { %11400 = vmatpush3.msra.mxu0 %v15274_v42  ;;  %v15545_v54 = vpop.permute.xlu0 %9419 }
 0xde5   :  { %11401 = vmatprep.subr.mxu0 %v16013_v2 }
 0xde6   :  { %11402 = vmatpush3.msra.mxu0 %v15276_v18  ;;  %v15554_v39 = vpop.permute.xlu1 %9606 }
 0xde7   :  { %16231 = vst [vmem:[#allocation65_spill] sm:$0xff] %v15554_v39  ;;  %11406 = vmatprep.subr.mxu0 %v16013_v2  ;;  %11404 = vmatmul.mubr.msk.f32.vlgmr.msra.gmra.mxu0 %vm1506_vm9, %v15550_v11  ;;  %v15575_v11 = vld [vmem:[%s15872_s25 + $0x28] sm:$0xff] }
 0xde8   :  { %11407 = vmatpush3.msra.mxu0 %v15473_v17  ;;  %v15560_v20 = vpop.permute.xlu0 %9612  ;;  %11414 = vmatprep.mubr.msk.f32.mxu0 %vm11938_vm11, %v16013_v2  ;;  %16234 = vst [vmem:[#allocation46_spill] sm:$0xff] %v15575_v11 }
 0xde9   :  { %11408 = vmatprep.subr.mxu0 %v16013_v2 }
 0xdea   :  { %11409 = vmatpush3.msra.mxu0 %v15382_v32  ;;  %v15566_v44 = vpop.permute.xlu1 %9799 }
 0xdeb   :  { %16232 = vst [vmem:[#allocation45_spill] sm:$0xff] %v15566_v44  ;;  %11410 = vmatprep.subr.mxu0 %v16013_v2 }
 0xdec   :  { %11411 = vmatpush3.msra.mxu0 %v15282_v4  ;;  %v15570_v39 = vpop.permute.xlu0 %9805 }
 0xded   :  { %16233 = vst [vmem:[#allocation64_spill] sm:$0xff] %v15570_v39  ;;  %11412 = vmatprep.subr.mxu0 %v16013_v2 }
 0xdee   :  { %11413 = vmatpush3.msra.mxu0 %v15284_v30  ;;  %v8696_v17 = vpop.permute.xlu1 %8695 }
 0xdef   :  { %11417 = vmatprep.subr.mxu0 %v16013_v2  ;;  %11415 = vmatmul.mubr.msk.f32.vlgmr.msra.gmra.mxu0 %vm1506_vm9, %v15575_v11  ;;  %v8710_v11 = vsel %vm352_vm1, %v8696_v17, %v15334_v38  ;;  %v8707_v38 = vsel %vm352_vm1, %v15292_v55, %v15399_v41 }
 0xdf0   :  { %11418 = vmatpush3.msra.mxu0 %v15490_v9  ;;  %v8702_v44 = vpop.permute.xlu0 %8701  ;;  %11425 = vmatprep.mubr.msk.f32.mxu0 %vm11938_vm11, %v16013_v2  ;;  %v8709_v9 = vsel %vm352_vm1, %v8694_v40, %v8696_v17  ;;  %v16241_v40 = vld [vmem:[#allocation96_spill] sm:$0xff] }
 0xdf1   :  { %v8711_v39 = vsel %vm352_vm1, %v8700_v33, %v8702_v44  ;;  %11419 = vmatprep.subr.mxu0 %v16013_v2  ;;  %v8712_v4 = vsel %vm352_vm1, %v8702_v44, %v15396_v27  ;;  %v8706_v27 = vsel %vm352_vm1, %v15328_v13, %v15252_v56 }
 0xdf2   :  { %11420 = vmatpush3.msra.mxu0 %v15390_v12  ;;  %8752 = vmatprep.subr.mxu1 %v8712_v4  ;;  %v9030_v30 = vpop.permute.xlu1 %9029  ;;  %v8708_v4 = vsel %vm352_vm1, %v15399_v41, %v15250_v62  ;;  %vm10377_vm1 = vcmask 392448  }
 0xdf3   :  { %11421 = vmatprep.subr.mxu0 %v16013_v2  ;;  %8753 = vmatpush1.msra.mxu1 %v8711_v39  ;;  %v15604_v39 = vld [vmem:[%s15872_s25 + $0x30] sm:$0xff] }
 0xdf4   :  { %11422 = vmatpush3.msra.mxu0 %v15290_v14  ;;  %v15595_v33 = vpop.permute.xlu0 %9791  ;;  %8754 = vmatprep.subr.mxu1 %v8710_v11 }
 0xdf5   :  { %11423 = vmatprep.subr.mxu0 %v16013_v2  ;;  %8755 = vmatpush1.msra.mxu1 %v8709_v9  ;;  %v16238_v9 = vld [vmem:[#allocation110_spill] sm:$0xff] }
 0xdf6   :  { %11424 = vmatpush3.msra.mxu0 %v15595_v33  ;;  %8756 = vmatprep.subr.mxu1 %v8708_v4  ;;  %v9223_v11 = vpop.permute.xlu1 %9222 }
 0xdf7   :  { %8757 = vmatpush1.msra.mxu1 %v8707_v38  ;;  %11428 = vmatprep.subr.mxu0 %v16013_v2  ;;  %v16244_v38 = vld [vmem:[#allocation95_spill] sm:$0xff] }
 0xdf8   :  { %v15614_v62 = vpop.permute.xlu0 %9998  ;;  %8758 = vmatprep.subr.mxu1 %v8706_v27  ;;  %11426 = vmatmul.mubr.msk.f32.vlgmr.msra.gmra.mxu0 %vm1506_vm9, %v15604_v39 }
 0xdf9   :  { %8759 = vmatpush1.msra.mxu1 %v15332_v35  ;;  %11436 = vmatprep.mubr.msk.f32.mxu0 %vm11938_vm11, %v16013_v2 }
 0xdfa   :  { %8896 = vmatprep.subr.mxu1 %v15123_v59  ;;  %v15622_v55 = vpop.permute.xlu1 %9415  ;;  %10643 = vmatmul.mubr.msk.f32.vlgmr.msra.gmra.mxu1 %vm1506_vm9, %v15419_v43 }
 0xdfb   :  { %8897 = vmatpush1.msra.mxu1 %v15118_v25  ;;  %8936 = vmatprep.mubr.f32.mxu1 %v16013_v2 }
 0xdfc   :  { %v15628_v56 = vpop.permute.xlu0 %9996  ;;  %8898 = vmatprep.subr.mxu1 %v15112_v5  ;;  %v9044_v5 = vsel %vm568_vm2, %v9030_v30, %v15346_v7  ;;  %v9040_v7 = vsel %vm568_vm2, %v15340_v45, %v15260_v8  ;;  %v9237_v8 = vsel %vm934_vm4, %v9223_v11, %v15358_v19  ;;  %v9236_v45 = vsel %vm934_vm4, %v15529_v57, %v9223_v11  ;;  %v16243_v57 = vld [vmem:[#allocation64_spill] sm:$0xff]  ;;  %v16245_v11 = vld [vmem:[#allocation86_spill] sm:$0xff] }
 0xdfd   :  { %8899 = vmatpush1.msra.mxu1 %v15105_v53  ;;  %v9233_v19 = vsel %vm934_vm4, %v15352_v29, %v15268_v23  ;;  %v9430_v23 = vsel %vm7182_vm3, %v15622_v55, %v15370_v16  ;;  %v9429_v29 = vsel %vm7182_vm3, %v15541_v49, %v15622_v55  ;;  %v9426_v16 = vsel %vm7182_vm3, %v15364_v28, %v15276_v18  ;;  %v16236_v18 = vld [vmem:[#allocation61_spill] sm:$0xff]  ;;  %v16246_v55 = vld [vmem:[#allocation46_spill] sm:$0xff] }
 0xdfe   :  { %8900 = vmatprep.subr.mxu1 %v15200_v10  ;;  %v15633_v13 = vpop.permute.xlu1 %9608 }
 0xdff   :  { %8901 = vmatpush1.msra.mxu1 %v15127_v46  ;;  %v9043_v46 = vsel %vm568_vm2, %v15516_v37, %v9030_v30  ;;  %v9623_v17 = vsel %vm7474_vm5, %v15633_v13, %v15382_v32  ;;  %v16240_v32 = vld [vmem:[#allocation74_spill] sm:$0xff]  ;;  %v16242_v37 = vld [vmem:[#allocation109_spill] sm:$0xff] }
 0xe00   :  { %v9036_v59 = vpop.permute.xlu0 %9035  ;;  %8902 = vmatprep.subr.mxu1 %v15164_v48 }
 0xe01   :  { %v9045_v25 = vsel %vm568_vm2, %v15520_v52, %v9036_v59  ;;  %8903 = vmatpush1.msra.mxu1 %v15131_v50  ;;  %v9046_v35 = vsel %vm568_vm2, %v9036_v59, %v15408_v47  ;;  %v9042_v50 = vsel %vm568_vm2, %v15411_v24, %v15258_v21  ;;  %v9619_v52 = vsel %vm7474_vm5, %v16242_v37, %v16241_v40 }
 0xe02   :  { %10645 = vmatmul.mubr.msk.f32.vlgmr.msra.gmra.mxu1 %vm1506_vm9, %v15463_v61  ;;  %9086 = vmatprep.subr.mxu1 %v9046_v35  ;;  %v15644_v53 = vpop.permute.xlu1 %9801  ;;  %v15723_v61 = vld [vmem:[%s15872_s25 + $0x38] sm:$0xff]  ;;  %vm10383_vm2 = vcmask 490880  }
 0xe03   :  { %9087 = vmatpush1.msra.mxu1 %v9045_v25  ;;  %9126 = vmatprep.mubr.f32.mxu1 %v16013_v2  ;;  %v9816_v59 = vsel %vm7766_vm6, %v15644_v53, %v15390_v12  ;;  %v16247_v25 = vld [vmem:[#allocation45_spill] sm:$0xff] }
 0xe04   :  { %v15651_v48 = vpop.permute.xlu0 %9988  ;;  %9088 = vmatprep.subr.mxu1 %v9044_v5  ;;  %v9815_v35 = vsel %vm7766_vm6, %v16247_v25, %v15644_v53  ;;  %v16250_v12 = vld [vmem:[#allocation101_spill] sm:$0xff] }
 0xe05   :  { %9089 = vmatpush1.msra.mxu1 %v9043_v46  ;;  %v16248_v46 = vld [vmem:[#allocation73_spill] sm:$0xff]  ;;  %v9812_v53 = vsel %vm7766_vm6, %v16250_v12, %v15595_v33 }
 0xe06   :  { %9090 = vmatprep.subr.mxu1 %v9042_v50  ;;  %v15656_v10 = vpop.permute.xlu1 %9787  ;;  %v9814_v50 = vsel %vm7766_vm6, %v16248_v46, %v15290_v14 }
 0xe07   :  { %9091 = vmatpush1.msra.mxu1 %v15424_v63 }
 0xe08   :  { %v9229_v41 = vpop.permute.xlu0 %9228  ;;  %9092 = vmatprep.subr.mxu1 %v9040_v7 }
 0xe09   :  { %v9238_v30 = vsel %vm934_vm4, %v15535_v6, %v9229_v41  ;;  %9093 = vmatpush1.msra.mxu1 %v15344_v1  ;;  %v9239_v47 = vsel %vm934_vm4, %v9229_v41, %v15430_v15  ;;  %v9235_v1 = vsel %vm934_vm4, %v15438_v3, %v15266_v58  ;;  %v9428_v3 = vsel %vm7182_vm3, %v15458_v31, %v15274_v42  ;;  %v16235_v31 = vld [vmem:[#allocation82_spill] sm:$0xff]  ;;  %v16249_v41 = vld [vmem:[#allocation79_spill] sm:$0xff] }
 0xe0a   :  { %10648 = vmatmul.mubr.msk.f32.vlgmr.msra.gmra.mxu1 %vm1506_vm9, %v15499_v36  ;;  %9279 = vmatprep.subr.mxu1 %v9239_v47  ;;  %v15669_v21 = vpop.permute.xlu1 %10002  ;;  %vm10399_vm4 = vcmask 1048032  }
 0xe0b   :  { %9280 = vmatpush1.msra.mxu1 %v9238_v30  ;;  %11429 = vmatpush3.msra.mxu0 %v15669_v21  ;;  %v9811_v30 = vsel %vm7766_vm6, %v15656_v10, %v16250_v12 }
 0xe0c   :  { %v15676_v6 = vpop.permute.xlu0 %9986  ;;  %9281 = vmatprep.subr.mxu1 %v9237_v8  ;;  %11430 = vmatprep.subr.mxu0 %v16013_v2 }
 0xe0d   :  { %9282 = vmatpush1.msra.mxu1 %v9236_v45  ;;  %11431 = vmatpush3.msra.mxu0 %v15628_v56 }
 0xe0e   :  { %9283 = vmatprep.subr.mxu1 %v9235_v1  ;;  %v15683_v24 = vpop.permute.xlu1 %9994  ;;  %9319 = vmatprep.mubr.f32.mxu1 %v16013_v2 }
 0xe0f   :  { %9284 = vmatpush1.msra.mxu1 %v15447_v0  ;;  %11432 = vmatprep.subr.mxu0 %v16013_v2  ;;  %v10009_v45 = vsel %vm8058_vm7, %v15683_v24, %v15628_v56 }
 0xe10   :  { %v9422_v43 = vpop.permute.xlu0 %9421  ;;  %9285 = vmatprep.subr.mxu1 %v9233_v19 }
 0xe11   :  { %v9431_v63 = vsel %vm7182_vm3, %v15545_v54, %v9422_v43  ;;  %9286 = vmatpush1.msra.mxu1 %v15356_v26  ;;  %v9432_v58 = vsel %vm7182_vm3, %v9422_v43, %v15453_v51  ;;  %v16239_v54 = vld [vmem:[#allocation87_spill] sm:$0xff] }
 0xe12   :  { %10651 = vmatmul.mubr.msk.f32.vlgmr.msra.gmra.mxu1 %vm1506_vm9, %v15525_v34  ;;  %9472 = vmatprep.subr.mxu1 %v9432_v58  ;;  %v15698_v15 = vpop.permute.xlu1 %9992  ;;  %v9621_v36 = vsel %vm7474_vm5, %v16239_v54, %v16238_v9 }
 0xe13   :  { %9473 = vmatpush1.msra.mxu1 %v9431_v63  ;;  %9512 = vmatprep.mubr.f32.mxu1 %v16013_v2 }
 0xe14   :  { %v15707_v26 = vpop.permute.xlu0 %9984  ;;  %9474 = vmatprep.subr.mxu1 %v9430_v23 }
 0xe15   :  { %9475 = vmatpush1.msra.mxu1 %v9429_v29 }
 0xe16   :  { %9476 = vmatprep.subr.mxu1 %v9428_v3  ;;  %v15712_v0 = vpop.permute.xlu1 %9990  ;;  %v10665_v3 = vld [vmem:[%s15872_s25 + $0x40] sm:$0xff] }
 0xe17   :  { %9477 = vmatpush1.msra.mxu1 %v15468_v60  ;;  %11433 = vmatpush3.msra.mxu0 %v15712_v0 }
 0xe18   :  { %v9615_v51 = vpop.permute.xlu0 %9614  ;;  %9478 = vmatprep.subr.mxu1 %v9426_v16  ;;  %11434 = vmatprep.subr.mxu0 %v16013_v2 }
 0xe19   :  { %v9624_v42 = vsel %vm7474_vm5, %v15560_v20, %v9615_v51  ;;  %9479 = vmatpush1.msra.mxu1 %v15368_v22  ;;  %11435 = vmatpush3.msra.mxu0 %v15707_v26  ;;  %v9625_v60 = vsel %vm7474_vm5, %v9615_v51, %v16235_v31  ;;  %v16237_v22 = vld [vmem:[#allocation65_spill] sm:$0xff] }
 0xe1a   :  { %10654 = vmatmul.mubr.msk.f32.vlgmr.msra.gmra.mxu1 %vm1506_vm9, %v16236_v18  ;;  %9665 = vmatprep.subr.mxu1 %v9625_v60  ;;  %v15733_v28 = vpop.permute.xlu1 %9982  ;;  %v9622_v44 = vsel %vm7474_vm5, %v16237_v22, %v15633_v13 }
 0xe1b   :  { %11437 = vmatmul.mubr.msk.f32.vlgmr.msra.gmra.mxu0 %vm1506_vm9, %v15723_v61  ;;  %9666 = vmatpush1.msra.mxu1 %v9624_v42  ;;  %v10005_v56 = vsel %vm8058_vm7, %v15733_v28, %v15707_v26 }
 0xe1c   :  { %v15743_v20 = vpop.permute.xlu0 %10191  ;;  %9667 = vmatprep.subr.mxu1 %v9623_v17  ;;  %9705 = vmatprep.mubr.f32.mxu1 %v16013_v2 }
 0xe1d   :  { %9668 = vmatpush1.msra.mxu1 %v9622_v44  ;;  %11439 = vmatprep.subr.mxu0 %v16013_v2 }
 0xe1e   :  { %9669 = vmatprep.subr.mxu1 %v9621_v36  ;;  %v9981_v49 = vpop.permute.xlu1 %9980  ;;  %11447 = vmatprep.mubr.msk.f32.mxu0 %vm11938_vm11, %v16013_v2 }
 0xe1f   :  { %9670 = vmatpush1.msra.mxu1 %v16240_v32 }
 0xe20   :  { %v9808_v34 = vpop.permute.xlu0 %9807  ;;  %9671 = vmatprep.subr.mxu1 %v9619_v52 }
 0xe21   :  { %v9817_v4 = vsel %vm7766_vm6, %v16243_v57, %v9808_v34  ;;  %9672 = vmatpush1.msra.mxu1 %v16244_v38  ;;  %v9818_v27 = vsel %vm7766_vm6, %v9808_v34, %v16245_v11 }
 0xe22   :  { %10657 = vmatmul.mubr.msk.f32.vlgmr.msra.gmra.mxu1 %vm1506_vm9, %v16246_v55  ;;  %9858 = vmatprep.subr.mxu1 %v9818_v27  ;;  %v10196_v13 = vpop.permute.xlu1 %10195 }
 0xe23   :  { %9859 = vmatpush1.msra.mxu1 %v9817_v4  ;;  %11440 = vmatpush3.msra.mxu0 %v10196_v13 }
 0xe24   :  { %v10190_v5 = vpop.permute.xlu0 %10189  ;;  %9860 = vmatprep.subr.mxu1 %v9816_v59  ;;  %11441 = vmatprep.subr.mxu0 %v16013_v2 }
 0xe25   :  { %9861 = vmatpush1.msra.mxu1 %v9815_v35  ;;  %11442 = vmatpush3.msra.mxu0 %v10190_v5 }
 0xe26   :  { %9862 = vmatprep.subr.mxu1 %v9814_v50  ;;  %v10188_v7 = vpop.permute.xlu1 %10187  ;;  %9898 = vmatprep.mubr.f32.mxu1 %v16013_v2 }
 0xe27   :  { %9863 = vmatpush1.msra.mxu1 %v16249_v41  ;;  %11443 = vmatprep.subr.mxu0 %v16013_v2  ;;  %v10202_v63 = vsel %vm8350_vm8, %v10188_v7, %v10190_v5 }
 0xe28   :  { %v10001_v47 = vpop.permute.xlu0 %10000  ;;  %9864 = vmatprep.subr.mxu1 %v9812_v53 }
 0xe29   :  { %v10010_v14 = vsel %vm8058_vm7, %v15614_v62, %v10001_v47  ;;  %9865 = vmatpush1.msra.mxu1 %v9811_v30  ;;  %v10011_v8 = vsel %vm8058_vm7, %v10001_v47, %v15669_v21  ;;  %v10008_v62 = vsel %vm8058_vm7, %v15698_v15, %v15683_v24  ;;  %v10006_v21 = vsel %vm8058_vm7, %v15676_v6, %v15651_v48 }
 0xe2a   :  { %10660 = vmatmul.mubr.msk.f32.vlgmr.msra.gmra.mxu1 %vm1506_vm9, %v15604_v39  ;;  %10051 = vmatprep.subr.mxu1 %v10011_v8  ;;  %v10186_v33 = vpop.permute.xlu1 %10185  ;;  %v10007_v39 = vsel %vm8058_vm7, %v15651_v48, %v15712_v0  ;;  %v10004_v24 = vsel %vm8058_vm7, %v9981_v49, %v15733_v28 }
 0xe2b   :  { %10052 = vmatpush1.msra.mxu1 %v10010_v14  ;;  %10091 = vmatprep.mubr.f32.mxu1 %v16013_v2  ;;  %v10201_v58 = vsel %vm8350_vm8, %v10186_v33, %v10188_v7 }
 0xe2c   :  { %v10182_v10 = vpop.permute.xlu0 %10181  ;;  %10053 = vmatprep.subr.mxu1 %v10009_v45 }
 0xe2d   :  { %10054 = vmatpush1.msra.mxu1 %v10008_v62 }
 0xe2e   :  { %10055 = vmatprep.subr.mxu1 %v10007_v39  ;;  %v10184_v1 = vpop.permute.xlu1 %10183 }
 0xe2f   :  { %10056 = vmatpush1.msra.mxu1 %v10006_v21  ;;  %11444 = vmatpush3.msra.mxu0 %v10184_v1  ;;  %v10200_v29 = vsel %vm8350_vm8, %v10182_v10, %v10184_v1 }
 0xe30   :  { %v10194_v19 = vpop.permute.xlu0 %10193  ;;  %10057 = vmatprep.subr.mxu1 %v10005_v56  ;;  %11445 = vmatprep.subr.mxu0 %v16013_v2 }
 0xe31   :  { %v10203_v43 = vsel %vm8350_vm8, %v15743_v20, %v10194_v19  ;;  %10058 = vmatpush1.msra.mxu1 %v10004_v24  ;;  %v10204_v48 = vsel %vm8350_vm8, %v10194_v19, %v10196_v13 }
 0xe32   :  { %10663 = vmatmul.mubr.msk.f32.vlgmr.msra.gmra.mxu1 %vm1506_vm9, %v15723_v61  ;;  %10244 = vmatprep.subr.mxu1 %v10204_v48  ;;  %v10176_v6 = vpop.permute.xlu1 %10175 }
 0xe33   :  { %10245 = vmatpush1.msra.mxu1 %v10203_v43  ;;  %10284 = vmatprep.mubr.f32.mxu1 %v16013_v2 }
 0xe34   :  { %v10180_v15 = vpop.permute.xlu0 %10179  ;;  %10246 = vmatprep.subr.mxu1 %v10202_v63 }
 0xe35   :  { %v10199_v23 = vsel %vm8350_vm8, %v10180_v15, %v10182_v10  ;;  %10247 = vmatpush1.msra.mxu1 %v10201_v58 }
 0xe36   :  { %10248 = vmatprep.subr.mxu1 %v10200_v29  ;;  %v10174_v26 = vpop.permute.xlu1 %10173 }
 0xe37   :  { %10249 = vmatpush1.msra.mxu1 %v10199_v23  ;;  %v10197_v16 = vsel %vm8350_vm8, %v10174_v26, %v10176_v6 }
 0xe38   :  { %v10178_v0 = vpop.permute.xlu0 %10177 }
 0xe39   :  { %11446 = vmatpush3.msra.mxu0 %v10178_v0  ;;  %v10198_v2 = vsel %vm8350_vm8, %v10176_v6, %v10178_v0 }
 0xe3a   :  { %10250 = vmatprep.subr.mxu1 %v10198_v2  ;;  %11448 = vmatmul.mubr.msk.f32.vlgmr.msra.gmra.mxu0 %vm1506_vm9, %v10665_v3  ;;  %v10375_v51 = vpop.permute.xlu1 %10374 }
 0xe3b   :  { %10378 = vst.msk [vmem:[%s15874_s27] sm:$0xff] %vm10377_vm1, %v10375_v51  ;;  %10251 = vmatpush1.msra.mxu1 %v10197_v16 }
 0xe3c   :  { %10666 = vmatmul.mubr.msk.f32.vlgmr.msra.gmra.mxu1 %vm1506_vm9, %v10665_v3 }
 0xe45   :  { %v15827_v61 = vpop.permute.xlu0 %10367 }
 0xe49   :  { %v10381_v42 = vpop.permute.xlu0 %10380 }
 0xe4a   :  { %10384 = vst.msk [vmem:[%s15874_s27] sm:$0xff] %vm10383_vm2, %v10381_v42 }
 0xe87   :  { %v8865_v31 = vpop.f32.mrf.mxu0 }
 0xe89   :  { %v11361_v60 = vpop.f32.mrf.mxu0 }
 0xe8f   :  { %v9009_v18 = vpop.f32.mrf.mxu0 }
 0xe90   :  { %v9010_v28 = vadd.f32 %v9009_v18, %v8865_v31 }
 0xe91   :  { %v11372_v17 = vpop.f32.mrf.mxu0 }
 0xe97   :  { %v9199_v22 = vpop.f32.mrf.mxu0 }
 0xe98   :  { %v9205_v44 = vadd.f32 %v9199_v22, %v9010_v28 }
 0xe99   :  { %v11383_v20 = vpop.f32.mrf.mxu0 }
 0xe9f   :  { %v9392_v9 = vpop.f32.mrf.mxu0 }
 0xea0   :  { %v9398_v54 = vadd.f32 %v9392_v9, %v9205_v44 }
 0xea1   :  { %v11394_v36 = vpop.f32.mrf.mxu0 }
 0xea7   :  { %v9585_v49 = vpop.f32.mrf.mxu0 }
 0xea8   :  { %v9591_v32 = vadd.f32 %v9585_v49, %v9398_v54 }
 0xea9   :  { %v11405_v40 = vpop.f32.mrf.mxu0 }
 0xeaf   :  { %v9778_v37 = vpop.f32.mrf.mxu0 }
 0xeb0   :  { %v9784_v52 = vadd.f32 %v9778_v37, %v9591_v32 }
 0xeb1   :  { %v11416_v34 = vpop.f32.mrf.mxu0 }
 0xeb8   :  { %v9971_v57 = vpop.f32.mrf.mxu0 }
 0xeb9   :  { %v9977_v4 = vadd.f32 %v9971_v57, %v9784_v52 }
 0xeba   :  { %v11427_v38 = vpop.f32.mrf.mxu0  ;;  %v8794_v11 = vpop.f32.mrf.mxu1 }
 0xebc   :  { %v8796_v27 = vpop.f32.mrf.mxu1 }
 0xec2   :  { %v8938_v55 = vpop.f32.mrf.mxu1 }
 0xec3   :  { %v8939_v30 = vadd.f32 %v8938_v55, %v8794_v11 }
 0xec4   :  { %v8940_v13 = vpop.f32.mrf.mxu1 }
 0xec5   :  { %v8941_v14 = vadd.f32 %v8940_v13, %v8796_v27 }
 0xeca   :  { %v9128_v59 = vpop.f32.mrf.mxu1 }
 0xecb   :  { %v9203_v8 = vadd.f32 %v9128_v59, %v8939_v30 }
 0xecc   :  { %v9130_v35 = vpop.f32.mrf.mxu1 }
 0xecd   :  { %v9204_v33 = vadd.f32 %v9130_v35, %v8941_v14 }
 0xed2   :  { %v9321_v46 = vpop.f32.mrf.mxu1 }
 0xed3   :  { %v9396_v45 = vadd.f32 %v9321_v46, %v9203_v8 }
 0xed4   :  { %v9323_v50 = vpop.f32.mrf.mxu1 }
 0xed5   :  { %v9397_v10 = vadd.f32 %v9323_v50, %v9204_v33 }
 0xeda   :  { %v9514_v7 = vpop.f32.mrf.mxu1 }
 0xedb   :  { %v10164_v25 = vpop.f32.mrf.mxu0  ;;  %v9589_v39 = vadd.f32 %v9514_v7, %v9396_v45 }
 0xedc   :  { %v9516_v41 = vpop.f32.mrf.mxu1  ;;  %v10170_v23 = vadd.f32 %v10164_v25, %v9977_v4 }
 0xedd   :  { %v11438_v5 = vpop.f32.mrf.mxu0  ;;  %v9590_v1 = vadd.f32 %v9516_v41, %v9397_v10 }
 0xee2   :  { %v9707_v12 = vpop.f32.mrf.mxu1 }
 0xee3   :  { %v9782_v56 = vadd.f32 %v9707_v12, %v9589_v39 }
 0xee4   :  { %v9709_v53 = vpop.f32.mrf.mxu1 }
 0xee5   :  { %v9783_v24 = vadd.f32 %v9709_v53, %v9590_v1 }
 0xeea   :  { %v9900_v47 = vpop.f32.mrf.mxu1 }
 0xeeb   :  { %v9975_v19 = vadd.f32 %v9900_v47, %v9782_v56 }
 0xeec   :  { %v9902_v62 = vpop.f32.mrf.mxu1 }
 0xeed   :  { %v9976_v6 = vadd.f32 %v9902_v62, %v9783_v24 }
 0xef2   :  { %v10093_v21 = vpop.f32.mrf.mxu1 }
 0xef3   :  { %v10168_v63 = vadd.f32 %v10093_v21, %v9975_v19 }
 0xef4   :  { %v10095_v43 = vpop.f32.mrf.mxu1 }
 0xef5   :  { %v10169_v29 = vadd.f32 %v10095_v43, %v9976_v6 }
 0xefa   :  { %v10357_v48 = vpop.f32.mrf.mxu0 }
 0xefb   :  { %v10363_v0 = vadd.f32 %v10357_v48, %v10170_v23 }
 0xefc   :  { %v10286_v58 = vpop.f32.mrf.mxu1  ;;  %v11449_v15 = vpop.f32.mrf.mxu0 }
 0xefd   :  { %v10361_v26 = vadd.f32 %v10286_v58, %v10168_v63  ;;  %v10372_v42 = vadd.f32 %v15827_v61, %v10363_v0 }
 0xefe   :  { %v10288_v3 = vpop.f32.mrf.mxu1 }
 0xeff   :  { %v10370_v2 = vadd.f32 %v15827_v61, %v10361_v26  ;;  %v10362_v16 = vadd.f32 %v10288_v3, %v10169_v29 }
 0xf01   :  { %v10371_v51 = vadd.f32 %v15827_v61, %v10362_v16  ;;  %10388 = vrot.lane.b32.xlu1 %v10370_v2, %s11945_s21 }
 0xf03   :  { %10390 = vrot.lane.b32.xlu0 %v10371_v51, %s11945_s21 }
 0xf05   :  { %10392 = vrot.lane.b32.xlu1 %v10372_v42, %s11945_s21 }
 0xf73   :  { %v10389_v31 = vpop.permute.xlu1 %10388 }
 0xf74   :  { %10400 = vst.msk [vmem:[%s15874_s27] sm:$0xff] %vm10399_vm4, %v10389_v31 }
 0xf75   :  { %v10391_v60 = vpop.permute.xlu0 %10390 }
 0xf76   :  { %v10394_v18 = vsel %vm3302_vm13, %v10389_v31, %v10391_v60 }
 0xf77   :  { %10401 = vst [vmem:[%s15874_s27 + $0x8] sm:$0xff] %v10394_v18  ;;  %v10393_v28 = vpop.permute.xlu1 %10392 }
 0xf78   :  { %v10395_v17 = vsel %vm3302_vm13, %v10391_v60, %v10393_v28 }
 0xf79   :  { %10402 = vst.msk [vmem:[%s15874_s27 + $0x10] sm:$0xff] %vm8350_vm8, %v10395_v17 }
 0xf7a   :  { %10407 = vsyncpa [#allocation4], 1 }
 0xf7b   :  { %10408 = vsyncpa [#allocation6], 1 }
 0xf7c   :  { %10409 = vsyncpa [#allocation9], 1 }
 0xf7d   :  { %10410 = vsyncpa [#allocation12], 1 }
 0xf7e   :  { %10411 = vsyncpa [#allocation15], 1 }
 0xf7f   :  { %10412 = vsyncpa [#allocation18], 1 }
 0xf80   :  { %10413 = vsyncpa [#allocation21], 1 }
 0xf81   :  { %10414 = vsyncpa [#allocation24], 1 }
 0xf82   :  { %10415 = vsyncpa [#allocation27], 1 }
 0xf83   :  { %10416 = vsyncpa [#allocation30], 1 }

</bundles_post_ra>
